<compile_context>
chip_gen: v6e
topology: v6e:2x2x1
jax: 0.10.0
libtpu: 0.0.40
codegen_flags: <defaults>
</compile_context>

<pallas_src>
import jax
import jax.numpy as jnp
from jax.experimental import pallas as pl
from jax.experimental.pallas import tpu as pltpu


# --------------------------------------------------------------------------
# Fused kernel: one grid step = one batch tile; everything stays in VMEM.
# --------------------------------------------------------------------------
def _fused_cnn_kernel(x_ref, w1, b1, w2, b2, w3, b3, fw1, fb1, fw2, fb2,
                      o_ref,
                      pad1, col1, pad2, col2, pad3, col3, feat_ref):

    def conv3x3_relu_pool(a, w_ref, b_ref, pad_ref, col_ref):
        # a: (bt, h, w, cin) f32.  w_ref: (9*cin, cout) bf16.  b_ref: (1, cout) f32.
        bt, h, w, cin = a.shape
        cout = w_ref.shape[1]
        m = bt * h * w

        # Zero-pad (padding=1) inside VMEM; a few KiB of stores per step.
        pad_ref[...] = jnp.zeros_like(pad_ref)
        pad_ref[:, 1:h + 1, 1:w + 1, :] = a

        # im2col: (m, 9*cin) patch matrix, column order (kh, kw, cin) -- matches
        # the HWIO-reshaped weight rows.
        t = 0
        for kh in range(3):
            for kw in range(3):
                col_ref[:, t * cin:(t + 1) * cin] = (
                    pad_ref[:, kh:kh + h, kw:kw + w, :].reshape(m, cin))
                t += 1

        # Single MXU matmul (bf16 in, f32 accumulate) + bias + ReLU.
        acc = jnp.dot(col_ref[...].astype(jnp.bfloat16), w_ref[...],
                      preferred_element_type=jnp.float32)
        acc = jnp.maximum(acc + b_ref[...], 0.0)

        # 2x2 / stride-2 max pool.
        y = acc.reshape(bt, h // 2, 2, w // 2, 2, cout)
        y = jnp.max(y, axis=4)
        y = jnp.max(y, axis=2)
        return y                                  # (bt, h//2, w//2, cout)

    x = x_ref[...].astype(jnp.float32)            # (bt, H, W, 3) NHWC
    a = conv3x3_relu_pool(x, w1, b1, pad1, col1)
    a = conv3x3_relu_pool(a, w2, b2, pad2, col2)
    a = conv3x3_relu_pool(a, w3, b3, pad3, col3)  # (bt, H//8, W//8, 128)

    # NHWC flatten via lane-aligned 128-wide copies.  fc1_w rows were permuted
    # at pack time to this order, so semantics == PyTorch's NCHW flatten.
    bt, h8, w8, c3 = a.shape
    for i in range(h8):
        for j in range(w8):
            off = (i * w8 + j) * c3
            feat_ref[:, off:off + c3] = a[:, i, j, :]

    h1 = jnp.dot(feat_ref[...].astype(jnp.bfloat16), fw1[...],
                 preferred_element_type=jnp.float32)
    h1 = jnp.maximum(h1 + fb1[...], 0.0)
    logits = jnp.dot(h1.astype(jnp.bfloat16), fw2[...],
                     preferred_element_type=jnp.float32) + fb2[...]
    o_ref[...] = jax.nn.sigmoid(logits)[None].astype(o_ref.dtype)


def _full_spec(arr):
    nd = arr.ndim
    return pl.BlockSpec(arr.shape, lambda n, _nd=nd: (0,) * _nd)


def fused_cnn_forward(x_nhwc, kp, *, batch_tile=1):
    """x_nhwc: (N, H, W, 3) f32.  kp: packed params.  Returns (N//bt, bt, out_pad)."""
    N, H, W, _ = x_nhwc.shape
    assert H % 8 == 0 and W % 8 == 0, "spatial dims must be divisible by 8"
    bt = max(1, min(batch_tile, N))
    assert N % bt == 0, "batch must be divisible by batch_tile"
    h2, w2, h4, w4, h8, w8 = H // 2, W // 2, H // 4, W // 4, H // 8, W // 8
    out_pad = kp["fc2_w"].shape[1]

    weights = [kp["w1"], kp["b1"], kp["w2"], kp["b2"], kp["w3"], kp["b3"],
               kp["fc1_w"], kp["fc1_b"], kp["fc2_w"], kp["fc2_b"]]
    in_specs = [pl.BlockSpec((bt, H, W, 3), lambda n: (n, 0, 0, 0))]
    in_specs += [_full_spec(wgt) for wgt in weights]

    return pl.pallas_call(
        _fused_cnn_kernel,
        out_shape=jax.ShapeDtypeStruct((N // bt, bt, out_pad), jnp.float32),
        grid=(N // bt,),
        in_specs=in_specs,
        out_specs=pl.BlockSpec((1, bt, out_pad), lambda n: (n, 0, 0)),
        scratch_shapes=[
            pltpu.VMEM((bt, H + 2, W + 2, 3), jnp.float32),      # pad1
            pltpu.VMEM((bt * H * W, 27), jnp.float32),           # col1
            pltpu.VMEM((bt, h2 + 2, w2 + 2, 32), jnp.float32),   # pad2
            pltpu.VMEM((bt * h2 * w2, 288), jnp.float32),        # col2
            pltpu.VMEM((bt, h4 + 2, w4 + 2, 64), jnp.float32),   # pad3
            pltpu.VMEM((bt * h4 * w4, 576), jnp.float32),        # col3
            pltpu.VMEM((bt, h8 * w8 * 128), jnp.float32),        # flattened feats
        ],
        compiler_params=pltpu.CompilerParams(
            dimension_semantics=("parallel",)),   # v7x: 2 TCs split the batch
    )(x_nhwc, *weights)


def simple_cnn_forward(x_nchw, packed_params, num_boxes, *, batch_tile=1):
    N = x_nchw.shape[0]
    x = jnp.transpose(x_nchw, (0, 2, 3, 1))       # NCHW -> NHWC (tiny, one-off)
    out = fused_cnn_forward(x, packed_params, batch_tile=batch_tile)
    out = out.reshape(N, -1)[:, :num_boxes * 4]   # drop lane padding
    return out.reshape(N, num_boxes, 4)


# --------------------------------------------------------------------------
# Parameters.
# --------------------------------------------------------------------------
def init_params(key, input_shape, num_boxes):
    """PyTorch-equivalent 'logical' params: convs HWIO, linears (in, out),
    fc1 rows in PyTorch's NCHW-flatten order.  (To import real PyTorch
    weights: conv OIHW -> transpose(2, 3, 1, 0); linear (out, in) -> .T.)"""
    h8, w8 = input_shape[0] // 8, input_shape[1] // 8
    fc1_in = 128 * h8 * w8
    out_dim = num_boxes * 4
    ks = jax.random.split(key, 10)

    def init(k, shape, fan_in):
        bound = 1.0 / jnp.sqrt(jnp.float32(fan_in))
        return jax.random.uniform(k, shape, jnp.float32, -bound, bound)

    return {
        "w1": init(ks[0], (3, 3, 3, 32), 3 * 9),
        "b1": init(ks[1], (32,), 3 * 9),
        "w2": init(ks[2], (3, 3, 32, 64), 32 * 9),
        "b2": init(ks[3], (64,), 32 * 9),
        "w3": init(ks[4], (3, 3, 64, 128), 64 * 9),
        "b3": init(ks[5], (128,), 64 * 9),
        "fc1_w": init(ks[6], (fc1_in, 256), fc1_in),
        "fc1_b": init(ks[7], (256,), fc1_in),
        "fc2_w": init(ks[8], (256, out_dim), 256),
        "fc2_b": init(ks[9], (out_dim,), 256),     # fixed: was hardcoded (40,)
    }


def pack_params(p, input_shape, num_boxes):
    """One-time conversion to the fused-kernel layout:
       conv weights -> (9*Cin, Cout) im2col matrices (bf16);
       fc1 rows permuted NCHW-flatten -> NHWC-flatten order (bf16);
       fc2 weight/bias lane-padded to a multiple of 128; biases as (1, C) f32."""
    h8, w8 = input_shape[0] // 8, input_shape[1] // 8
    out_dim = num_boxes * 4
    out_pad = ((out_dim + 127) // 128) * 128

    def conv_w(w):
        return w.reshape(-1, w.shape[-1]).astype(jnp.bfloat16)

    def row(b):
        return b.reshape(1, -1).astype(jnp.float32)

    fc1_w = p["fc1_w"].reshape(128, h8, w8, 256)               # (c, h, w, out)
    fc1_w = jnp.transpose(fc1_w, (1, 2, 0, 3)).reshape(h8 * w8 * 128, 256)

    fc2_w = jnp.zeros((256, out_pad), jnp.float32).at[:, :out_dim].set(p["fc2_w"])
    fc2_b = jnp.zeros((out_pad,), jnp.float32).at[:out_dim].set(p["fc2_b"])

    return {
        "w1": conv_w(p["w1"]), "b1": row(p["b1"]),
        "w2": conv_w(p["w2"]), "b2": row(p["b2"]),
        "w3": conv_w(p["w3"]), "b3": row(p["b3"]),
        "fc1_w": fc1_w.astype(jnp.bfloat16), "fc1_b": row(p["fc1_b"]),
        "fc2_w": fc2_w.astype(jnp.bfloat16), "fc2_b": row(fc2_b),
    }


if __name__ == "__main__":
    # Small shapes consistent with the module (spatial divisible by 8).
    input_shape = (16, 16)
    num_boxes = 10
    batch = 2

    key = jax.random.PRNGKey(0)
    k_x, k_p = jax.random.split(key)
    x = jax.random.normal(k_x, (batch, 3, input_shape[0], input_shape[1]),
                          jnp.float32)
    params = pack_params(init_params(k_p, input_shape, num_boxes),
                         input_shape, num_boxes)

    fwd = jax.jit(lambda xx: simple_cnn_forward(xx, params, num_boxes,
                                                batch_tile=1))
    out = fwd(x)
    jax.block_until_ready(out)
    assert out.shape == (batch, num_boxes, 4), out.shape
    assert bool(jnp.all((out >= 0.0) & (out <= 1.0)))   # sigmoid range
    print("KERNEL_OK")
</pallas_src>

<mosaic_0001>
module attributes {stable_mosaic.version = 11 : i64} {
  func.func @_fused_cnn_kernel(%arg0: i32, %arg1: memref<1x16x16x3xf32, #tpu.memory_space<vmem>>, %arg2: memref<27x32xbf16, #tpu.memory_space<vmem>>, %arg3: memref<1x32xf32, #tpu.memory_space<vmem>>, %arg4: memref<288x64xbf16, #tpu.memory_space<vmem>>, %arg5: memref<1x64xf32, #tpu.memory_space<vmem>>, %arg6: memref<576x128xbf16, #tpu.memory_space<vmem>>, %arg7: memref<1x128xf32, #tpu.memory_space<vmem>>, %arg8: memref<512x256xbf16, #tpu.memory_space<vmem>>, %arg9: memref<1x256xf32, #tpu.memory_space<vmem>>, %arg10: memref<256x128xbf16, #tpu.memory_space<vmem>>, %arg11: memref<1x128xf32, #tpu.memory_space<vmem>>, %arg12: memref<1x1x128xf32, #tpu.memory_space<vmem>>, %arg13: memref<1x18x18x3xf32, #tpu.memory_space<vmem>>, %arg14: memref<256x27xf32, #tpu.memory_space<vmem>>, %arg15: memref<1x10x10x32xf32, #tpu.memory_space<vmem>>, %arg16: memref<64x288xf32, #tpu.memory_space<vmem>>, %arg17: memref<1x6x6x64xf32, #tpu.memory_space<vmem>>, %arg18: memref<16x576xf32, #tpu.memory_space<vmem>>, %arg19: memref<1x512xf32, #tpu.memory_space<vmem>>) attributes {dimension_semantics = [#tpu.dimension_semantics<parallel>], iteration_bounds = array<i64: 2>, scalar_prefetch = 0 : i64, scratch_operands = 7 : i64, tpu.core_type = #tpu.core_type<tc>, window_params = [{transform_indices = @transform_0, window_bounds = array<i64: 1, 16, 16, 3>}, {pipeline_mode = #tpu.pipeline_mode<synchronous>, transform_indices = @transform_1, window_bounds = array<i64: 27, 32>}, {pipeline_mode = #tpu.pipeline_mode<synchronous>, transform_indices = @transform_2, window_bounds = array<i64: 1, 32>}, {pipeline_mode = #tpu.pipeline_mode<synchronous>, transform_indices = @transform_3, window_bounds = array<i64: 288, 64>}, {pipeline_mode = #tpu.pipeline_mode<synchronous>, transform_indices = @transform_4, window_bounds = array<i64: 1, 64>}, {pipeline_mode = #tpu.pipeline_mode<synchronous>, transform_indices = @transform_5, window_bounds = array<i64: 576, 128>}, {pipeline_mode = #tpu.pipeline_mode<synchronous>, transform_indices = @transform_6, window_bounds = array<i64: 1, 128>}, {pipeline_mode = #tpu.pipeline_mode<synchronous>, transform_indices = @transform_7, window_bounds = array<i64: 512, 256>}, {pipeline_mode = #tpu.pipeline_mode<synchronous>, transform_indices = @transform_8, window_bounds = array<i64: 1, 256>}, {pipeline_mode = #tpu.pipeline_mode<synchronous>, transform_indices = @transform_9, window_bounds = array<i64: 256, 128>}, {pipeline_mode = #tpu.pipeline_mode<synchronous>, transform_indices = @transform_10, window_bounds = array<i64: 1, 128>}, {transform_indices = @transform_11, window_bounds = array<i64: 1, 1, 128>}]} {
    %c0 = arith.constant 0 : index
    %c0_0 = arith.constant 0 : index
    %c0_1 = arith.constant 0 : index
    %c0_2 = arith.constant 0 : index
    %0 = vector.load %arg1[%c0, %c0_0, %c0_1, %c0_2] : memref<1x16x16x3xf32, #tpu.memory_space<vmem>>, vector<1x16x16x3xf32>
    %cst = arith.constant 0.000000e+00 : f32
    %1 = vector.broadcast %cst : f32 to vector<1x18x18x3xf32>
    %c0_3 = arith.constant 0 : index
    %c0_4 = arith.constant 0 : index
    %c0_5 = arith.constant 0 : index
    %c0_6 = arith.constant 0 : index
    %2 = vector.load %arg13[%c0_3, %c0_4, %c0_5, %c0_6] : memref<1x18x18x3xf32, #tpu.memory_space<vmem>>, vector<1x18x18x3xf32>
    tpu.vector_store %arg13[%c0_3, %c0_4, %c0_5, %c0_6], %1 {strides = array<i32>} : memref<1x18x18x3xf32, #tpu.memory_space<vmem>>, vector<1x18x18x3xf32>,
    %c0_7 = arith.constant 0 : index
    %c1 = arith.constant 1 : index
    %c1_8 = arith.constant 1 : index
    %c0_9 = arith.constant 0 : index
    %3 = vector.load %arg13[%c0_7, %c1, %c1_8, %c0_9] : memref<1x18x18x3xf32, #tpu.memory_space<vmem>>, vector<1x16x16x3xf32>
    tpu.vector_store %arg13[%c0_7, %c1, %c1_8, %c0_9], %0 {strides = array<i32>} : memref<1x18x18x3xf32, #tpu.memory_space<vmem>>, vector<1x16x16x3xf32>,
    %c0_10 = arith.constant 0 : index
    %c0_11 = arith.constant 0 : index
    %c0_12 = arith.constant 0 : index
    %c0_13 = arith.constant 0 : index
    %4 = vector.load %arg13[%c0_10, %c0_11, %c0_12, %c0_13] : memref<1x18x18x3xf32, #tpu.memory_space<vmem>>, vector<1x16x16x3xf32>
    %5 = vector.shape_cast %4 : vector<1x16x16x3xf32> to vector<256x3xf32>
    %c0_14 = arith.constant 0 : index
    %c0_15 = arith.constant 0 : index
    %6 = vector.load %arg14[%c0_14, %c0_15] : memref<256x27xf32, #tpu.memory_space<vmem>>, vector<256x3xf32>
    tpu.vector_store %arg14[%c0_14, %c0_15], %5 {strides = array<i32>} : memref<256x27xf32, #tpu.memory_space<vmem>>, vector<256x3xf32>,
    %c0_16 = arith.constant 0 : index
    %c0_17 = arith.constant 0 : index
    %c1_18 = arith.constant 1 : index
    %c0_19 = arith.constant 0 : index
    %7 = vector.load %arg13[%c0_16, %c0_17, %c1_18, %c0_19] : memref<1x18x18x3xf32, #tpu.memory_space<vmem>>, vector<1x16x16x3xf32>
    %8 = vector.shape_cast %7 : vector<1x16x16x3xf32> to vector<256x3xf32>
    %c0_20 = arith.constant 0 : index
    %c3 = arith.constant 3 : index
    %9 = vector.load %arg14[%c0_20, %c3] : memref<256x27xf32, #tpu.memory_space<vmem>>, vector<256x3xf32>
    tpu.vector_store %arg14[%c0_20, %c3], %8 {strides = array<i32>} : memref<256x27xf32, #tpu.memory_space<vmem>>, vector<256x3xf32>,
    %c0_21 = arith.constant 0 : index
    %c0_22 = arith.constant 0 : index
    %c2 = arith.constant 2 : index
    %c0_23 = arith.constant 0 : index
    %10 = vector.load %arg13[%c0_21, %c0_22, %c2, %c0_23] : memref<1x18x18x3xf32, #tpu.memory_space<vmem>>, vector<1x16x16x3xf32>
    %11 = vector.shape_cast %10 : vector<1x16x16x3xf32> to vector<256x3xf32>
    %c0_24 = arith.constant 0 : index
    %c6 = arith.constant 6 : index
    %12 = vector.load %arg14[%c0_24, %c6] : memref<256x27xf32, #tpu.memory_space<vmem>>, vector<256x3xf32>
    tpu.vector_store %arg14[%c0_24, %c6], %11 {strides = array<i32>} : memref<256x27xf32, #tpu.memory_space<vmem>>, vector<256x3xf32>,
    %c0_25 = arith.constant 0 : index
    %c1_26 = arith.constant 1 : index
    %c0_27 = arith.constant 0 : index
    %c0_28 = arith.constant 0 : index
    %13 = vector.load %arg13[%c0_25, %c1_26, %c0_27, %c0_28] : memref<1x18x18x3xf32, #tpu.memory_space<vmem>>, vector<1x16x16x3xf32>
    %14 = vector.shape_cast %13 : vector<1x16x16x3xf32> to vector<256x3xf32>
    %c0_29 = arith.constant 0 : index
    %c9 = arith.constant 9 : index
    %15 = vector.load %arg14[%c0_29, %c9] : memref<256x27xf32, #tpu.memory_space<vmem>>, vector<256x3xf32>
    tpu.vector_store %arg14[%c0_29, %c9], %14 {strides = array<i32>} : memref<256x27xf32, #tpu.memory_space<vmem>>, vector<256x3xf32>,
    %c0_30 = arith.constant 0 : index
    %c1_31 = arith.constant 1 : index
    %c1_32 = arith.constant 1 : index
    %c0_33 = arith.constant 0 : index
    %16 = vector.load %arg13[%c0_30, %c1_31, %c1_32, %c0_33] : memref<1x18x18x3xf32, #tpu.memory_space<vmem>>, vector<1x16x16x3xf32>
    %17 = vector.shape_cast %16 : vector<1x16x16x3xf32> to vector<256x3xf32>
    %c0_34 = arith.constant 0 : index
    %c12 = arith.constant 12 : index
    %18 = vector.load %arg14[%c0_34, %c12] : memref<256x27xf32, #tpu.memory_space<vmem>>, vector<256x3xf32>
    tpu.vector_store %arg14[%c0_34, %c12], %17 {strides = array<i32>} : memref<256x27xf32, #tpu.memory_space<vmem>>, vector<256x3xf32>,
    %c0_35 = arith.constant 0 : index
    %c1_36 = arith.constant 1 : index
    %c2_37 = arith.constant 2 : index
    %c0_38 = arith.constant 0 : index
    %19 = vector.load %arg13[%c0_35, %c1_36, %c2_37, %c0_38] : memref<1x18x18x3xf32, #tpu.memory_space<vmem>>, vector<1x16x16x3xf32>
    %20 = vector.shape_cast %19 : vector<1x16x16x3xf32> to vector<256x3xf32>
    %c0_39 = arith.constant 0 : index
    %c15 = arith.constant 15 : index
    %21 = vector.load %arg14[%c0_39, %c15] : memref<256x27xf32, #tpu.memory_space<vmem>>, vector<256x3xf32>
    tpu.vector_store %arg14[%c0_39, %c15], %20 {strides = array<i32>} : memref<256x27xf32, #tpu.memory_space<vmem>>, vector<256x3xf32>,
    %c0_40 = arith.constant 0 : index
    %c2_41 = arith.constant 2 : index
    %c0_42 = arith.constant 0 : index
    %c0_43 = arith.constant 0 : index
    %22 = vector.load %arg13[%c0_40, %c2_41, %c0_42, %c0_43] : memref<1x18x18x3xf32, #tpu.memory_space<vmem>>, vector<1x16x16x3xf32>
    %23 = vector.shape_cast %22 : vector<1x16x16x3xf32> to vector<256x3xf32>
    %c0_44 = arith.constant 0 : index
    %c18 = arith.constant 18 : index
    %24 = vector.load %arg14[%c0_44, %c18] : memref<256x27xf32, #tpu.memory_space<vmem>>, vector<256x3xf32>
    tpu.vector_store %arg14[%c0_44, %c18], %23 {strides = array<i32>} : memref<256x27xf32, #tpu.memory_space<vmem>>, vector<256x3xf32>,
    %c0_45 = arith.constant 0 : index
    %c2_46 = arith.constant 2 : index
    %c1_47 = arith.constant 1 : index
    %c0_48 = arith.constant 0 : index
    %25 = vector.load %arg13[%c0_45, %c2_46, %c1_47, %c0_48] : memref<1x18x18x3xf32, #tpu.memory_space<vmem>>, vector<1x16x16x3xf32>
    %26 = vector.shape_cast %25 : vector<1x16x16x3xf32> to vector<256x3xf32>
    %c0_49 = arith.constant 0 : index
    %c21 = arith.constant 21 : index
    %27 = vector.load %arg14[%c0_49, %c21] : memref<256x27xf32, #tpu.memory_space<vmem>>, vector<256x3xf32>
    tpu.vector_store %arg14[%c0_49, %c21], %26 {strides = array<i32>} : memref<256x27xf32, #tpu.memory_space<vmem>>, vector<256x3xf32>,
    %c0_50 = arith.constant 0 : index
    %c2_51 = arith.constant 2 : index
    %c2_52 = arith.constant 2 : index
    %c0_53 = arith.constant 0 : index
    %28 = vector.load %arg13[%c0_50, %c2_51, %c2_52, %c0_53] : memref<1x18x18x3xf32, #tpu.memory_space<vmem>>, vector<1x16x16x3xf32>
    %29 = vector.shape_cast %28 : vector<1x16x16x3xf32> to vector<256x3xf32>
    %c0_54 = arith.constant 0 : index
    %c24 = arith.constant 24 : index
    %30 = vector.load %arg14[%c0_54, %c24] : memref<256x27xf32, #tpu.memory_space<vmem>>, vector<256x3xf32>
    tpu.vector_store %arg14[%c0_54, %c24], %29 {strides = array<i32>} : memref<256x27xf32, #tpu.memory_space<vmem>>, vector<256x3xf32>,
    %c0_55 = arith.constant 0 : index
    %c0_56 = arith.constant 0 : index
    %31 = vector.load %arg14[%c0_55, %c0_56] : memref<256x27xf32, #tpu.memory_space<vmem>>, vector<256x27xf32>
    %32 = arith.truncf %31 : vector<256x27xf32> to vector<256x27xbf16>
    %c0_57 = arith.constant 0 : index
    %c0_58 = arith.constant 0 : index
    %33 = vector.load %arg2[%c0_57, %c0_58] : memref<27x32xbf16, #tpu.memory_space<vmem>>, vector<27x32xbf16>
    %cst_59 = arith.constant dense<0.000000e+00> : vector<256x32xf32>
    %34 = tpu.matmul %32, %33, %cst_59 {dimension_numbers = #tpu.dot_dimension_numbers<[1], [0], [0], [1], [0, 0, 1, 1], [], []>} : vector<256x27xbf16>, vector<27x32xbf16>, vector<256x32xf32> -> vector<256x32xf32>
    %c0_60 = arith.constant 0 : index
    %c0_61 = arith.constant 0 : index
    %35 = vector.load %arg3[%c0_60, %c0_61] : memref<1x32xf32, #tpu.memory_space<vmem>>, vector<1x32xf32>
    %36 = vector.broadcast %35 : vector<1x32xf32> to vector<256x32xf32>
    %37 = arith.addf %34, %36 : vector<256x32xf32>
    %cst_62 = arith.constant 0.000000e+00 : f32
    %38 = vector.broadcast %cst_62 : f32 to vector<256x32xf32>
    %39 = arith.maximumf %37, %38 : vector<256x32xf32>
    %40 = vector.shape_cast %39 : vector<256x32xf32> to vector<1x8x2x8x2x32xf32>
    %cst_63 = arith.constant dense<0xFF800000> : vector<1x8x2x8x32xf32>
    %41 = vector.multi_reduction <maximumf>, %40, %cst_63 [4] : vector<1x8x2x8x2x32xf32> to vector<1x8x2x8x32xf32>
    %cst_64 = arith.constant dense<0xFF800000> : vector<1x8x8x32xf32>
    %42 = vector.multi_reduction <maximumf>, %41, %cst_64 [2] : vector<1x8x2x8x32xf32> to vector<1x8x8x32xf32>
    %cst_65 = arith.constant 0.000000e+00 : f32
    %43 = vector.broadcast %cst_65 : f32 to vector<1x10x10x32xf32>
    %c0_66 = arith.constant 0 : index
    %c0_67 = arith.constant 0 : index
    %c0_68 = arith.constant 0 : index
    %c0_69 = arith.constant 0 : index
    %44 = vector.load %arg15[%c0_66, %c0_67, %c0_68, %c0_69] : memref<1x10x10x32xf32, #tpu.memory_space<vmem>>, vector<1x10x10x32xf32>
    tpu.vector_store %arg15[%c0_66, %c0_67, %c0_68, %c0_69], %43 {strides = array<i32>} : memref<1x10x10x32xf32, #tpu.memory_space<vmem>>, vector<1x10x10x32xf32>,
    %c0_70 = arith.constant 0 : index
    %c1_71 = arith.constant 1 : index
    %c1_72 = arith.constant 1 : index
    %c0_73 = arith.constant 0 : index
    %45 = vector.load %arg15[%c0_70, %c1_71, %c1_72, %c0_73] : memref<1x10x10x32xf32, #tpu.memory_space<vmem>>, vector<1x8x8x32xf32>
    tpu.vector_store %arg15[%c0_70, %c1_71, %c1_72, %c0_73], %42 {strides = array<i32>} : memref<1x10x10x32xf32, #tpu.memory_space<vmem>>, vector<1x8x8x32xf32>,
    %c0_74 = arith.constant 0 : index
    %c0_75 = arith.constant 0 : index
    %c0_76 = arith.constant 0 : index
    %c0_77 = arith.constant 0 : index
    %46 = vector.load %arg15[%c0_74, %c0_75, %c0_76, %c0_77] : memref<1x10x10x32xf32, #tpu.memory_space<vmem>>, vector<1x8x8x32xf32>
    %47 = vector.shape_cast %46 : vector<1x8x8x32xf32> to vector<64x32xf32>
    %c0_78 = arith.constant 0 : index
    %c0_79 = arith.constant 0 : index
    %48 = vector.load %arg16[%c0_78, %c0_79] : memref<64x288xf32, #tpu.memory_space<vmem>>, vector<64x32xf32>
    tpu.vector_store %arg16[%c0_78, %c0_79], %47 {strides = array<i32>} : memref<64x288xf32, #tpu.memory_space<vmem>>, vector<64x32xf32>,
    %c0_80 = arith.constant 0 : index
    %c0_81 = arith.constant 0 : index
    %c1_82 = arith.constant 1 : index
    %c0_83 = arith.constant 0 : index
    %49 = vector.load %arg15[%c0_80, %c0_81, %c1_82, %c0_83] : memref<1x10x10x32xf32, #tpu.memory_space<vmem>>, vector<1x8x8x32xf32>
    %50 = vector.shape_cast %49 : vector<1x8x8x32xf32> to vector<64x32xf32>
    %c0_84 = arith.constant 0 : index
    %c32 = arith.constant 32 : index
    %51 = vector.load %arg16[%c0_84, %c32] : memref<64x288xf32, #tpu.memory_space<vmem>>, vector<64x32xf32>
    tpu.vector_store %arg16[%c0_84, %c32], %50 {strides = array<i32>} : memref<64x288xf32, #tpu.memory_space<vmem>>, vector<64x32xf32>,
    %c0_85 = arith.constant 0 : index
    %c0_86 = arith.constant 0 : index
    %c2_87 = arith.constant 2 : index
    %c0_88 = arith.constant 0 : index
    %52 = vector.load %arg15[%c0_85, %c0_86, %c2_87, %c0_88] : memref<1x10x10x32xf32, #tpu.memory_space<vmem>>, vector<1x8x8x32xf32>
    %53 = vector.shape_cast %52 : vector<1x8x8x32xf32> to vector<64x32xf32>
    %c0_89 = arith.constant 0 : index
    %c64 = arith.constant 64 : index
    %54 = vector.load %arg16[%c0_89, %c64] : memref<64x288xf32, #tpu.memory_space<vmem>>, vector<64x32xf32>
    tpu.vector_store %arg16[%c0_89, %c64], %53 {strides = array<i32>} : memref<64x288xf32, #tpu.memory_space<vmem>>, vector<64x32xf32>,
    %c0_90 = arith.constant 0 : index
    %c1_91 = arith.constant 1 : index
    %c0_92 = arith.constant 0 : index
    %c0_93 = arith.constant 0 : index
    %55 = vector.load %arg15[%c0_90, %c1_91, %c0_92, %c0_93] : memref<1x10x10x32xf32, #tpu.memory_space<vmem>>, vector<1x8x8x32xf32>
    %56 = vector.shape_cast %55 : vector<1x8x8x32xf32> to vector<64x32xf32>
    %c0_94 = arith.constant 0 : index
    %c96 = arith.constant 96 : index
    %57 = vector.load %arg16[%c0_94, %c96] : memref<64x288xf32, #tpu.memory_space<vmem>>, vector<64x32xf32>
    tpu.vector_store %arg16[%c0_94, %c96], %56 {strides = array<i32>} : memref<64x288xf32, #tpu.memory_space<vmem>>, vector<64x32xf32>,
    %c0_95 = arith.constant 0 : index
    %c1_96 = arith.constant 1 : index
    %c1_97 = arith.constant 1 : index
    %c0_98 = arith.constant 0 : index
    %58 = vector.load %arg15[%c0_95, %c1_96, %c1_97, %c0_98] : memref<1x10x10x32xf32, #tpu.memory_space<vmem>>, vector<1x8x8x32xf32>
    %59 = vector.shape_cast %58 : vector<1x8x8x32xf32> to vector<64x32xf32>
    %c0_99 = arith.constant 0 : index
    %c128 = arith.constant 128 : index
    %60 = vector.load %arg16[%c0_99, %c128] : memref<64x288xf32, #tpu.memory_space<vmem>>, vector<64x32xf32>
    tpu.vector_store %arg16[%c0_99, %c128], %59 {strides = array<i32>} : memref<64x288xf32, #tpu.memory_space<vmem>>, vector<64x32xf32>,
    %c0_100 = arith.constant 0 : index
    %c1_101 = arith.constant 1 : index
    %c2_102 = arith.constant 2 : index
    %c0_103 = arith.constant 0 : index
    %61 = vector.load %arg15[%c0_100, %c1_101, %c2_102, %c0_103] : memref<1x10x10x32xf32, #tpu.memory_space<vmem>>, vector<1x8x8x32xf32>
    %62 = vector.shape_cast %61 : vector<1x8x8x32xf32> to vector<64x32xf32>
    %c0_104 = arith.constant 0 : index
    %c160 = arith.constant 160 : index
    %63 = vector.load %arg16[%c0_104, %c160] : memref<64x288xf32, #tpu.memory_space<vmem>>, vector<64x32xf32>
    tpu.vector_store %arg16[%c0_104, %c160], %62 {strides = array<i32>} : memref<64x288xf32, #tpu.memory_space<vmem>>, vector<64x32xf32>,
    %c0_105 = arith.constant 0 : index
    %c2_106 = arith.constant 2 : index
    %c0_107 = arith.constant 0 : index
    %c0_108 = arith.constant 0 : index
    %64 = vector.load %arg15[%c0_105, %c2_106, %c0_107, %c0_108] : memref<1x10x10x32xf32, #tpu.memory_space<vmem>>, vector<1x8x8x32xf32>
    %65 = vector.shape_cast %64 : vector<1x8x8x32xf32> to vector<64x32xf32>
    %c0_109 = arith.constant 0 : index
    %c192 = arith.constant 192 : index
    %66 = vector.load %arg16[%c0_109, %c192] : memref<64x288xf32, #tpu.memory_space<vmem>>, vector<64x32xf32>
    tpu.vector_store %arg16[%c0_109, %c192], %65 {strides = array<i32>} : memref<64x288xf32, #tpu.memory_space<vmem>>, vector<64x32xf32>,
    %c0_110 = arith.constant 0 : index
    %c2_111 = arith.constant 2 : index
    %c1_112 = arith.constant 1 : index
    %c0_113 = arith.constant 0 : index
    %67 = vector.load %arg15[%c0_110, %c2_111, %c1_112, %c0_113] : memref<1x10x10x32xf32, #tpu.memory_space<vmem>>, vector<1x8x8x32xf32>
    %68 = vector.shape_cast %67 : vector<1x8x8x32xf32> to vector<64x32xf32>
    %c0_114 = arith.constant 0 : index
    %c224 = arith.constant 224 : index
    %69 = vector.load %arg16[%c0_114, %c224] : memref<64x288xf32, #tpu.memory_space<vmem>>, vector<64x32xf32>
    tpu.vector_store %arg16[%c0_114, %c224], %68 {strides = array<i32>} : memref<64x288xf32, #tpu.memory_space<vmem>>, vector<64x32xf32>,
    %c0_115 = arith.constant 0 : index
    %c2_116 = arith.constant 2 : index
    %c2_117 = arith.constant 2 : index
    %c0_118 = arith.constant 0 : index
    %70 = vector.load %arg15[%c0_115, %c2_116, %c2_117, %c0_118] : memref<1x10x10x32xf32, #tpu.memory_space<vmem>>, vector<1x8x8x32xf32>
    %71 = vector.shape_cast %70 : vector<1x8x8x32xf32> to vector<64x32xf32>
    %c0_119 = arith.constant 0 : index
    %c256 = arith.constant 256 : index
    %72 = vector.load %arg16[%c0_119, %c256] : memref<64x288xf32, #tpu.memory_space<vmem>>, vector<64x32xf32>
    tpu.vector_store %arg16[%c0_119, %c256], %71 {strides = array<i32>} : memref<64x288xf32, #tpu.memory_space<vmem>>, vector<64x32xf32>,
    %c0_120 = arith.constant 0 : index
    %c0_121 = arith.constant 0 : index
    %73 = vector.load %arg16[%c0_120, %c0_121] : memref<64x288xf32, #tpu.memory_space<vmem>>, vector<64x288xf32>
    %74 = arith.truncf %73 : vector<64x288xf32> to vector<64x288xbf16>
    %c0_122 = arith.constant 0 : index
    %c0_123 = arith.constant 0 : index
    %75 = vector.load %arg4[%c0_122, %c0_123] : memref<288x64xbf16, #tpu.memory_space<vmem>>, vector<288x64xbf16>
    %cst_124 = arith.constant dense<0.000000e+00> : vector<64x64xf32>
    %76 = tpu.matmul %74, %75, %cst_124 {dimension_numbers = #tpu.dot_dimension_numbers<[1], [0], [0], [1], [0, 0, 1, 1], [], []>} : vector<64x288xbf16>, vector<288x64xbf16>, vector<64x64xf32> -> vector<64x64xf32>
    %c0_125 = arith.constant 0 : index
    %c0_126 = arith.constant 0 : index
    %77 = vector.load %arg5[%c0_125, %c0_126] : memref<1x64xf32, #tpu.memory_space<vmem>>, vector<1x64xf32>
    %78 = vector.broadcast %77 : vector<1x64xf32> to vector<64x64xf32>
    %79 = arith.addf %76, %78 : vector<64x64xf32>
    %cst_127 = arith.constant 0.000000e+00 : f32
    %80 = vector.broadcast %cst_127 : f32 to vector<64x64xf32>
    %81 = arith.maximumf %79, %80 : vector<64x64xf32>
    %82 = vector.shape_cast %81 : vector<64x64xf32> to vector<1x4x2x4x2x64xf32>
    %cst_128 = arith.constant dense<0xFF800000> : vector<1x4x2x4x64xf32>
    %83 = vector.multi_reduction <maximumf>, %82, %cst_128 [4] : vector<1x4x2x4x2x64xf32> to vector<1x4x2x4x64xf32>
    %cst_129 = arith.constant dense<0xFF800000> : vector<1x4x4x64xf32>
    %84 = vector.multi_reduction <maximumf>, %83, %cst_129 [2] : vector<1x4x2x4x64xf32> to vector<1x4x4x64xf32>
    %cst_130 = arith.constant 0.000000e+00 : f32
    %85 = vector.broadcast %cst_130 : f32 to vector<1x6x6x64xf32>
    %c0_131 = arith.constant 0 : index
    %c0_132 = arith.constant 0 : index
    %c0_133 = arith.constant 0 : index
    %c0_134 = arith.constant 0 : index
    %86 = vector.load %arg17[%c0_131, %c0_132, %c0_133, %c0_134] : memref<1x6x6x64xf32, #tpu.memory_space<vmem>>, vector<1x6x6x64xf32>
    tpu.vector_store %arg17[%c0_131, %c0_132, %c0_133, %c0_134], %85 {strides = array<i32>} : memref<1x6x6x64xf32, #tpu.memory_space<vmem>>, vector<1x6x6x64xf32>,
    %c0_135 = arith.constant 0 : index
    %c1_136 = arith.constant 1 : index
    %c1_137 = arith.constant 1 : index
    %c0_138 = arith.constant 0 : index
    %87 = vector.load %arg17[%c0_135, %c1_136, %c1_137, %c0_138] : memref<1x6x6x64xf32, #tpu.memory_space<vmem>>, vector<1x4x4x64xf32>
    tpu.vector_store %arg17[%c0_135, %c1_136, %c1_137, %c0_138], %84 {strides = array<i32>} : memref<1x6x6x64xf32, #tpu.memory_space<vmem>>, vector<1x4x4x64xf32>,
    %c0_139 = arith.constant 0 : index
    %c0_140 = arith.constant 0 : index
    %c0_141 = arith.constant 0 : index
    %c0_142 = arith.constant 0 : index
    %88 = vector.load %arg17[%c0_139, %c0_140, %c0_141, %c0_142] : memref<1x6x6x64xf32, #tpu.memory_space<vmem>>, vector<1x4x4x64xf32>
    %89 = vector.shape_cast %88 : vector<1x4x4x64xf32> to vector<16x64xf32>
    %c0_143 = arith.constant 0 : index
    %c0_144 = arith.constant 0 : index
    %90 = vector.load %arg18[%c0_143, %c0_144] : memref<16x576xf32, #tpu.memory_space<vmem>>, vector<16x64xf32>
    tpu.vector_store %arg18[%c0_143, %c0_144], %89 {strides = array<i32>} : memref<16x576xf32, #tpu.memory_space<vmem>>, vector<16x64xf32>,
    %c0_145 = arith.constant 0 : index
    %c0_146 = arith.constant 0 : index
    %c1_147 = arith.constant 1 : index
    %c0_148 = arith.constant 0 : index
    %91 = vector.load %arg17[%c0_145, %c0_146, %c1_147, %c0_148] : memref<1x6x6x64xf32, #tpu.memory_space<vmem>>, vector<1x4x4x64xf32>
    %92 = vector.shape_cast %91 : vector<1x4x4x64xf32> to vector<16x64xf32>
    %c0_149 = arith.constant 0 : index
    %c64_150 = arith.constant 64 : index
    %93 = vector.load %arg18[%c0_149, %c64_150] : memref<16x576xf32, #tpu.memory_space<vmem>>, vector<16x64xf32>
    tpu.vector_store %arg18[%c0_149, %c64_150], %92 {strides = array<i32>} : memref<16x576xf32, #tpu.memory_space<vmem>>, vector<16x64xf32>,
    %c0_151 = arith.constant 0 : index
    %c0_152 = arith.constant 0 : index
    %c2_153 = arith.constant 2 : index
    %c0_154 = arith.constant 0 : index
    %94 = vector.load %arg17[%c0_151, %c0_152, %c2_153, %c0_154] : memref<1x6x6x64xf32, #tpu.memory_space<vmem>>, vector<1x4x4x64xf32>
    %95 = vector.shape_cast %94 : vector<1x4x4x64xf32> to vector<16x64xf32>
    %c0_155 = arith.constant 0 : index
    %c128_156 = arith.constant 128 : index
    %96 = vector.load %arg18[%c0_155, %c128_156] : memref<16x576xf32, #tpu.memory_space<vmem>>, vector<16x64xf32>
    tpu.vector_store %arg18[%c0_155, %c128_156], %95 {strides = array<i32>} : memref<16x576xf32, #tpu.memory_space<vmem>>, vector<16x64xf32>,
    %c0_157 = arith.constant 0 : index
    %c1_158 = arith.constant 1 : index
    %c0_159 = arith.constant 0 : index
    %c0_160 = arith.constant 0 : index
    %97 = vector.load %arg17[%c0_157, %c1_158, %c0_159, %c0_160] : memref<1x6x6x64xf32, #tpu.memory_space<vmem>>, vector<1x4x4x64xf32>
    %98 = vector.shape_cast %97 : vector<1x4x4x64xf32> to vector<16x64xf32>
    %c0_161 = arith.constant 0 : index
    %c192_162 = arith.constant 192 : index
    %99 = vector.load %arg18[%c0_161, %c192_162] : memref<16x576xf32, #tpu.memory_space<vmem>>, vector<16x64xf32>
    tpu.vector_store %arg18[%c0_161, %c192_162], %98 {strides = array<i32>} : memref<16x576xf32, #tpu.memory_space<vmem>>, vector<16x64xf32>,
    %c0_163 = arith.constant 0 : index
    %c1_164 = arith.constant 1 : index
    %c1_165 = arith.constant 1 : index
    %c0_166 = arith.constant 0 : index
    %100 = vector.load %arg17[%c0_163, %c1_164, %c1_165, %c0_166] : memref<1x6x6x64xf32, #tpu.memory_space<vmem>>, vector<1x4x4x64xf32>
    %101 = vector.shape_cast %100 : vector<1x4x4x64xf32> to vector<16x64xf32>
    %c0_167 = arith.constant 0 : index
    %c256_168 = arith.constant 256 : index
    %102 = vector.load %arg18[%c0_167, %c256_168] : memref<16x576xf32, #tpu.memory_space<vmem>>, vector<16x64xf32>
    tpu.vector_store %arg18[%c0_167, %c256_168], %101 {strides = array<i32>} : memref<16x576xf32, #tpu.memory_space<vmem>>, vector<16x64xf32>,
    %c0_169 = arith.constant 0 : index
    %c1_170 = arith.constant 1 : index
    %c2_171 = arith.constant 2 : index
    %c0_172 = arith.constant 0 : index
    %103 = vector.load %arg17[%c0_169, %c1_170, %c2_171, %c0_172] : memref<1x6x6x64xf32, #tpu.memory_space<vmem>>, vector<1x4x4x64xf32>
    %104 = vector.shape_cast %103 : vector<1x4x4x64xf32> to vector<16x64xf32>
    %c0_173 = arith.constant 0 : index
    %c320 = arith.constant 320 : index
    %105 = vector.load %arg18[%c0_173, %c320] : memref<16x576xf32, #tpu.memory_space<vmem>>, vector<16x64xf32>
    tpu.vector_store %arg18[%c0_173, %c320], %104 {strides = array<i32>} : memref<16x576xf32, #tpu.memory_space<vmem>>, vector<16x64xf32>,
    %c0_174 = arith.constant 0 : index
    %c2_175 = arith.constant 2 : index
    %c0_176 = arith.constant 0 : index
    %c0_177 = arith.constant 0 : index
    %106 = vector.load %arg17[%c0_174, %c2_175, %c0_176, %c0_177] : memref<1x6x6x64xf32, #tpu.memory_space<vmem>>, vector<1x4x4x64xf32>
    %107 = vector.shape_cast %106 : vector<1x4x4x64xf32> to vector<16x64xf32>
    %c0_178 = arith.constant 0 : index
    %c384 = arith.constant 384 : index
    %108 = vector.load %arg18[%c0_178, %c384] : memref<16x576xf32, #tpu.memory_space<vmem>>, vector<16x64xf32>
    tpu.vector_store %arg18[%c0_178, %c384], %107 {strides = array<i32>} : memref<16x576xf32, #tpu.memory_space<vmem>>, vector<16x64xf32>,
    %c0_179 = arith.constant 0 : index
    %c2_180 = arith.constant 2 : index
    %c1_181 = arith.constant 1 : index
    %c0_182 = arith.constant 0 : index
    %109 = vector.load %arg17[%c0_179, %c2_180, %c1_181, %c0_182] : memref<1x6x6x64xf32, #tpu.memory_space<vmem>>, vector<1x4x4x64xf32>
    %110 = vector.shape_cast %109 : vector<1x4x4x64xf32> to vector<16x64xf32>
    %c0_183 = arith.constant 0 : index
    %c448 = arith.constant 448 : index
    %111 = vector.load %arg18[%c0_183, %c448] : memref<16x576xf32, #tpu.memory_space<vmem>>, vector<16x64xf32>
    tpu.vector_store %arg18[%c0_183, %c448], %110 {strides = array<i32>} : memref<16x576xf32, #tpu.memory_space<vmem>>, vector<16x64xf32>,
    %c0_184 = arith.constant 0 : index
    %c2_185 = arith.constant 2 : index
    %c2_186 = arith.constant 2 : index
    %c0_187 = arith.constant 0 : index
    %112 = vector.load %arg17[%c0_184, %c2_185, %c2_186, %c0_187] : memref<1x6x6x64xf32, #tpu.memory_space<vmem>>, vector<1x4x4x64xf32>
    %113 = vector.shape_cast %112 : vector<1x4x4x64xf32> to vector<16x64xf32>
    %c0_188 = arith.constant 0 : index
    %c512 = arith.constant 512 : index
    %114 = vector.load %arg18[%c0_188, %c512] : memref<16x576xf32, #tpu.memory_space<vmem>>, vector<16x64xf32>
    tpu.vector_store %arg18[%c0_188, %c512], %113 {strides = array<i32>} : memref<16x576xf32, #tpu.memory_space<vmem>>, vector<16x64xf32>,
    %c0_189 = arith.constant 0 : index
    %c0_190 = arith.constant 0 : index
    %115 = vector.load %arg18[%c0_189, %c0_190] : memref<16x576xf32, #tpu.memory_space<vmem>>, vector<16x576xf32>
    %116 = arith.truncf %115 : vector<16x576xf32> to vector<16x576xbf16>
    %c0_191 = arith.constant 0 : index
    %c0_192 = arith.constant 0 : index
    %117 = vector.load %arg6[%c0_191, %c0_192] : memref<576x128xbf16, #tpu.memory_space<vmem>>, vector<576x128xbf16>
    %cst_193 = arith.constant dense<0.000000e+00> : vector<16x128xf32>
    %118 = tpu.matmul %116, %117, %cst_193 {dimension_numbers = #tpu.dot_dimension_numbers<[1], [0], [0], [1], [0, 0, 1, 1], [], []>} : vector<16x576xbf16>, vector<576x128xbf16>, vector<16x128xf32> -> vector<16x128xf32>
    %c0_194 = arith.constant 0 : index
    %c0_195 = arith.constant 0 : index
    %119 = vector.load %arg7[%c0_194, %c0_195] : memref<1x128xf32, #tpu.memory_space<vmem>>, vector<1x128xf32>
    %120 = vector.broadcast %119 : vector<1x128xf32> to vector<16x128xf32>
    %121 = arith.addf %118, %120 : vector<16x128xf32>
    %cst_196 = arith.constant 0.000000e+00 : f32
    %122 = vector.broadcast %cst_196 : f32 to vector<16x128xf32>
    %123 = arith.maximumf %121, %122 : vector<16x128xf32>
    %124 = vector.shape_cast %123 : vector<16x128xf32> to vector<1x2x2x2x2x128xf32>
    %cst_197 = arith.constant dense<0xFF800000> : vector<1x2x2x2x128xf32>
    %125 = vector.multi_reduction <maximumf>, %124, %cst_197 [4] : vector<1x2x2x2x2x128xf32> to vector<1x2x2x2x128xf32>
    %cst_198 = arith.constant dense<0xFF800000> : vector<1x2x2x128xf32>
    %126 = vector.multi_reduction <maximumf>, %125, %cst_198 [2] : vector<1x2x2x2x128xf32> to vector<1x2x2x128xf32>
    %127 = vector.extract_strided_slice %126 {offsets = [0, 0, 0, 0], sizes = [1, 1, 1, 128], strides = [1, 1, 1, 1]} : vector<1x2x2x128xf32> to vector<1x1x1x128xf32>
    %128 = vector.shape_cast %127 : vector<1x1x1x128xf32> to vector<1x128xf32>
    %c0_199 = arith.constant 0 : index
    %c0_200 = arith.constant 0 : index
    %129 = vector.load %arg19[%c0_199, %c0_200] : memref<1x512xf32, #tpu.memory_space<vmem>>, vector<1x128xf32>
    tpu.vector_store %arg19[%c0_199, %c0_200], %128 {strides = array<i32>} : memref<1x512xf32, #tpu.memory_space<vmem>>, vector<1x128xf32>,
    %130 = vector.extract_strided_slice %126 {offsets = [0, 0, 1, 0], sizes = [1, 1, 1, 128], strides = [1, 1, 1, 1]} : vector<1x2x2x128xf32> to vector<1x1x1x128xf32>
    %131 = vector.shape_cast %130 : vector<1x1x1x128xf32> to vector<1x128xf32>
    %c0_201 = arith.constant 0 : index
    %c128_202 = arith.constant 128 : index
    %132 = vector.load %arg19[%c0_201, %c128_202] : memref<1x512xf32, #tpu.memory_space<vmem>>, vector<1x128xf32>
    tpu.vector_store %arg19[%c0_201, %c128_202], %131 {strides = array<i32>} : memref<1x512xf32, #tpu.memory_space<vmem>>, vector<1x128xf32>,
    %133 = vector.extract_strided_slice %126 {offsets = [0, 1, 0, 0], sizes = [1, 1, 1, 128], strides = [1, 1, 1, 1]} : vector<1x2x2x128xf32> to vector<1x1x1x128xf32>
    %134 = vector.shape_cast %133 : vector<1x1x1x128xf32> to vector<1x128xf32>
    %c0_203 = arith.constant 0 : index
    %c256_204 = arith.constant 256 : index
    %135 = vector.load %arg19[%c0_203, %c256_204] : memref<1x512xf32, #tpu.memory_space<vmem>>, vector<1x128xf32>
    tpu.vector_store %arg19[%c0_203, %c256_204], %134 {strides = array<i32>} : memref<1x512xf32, #tpu.memory_space<vmem>>, vector<1x128xf32>,
    %136 = vector.extract_strided_slice %126 {offsets = [0, 1, 1, 0], sizes = [1, 1, 1, 128], strides = [1, 1, 1, 1]} : vector<1x2x2x128xf32> to vector<1x1x1x128xf32>
    %137 = vector.shape_cast %136 : vector<1x1x1x128xf32> to vector<1x128xf32>
    %c0_205 = arith.constant 0 : index
    %c384_206 = arith.constant 384 : index
    %138 = vector.load %arg19[%c0_205, %c384_206] : memref<1x512xf32, #tpu.memory_space<vmem>>, vector<1x128xf32>
    tpu.vector_store %arg19[%c0_205, %c384_206], %137 {strides = array<i32>} : memref<1x512xf32, #tpu.memory_space<vmem>>, vector<1x128xf32>,
    %c0_207 = arith.constant 0 : index
    %c0_208 = arith.constant 0 : index
    %139 = vector.load %arg19[%c0_207, %c0_208] : memref<1x512xf32, #tpu.memory_space<vmem>>, vector<1x512xf32>
    %140 = arith.truncf %139 : vector<1x512xf32> to vector<1x512xbf16>
    %c0_209 = arith.constant 0 : index
    %c0_210 = arith.constant 0 : index
    %141 = vector.load %arg8[%c0_209, %c0_210] : memref<512x256xbf16, #tpu.memory_space<vmem>>, vector<512x256xbf16>
    %cst_211 = arith.constant dense<0.000000e+00> : vector<1x256xf32>
    %142 = tpu.matmul %140, %141, %cst_211 {dimension_numbers = #tpu.dot_dimension_numbers<[1], [0], [0], [1], [0, 0, 1, 1], [], []>} : vector<1x512xbf16>, vector<512x256xbf16>, vector<1x256xf32> -> vector<1x256xf32>
    %c0_212 = arith.constant 0 : index
    %c0_213 = arith.constant 0 : index
    %143 = vector.load %arg9[%c0_212, %c0_213] : memref<1x256xf32, #tpu.memory_space<vmem>>, vector<1x256xf32>
    %144 = arith.addf %142, %143 : vector<1x256xf32>
    %cst_214 = arith.constant 0.000000e+00 : f32
    %145 = vector.broadcast %cst_214 : f32 to vector<1x256xf32>
    %146 = arith.maximumf %144, %145 : vector<1x256xf32>
    %147 = arith.truncf %146 : vector<1x256xf32> to vector<1x256xbf16>
    %c0_215 = arith.constant 0 : index
    %c0_216 = arith.constant 0 : index
    %148 = vector.load %arg10[%c0_215, %c0_216] : memref<256x128xbf16, #tpu.memory_space<vmem>>, vector<256x128xbf16>
    %cst_217 = arith.constant dense<0.000000e+00> : vector<1x128xf32>
    %149 = tpu.matmul %147, %148, %cst_217 {dimension_numbers = #tpu.dot_dimension_numbers<[1], [0], [0], [1], [0, 0, 1, 1], [], []>} : vector<1x256xbf16>, vector<256x128xbf16>, vector<1x128xf32> -> vector<1x128xf32>
    %c0_218 = arith.constant 0 : index
    %c0_219 = arith.constant 0 : index
    %150 = vector.load %arg11[%c0_218, %c0_219] : memref<1x128xf32, #tpu.memory_space<vmem>>, vector<1x128xf32>
    %151 = arith.addf %149, %150 : vector<1x128xf32>
    %152 = arith.negf %151 : vector<1x128xf32>
    %153 = math.exp %152 : vector<1x128xf32>
    %cst_220 = arith.constant 1.000000e+00 : f32
    %154 = vector.broadcast %cst_220 : f32 to vector<1x128xf32>
    %155 = arith.addf %154, %153 : vector<1x128xf32>
    %156 = arith.divf %154, %155 : vector<1x128xf32>
    %157 = vector.shape_cast %156 : vector<1x128xf32> to vector<1x1x128xf32>
    %c0_221 = arith.constant 0 : index
    %c0_222 = arith.constant 0 : index
    %c0_223 = arith.constant 0 : index
    %158 = vector.load %arg12[%c0_221, %c0_222, %c0_223] : memref<1x1x128xf32, #tpu.memory_space<vmem>>, vector<1x1x128xf32>
    tpu.vector_store %arg12[%c0_221, %c0_222, %c0_223], %157 {strides = array<i32>} : memref<1x1x128xf32, #tpu.memory_space<vmem>>, vector<1x1x128xf32>,
    return
  }
  func.func @transform_0(%arg0: i32) -> (i32, i32, i32, i32) {
    %c0_i32 = arith.constant 0 : i32
    %c0_i32_0 = arith.constant 0 : i32
    %c0_i32_1 = arith.constant 0 : i32
    %c0_i32_2 = arith.constant 0 : i32
    return %arg0, %c0_i32, %c0_i32_0, %c0_i32_1 : i32, i32, i32, i32
  }
  func.func @transform_1(%arg0: i32) -> (i32, i32) {
    %c0_i32 = arith.constant 0 : i32
    %c0_i32_0 = arith.constant 0 : i32
    %c0_i32_1 = arith.constant 0 : i32
    return %c0_i32, %c0_i32_0 : i32, i32
  }
  func.func @transform_2(%arg0: i32) -> (i32, i32) {
    %c0_i32 = arith.constant 0 : i32
    %c0_i32_0 = arith.constant 0 : i32
    %c0_i32_1 = arith.constant 0 : i32
    return %c0_i32, %c0_i32_0 : i32, i32
  }
  func.func @transform_3(%arg0: i32) -> (i32, i32) {
    %c0_i32 = arith.constant 0 : i32
    %c0_i32_0 = arith.constant 0 : i32
    %c0_i32_1 = arith.constant 0 : i32
    return %c0_i32, %c0_i32_0 : i32, i32
  }
  func.func @transform_4(%arg0: i32) -> (i32, i32) {
    %c0_i32 = arith.constant 0 : i32
    %c0_i32_0 = arith.constant 0 : i32
    %c0_i32_1 = arith.constant 0 : i32
    return %c0_i32, %c0_i32_0 : i32, i32
  }
  func.func @transform_5(%arg0: i32) -> (i32, i32) {
    %c0_i32 = arith.constant 0 : i32
    %c0_i32_0 = arith.constant 0 : i32
    %c0_i32_1 = arith.constant 0 : i32
    return %c0_i32, %c0_i32_0 : i32, i32
  }
  func.func @transform_6(%arg0: i32) -> (i32, i32) {
    %c0_i32 = arith.constant 0 : i32
    %c0_i32_0 = arith.constant 0 : i32
    %c0_i32_1 = arith.constant 0 : i32
    return %c0_i32, %c0_i32_0 : i32, i32
  }
  func.func @transform_7(%arg0: i32) -> (i32, i32) {
    %c0_i32 = arith.constant 0 : i32
    %c0_i32_0 = arith.constant 0 : i32
    %c0_i32_1 = arith.constant 0 : i32
    return %c0_i32, %c0_i32_0 : i32, i32
  }
  func.func @transform_8(%arg0: i32) -> (i32, i32) {
    %c0_i32 = arith.constant 0 : i32
    %c0_i32_0 = arith.constant 0 : i32
    %c0_i32_1 = arith.constant 0 : i32
    return %c0_i32, %c0_i32_0 : i32, i32
  }
  func.func @transform_9(%arg0: i32) -> (i32, i32) {
    %c0_i32 = arith.constant 0 : i32
    %c0_i32_0 = arith.constant 0 : i32
    %c0_i32_1 = arith.constant 0 : i32
    return %c0_i32, %c0_i32_0 : i32, i32
  }
  func.func @transform_10(%arg0: i32) -> (i32, i32) {
    %c0_i32 = arith.constant 0 : i32
    %c0_i32_0 = arith.constant 0 : i32
    %c0_i32_1 = arith.constant 0 : i32
    return %c0_i32, %c0_i32_0 : i32, i32
  }
  func.func @transform_11(%arg0: i32) -> (i32, i32, i32) {
    %c0_i32 = arith.constant 0 : i32
    %c0_i32_0 = arith.constant 0 : i32
    %c0_i32_1 = arith.constant 0 : i32
    return %arg0, %c0_i32, %c0_i32_0 : i32, i32, i32
  }
}

</mosaic_0001>

<bundles_post_ra>
// kernel: _lambda_.1
= control target key start
LH: loop header
LB: loop body
LE: loop exit
PB: predicated region body
PF: predicated region fallthrough
CT: control target
= control target key end

     0   :  { %16 = vsyncpa [#allocation10], 0  ;;  %s10374_s0 = inlined_call_operand.vmem [shape: f32[2,16,16,3], index: 0, kind: input, shape index: {}]   ;;  %s10375_s1 = inlined_call_operand.vmem [shape: bf16[27,32], index: 1, kind: input, shape index: {}]   ;;  %s10376_s2 = inlined_call_operand.vmem [shape: f32[1,32], index: 2, kind: input, shape index: {}]   ;;  %s10377_s3 = inlined_call_operand.hbm [shape: bf16[288,64], index: 3, kind: input, shape index: {}]   ;;  %s10378_s4 = inlined_call_operand.vmem [shape: f32[1,64], index: 4, kind: input, shape index: {}]   ;;  %s10379_s5 = inlined_call_operand.hbm [shape: bf16[576,128], index: 5, kind: input, shape index: {}]   ;;  %s10380_s6 = inlined_call_operand.vmem [shape: f32[1,128], index: 6, kind: input, shape index: {}]   ;;  %s10381_s7 = inlined_call_operand.vmem [shape: bf16[512,256], index: 7, kind: input, shape index: {}]   ;;  %s10382_s8 = inlined_call_operand.vmem [shape: f32[1,256], index: 8, kind: input, shape index: {}]   ;;  %s10383_s9 = inlined_call_operand.hbm [shape: bf16[256,128], index: 9, kind: input, shape index: {}]   ;;  %s10384_s10 = inlined_call_operand.vmem [shape: f32[1,128], index: 10, kind: input, shape index: {}]   ;;  %s10385_s11 = inlined_call_operand.vmem [shape: f32[2,1,128], index: 11, kind: output, shape index: {}]  }
   0x1   :  { %17 = vsyncpa [#allocation12], 0  ;;  %s7863_s17 = smov 0  }
   0x2 LB: > { %s7869_s18 = sadd.s32 4294967295, %s7781_s17   ;;  %p7066_p0 = scmp.ge.s32.totalorder %s7781_s17, 1  ;;  %s7781_s17 = sphi %s7863_s17, %s23_s17  }
   0x3   : > { %p290_p1 = scmp.lt.s32.totalorder %s7781_s17, 3  ;;  %p7462_p2 = scmp.eq.s32.totalorder %s7869_s18, 0 }
   0x4   : > { %s7783_s20 = smov [#allocation11]   ;;  %s7784_s22 = smov [#allocation9]  }
   0x5   : > { %p7874_p3 = pnand %p7066_p0, %p290_p1  ;;  %s324_s21 = sshll.u32 %s7783_s20, 4  ;;  %s325_s21 = int_to_ptr.vmem [resolvable:$true] %s324_s21 }
   0x6   : > { %s308_s23 = sshll.u32 %s7784_s22, 4  ;;  %s7785_s25 = smov [#allocation13]   ;;  %s309_s23 = int_to_ptr.vmem [resolvable:$true] %s308_s23 }
   0x7   : > { %p7452_p4 = pneg %p7874_p3  ;;  %s346_s26 = sshll.u32 %s7785_s25, 4  ;;  %s7886_s26 = int_to_ptr.vmem [resolvable:$true] %s346_s26 }
   0x8   : > { %s7700_s27 = scalar_lea.vmem %s325_s21, 4608  ;;  %p7708_p10 = scmp.lt.s32.totalorder %s325_s21, %s325_s21 }
   0x9   : > { %p7882_p5 = pnand %p7462_p2, %p7452_p4  ;;  %p7701_p7 = scmp.ne.s32.totalorder %s325_s21, %s7700_s27 }
   0xa   : > { %p7709_p11 = scmp.lt.s32.totalorder %s7700_s27, %s7700_s27 }
   0xb   : > { %p7691_p6 = pneg %p7882_p5 }
   0xc   : > { %p7710_p12 = por %p7709_p11, %p7708_p10 }
   0xd   : > { %p7703_p8 = pnand %p7701_p7, %p7691_p6 }
   0xf   : > { %p7704_p9 = pneg %p7703_p8 }
  0x11   : > { %p7711_p13 = pnand %p7710_p12, %p7704_p9 }
  0x13   : > { %7714 = shalt.err (!%p7711_p13)
}
  0x14   : > { %s7786_s28 = smov 64   ;;  %s7787_s29 = smov 4  }
  0x15   : > { %7458 = dma.hbm_to_vmem [thread:$0]  (!%p7882_p5), %s10379_s5, 4608, %s325_s21, [#allocation12], %s7786_s28, %s7786_s28, %s7787_s29  }
  0x16   : > { %s7726_s13 = scalar_lea.vmem %s309_s23, 2304  ;;  %p7734_p7 = scmp.lt.s32.totalorder %s309_s23, %s309_s23 }
  0x17   : > { %p7727_p0 = scmp.ne.s32.totalorder %s309_s23, %s7726_s13  ;;  %p7735_p8 = scmp.lt.s32.totalorder %s7726_s13, %s7726_s13 }
  0x19   : > { %p7729_p1 = pnand %p7727_p0, %p7691_p6  ;;  %p7736_p10 = por %p7735_p8, %p7734_p7 }
  0x1b   : > { %p7730_p4 = pneg %p7729_p1 }
  0x1d   : > { %p7737_p9 = pnand %p7736_p10, %p7730_p4 }
  0x1f   : > { %7740 = shalt.err (!%p7737_p9)
}
  0x20   : > { %7455 = dma.hbm_to_vmem [thread:$0]  (!%p7882_p5), %s10377_s3, 2304, %s309_s23, [#allocation10], %s7786_s28, %s7786_s28, %s7787_s29  }
  0x21   : > { %s7752_s16 = scalar_lea.vmem %s7886_s26, 2048  ;;  %p7760_p0 = scmp.lt.s32.totalorder %s7886_s26, %s7886_s26 }
  0x22   : > { %p7753_p11 = scmp.ne.s32.totalorder %s7886_s26, %s7752_s16  ;;  %p7761_p1 = scmp.lt.s32.totalorder %s7752_s16, %s7752_s16 }
  0x24   : > { %p7755_p12 = pnand %p7753_p11, %p7691_p6  ;;  %p7762_p4 = por %p7761_p1, %p7760_p0 }
  0x26   : > { %p7756_p13 = pneg %p7755_p12 }
  0x28   : > { %p7763_p7 = pnand %p7762_p4, %p7756_p13 }
  0x2a   : > { %7766 = shalt.err (!%p7763_p7)
}
  0x2b   : > { %7461 = dma.hbm_to_vmem [thread:$0]  (!%p7882_p5), %s10383_s9, 2048, %s7886_s26, [#allocation12], %s7786_s28, %s7786_s28, %s7787_s29  }
  0x2c   : > { %373 = sbr.rel (%p7874_p3) target bundleno = 2251 (0x8cb), region = 64 }
  0x31   : > { %7772 = dma.done.wait (%p7462_p2), [#allocation10], 2304  }
  0x32   : > { %7774 = vsyncadd (%p7462_p2), [#allocation10], 4294964992 }
  0x33   : > { %7776 = dma.done.wait (%p7462_p2), [#allocation12], 6656  }
  0x34   : > { %7778 = vsyncadd (%p7462_p2), [#allocation12], 4294960640  ;;  %vm460_vm0 = vcmask 23552   ;;  %vm463_vm1 = vcmask 17408   ;;  %v7788_v0 = vmov 0.0   ;;  %p419_p2 = scmp.lt.s32.totalorder %s7869_s18, 1 }
  0x35   : > { %461 = vst.msk [vmem:[#allocation2] sm:$0xff] %vm460_vm0, %v7788_v0  ;;  %462 = vst.msk [vmem:[#allocation2 + $0x8] sm:$0xff] %vm460_vm0, %v7788_v0  ;;  %s7789_s25 = smov 3   ;;  %s7790_s26 = smov 6   ;;  %vm2277_vm2 = vcmask 1044480   ;;  %vm2278_vm3 = vcmask 1045504  }
  0x36   : > { %465 = vst.msk [vmem:[#allocation2 + $0x18] sm:$0xff] %vm460_vm0, %v7788_v0  ;;  %466 = vst.msk [vmem:[#allocation2 + $0x20] sm:$0xff] %vm460_vm0, %v7788_v0  ;;  %s10430_s18 = smov (!%p419_p2, %s7869_s18), 1  ;;  %s7791_s27 = smov 9   ;;  %v7496_v51 = vld [vmem:[%s10375_s1 + $0x8] sm:$0x3f]  }
  0x37   : > { %468 = vst.msk [vmem:[#allocation2 + $0x30] sm:$0xff] %vm460_vm0, %v7788_v0  ;;  %469 = vst.msk [vmem:[#allocation2 + $0x38] sm:$0xff] %vm460_vm0, %v7788_v0  ;;  %s7240_s19 = sshll.u32 %s10430_s18, 8  ;;  %s7792_s28 = smov 12   ;;  %v7796_v52 = vmov 65535   ;;  %v7497_v56 = vld [vmem:[%s10375_s1] sm:$0xff]  }
  0x38   : > { %471 = vst.msk [vmem:[#allocation2 + $0x48] sm:$0xff] %vm460_vm0, %v7788_v0  ;;  %472 = vst.msk [vmem:[#allocation2 + $0x50] sm:$0xff] %vm460_vm0, %v7788_v0  ;;  %s8045_s24 = scalar_lea.vmem %s10374_s0, %s7240_s19  ;;  %s7793_s29 = smov 15   ;;  %v2279_v53 = vsel %vm2277_vm2, 4294967295, %v7796_v52  ;;  %vm773_vm4 = vcmask 48152   ;;  %vm10387_vm5 = vcmask 72752  }
  0x39   : > { %474 = vst.msk [vmem:[#allocation2 + $0x60] sm:$0xff] %vm460_vm0, %v7788_v0  ;;  %475 = vst.msk [vmem:[#allocation2 + $0x68] sm:$0xff] %vm460_vm0, %v7788_v0  ;;  %v428_v1 = vld [vmem:[%s8045_s24] sm:$0xff]  ;;  %v429_v2 = vld [vmem:[%s8045_s24 + $0x8] sm:$0xff]  ;;  %s7794_s30 = smov 18   ;;  %s7795_s12 = smov 21  }
  0x3a   : > { %477 = vst.msk [vmem:[#allocation2 + $0x78] sm:$0xff] %vm460_vm0, %v7788_v0  ;;  %478 = vst.msk [vmem:[#allocation2 + $0x80] sm:$0xff] %vm460_vm0, %v7788_v0  ;;  %v430_v3 = vld [vmem:[%s8045_s24 + $0x10] sm:$0xff]  ;;  %v431_v7 = vld [vmem:[%s8045_s24 + $0x18] sm:$0xff]  ;;  %v2280_v54 = vsel %vm2278_vm3, %v2279_v53, 0  ;;  %s7797_s15 = smov 24  }
  0x3b   : > { %480 = vst.msk [vmem:[#allocation2 + $0x90] sm:$0xff] %vm460_vm0, %v7788_v0  ;;  %481 = vst.msk [vmem:[#allocation2 + $0x98] sm:$0xff] %vm460_vm0, %v7788_v0  ;;  %v432_v8 = vld [vmem:[%s8045_s24 + $0x20] sm:$0xff]  ;;  %v433_v9 = vld [vmem:[%s8045_s24 + $0x28] sm:$0xff]  ;;  %v2282_v55 = vand.u32 %v7496_v51, %v2280_v54  ;;  %vm10386_vm6 = vcmask 97352   ;;  %vm1352_vm7 = vcmask 121952  }
  0x3c   : > { %483 = vst.msk [vmem:[#allocation2 + $0xa8] sm:$0xff] %vm460_vm0, %v7788_v0  ;;  %484 = vst.msk [vmem:[#allocation2 + $0xb0] sm:$0xff] %vm460_vm0, %v7788_v0  ;;  %v613_v4 = vld [vmem:[#allocation2 + $0x1] sm:$0xff]  ;;  %v434_v10 = vld [vmem:[%s8045_s24 + $0x30] sm:$0xff]  ;;  %vm1545_vm8 = vcmask 146552   ;;  %vm1739_vm9 = vcmask 171152  }
  0x3d   : > { %486 = vst.msk [vmem:[#allocation2 + $0xc0] sm:$0xff] %vm460_vm0, %v7788_v0  ;;  %487 = vst.msk [vmem:[#allocation2 + $0xc8] sm:$0xff] %vm460_vm0, %v7788_v0  ;;  %677 = vrot.lane.b32.xlu0 %v613_v4, %s7789_s25  ;;  %v435_v11 = vld [vmem:[%s8045_s24 + $0x38] sm:$0xff]  ;;  %v436_v12 = vld [vmem:[%s8045_s24 + $0x40] sm:$0xff]  ;;  %7376 = vmatprep.subr.bf16.mxu0 %v2282_v55  ;;  %vm1932_vm10 = vcmask 195752   ;;  %vm2125_vm11 = vcmask 220352  }
  0x3e   : > { %489 = vst.msk [vmem:[#allocation2 + $0xd8] sm:$0xff] %vm460_vm0, %v7788_v0  ;;  %490 = vst.msk [vmem:[#allocation2 + $0xe0] sm:$0xff] %vm460_vm0, %v7788_v0  ;;  %v437_v13 = vld [vmem:[%s8045_s24 + $0x48] sm:$0xff]  ;;  %v549_v14 = vld [vmem:[#allocation2] sm:$0xff]  ;;  %7377 = vmatpush3.bf16.msra.mxu0 %v2282_v55  ;;  %7436 = vmatprep.subr.bf16.mxu1 %v2282_v55  ;;  %vm2228_vm12 = vcmask 220160   ;;  %vm3181_vm13 = vcmask 254976  }
  0x3f   : > { %492 = vst.msk [vmem:[#allocation2 + $0xf0] sm:$0xff] %vm460_vm0, %v7788_v0  ;;  %493 = vst.msk [vmem:[#allocation2 + $0xf8] sm:$0xff] %vm460_vm0, %v7788_v0  ;;  %v806_v15 = vld [vmem:[#allocation2 + $0x2] sm:$0xff]  ;;  %v442_v17 = vld [vmem:[%s8045_s24 + $0x70] sm:$0xff]  ;;  %7438 = vmatpush3.bf16.msra.mxu1 %v2282_v55  ;;  %7378 = vmatprep.subr.bf16.mxu0 %v7497_v56  ;;  %vm4078_vm14 = vcmask 261120   ;;  %vm4355_vm15 = vcmask 1041409  }
  0x40   : > { %495 = vst.msk [vmem:[#allocation2 + $0x108] sm:$0xff] %vm460_vm0, %v7788_v0  ;;  %496 = vst.msk [vmem:[#allocation2 + $0x110] sm:$0xff] %vm460_vm0, %v7788_v0  ;;  %v550_v16 = vld [vmem:[#allocation2 + $0x8] sm:$0xff]  ;;  %v443_v18 = vld [vmem:[%s8045_s24 + $0x78] sm:$0xff]  ;;  %7437 = vmatprep.subr.bf16.mxu1 %v7497_v56  ;;  %vm4361_vm2 = vcmask 1044484   ;;  %vm10390_vm3 = vcmask 1045509  }
  0x41   : > { %498 = vst.msk [vmem:[#allocation2 + $0x120] sm:$0xff] %vm460_vm0, %v7788_v0  ;;  %499 = vst.msk [vmem:[#allocation2 + $0x128] sm:$0xff] %vm460_vm0, %v7788_v0  ;;  %v444_v19 = vld [vmem:[%s8045_s24 + $0x80] sm:$0xff]  ;;  %v445_v34 = vld [vmem:[%s8045_s24 + $0x88] sm:$0xff]  ;;  %s7799_s22 = smov 32   ;;  %s7800_s23 = smov 64  }
  0x42   : > { %501 = vst.msk [vmem:[#allocation2 + $0x138] sm:$0xff] %vm460_vm0, %v7788_v0  ;;  %502 = vst.msk [vmem:[#allocation2 + $0x140] sm:$0xff] %vm460_vm0, %v7788_v0  ;;  %v438_v38 = vld [vmem:[%s8045_s24 + $0x50] sm:$0xff]  ;;  %v439_v40 = vld [vmem:[%s8045_s24 + $0x58] sm:$0xff]  ;;  %7379 = vmatpush3.bf16.msra.mxu0 %v7497_v56 }
  0x43   : > { %504 = vst.msk [vmem:[#allocation2 + $0x150] sm:$0xff] %vm460_vm0, %v7788_v0  ;;  %505 = vst.msk [vmem:[#allocation2 + $0x158] sm:$0xff] %vm460_vm0, %v7788_v0  ;;  %v446_v42 = vld [vmem:[%s8045_s24 + $0x90] sm:$0xff]  ;;  %v447_v44 = vld [vmem:[%s8045_s24 + $0x98] sm:$0xff]  ;;  %7439 = vmatpush3.bf16.msra.mxu1 %v7497_v56 }
  0x44   : > { %507 = vst.msk [vmem:[#allocation2 + $0x168] sm:$0xff] %vm460_vm0, %v7788_v0  ;;  %508 = vst.msk [vmem:[#allocation2 + $0x170] sm:$0xff] %vm460_vm0, %v7788_v0  ;;  %v440_v59 = vld [vmem:[%s8045_s24 + $0x60] sm:$0xff]  ;;  %v441_v60 = vld [vmem:[%s8045_s24 + $0x68] sm:$0xff] }
  0x45   : > { %510 = vst.msk [vmem:[#allocation2 + $0x180] sm:$0xff] %vm460_vm0, %v7788_v0  ;;  %511 = vst.msk [vmem:[#allocation2 + $0x188] sm:$0xff] %vm460_vm0, %v7788_v0  ;;  %v448_v61 = vld [vmem:[%s8045_s24 + $0xa0] sm:$0xff]  ;;  %v449_v62 = vld [vmem:[%s8045_s24 + $0xa8] sm:$0xff] }
  0x46   : > { %513 = vst.msk [vmem:[#allocation2 + $0x198] sm:$0xff] %vm460_vm0, %v7788_v0  ;;  %514 = vst.msk [vmem:[#allocation2 + $0x1a0] sm:$0xff] %vm460_vm0, %v7788_v0  ;;  %v450_v55 = vld [vmem:[%s8045_s24 + $0xb0] sm:$0xff] }
  0x47   : > { %464 = vst.msk [vmem:[#allocation2 + $0x10] sm:$0x3] %vm463_vm1, %v7788_v0  ;;  %467 = vst.msk [vmem:[#allocation2 + $0x28] sm:$0x3] %vm463_vm1, %v7788_v0 }
  0x48   : > { %470 = vst.msk [vmem:[#allocation2 + $0x40] sm:$0x3] %vm463_vm1, %v7788_v0  ;;  %473 = vst.msk [vmem:[#allocation2 + $0x58] sm:$0x3] %vm463_vm1, %v7788_v0 }
  0x49   : > { %476 = vst.msk [vmem:[#allocation2 + $0x70] sm:$0x3] %vm463_vm1, %v7788_v0  ;;  %479 = vst.msk [vmem:[#allocation2 + $0x88] sm:$0x3] %vm463_vm1, %v7788_v0 }
  0x4a   : > { %482 = vst.msk [vmem:[#allocation2 + $0xa0] sm:$0x3] %vm463_vm1, %v7788_v0  ;;  %485 = vst.msk [vmem:[#allocation2 + $0xb8] sm:$0x3] %vm463_vm1, %v7788_v0 }
  0x4b   : > { %488 = vst.msk [vmem:[#allocation2 + $0xd0] sm:$0x3] %vm463_vm1, %v7788_v0  ;;  %491 = vst.msk [vmem:[#allocation2 + $0xe8] sm:$0x3] %vm463_vm1, %v7788_v0 }
  0x4c   : > { %494 = vst.msk [vmem:[#allocation2 + $0x100] sm:$0x3] %vm463_vm1, %v7788_v0  ;;  %497 = vst.msk [vmem:[#allocation2 + $0x118] sm:$0x3] %vm463_vm1, %v7788_v0 }
  0x4d   : > { %500 = vst.msk [vmem:[#allocation2 + $0x130] sm:$0x3] %vm463_vm1, %v7788_v0  ;;  %503 = vst.msk [vmem:[#allocation2 + $0x148] sm:$0x3] %vm463_vm1, %v7788_v0 }
  0x4e   : > { %506 = vst.msk [vmem:[#allocation2 + $0x160] sm:$0x3] %vm463_vm1, %v7788_v0  ;;  %509 = vst.msk [vmem:[#allocation2 + $0x178] sm:$0x3] %vm463_vm1, %v7788_v0  ;;  %v807_v5 = vld [vmem:[#allocation2 + $0xa] sm:$0xff] }
  0x4f   : > { %512 = vst.msk [vmem:[#allocation2 + $0x190] sm:$0x3] %vm463_vm1, %v7788_v0  ;;  %515 = vst.msk [vmem:[#allocation2 + $0x1a8] sm:$0x3] %vm463_vm1, %v7788_v0  ;;  %872 = vrot.lane.b32.xlu1 %v807_v5, %s7790_s26  ;;  %v614_v6 = vld [vmem:[#allocation2 + $0x9] sm:$0xff]  ;;  %vm4359_vm1 = vcmask 1043459  }
  0x50   : > { %517 = vst.msk [vmem:[#allocation2 + $0x19] sm:$0xff] %vm460_vm0, %v428_v1  ;;  %518 = vst.msk [vmem:[#allocation2 + $0x21] sm:$0xff] %vm460_vm0, %v429_v2  ;;  %679 = vrot.lane.b32.xlu0 %v614_v6, %s7789_s25 }
  0x51   : > { %519 = vst.msk [vmem:[#allocation2 + $0x31] sm:$0xff] %vm460_vm0, %v430_v3  ;;  %520 = vst.msk [vmem:[#allocation2 + $0x39] sm:$0xff] %vm460_vm0, %v431_v7 }
  0x52   : > { %521 = vst.msk [vmem:[#allocation2 + $0x49] sm:$0xff] %vm460_vm0, %v432_v8  ;;  %522 = vst.msk [vmem:[#allocation2 + $0x51] sm:$0xff] %vm460_vm0, %v433_v9 }
  0x53   : > { %523 = vst.msk [vmem:[#allocation2 + $0x61] sm:$0xff] %vm460_vm0, %v434_v10  ;;  %524 = vst.msk [vmem:[#allocation2 + $0x69] sm:$0xff] %vm460_vm0, %v435_v11 }
  0x54   : > { %525 = vst.msk [vmem:[#allocation2 + $0x79] sm:$0xff] %vm460_vm0, %v436_v12  ;;  %526 = vst.msk [vmem:[#allocation2 + $0x81] sm:$0xff] %vm460_vm0, %v437_v13  ;;  %870 = vrot.lane.b32.xlu0 %v806_v15, %s7790_s26 }
  0x55   : > { %581 = vst.msk [vmem:[#allocation3] sm:$0xff] %vm460_vm0, %v549_v14  ;;  %582 = vst.msk [vmem:[#allocation3 + $0x8] sm:$0xff] %vm460_vm0, %v550_v16 }
  0x56   : > { %531 = vst.msk [vmem:[#allocation2 + $0xc1] sm:$0xff] %vm460_vm0, %v442_v17  ;;  %532 = vst.msk [vmem:[#allocation2 + $0xc9] sm:$0xff] %vm460_vm0, %v443_v18 }
  0x57   : > { %533 = vst.msk [vmem:[#allocation2 + $0xd9] sm:$0xff] %vm460_vm0, %v444_v19  ;;  %v615_v20 = vld [vmem:[#allocation2 + $0x19] sm:$0xff]  ;;  %v616_v23 = vld [vmem:[#allocation2 + $0x21] sm:$0xff]  ;;  %534 = vst.msk [vmem:[#allocation2 + $0xe1] sm:$0xff] %vm460_vm0, %v445_v34 }
  0x58   : > { %681 = vrot.lane.b32.xlu1 %v615_v20, %s7789_s25  ;;  %v999_v21 = vld [vmem:[#allocation2 + $0x18] sm:$0xff]  ;;  %v1000_v22 = vld [vmem:[#allocation2 + $0x20] sm:$0xff]  ;;  %v1001_v24 = vld [vmem:[#allocation2 + $0x30] sm:$0xff]  ;;  %527 = vst.msk [vmem:[#allocation2 + $0x91] sm:$0xff] %vm460_vm0, %v438_v38 }
  0x59   : > { %v1002_v25 = vld [vmem:[#allocation2 + $0x38] sm:$0xff]  ;;  %583 = vst.msk [vmem:[#allocation3 + $0x10] sm:$0xff] %vm460_vm0, %v999_v21  ;;  %584 = vst.msk [vmem:[#allocation3 + $0x18] sm:$0xff] %vm460_vm0, %v1000_v22  ;;  %v8084_v27 = vld [vmem:[#allocation2 + $0x48] sm:$0xff] }
  0x5a   : > { %v808_v26 = vld [vmem:[#allocation2 + $0x1a] sm:$0xff]  ;;  %585 = vst.msk [vmem:[#allocation3 + $0x20] sm:$0xff] %vm460_vm0, %v1001_v24  ;;  %586 = vst.msk [vmem:[#allocation3 + $0x28] sm:$0xff] %vm460_vm0, %v1002_v25  ;;  %v8086_v28 = vld [vmem:[#allocation2 + $0x50] sm:$0xff] }
  0x5b   : > { %587 = vst.msk [vmem:[#allocation3 + $0x30] sm:$0xff] %vm460_vm0, %v8084_v27  ;;  %588 = vst.msk [vmem:[#allocation3 + $0x38] sm:$0xff] %vm460_vm0, %v8086_v28  ;;  %874 = vrot.lane.b32.xlu0 %v808_v26, %s7790_s26  ;;  %v809_v29 = vld [vmem:[#allocation2 + $0x22] sm:$0xff]  ;;  %v8102_v32 = vld [vmem:[#allocation2 + $0x78] sm:$0xff] }
  0x5c   : > { %683 = vrot.lane.b32.xlu1 %v616_v23, %s7789_s25  ;;  %v8094_v30 = vld [vmem:[#allocation2 + $0x60] sm:$0xff]  ;;  %v8096_v31 = vld [vmem:[#allocation2 + $0x68] sm:$0xff]  ;;  %591 = vst.msk [vmem:[#allocation3 + $0x50] sm:$0xff] %vm460_vm0, %v8102_v32  ;;  %v1194_v35 = vld [vmem:[#allocation2 + $0x31] sm:$0xff] }
  0x5d   : > { %589 = vst.msk [vmem:[#allocation3 + $0x40] sm:$0xff] %vm460_vm0, %v8094_v30  ;;  %590 = vst.msk [vmem:[#allocation3 + $0x48] sm:$0xff] %vm460_vm0, %v8096_v31  ;;  %v8104_v33 = vld [vmem:[#allocation2 + $0x80] sm:$0xff]  ;;  %v8124_v37 = vld [vmem:[#allocation2 + $0x32] sm:$0xff] }
  0x5e   : > { %592 = vst.msk [vmem:[#allocation3 + $0x58] sm:$0xff] %vm460_vm0, %v8104_v33  ;;  %v8119_v36 = vld [vmem:[#allocation2 + $0x39] sm:$0xff]  ;;  %528 = vst.msk [vmem:[#allocation2 + $0x99] sm:$0xff] %vm460_vm0, %v439_v40  ;;  %v1774_v49 = vld [vmem:[#allocation2 + $0x49] sm:$0xff] }
  0x5f   : > { %1063 = vrot.lane.b32.xlu0 %v999_v21, %s7791_s27  ;;  %v1388_v39 = vld [vmem:[#allocation2 + $0x3a] sm:$0xff]  ;;  %535 = vst.msk [vmem:[#allocation2 + $0xf1] sm:$0xff] %vm460_vm0, %v446_v42  ;;  %v8144_v45 = vld [vmem:[#allocation2 + $0x90] sm:$0xff]  ;;  %536 = vst.msk [vmem:[#allocation2 + $0xf9] sm:$0xff] %vm460_vm0, %v447_v44 }
  0x60   : > { %876 = vrot.lane.b32.xlu1 %v809_v29, %s7790_s26  ;;  %v8131_v41 = vld [vmem:[#allocation2 + $0xd8] sm:$0xff]  ;;  %v8140_v43 = vld [vmem:[#allocation2 + $0xe0] sm:$0xff]  ;;  %593 = vst.msk [vmem:[#allocation3 + $0x60] sm:$0xff] %vm460_vm0, %v8144_v45  ;;  %v1967_v57 = vld [vmem:[#allocation2 + $0x4a] sm:$0xff] }
  0x61   : > { %599 = vst.msk [vmem:[#allocation3 + $0x90] sm:$0xff] %vm460_vm0, %v8131_v41  ;;  %600 = vst.msk [vmem:[#allocation3 + $0x98] sm:$0xff] %vm460_vm0, %v8140_v43  ;;  %v1775_v50 = vld [vmem:[#allocation2 + $0x51] sm:$0xff]  ;;  %v1198_v63 = vld [vmem:[#allocation2 + $0x61] sm:$0xff] }
  0x62   : > { %v1968_v58 = vld [vmem:[#allocation2 + $0x52] sm:$0xff]  ;;  %529 = vst.msk [vmem:[#allocation2 + $0xa9] sm:$0xff] %vm460_vm0, %v440_v59  ;;  %530 = vst.msk [vmem:[#allocation2 + $0xb1] sm:$0xff] %vm460_vm0, %v441_v60  ;;  %v1199_v2 = vld [vmem:[#allocation2 + $0x69] sm:$0xff] }
  0x63   : > { %1067 = vrot.lane.b32.xlu0 %v1001_v24, %s7791_s27  ;;  %537 = vst.msk [vmem:[#allocation2 + $0x109] sm:$0xff] %vm460_vm0, %v448_v61  ;;  %538 = vst.msk [vmem:[#allocation2 + $0x111] sm:$0xff] %vm460_vm0, %v449_v62  ;;  %v8232_v6 = vld [vmem:[#allocation2 + $0x62] sm:$0xff]  ;;  %v8237_v7 = vld [vmem:[#allocation2 + $0x6a] sm:$0xff] }
  0x64   : > { %1065 = vrot.lane.b32.xlu1 %v1000_v22, %s7791_s27  ;;  %v8250_v8 = vld [vmem:[#allocation2 + $0x79] sm:$0xff]  ;;  %v8260_v12 = vld [vmem:[#allocation2 + $0x81] sm:$0xff]  ;;  %v8326_v38 = vld [vmem:[#allocation2 + $0xca] sm:$0xff]  ;;  %539 = vst.msk [vmem:[#allocation2 + $0x121] sm:$0xff] %vm460_vm0, %v450_v55 }
  0x65   : > { %v8152_v46 = vld [vmem:[#allocation2 + $0x98] sm:$0xff]  ;;  %v8252_v10 = vld [vmem:[#allocation2 + $0xc0] sm:$0xff]  ;;  %v8262_v13 = vld [vmem:[#allocation2 + $0xc8] sm:$0xff]  ;;  %4272 = vst.msk [vmem:[#allocation4 + $0x8] sm:$0x3] %vm3181_vm13, %v7788_v0 }
  0x66   : > { %v8155_v47 = vld [vmem:[#allocation2 + $0xf0] sm:$0xff]  ;;  %594 = vst.msk [vmem:[#allocation3 + $0x68] sm:$0xff] %vm460_vm0, %v8152_v46  ;;  %v8163_v48 = vld [vmem:[#allocation2 + $0xf8] sm:$0xff]  ;;  %597 = vst.msk [vmem:[#allocation3 + $0x80] sm:$0xff] %vm460_vm0, %v8252_v10 }
  0x67   : > { %1256 = vrot.lane.b32.xlu0 %v615_v20, %s7792_s28  ;;  %601 = vst.msk [vmem:[#allocation3 + $0xa0] sm:$0xff] %vm460_vm0, %v8155_v47  ;;  %602 = vst.msk [vmem:[#allocation3 + $0xa8] sm:$0xff] %vm460_vm0, %v8163_v48  ;;  %v8277_v18 = vld [vmem:[#allocation2 + $0xc1] sm:$0xff]  ;;  %v8284_v20 = vld [vmem:[#allocation2 + $0xc9] sm:$0xff] }
  0x68   : > { %1069 = vrot.lane.b32.xlu1 %v1002_v25, %s7791_s27  ;;  %598 = vst.msk [vmem:[#allocation3 + $0x88] sm:$0xff] %vm460_vm0, %v8262_v13  ;;  %v8286_v22 = vld [vmem:[#allocation2 + $0x7a] sm:$0xff] }
  0x69   : > { %v8210_v1 = vld [vmem:[#allocation2 + $0xa8] sm:$0xff]  ;;  %v8216_v3 = vld [vmem:[#allocation2 + $0xb0] sm:$0xff]  ;;  %v8334_v44 = vld [vmem:[#allocation2 + $0xda] sm:$0xff]  ;;  %4274 = vst.msk [vmem:[#allocation4 + $0x18] sm:$0x3] %vm3181_vm13, %v7788_v0 }
  0x6a   : > { %595 = vst.msk [vmem:[#allocation3 + $0x70] sm:$0xff] %vm460_vm0, %v8210_v1  ;;  %v8219_v4 = vld [vmem:[#allocation2 + $0x108] sm:$0xff]  ;;  %596 = vst.msk [vmem:[#allocation3 + $0x78] sm:$0xff] %vm460_vm0, %v8216_v3  ;;  %v8226_v5 = vld [vmem:[#allocation2 + $0x110] sm:$0xff] }
  0x6b   : > { %1260 = vrot.lane.b32.xlu0 %v1194_v35, %s7792_s28  ;;  %603 = vst.msk [vmem:[#allocation3 + $0xb0] sm:$0xff] %vm460_vm0, %v8219_v4  ;;  %604 = vst.msk [vmem:[#allocation3 + $0xb8] sm:$0xff] %vm460_vm0, %v8226_v5  ;;  %v8478_v55 = vld [vmem:[#allocation2 + $0xa9] sm:$0xff] }
  0x6c   : > { %1258 = vrot.lane.b32.xlu1 %v616_v23, %s7792_s28  ;;  %4276 = vst.msk [vmem:[#allocation4 + $0x28] sm:$0x3] %vm3181_vm13, %v7788_v0  ;;  %4278 = vst.msk [vmem:[#allocation4 + $0x38] sm:$0x3] %vm3181_vm13, %v7788_v0 }
  0x6d   : > { %4280 = vst.msk [vmem:[#allocation4 + $0x48] sm:$0x3] %vm3181_vm13, %v7788_v0  ;;  %4282 = vst.msk [vmem:[#allocation4 + $0x58] sm:$0x3] %vm3181_vm13, %v7788_v0 }
  0x6e   : > { %4284 = vst.msk [vmem:[#allocation4 + $0x68] sm:$0x3] %vm3181_vm13, %v7788_v0  ;;  %4286 = vst.msk [vmem:[#allocation4 + $0x78] sm:$0x3] %vm3181_vm13, %v7788_v0 }
  0x6f   : > { %1449 = vrot.lane.b32.xlu0 %v808_v26, %s7793_s29  ;;  %4288 = vst.msk [vmem:[#allocation4 + $0x88] sm:$0x3] %vm3181_vm13, %v7788_v0  ;;  %4290 = vst.msk [vmem:[#allocation4 + $0x98] sm:$0x3] %vm3181_vm13, %v7788_v0 }
  0x70   : > { %1262 = vrot.lane.b32.xlu1 %v8119_v36, %s7792_s28  ;;  %4271 = vst.msk [vmem:[#allocation4] sm:$0xff] %vm4078_vm14, %v7788_v0  ;;  %4273 = vst.msk [vmem:[#allocation4 + $0x10] sm:$0xff] %vm4078_vm14, %v7788_v0 }
  0x71   : > { %4275 = vst.msk [vmem:[#allocation4 + $0x20] sm:$0xff] %vm4078_vm14, %v7788_v0  ;;  %4277 = vst.msk [vmem:[#allocation4 + $0x30] sm:$0xff] %vm4078_vm14, %v7788_v0 }
  0x72   : > { %4279 = vst.msk [vmem:[#allocation4 + $0x40] sm:$0xff] %vm4078_vm14, %v7788_v0  ;;  %4281 = vst.msk [vmem:[#allocation4 + $0x50] sm:$0xff] %vm4078_vm14, %v7788_v0 }
  0x73   : > { %1453 = vrot.lane.b32.xlu0 %v8124_v37, %s7793_s29  ;;  %4283 = vst.msk [vmem:[#allocation4 + $0x60] sm:$0xff] %vm4078_vm14, %v7788_v0  ;;  %4285 = vst.msk [vmem:[#allocation4 + $0x70] sm:$0xff] %vm4078_vm14, %v7788_v0 }
  0x74   : > { %1451 = vrot.lane.b32.xlu1 %v809_v29, %s7793_s29  ;;  %4287 = vst.msk [vmem:[#allocation4 + $0x80] sm:$0xff] %vm4078_vm14, %v7788_v0  ;;  %4289 = vst.msk [vmem:[#allocation4 + $0x90] sm:$0xff] %vm4078_vm14, %v7788_v0 }
  0x77   : > { %1643 = vrot.lane.b32.xlu0 %v1001_v24, %s7794_s30  ;;  %v8294_v24 = vld [vmem:[#allocation2 + $0x82] sm:$0xff] }
  0x78   : > { %1455 = vrot.lane.b32.xlu1 %v1388_v39, %s7793_s29 }
  0x7b   : > { %1647 = vrot.lane.b32.xlu0 %v8084_v27, %s7794_s30 }
  0x7c   : > { %1645 = vrot.lane.b32.xlu1 %v1002_v25, %s7794_s30 }
  0x7f   : > { %1836 = vrot.lane.b32.xlu0 %v1194_v35, %s7795_s12 }
  0x80   : > { %1649 = vrot.lane.b32.xlu1 %v8086_v28, %s7794_s30 }
  0x83   : > { %1840 = vrot.lane.b32.xlu0 %v1774_v49, %s7795_s12 }
  0x84   : > { %1838 = vrot.lane.b32.xlu1 %v8119_v36, %s7795_s12 }
  0x87   : > { %2029 = vrot.lane.b32.xlu0 %v8124_v37, %s7797_s15 }
  0x88   : > { %1842 = vrot.lane.b32.xlu1 %v1775_v50, %s7795_s12 }
  0x8b   : > { %685 = vrot.lane.b32.xlu0 %v1194_v35, %s7789_s25 }
  0x8c   : > { %2031 = vrot.lane.b32.xlu1 %v1388_v39, %s7797_s15 }
  0x8f   : > { %2033 = vrot.lane.b32.xlu0 %v1967_v57, %s7797_s15 }
  0x90   : > { %687 = vrot.lane.b32.xlu1 %v8119_v36, %s7789_s25  ;;  %v8318_v36 = vld [vmem:[#allocation2 + $0xc2] sm:$0xff] }
  0x93   : > { %689 = vrot.lane.b32.xlu0 %v1774_v49, %s7789_s25 }
  0x94   : > { %2035 = vrot.lane.b32.xlu1 %v1968_v58, %s7797_s15 }
  0x97   : > { %878 = vrot.lane.b32.xlu0 %v8124_v37, %s7790_s26 }
  0x98   : > { %691 = vrot.lane.b32.xlu1 %v1775_v50, %s7789_s25 }
  0x9b   : > { %882 = vrot.lane.b32.xlu0 %v1967_v57, %s7790_s26 }
  0x9c   : > { %880 = vrot.lane.b32.xlu1 %v1388_v39, %s7790_s26 }
  0x9f   : > { %1071 = vrot.lane.b32.xlu0 %v8084_v27, %s7791_s27 }
  0xa0   : > { %884 = vrot.lane.b32.xlu1 %v1968_v58, %s7790_s26 }
  0xa3   : > { %1075 = vrot.lane.b32.xlu0 %v8094_v30, %s7791_s27 }
  0xa4   : > { %1073 = vrot.lane.b32.xlu1 %v8086_v28, %s7791_s27  ;;  %v8302_v28 = vld [vmem:[#allocation2 + $0xd9] sm:$0xff] }
  0xa7   : > { %1264 = vrot.lane.b32.xlu0 %v1774_v49, %s7792_s28 }
  0xa8   : > { %1077 = vrot.lane.b32.xlu1 %v8096_v31, %s7791_s27 }
  0xab   : > { %1268 = vrot.lane.b32.xlu0 %v1198_v63, %s7792_s28 }
  0xac   : > { %1266 = vrot.lane.b32.xlu1 %v1775_v50, %s7792_s28  ;;  %v8342_v50 = vld [vmem:[#allocation2 + $0xe2] sm:$0xff] }
  0xaf   : > { %1457 = vrot.lane.b32.xlu0 %v1967_v57, %s7793_s29  ;;  %v678_v9 = vpop.permute.xlu0 %677  ;;  %v451_v57 = vld [vmem:[%s8045_s24 + $0xb8] sm:$0xff] }
  0xb0   : > { %1270 = vrot.lane.b32.xlu1 %v1199_v2, %s7792_s28  ;;  %774 = vst.msk [vmem:[#allocation3] sm:$0xff] %vm773_vm4, %v678_v9 }
  0xb1   : > { %540 = vst.msk [vmem:[#allocation2 + $0x129] sm:$0xff] %vm460_vm0, %v451_v57 }
  0xb3   : > { %1461 = vrot.lane.b32.xlu0 %v8232_v6, %s7793_s29 }
  0xb4   : > { %1459 = vrot.lane.b32.xlu1 %v1968_v58, %s7793_s29 }
  0xb7   : > { %1651 = vrot.lane.b32.xlu0 %v8094_v30, %s7794_s30  ;;  %v8310_v30 = vld [vmem:[#allocation2 + $0xe1] sm:$0xff] }
  0xb8   : > { %1463 = vrot.lane.b32.xlu1 %v8237_v7, %s7793_s29 }
  0xbb   : > { %1655 = vrot.lane.b32.xlu0 %v8102_v32, %s7794_s30 }
  0xbc   : > { %1653 = vrot.lane.b32.xlu1 %v8096_v31, %s7794_s30 }
  0xbf   : > { %1844 = vrot.lane.b32.xlu0 %v1198_v63, %s7795_s12 }
  0xc0   : > { %1657 = vrot.lane.b32.xlu1 %v8104_v33, %s7794_s30 }
  0xc1   : > { %v873_v11 = vpop.permute.xlu1 %872 }
  0xc2   : > { %v680_v14 = vpop.permute.xlu0 %679 }
  0xc3   : > { %1848 = vrot.lane.b32.xlu0 %v8250_v8, %s7795_s12  ;;  %775 = vst.msk [vmem:[#allocation3 + $0x8] sm:$0xff] %vm773_vm4, %v680_v14  ;;  %v8395_v14 = vld [vmem:[#allocation2 + $0xf1] sm:$0xff] }
  0xc4   : > { %1846 = vrot.lane.b32.xlu1 %v1199_v2, %s7795_s12  ;;  %968 = vst.msk [vmem:[#allocation3 + $0x8] sm:$0xff] %vm10387_vm5, %v873_v11  ;;  %v8393_v11 = vld [vmem:[#allocation2 + $0x99] sm:$0xff] }
  0xc6   : > { %v871_v16 = vpop.permute.xlu0 %870 }
  0xc7   : > { %2037 = vrot.lane.b32.xlu0 %v8232_v6, %s7797_s15  ;;  %967 = vst.msk [vmem:[#allocation3] sm:$0xff] %vm10387_vm5, %v871_v16 }
  0xc8   : > { %1850 = vrot.lane.b32.xlu1 %v8260_v12, %s7795_s12 }
  0xca   : > { %v682_v15 = vpop.permute.xlu1 %681 }
  0xcb   : > { %776 = vst.msk [vmem:[#allocation3 + $0x10] sm:$0xff] %vm773_vm4, %v682_v15  ;;  %693 = vrot.lane.b32.xlu0 %v1198_v63, %s7789_s25 }
  0xcc   : > { %2039 = vrot.lane.b32.xlu1 %v8237_v7, %s7797_s15 }
  0xcd   : > { %v875_v19 = vpop.permute.xlu0 %874 }
  0xce   : > { %v684_v17 = vpop.permute.xlu1 %683  ;;  %969 = vst.msk [vmem:[#allocation3 + $0x10] sm:$0xff] %vm10387_vm5, %v875_v19 }
  0xcf   : > { %777 = vst.msk [vmem:[#allocation3 + $0x18] sm:$0xff] %vm773_vm4, %v684_v17  ;;  %709 = vrot.lane.b32.xlu0 %v8277_v18, %s7789_s25  ;;  %v8403_v17 = vld [vmem:[#allocation2 + $0xf9] sm:$0xff] }
  0xd0   : > { %695 = vrot.lane.b32.xlu1 %v1199_v2, %s7789_s25 }
  0xd1   : > { %v1064_v23 = vpop.permute.xlu0 %1063 }
  0xd2   : > { %v877_v21 = vpop.permute.xlu1 %876  ;;  %1160 = vst.msk [vmem:[#allocation3] sm:$0xff] %vm10386_vm6, %v1064_v23 }
  0xd3   : > { %970 = vst.msk [vmem:[#allocation3 + $0x18] sm:$0xff] %vm10387_vm5, %v877_v21  ;;  %2041 = vrot.lane.b32.xlu0 %v8286_v22, %s7797_s15 }
  0xd4   : > { %711 = vrot.lane.b32.xlu1 %v8284_v20, %s7789_s25 }
  0xd5   : > { %v1068_v26 = vpop.permute.xlu0 %1067 }
  0xd6   : > { %v1066_v25 = vpop.permute.xlu1 %1065  ;;  %1162 = vst.msk [vmem:[#allocation3 + $0x10] sm:$0xff] %vm10386_vm6, %v1068_v26 }
  0xd7   : > { %1161 = vst.msk [vmem:[#allocation3 + $0x8] sm:$0xff] %vm10386_vm6, %v1066_v25  ;;  %697 = vrot.lane.b32.xlu0 %v8250_v8, %s7789_s25 }
  0xd8   : > { %2043 = vrot.lane.b32.xlu1 %v8294_v24, %s7797_s15 }
  0xd9   : > { %v1257_v29 = vpop.permute.xlu0 %1256 }
  0xda   : > { %v1070_v27 = vpop.permute.xlu1 %1069  ;;  %1353 = vst.msk [vmem:[#allocation3] sm:$0xff] %vm1352_vm7, %v1257_v29  ;;  %v8418_v29 = vld [vmem:[#allocation2 + $0x92] sm:$0xff] }
  0xdb   : > { %1163 = vst.msk [vmem:[#allocation3 + $0x18] sm:$0xff] %vm10386_vm6, %v1070_v27  ;;  %713 = vrot.lane.b32.xlu0 %v8302_v28, %s7789_s25 }
  0xdc   : > { %699 = vrot.lane.b32.xlu1 %v8260_v12, %s7789_s25 }
  0xdd   : > { %v1261_v34 = vpop.permute.xlu0 %1260 }
  0xde   : > { %v1259_v31 = vpop.permute.xlu1 %1258  ;;  %1355 = vst.msk [vmem:[#allocation3 + $0x10] sm:$0xff] %vm1352_vm7, %v1261_v34 }
  0xdf   : > { %1354 = vst.msk [vmem:[#allocation3 + $0x8] sm:$0xff] %vm1352_vm7, %v1259_v31  ;;  %886 = vrot.lane.b32.xlu0 %v8232_v6, %s7790_s26  ;;  %v8384_v6 = vld [vmem:[#allocation2 + $0x91] sm:$0xff] }
  0xe0   : > { %715 = vrot.lane.b32.xlu1 %v8310_v30, %s7789_s25  ;;  %v8428_v31 = vld [vmem:[#allocation2 + $0xf2] sm:$0xff] }
  0xe1   : > { %v1450_v37 = vpop.permute.xlu0 %1449 }
  0xe2   : > { %v1263_v35 = vpop.permute.xlu1 %1262  ;;  %1546 = vst.msk [vmem:[#allocation3] sm:$0xff] %vm1545_vm8, %v1450_v37 }
  0xe3   : > { %1356 = vst.msk [vmem:[#allocation3 + $0x18] sm:$0xff] %vm1352_vm7, %v1263_v35  ;;  %902 = vrot.lane.b32.xlu0 %v8318_v36, %s7790_s26  ;;  %v8436_v35 = vld [vmem:[#allocation2 + $0xfa] sm:$0xff] }
  0xe4   : > { %888 = vrot.lane.b32.xlu1 %v8237_v7, %s7790_s26 }
  0xe5   : > { %v1454_v40 = vpop.permute.xlu0 %1453 }
  0xe6   : > { %v1452_v39 = vpop.permute.xlu1 %1451  ;;  %1548 = vst.msk [vmem:[#allocation3 + $0x10] sm:$0xff] %vm1545_vm8, %v1454_v40 }
  0xe7   : > { %1547 = vst.msk [vmem:[#allocation3 + $0x8] sm:$0xff] %vm1545_vm8, %v1452_v39  ;;  %890 = vrot.lane.b32.xlu0 %v8286_v22, %s7790_s26 }
  0xe8   : > { %904 = vrot.lane.b32.xlu1 %v8326_v38, %s7790_s26 }
  0xe9   : > { %v1644_v49 = vpop.permute.xlu0 %1643 }
  0xea   : > { %v1456_v42 = vpop.permute.xlu1 %1455  ;;  %1740 = vst.msk [vmem:[#allocation3] sm:$0xff] %vm1739_vm9, %v1644_v49 }
  0xeb   : > { %1549 = vst.msk [vmem:[#allocation3 + $0x18] sm:$0xff] %vm1545_vm8, %v1456_v42  ;;  %906 = vrot.lane.b32.xlu0 %v8334_v44, %s7790_s26 }
  0xec   : > { %892 = vrot.lane.b32.xlu1 %v8294_v24, %s7790_s26 }
  0xed   : > { %v1648_v52 = vpop.permute.xlu0 %1647 }
  0xee   : > { %v1646_v51 = vpop.permute.xlu1 %1645  ;;  %1742 = vst.msk [vmem:[#allocation3 + $0x10] sm:$0xff] %vm1739_vm9, %v1648_v52 }
  0xef   : > { %1741 = vst.msk [vmem:[#allocation3 + $0x8] sm:$0xff] %vm1739_vm9, %v1646_v51  ;;  %1079 = vrot.lane.b32.xlu0 %v8102_v32, %s7791_s27 }
  0xf0   : > { %908 = vrot.lane.b32.xlu1 %v8342_v50, %s7790_s26 }
  0xf1   : > { %v1837_v54 = vpop.permute.xlu0 %1836 }
  0xf2   : > { %v1650_v53 = vpop.permute.xlu1 %1649  ;;  %1933 = vst.msk [vmem:[#allocation3] sm:$0xff] %vm1932_vm10, %v1837_v54 }
  0xf3   : > { %1743 = vst.msk [vmem:[#allocation3 + $0x18] sm:$0xff] %vm1739_vm9, %v1650_v53  ;;  %1095 = vrot.lane.b32.xlu0 %v8131_v41, %s7791_s27 }
  0xf4   : > { %1081 = vrot.lane.b32.xlu1 %v8104_v33, %s7791_s27 }
  0xf5   : > { %v1841_v32 = vpop.permute.xlu0 %1840 }
  0xf6   : > { %v1839_v56 = vpop.permute.xlu1 %1838  ;;  %1935 = vst.msk [vmem:[#allocation3 + $0x10] sm:$0xff] %vm1932_vm10, %v1841_v32  ;;  %v8486_v32 = vld [vmem:[#allocation2 + $0xb1] sm:$0xff] }
  0xf7   : > { %1934 = vst.msk [vmem:[#allocation3 + $0x8] sm:$0xff] %vm1932_vm10, %v1839_v56  ;;  %1083 = vrot.lane.b32.xlu0 %v8144_v45, %s7791_s27 }
  0xf8   : > { %1097 = vrot.lane.b32.xlu1 %v8140_v43, %s7791_s27 }
  0xf9   : > { %v2030_v58 = vpop.permute.xlu0 %2029 }
  0xfa   : > { %v1843_v33 = vpop.permute.xlu1 %1842  ;;  %2126 = vst.msk [vmem:[#allocation3] sm:$0xff] %vm2125_vm11, %v2030_v58 }
  0xfb   : > { %1936 = vst.msk [vmem:[#allocation3 + $0x18] sm:$0xff] %vm1932_vm10, %v1843_v33  ;;  %1099 = vrot.lane.b32.xlu0 %v8155_v47, %s7791_s27  ;;  %v8488_v33 = vld [vmem:[#allocation2 + $0x109] sm:$0xff] }
  0xfc   : > { %1085 = vrot.lane.b32.xlu1 %v8152_v46, %s7791_s27 }
  0xfd   : > { %v686_v60 = vpop.permute.xlu0 %685 }
  0xfe   : > { %v2032_v59 = vpop.permute.xlu1 %2031  ;;  %778 = vst.msk [vmem:[#allocation3 + $0x20] sm:$0xff] %vm773_vm4, %v686_v60 }
  0xff   : > { %2127 = vst.msk [vmem:[#allocation3 + $0x8] sm:$0xff] %vm2125_vm11, %v2032_v59  ;;  %1272 = vrot.lane.b32.xlu0 %v8250_v8, %s7792_s28  ;;  %v8496_v59 = vld [vmem:[#allocation2 + $0x111] sm:$0xff] }
 0x100   : > { %1101 = vrot.lane.b32.xlu1 %v8163_v48, %s7791_s27 }
 0x101   : > { %v2034_v62 = vpop.permute.xlu0 %2033  ;;  %v2158_v63 = vld [vmem:[#allocation3] sm:$0xff] }
 0x102   : > { %v688_v61 = vpop.permute.xlu1 %687  ;;  %2128 = vst.msk [vmem:[#allocation3 + $0x10] sm:$0xff] %vm2125_vm11, %v2034_v62 }
 0x103   : > { %779 = vst.msk [vmem:[#allocation3 + $0x28] sm:$0xff] %vm773_vm4, %v688_v61  ;;  %1288 = vrot.lane.b32.xlu0 %v8302_v28, %s7792_s28 }
 0x104   : > { %1274 = vrot.lane.b32.xlu1 %v8260_v12, %s7792_s28 }
 0x105   : > { %v690_v8 = vpop.permute.xlu0 %689 }
 0x106   : > { %v2036_v2 = vpop.permute.xlu1 %2035  ;;  %v2159_v7 = vld [vmem:[#allocation3 + $0x8] sm:$0xff]  ;;  %780 = vst.msk [vmem:[#allocation3 + $0x30] sm:$0xff] %vm773_vm4, %v690_v8 }
 0x107   : > { %2129 = vst.msk [vmem:[#allocation3 + $0x18] sm:$0xff] %vm2125_vm11, %v2036_v2  ;;  %v2190_v9 = vpack.c.bf16 %v2159_v7, %v2158_v63  ;;  %1276 = vrot.lane.b32.xlu0 %v8384_v6, %s7792_s28 }
 0x108   : > { %1290 = vrot.lane.b32.xlu1 %v8310_v30, %s7792_s28  ;;  %v8426_v30 = vld [vmem:[#allocation2 + $0x9a] sm:$0xff] }
 0x109   : > { %7380 = vmatprep.mubr.msk.bf16.mxu0 %vm2228_vm12, %v2190_v9  ;;  %v879_v15 = vpop.permute.xlu0 %878  ;;  %v2160_v16 = vld [vmem:[#allocation3 + $0x10] sm:$0xff] }
 0x10a   : > { %v692_v12 = vpop.permute.xlu1 %691  ;;  %971 = vst.msk [vmem:[#allocation3 + $0x20] sm:$0xff] %vm10387_vm5, %v879_v15 }
 0x10b   : > { %781 = vst.msk [vmem:[#allocation3 + $0x38] sm:$0xff] %vm773_vm4, %v692_v12  ;;  %1292 = vrot.lane.b32.xlu0 %v8395_v14, %s7792_s28 }
 0x10c   : > { %1278 = vrot.lane.b32.xlu1 %v8393_v11, %s7792_s28 }
 0x10d   : > { %v883_v23 = vpop.permute.xlu0 %882 }
 0x10e   : > { %v881_v19 = vpop.permute.xlu1 %880  ;;  %v2161_v21 = vld [vmem:[#allocation3 + $0x18] sm:$0xff]  ;;  %973 = vst.msk [vmem:[#allocation3 + $0x30] sm:$0xff] %vm10387_vm5, %v883_v23 }
 0x10f   : > { %972 = vst.msk [vmem:[#allocation3 + $0x28] sm:$0xff] %vm10387_vm5, %v881_v19  ;;  %v2191_v25 = vpack.c.bf16 %v2161_v21, %v2160_v16  ;;  %1465 = vrot.lane.b32.xlu0 %v8286_v22, %s7793_s29  ;;  %v8523_v21 = vld [vmem:[#allocation2 + $0xaa] sm:$0xff] }
 0x110   : > { %1294 = vrot.lane.b32.xlu1 %v8403_v17, %s7792_s28 }
 0x111   : > { %7381 = vmatmul.mubr.msk.bf16.vlgmr.msra.gmra.mxu0 %vm2228_vm12, %v2191_v25  ;;  %v1072_v27 = vpop.permute.xlu0 %1071  ;;  %v8531_v25 = vld [vmem:[#allocation2 + $0xb2] sm:$0xff] }
 0x112   : > { %v885_v26 = vpop.permute.xlu1 %884  ;;  %1164 = vst.msk [vmem:[#allocation3 + $0x20] sm:$0xff] %vm10386_vm6, %v1072_v27 }
 0x113   : > { %974 = vst.msk [vmem:[#allocation3 + $0x38] sm:$0xff] %vm10387_vm5, %v885_v26  ;;  %1481 = vrot.lane.b32.xlu0 %v8334_v44, %s7793_s29  ;;  %v452_v44 = vld [vmem:[%s8045_s24 + $0xc0] sm:$0xff]  ;;  %v8533_v26 = vld [vmem:[#allocation2 + $0x10a] sm:$0xff] }
 0x114   : > { %1467 = vrot.lane.b32.xlu1 %v8294_v24, %s7793_s29  ;;  %541 = vst.msk [vmem:[#allocation2 + $0x139] sm:$0xff] %vm460_vm0, %v452_v44 }
 0x115   : > { %v1076_v22 = vpop.permute.xlu0 %1075 }
 0x116   : > { %v1074_v28 = vpop.permute.xlu1 %1073  ;;  %1166 = vst.msk [vmem:[#allocation3 + $0x30] sm:$0xff] %vm10386_vm6, %v1076_v22 }
 0x117   : > { %1165 = vst.msk [vmem:[#allocation3 + $0x28] sm:$0xff] %vm10386_vm6, %v1074_v28  ;;  %1469 = vrot.lane.b32.xlu0 %v8418_v29, %s7793_s29 }
 0x118   : > { %1483 = vrot.lane.b32.xlu1 %v8342_v50, %s7793_s29 }
 0x119   : > { %v1265_v34 = vpop.permute.xlu0 %1264 }
 0x11a   : > { %v1078_v24 = vpop.permute.xlu1 %1077  ;;  %1357 = vst.msk [vmem:[#allocation3 + $0x20] sm:$0xff] %vm1352_vm7, %v1265_v34 }
 0x11b   : > { %1167 = vst.msk [vmem:[#allocation3 + $0x38] sm:$0xff] %vm10386_vm6, %v1078_v24  ;;  %1485 = vrot.lane.b32.xlu0 %v8428_v31, %s7793_s29 }
 0x11c   : > { %1471 = vrot.lane.b32.xlu1 %v8426_v30, %s7793_s29 }
 0x11d   : > { %v1269_v39 = vpop.permute.xlu0 %1268 }
 0x11e   : > { %v1267_v37 = vpop.permute.xlu1 %1266  ;;  %1359 = vst.msk [vmem:[#allocation3 + $0x30] sm:$0xff] %vm1352_vm7, %v1269_v39 }
 0x11f   : > { %1358 = vst.msk [vmem:[#allocation3 + $0x28] sm:$0xff] %vm1352_vm7, %v1267_v37  ;;  %1659 = vrot.lane.b32.xlu0 %v8144_v45, %s7794_s30  ;;  %v453_v45 = vld [vmem:[%s8045_s24 + $0xc8] sm:$0xff] }
 0x120   : > { %1487 = vrot.lane.b32.xlu1 %v8436_v35, %s7793_s29  ;;  %542 = vst.msk [vmem:[#allocation2 + $0x141] sm:$0xff] %vm460_vm0, %v453_v45  ;;  %v454_v45 = vld [vmem:[%s8045_s24 + $0xd0] sm:$0xff] }
 0x121   : > { %v1458_v42 = vpop.permute.xlu0 %1457  ;;  %543 = vst.msk [vmem:[#allocation2 + $0x151] sm:$0xff] %vm460_vm0, %v454_v45 }
 0x122   : > { %v1271_v40 = vpop.permute.xlu1 %1270  ;;  %1550 = vst.msk [vmem:[#allocation3 + $0x20] sm:$0xff] %vm1545_vm8, %v1458_v42 }
 0x123   : > { %1360 = vst.msk [vmem:[#allocation3 + $0x38] sm:$0xff] %vm1352_vm7, %v1271_v40  ;;  %1675 = vrot.lane.b32.xlu0 %v8155_v47, %s7794_s30 }
 0x124   : > { %1661 = vrot.lane.b32.xlu1 %v8152_v46, %s7794_s30 }
 0x125   : > { %v1462_v50 = vpop.permute.xlu0 %1461 }
 0x126   : > { %v1460_v49 = vpop.permute.xlu1 %1459  ;;  %1552 = vst.msk [vmem:[#allocation3 + $0x30] sm:$0xff] %vm1545_vm8, %v1462_v50 }
 0x127   : > { %1551 = vst.msk [vmem:[#allocation3 + $0x28] sm:$0xff] %vm1545_vm8, %v1460_v49  ;;  %1663 = vrot.lane.b32.xlu0 %v8210_v1, %s7794_s30 }
 0x128   : > { %1677 = vrot.lane.b32.xlu1 %v8163_v48, %s7794_s30 }
 0x129   : > { %v1652_v47 = vpop.permute.xlu0 %1651 }
 0x12a   : > { %v1464_v46 = vpop.permute.xlu1 %1463  ;;  %1744 = vst.msk [vmem:[#allocation3 + $0x20] sm:$0xff] %vm1739_vm9, %v1652_v47 }
 0x12b   : > { %1553 = vst.msk [vmem:[#allocation3 + $0x38] sm:$0xff] %vm1545_vm8, %v1464_v46  ;;  %1679 = vrot.lane.b32.xlu0 %v8219_v4, %s7794_s30 }
 0x12c   : > { %1665 = vrot.lane.b32.xlu1 %v8216_v3, %s7794_s30 }
 0x12d   : > { %v1656_v48 = vpop.permute.xlu0 %1655 }
 0x12e   : > { %v1654_v51 = vpop.permute.xlu1 %1653  ;;  %1746 = vst.msk [vmem:[#allocation3 + $0x30] sm:$0xff] %vm1739_vm9, %v1656_v48 }
 0x12f   : > { %1745 = vst.msk [vmem:[#allocation3 + $0x28] sm:$0xff] %vm1739_vm9, %v1654_v51  ;;  %1852 = vrot.lane.b32.xlu0 %v8384_v6, %s7795_s12  ;;  %v455_v51 = vld [vmem:[%s8045_s24 + $0xd8] sm:$0xff] }
 0x130   : > { %1681 = vrot.lane.b32.xlu1 %v8226_v5, %s7794_s30  ;;  %544 = vst.msk [vmem:[#allocation2 + $0x159] sm:$0xff] %vm460_vm0, %v455_v51 }
 0x131   : > { %v1845_v53 = vpop.permute.xlu0 %1844 }
 0x132   : > { %v1658_v52 = vpop.permute.xlu1 %1657  ;;  %1937 = vst.msk [vmem:[#allocation3 + $0x20] sm:$0xff] %vm1932_vm10, %v1845_v53  ;;  %v8646_v53 = vld [vmem:[#allocation2 + $0x120] sm:$0xff] }
 0x133   : > { %1747 = vst.msk [vmem:[#allocation3 + $0x38] sm:$0xff] %vm1739_vm9, %v1658_v52  ;;  %1868 = vrot.lane.b32.xlu0 %v8395_v14, %s7795_s12  ;;  %v8640_v52 = vld [vmem:[#allocation2 + $0x150] sm:$0xff] }
 0x134   : > { %1854 = vrot.lane.b32.xlu1 %v8393_v11, %s7795_s12  ;;  %609 = vst.msk [vmem:[#allocation3 + $0xe0] sm:$0xff] %vm460_vm0, %v8640_v52 }
 0x135   : > { %v1849_v56 = vpop.permute.xlu0 %1848 }
 0x136   : > { %v1847_v54 = vpop.permute.xlu1 %1846  ;;  %1939 = vst.msk [vmem:[#allocation3 + $0x30] sm:$0xff] %vm1932_vm10, %v1849_v56 }
 0x137   : > { %1938 = vst.msk [vmem:[#allocation3 + $0x28] sm:$0xff] %vm1932_vm10, %v1847_v54  ;;  %1856 = vrot.lane.b32.xlu0 %v8478_v55, %s7795_s12  ;;  %v8649_v54 = vld [vmem:[#allocation2 + $0x158] sm:$0xff] }
 0x138   : > { %1870 = vrot.lane.b32.xlu1 %v8403_v17, %s7795_s12  ;;  %610 = vst.msk [vmem:[#allocation3 + $0xe8] sm:$0xff] %vm460_vm0, %v8649_v54 }
 0x139   : > { %v2038_v58 = vpop.permute.xlu0 %2037 }
 0x13a   : > { %v1851_v57 = vpop.permute.xlu1 %1850  ;;  %2130 = vst.msk [vmem:[#allocation3 + $0x20] sm:$0xff] %vm2125_vm11, %v2038_v58 }
 0x13b   : > { %1940 = vst.msk [vmem:[#allocation3 + $0x38] sm:$0xff] %vm1932_vm10, %v1851_v57  ;;  %1872 = vrot.lane.b32.xlu0 %v8488_v33, %s7795_s12 }
 0x13c   : > { %1858 = vrot.lane.b32.xlu1 %v8486_v32, %s7795_s12 }
 0x13d   : > { %v694_v61 = vpop.permute.xlu0 %693 }
 0x13e   : > { %v2040_v60 = vpop.permute.xlu1 %2039  ;;  %782 = vst.msk [vmem:[#allocation3 + $0x40] sm:$0xff] %vm773_vm4, %v694_v61 }
 0x13f   : > { %2131 = vst.msk [vmem:[#allocation3 + $0x28] sm:$0xff] %vm2125_vm11, %v2040_v60  ;;  %2045 = vrot.lane.b32.xlu0 %v8418_v29, %s7797_s15 }
 0x140   : > { %1874 = vrot.lane.b32.xlu1 %v8496_v59, %s7795_s12 }
 0x141   : > { %v710_v63 = vpop.permute.xlu0 %709  ;;  %v2162_v2 = vld [vmem:[#allocation3 + $0x20] sm:$0xff] }
 0x142   : > { %v696_v62 = vpop.permute.xlu1 %695  ;;  %790 = vst.msk [vmem:[#allocation3 + $0x80] sm:$0xff] %vm773_vm4, %v710_v63  ;;  %v456_v63 = vld [vmem:[%s8045_s24 + $0xe0] sm:$0xff] }
 0x143   : > { %783 = vst.msk [vmem:[#allocation3 + $0x48] sm:$0xff] %vm773_vm4, %v696_v62  ;;  %2061 = vrot.lane.b32.xlu0 %v8428_v31, %s7797_s15 }
 0x144   : > { %2047 = vrot.lane.b32.xlu1 %v8426_v30, %s7797_s15  ;;  %545 = vst.msk [vmem:[#allocation2 + $0x169] sm:$0xff] %vm460_vm0, %v456_v63 }
 0x145   : > { %v2042_v9 = vpop.permute.xlu0 %2041 }
 0x146   : > { %v712_v7 = vpop.permute.xlu1 %711  ;;  %v2163_v8 = vld [vmem:[#allocation3 + $0x28] sm:$0xff]  ;;  %2132 = vst.msk [vmem:[#allocation3 + $0x30] sm:$0xff] %vm2125_vm11, %v2042_v9 }
 0x147   : > { %791 = vst.msk [vmem:[#allocation3 + $0x88] sm:$0xff] %vm773_vm4, %v712_v7  ;;  %v2192_v12 = vpack.c.bf16 %v2163_v8, %v2162_v2  ;;  %701 = vrot.lane.b32.xlu0 %v8384_v6, %s7789_s25 }
 0x148   : > { %2063 = vrot.lane.b32.xlu1 %v8436_v35, %s7797_s15 }
 0x149   : > { %7384 = vmatprep.mubr.msk.bf16.mxu0 %vm2228_vm12, %v2192_v12  ;;  %v698_v16 = vpop.permute.xlu0 %697 }
 0x14a   : > { %v2044_v15 = vpop.permute.xlu1 %2043  ;;  %784 = vst.msk [vmem:[#allocation3 + $0x50] sm:$0xff] %vm773_vm4, %v698_v16 }
 0x14b   : > { %2133 = vst.msk [vmem:[#allocation3 + $0x38] sm:$0xff] %vm2125_vm11, %v2044_v15  ;;  %717 = vrot.lane.b32.xlu0 %v8395_v14, %s7789_s25  ;;  %v8693_v8 = vld [vmem:[#allocation2 + $0x168] sm:$0xff] }
 0x14c   : > { %703 = vrot.lane.b32.xlu1 %v8393_v11, %s7789_s25  ;;  %611 = vst.msk [vmem:[#allocation3 + $0xf0] sm:$0xff] %vm460_vm0, %v8693_v8 }
 0x14d   : > { %v714_v6 = vpop.permute.xlu0 %713  ;;  %v2164_v23 = vld [vmem:[#allocation3 + $0x30] sm:$0xff] }
 0x14e   : > { %v700_v19 = vpop.permute.xlu1 %699  ;;  %792 = vst.msk [vmem:[#allocation3 + $0x90] sm:$0xff] %vm773_vm4, %v714_v6 }
 0x14f   : > { %785 = vst.msk [vmem:[#allocation3 + $0x58] sm:$0xff] %vm773_vm4, %v700_v19  ;;  %2049 = vrot.lane.b32.xlu0 %v8523_v21, %s7797_s15 }
 0x150   : > { %719 = vrot.lane.b32.xlu1 %v8403_v17, %s7789_s25  ;;  %v8542_v17 = vld [vmem:[#allocation2 + $0x112] sm:$0xff] }
 0x151   : > { %v887_v27 = vpop.permute.xlu0 %886 }
 0x152   : > { %v716_v11 = vpop.permute.xlu1 %715  ;;  %v2165_v14 = vld [vmem:[#allocation3 + $0x38] sm:$0xff]  ;;  %975 = vst.msk [vmem:[#allocation3 + $0x40] sm:$0xff] %vm10387_vm5, %v887_v27  ;;  %v8746_v27 = vld [vmem:[#allocation2 + $0x138] sm:$0xff] }
 0x153   : > { %793 = vst.msk [vmem:[#allocation3 + $0x98] sm:$0xff] %vm773_vm4, %v716_v11  ;;  %v2193_v28 = vpack.c.bf16 %v2165_v14, %v2164_v23  ;;  %2065 = vrot.lane.b32.xlu0 %v8533_v26, %s7797_s15  ;;  %v8726_v23 = vld [vmem:[#allocation2 + $0x12a] sm:$0xff] }
 0x154   : > { %2051 = vrot.lane.b32.xlu1 %v8531_v25, %s7797_s15 }
 0x155   : > { %7385 = vmatmul.mubr.msk.bf16.gmra.mxu0 %vm2228_vm12, %v2193_v28  ;;  %v903_v24 = vpop.permute.xlu0 %902  ;;  %v8754_v28 = vld [vmem:[#allocation2 + $0x140] sm:$0xff] }
 0x156   : > { %v889_v22 = vpop.permute.xlu1 %888  ;;  %983 = vst.msk [vmem:[#allocation3 + $0x80] sm:$0xff] %vm10387_vm5, %v903_v24  ;;  %v458_v24 = vld [vmem:[%s8045_s24 + $0xf0] sm:$0xff] }
 0x157   : > { %976 = vst.msk [vmem:[#allocation3 + $0x48] sm:$0xff] %vm10387_vm5, %v889_v22  ;;  %705 = vrot.lane.b32.xlu0 %v8478_v55, %s7789_s25  ;;  %v1784_v22 = vld [vmem:[#allocation2 + $0xc1] sm:$0xff] }
 0x158   : > { %2067 = vrot.lane.b32.xlu1 %v8542_v17, %s7797_s15  ;;  %547 = vst.msk [vmem:[#allocation2 + $0x181] sm:$0xff] %vm460_vm0, %v458_v24 }
 0x159   : > { %v891_v37 = vpop.permute.xlu0 %890 }
 0x15a   : > { %v905_v34 = vpop.permute.xlu1 %904  ;;  %977 = vst.msk [vmem:[#allocation3 + $0x50] sm:$0xff] %vm10387_vm5, %v891_v37 }
 0x15b   : > { %984 = vst.msk [vmem:[#allocation3 + $0x88] sm:$0xff] %vm10387_vm5, %v905_v34  ;;  %721 = vrot.lane.b32.xlu0 %v8488_v33, %s7789_s25 }
 0x15c   : > { %707 = vrot.lane.b32.xlu1 %v8486_v32, %s7789_s25 }
 0x15d   : > { %v907_v40 = vpop.permute.xlu0 %906 }
 0x15e   : > { %v893_v39 = vpop.permute.xlu1 %892  ;;  %985 = vst.msk [vmem:[#allocation3 + $0x90] sm:$0xff] %vm10387_vm5, %v907_v40 }
 0x15f   : > { %978 = vst.msk [vmem:[#allocation3 + $0x58] sm:$0xff] %vm10387_vm5, %v893_v39  ;;  %894 = vrot.lane.b32.xlu0 %v8418_v29, %s7790_s26  ;;  %v459_v39 = vld [vmem:[%s8045_s24 + $0xf8] sm:$0xff] }
 0x160   : > { %723 = vrot.lane.b32.xlu1 %v8496_v59, %s7789_s25  ;;  %548 = vst.msk [vmem:[#allocation2 + $0x189] sm:$0xff] %vm460_vm0, %v459_v39 }
 0x161   : > { %v1080_v44 = vpop.permute.xlu0 %1079 }
 0x162   : > { %v909_v42 = vpop.permute.xlu1 %908  ;;  %1168 = vst.msk [vmem:[#allocation3 + $0x40] sm:$0xff] %vm10386_vm6, %v1080_v44 }
 0x163   : > { %986 = vst.msk [vmem:[#allocation3 + $0x98] sm:$0xff] %vm10387_vm5, %v909_v42  ;;  %910 = vrot.lane.b32.xlu0 %v8428_v31, %s7790_s26  ;;  %v1786_v42 = vld [vmem:[#allocation2 + $0xd9] sm:$0xff] }
 0x164   : > { %896 = vrot.lane.b32.xlu1 %v8426_v30, %s7790_s26 }
 0x165   : > { %v1096_v30 = vpop.permute.xlu0 %1095 }
 0x166   : > { %v1082_v29 = vpop.permute.xlu1 %1081  ;;  %1176 = vst.msk [vmem:[#allocation3 + $0x80] sm:$0xff] %vm10386_vm6, %v1096_v30 }
 0x167   : > { %1169 = vst.msk [vmem:[#allocation3 + $0x48] sm:$0xff] %vm10386_vm6, %v1082_v29  ;;  %898 = vrot.lane.b32.xlu0 %v8523_v21, %s7790_s26  ;;  %v1787_v29 = vld [vmem:[#allocation2 + $0xe1] sm:$0xff] }
 0x168   : > { %912 = vrot.lane.b32.xlu1 %v8436_v35, %s7790_s26 }
 0x169   : > { %v1084_v49 = vpop.permute.xlu0 %1083 }
 0x16a   : > { %v1098_v31 = vpop.permute.xlu1 %1097  ;;  %1170 = vst.msk [vmem:[#allocation3 + $0x50] sm:$0xff] %vm10386_vm6, %v1084_v49 }
 0x16b   : > { %1177 = vst.msk [vmem:[#allocation3 + $0x88] sm:$0xff] %vm10386_vm6, %v1098_v31  ;;  %914 = vrot.lane.b32.xlu0 %v8533_v26, %s7790_s26  ;;  %v8775_v31 = vld [vmem:[#allocation2 + $0x139] sm:$0xff] }
 0x16c   : > { %900 = vrot.lane.b32.xlu1 %v8531_v25, %s7790_s26 }
 0x16d   : > { %v1100_v35 = vpop.permute.xlu0 %1099 }
 0x16e   : > { %v1086_v50 = vpop.permute.xlu1 %1085  ;;  %1178 = vst.msk [vmem:[#allocation3 + $0x90] sm:$0xff] %vm10386_vm6, %v1100_v35  ;;  %v8782_v35 = vld [vmem:[#allocation2 + $0x141] sm:$0xff] }
 0x16f   : > { %1171 = vst.msk [vmem:[#allocation3 + $0x58] sm:$0xff] %vm10386_vm6, %v1086_v50  ;;  %1087 = vrot.lane.b32.xlu0 %v8210_v1, %s7791_s27 }
 0x170   : > { %916 = vrot.lane.b32.xlu1 %v8542_v17, %s7790_s26 }
 0x171   : > { %v1273_v47 = vpop.permute.xlu0 %1272 }
 0x172   : > { %v1102_v46 = vpop.permute.xlu1 %1101  ;;  %1361 = vst.msk [vmem:[#allocation3 + $0x40] sm:$0xff] %vm1352_vm7, %v1273_v47 }
 0x173   : > { %1179 = vst.msk [vmem:[#allocation3 + $0x98] sm:$0xff] %vm10386_vm6, %v1102_v46  ;;  %1103 = vrot.lane.b32.xlu0 %v8219_v4, %s7791_s27  ;;  %v1977_v46 = vld [vmem:[#allocation2 + $0xc2] sm:$0xff] }
 0x174   : > { %1089 = vrot.lane.b32.xlu1 %v8216_v3, %s7791_s27 }
 0x175   : > { %v1289_v1 = vpop.permute.xlu0 %1288 }
 0x176   : > { %v1275_v48 = vpop.permute.xlu1 %1274  ;;  %1369 = vst.msk [vmem:[#allocation3 + $0x80] sm:$0xff] %vm1352_vm7, %v1289_v1 }
 0x177   : > { %1362 = vst.msk [vmem:[#allocation3 + $0x48] sm:$0xff] %vm1352_vm7, %v1275_v48  ;;  %1091 = vrot.lane.b32.xlu0 %v8252_v10, %s7791_s27 }
 0x178   : > { %1105 = vrot.lane.b32.xlu1 %v8226_v5, %s7791_s27  ;;  %v8658_v5 = vld [vmem:[#allocation2 + $0x128] sm:$0xff] }
 0x179   : > { %v1277_v4 = vpop.permute.xlu0 %1276 }
 0x17a   : > { %v1291_v3 = vpop.permute.xlu1 %1290  ;;  %1363 = vst.msk [vmem:[#allocation3 + $0x50] sm:$0xff] %vm1352_vm7, %v1277_v4 }
 0x17b   : > { %1370 = vst.msk [vmem:[#allocation3 + $0x88] sm:$0xff] %vm1352_vm7, %v1291_v3  ;;  %1107 = vrot.lane.b32.xlu0 %v8646_v53, %s7791_s27  ;;  %v1978_v3 = vld [vmem:[#allocation2 + $0xca] sm:$0xff] }
 0x17c   : > { %1093 = vrot.lane.b32.xlu1 %v8262_v13, %s7791_s27 }
 0x17d   : > { %v1293_v57 = vpop.permute.xlu0 %1292 }
 0x17e   : > { %v1279_v56 = vpop.permute.xlu1 %1278  ;;  %1371 = vst.msk [vmem:[#allocation3 + $0x90] sm:$0xff] %vm1352_vm7, %v1293_v57 }
 0x17f   : > { %1364 = vst.msk [vmem:[#allocation3 + $0x58] sm:$0xff] %vm1352_vm7, %v1279_v56  ;;  %1280 = vrot.lane.b32.xlu0 %v8478_v55, %s7792_s28  ;;  %v457_v55 = vld [vmem:[%s8045_s24 + $0xe8] sm:$0xff]  ;;  %s7801_s24 = smov 96  }
 0x180   : > { %1109 = vrot.lane.b32.xlu1 %v8658_v5, %s7791_s27  ;;  %546 = vst.msk [vmem:[#allocation2 + $0x171] sm:$0xff] %vm460_vm0, %v457_v55  ;;  %v2513_v55 = vlaneseq }
 0x181   : > { %v1466_v60 = vpop.permute.xlu0 %1465 }
 0x182   : > { %v1295_v58 = vpop.permute.xlu1 %1294  ;;  %1554 = vst.msk [vmem:[#allocation3 + $0x40] sm:$0xff] %vm1545_vm8, %v1466_v60 }
 0x183   : > { %1372 = vst.msk [vmem:[#allocation3 + $0x98] sm:$0xff] %vm1352_vm7, %v1295_v58  ;;  %1296 = vrot.lane.b32.xlu0 %v8488_v33, %s7792_s28  ;;  %v8682_v33 = vld [vmem:[#allocation2 + $0x121] sm:$0xff] }
 0x184   : > { %1282 = vrot.lane.b32.xlu1 %v8486_v32, %s7792_s28 }
 0x185   : > { %v1482_v62 = vpop.permute.xlu0 %1481 }
 0x186   : > { %v1468_v61 = vpop.permute.xlu1 %1467  ;;  %1562 = vst.msk [vmem:[#allocation3 + $0x80] sm:$0xff] %vm1545_vm8, %v1482_v62  ;;  %v7798_v62 = vmov 1983009808  }
 0x187   : > { %1555 = vst.msk [vmem:[#allocation3 + $0x48] sm:$0xff] %vm1545_vm8, %v1468_v61  ;;  %1284 = vrot.lane.b32.xlu0 %v8277_v18, %s7792_s28  ;;  %v8698_v9 = vld [vmem:[#allocation2 + $0x170] sm:$0xff]  ;;  %v1979_v61 = vld [vmem:[#allocation2 + $0xda] sm:$0xff]  ;;  %v2511_v63 = vunpack.c.l.s4 %v7798_v62 }
 0x188   : > { %1298 = vrot.lane.b32.xlu1 %v8496_v59, %s7792_s28  ;;  %v8690_v59 = vld [vmem:[#allocation2 + $0x129] sm:$0xff]  ;;  %612 = vst.msk [vmem:[#allocation3 + $0xf8] sm:$0xff] %vm460_vm0, %v8698_v9 }
 0x189   : > { %v1470_v2 = vpop.permute.xlu0 %1469 }
 0x18a   : > { %v1484_v32 = vpop.permute.xlu1 %1483  ;;  %1556 = vst.msk [vmem:[#allocation3 + $0x50] sm:$0xff] %vm1545_vm8, %v1470_v2  ;;  %v573_v2 = vld [vmem:[#allocation2 + $0x120] sm:$0xff] }
 0x18b   : > { %1563 = vst.msk [vmem:[#allocation3 + $0x88] sm:$0xff] %vm1545_vm8, %v1484_v32  ;;  %1300 = vrot.lane.b32.xlu0 %v8682_v33, %s7792_s28 }
 0x18c   : > { %1286 = vrot.lane.b32.xlu1 %v8284_v20, %s7792_s28  ;;  %605 = vst.msk [vmem:[#allocation3 + $0xc0] sm:$0xff] %vm460_vm0, %v573_v2 }
 0x18d   : > { %v1486_v18 = vpop.permute.xlu0 %1485 }
 0x18e   : > { %v1472_v7 = vpop.permute.xlu1 %1471  ;;  %1564 = vst.msk [vmem:[#allocation3 + $0x90] sm:$0xff] %vm1545_vm8, %v1486_v18  ;;  %v574_v18 = vld [vmem:[#allocation2 + $0x128] sm:$0xff] }
 0x18f   : > { %1557 = vst.msk [vmem:[#allocation3 + $0x58] sm:$0xff] %vm1545_vm8, %v1472_v7  ;;  %1473 = vrot.lane.b32.xlu0 %v8523_v21, %s7793_s29  ;;  %v8718_v21 = vld [vmem:[#allocation2 + $0x122] sm:$0xff] }
 0x190   : > { %1302 = vrot.lane.b32.xlu1 %v8690_v59, %s7792_s28  ;;  %606 = vst.msk [vmem:[#allocation3 + $0xc8] sm:$0xff] %vm460_vm0, %v574_v18 }
 0x191   : > { %v1660_v12 = vpop.permute.xlu0 %1659 }
 0x192   : > { %v1488_v20 = vpop.permute.xlu1 %1487  ;;  %1748 = vst.msk [vmem:[#allocation3 + $0x40] sm:$0xff] %vm1739_vm9, %v1660_v12 }
 0x193   : > { %1565 = vst.msk [vmem:[#allocation3 + $0x98] sm:$0xff] %vm1545_vm8, %v1488_v20  ;;  %1489 = vrot.lane.b32.xlu0 %v8533_v26, %s7793_s29  ;;  %v575_v20 = vld [vmem:[#allocation2 + $0x138] sm:$0xff] }
 0x194   : > { %1475 = vrot.lane.b32.xlu1 %v8531_v25, %s7793_s29  ;;  %607 = vst.msk [vmem:[#allocation3 + $0xd0] sm:$0xff] %vm460_vm0, %v575_v20 }
 0x195   : > { %v1676_v16 = vpop.permute.xlu0 %1675 }
 0x196   : > { %v1662_v15 = vpop.permute.xlu1 %1661  ;;  %1756 = vst.msk [vmem:[#allocation3 + $0x80] sm:$0xff] %vm1739_vm9, %v1676_v16  ;;  %v2512_v16 = vunpack.c.0.s8 %v2511_v63 }
 0x197   : > { %1749 = vst.msk [vmem:[#allocation3 + $0x48] sm:$0xff] %vm1739_vm9, %v1662_v15  ;;  %1477 = vrot.lane.b32.xlu0 %v8318_v36, %s7793_s29  ;;  %v8809_v15 = vld [vmem:[#allocation2 + $0x13a] sm:$0xff] }
 0x198   : > { %1491 = vrot.lane.b32.xlu1 %v8542_v17, %s7793_s29 }
 0x199   : > { %v1664_v6 = vpop.permute.xlu0 %1663 }
 0x19a   : > { %v1678_v19 = vpop.permute.xlu1 %1677  ;;  %1750 = vst.msk [vmem:[#allocation3 + $0x50] sm:$0xff] %vm1739_vm9, %v1664_v6 }
 0x19b   : > { %1757 = vst.msk [vmem:[#allocation3 + $0x88] sm:$0xff] %vm1739_vm9, %v1678_v19  ;;  %1493 = vrot.lane.b32.xlu0 %v8718_v21, %s7793_s29  ;;  %v8812_v19 = vshrl.u32 %v2513_v55, 7 }
 0x19c   : > { %1479 = vrot.lane.b32.xlu1 %v8326_v38, %s7793_s29 }
 0x19d   : > { %v1680_v36 = vpop.permute.xlu0 %1679 }
 0x19e   : > { %v1666_v25 = vpop.permute.xlu1 %1665  ;;  %1758 = vst.msk [vmem:[#allocation3 + $0x90] sm:$0xff] %vm1739_vm9, %v1680_v36  ;;  %v8819_v36 = vld [vmem:[%s10376_s2] ss:$0 sm:$0xff] }
 0x19f   : > { %1751 = vst.msk [vmem:[#allocation3 + $0x58] sm:$0xff] %vm1739_vm9, %v1666_v25  ;;  %1667 = vrot.lane.b32.xlu0 %v8252_v10, %s7794_s30 }
 0x1a0   : > { %1495 = vrot.lane.b32.xlu1 %v8726_v23, %s7793_s29 }
 0x1a1   : > { %v1853_v38 = vpop.permute.xlu0 %1852 }
 0x1a2   : > { %v1682_v11 = vpop.permute.xlu1 %1681  ;;  %1941 = vst.msk [vmem:[#allocation3 + $0x40] sm:$0xff] %vm1932_vm10, %v1853_v38 }
 0x1a3   : > { %1759 = vst.msk [vmem:[#allocation3 + $0x98] sm:$0xff] %vm1739_vm9, %v1682_v11  ;;  %1683 = vrot.lane.b32.xlu0 %v8646_v53, %s7794_s30 }
 0x1a4   : > { %1669 = vrot.lane.b32.xlu1 %v8262_v13, %s7794_s30 }
 0x1a5   : > { %v1869_v14 = vpop.permute.xlu0 %1868 }
 0x1a6   : > { %v1855_v26 = vpop.permute.xlu1 %1854  ;;  %1949 = vst.msk [vmem:[#allocation3 + $0x80] sm:$0xff] %vm1932_vm10, %v1869_v14  ;;  %v8827_v14 = vld [vmem:[#allocation2 + $0x142] sm:$0xff] }
 0x1a7   : > { %1942 = vst.msk [vmem:[#allocation3 + $0x48] sm:$0xff] %vm1932_vm10, %v1855_v26  ;;  %1671 = vrot.lane.b32.xlu0 %v8131_v41, %s7794_s30 }
 0x1a8   : > { %1685 = vrot.lane.b32.xlu1 %v8658_v5, %s7794_s30 }
 0x1a9   : > { %v1857_v13 = vpop.permute.xlu0 %1856 }
 0x1aa   : > { %v1871_v10 = vpop.permute.xlu1 %1870  ;;  %1943 = vst.msk [vmem:[#allocation3 + $0x50] sm:$0xff] %vm1932_vm10, %v1857_v13  ;;  %v8831_v13 = vsub.s32 %v2512_v16, %v8812_v19 }
 0x1ab   : > { %1950 = vst.msk [vmem:[#allocation3 + $0x88] sm:$0xff] %vm1932_vm10, %v1871_v10  ;;  %1687 = vrot.lane.b32.xlu0 %v8746_v27, %s7794_s30 }
 0x1ac   : > { %1673 = vrot.lane.b32.xlu1 %v8140_v43, %s7794_s30  ;;  %v1785_v43 = vld [vmem:[#allocation2 + $0xc9] sm:$0xff] }
 0x1ad   : > { %v1873_v41 = vpop.permute.xlu0 %1872 }
 0x1ae   : > { %v1859_v17 = vpop.permute.xlu1 %1858  ;;  %1951 = vst.msk [vmem:[#allocation3 + $0x90] sm:$0xff] %vm1932_vm10, %v1873_v41 }
 0x1af   : > { %1944 = vst.msk [vmem:[#allocation3 + $0x58] sm:$0xff] %vm1932_vm10, %v1859_v17  ;;  %1860 = vrot.lane.b32.xlu0 %v1784_v22, %s7795_s12 }
 0x1b0   : > { %1689 = vrot.lane.b32.xlu1 %v8754_v28, %s7794_s30 }
 0x1b1   : > { %v2046_v37 = vpop.permute.xlu0 %2045 }
 0x1b2   : > { %v1875_v34 = vpop.permute.xlu1 %1874  ;;  %2134 = vst.msk [vmem:[#allocation3 + $0x40] sm:$0xff] %vm2125_vm11, %v2046_v37 }
 0x1b3   : > { %1952 = vst.msk [vmem:[#allocation3 + $0x98] sm:$0xff] %vm1932_vm10, %v1875_v34  ;;  %1876 = vrot.lane.b32.xlu0 %v8682_v33, %s7795_s12 }
 0x1b4   : > { %1862 = vrot.lane.b32.xlu1 %v1785_v43, %s7795_s12 }
 0x1b5   : > { %v2062_v44 = vpop.permute.xlu0 %2061 }
 0x1b6   : > { %v2048_v40 = vpop.permute.xlu1 %2047  ;;  %2142 = vst.msk [vmem:[#allocation3 + $0x80] sm:$0xff] %vm2125_vm11, %v2062_v44 }
 0x1b7   : > { %2135 = vst.msk [vmem:[#allocation3 + $0x48] sm:$0xff] %vm2125_vm11, %v2048_v40  ;;  %1864 = vrot.lane.b32.xlu0 %v1786_v42, %s7795_s12 }
 0x1b8   : > { %1878 = vrot.lane.b32.xlu1 %v8690_v59, %s7795_s12 }
 0x1b9   : > { %v702_v49 = vpop.permute.xlu0 %701  ;;  %v2166_v50 = vld [vmem:[#allocation3 + $0x40] sm:$0xff] }
 0x1ba   : > { %v2064_v30 = vpop.permute.xlu1 %2063  ;;  %786 = vst.msk [vmem:[#allocation3 + $0x60] sm:$0xff] %vm773_vm4, %v702_v49 }
 0x1bb   : > { %2143 = vst.msk [vmem:[#allocation3 + $0x88] sm:$0xff] %vm2125_vm11, %v2064_v30  ;;  %1880 = vrot.lane.b32.xlu0 %v8775_v31, %s7795_s12 }
 0x1bc   : > { %1866 = vrot.lane.b32.xlu1 %v1787_v29, %s7795_s12 }
 0x1bd   : > { %v718_v51 = vpop.permute.xlu0 %717  ;;  %v2174_v1 = vld [vmem:[#allocation3 + $0x80] sm:$0xff] }
 0x1be   : > { %v704_v45 = vpop.permute.xlu1 %703  ;;  %v2167_v47 = vld [vmem:[#allocation3 + $0x48] sm:$0xff]  ;;  %794 = vst.msk [vmem:[#allocation3 + $0xa0] sm:$0xff] %vm773_vm4, %v718_v51 }
 0x1bf   : > { %787 = vst.msk [vmem:[#allocation3 + $0x68] sm:$0xff] %vm773_vm4, %v704_v45  ;;  %v2194_v48 = vpack.c.bf16 %v2167_v47, %v2166_v50  ;;  %2053 = vrot.lane.b32.xlu0 %v1977_v46, %s7797_s15 }
 0x1c0   : > { %1882 = vrot.lane.b32.xlu1 %v8782_v35, %s7795_s12 }
 0x1c1   : > { %7388 = vmatprep.mubr.msk.bf16.mxu0 %vm2228_vm12, %v2194_v48  ;;  %v2050_v5 = vpop.permute.xlu0 %2049 }
 0x1c2   : > { %v720_v53 = vpop.permute.xlu1 %719  ;;  %v2175_v4 = vld [vmem:[#allocation3 + $0x88] sm:$0xff]  ;;  %2136 = vst.msk [vmem:[#allocation3 + $0x50] sm:$0xff] %vm2125_vm11, %v2050_v5 }
 0x1c3   : > { %795 = vst.msk [vmem:[#allocation3 + $0xa8] sm:$0xff] %vm773_vm4, %v720_v53  ;;  %v2198_v56 = vpack.c.bf16 %v2175_v4, %v2174_v1  ;;  %2069 = vrot.lane.b32.xlu0 %v8718_v21, %s7797_s15 }
 0x1c4   : > { %2055 = vrot.lane.b32.xlu1 %v1978_v3, %s7797_s15 }
 0x1c5   : > { %7396 = vmatprep.mubr.msk.bf16.mxu1 %vm2228_vm12, %v2198_v56  ;;  %v2066_v58 = vpop.permute.xlu0 %2065 }
 0x1c6   : > { %v2052_v57 = vpop.permute.xlu1 %2051  ;;  %2144 = vst.msk [vmem:[#allocation3 + $0x90] sm:$0xff] %vm2125_vm11, %v2066_v58 }
 0x1c7   : > { %2137 = vst.msk [vmem:[#allocation3 + $0x58] sm:$0xff] %vm2125_vm11, %v2052_v57  ;;  %725 = vrot.lane.b32.xlu0 %v8682_v33, %s7789_s25  ;;  %v1980_v33 = vld [vmem:[#allocation2 + $0xe2] sm:$0xff] }
 0x1c8   : > { %2071 = vrot.lane.b32.xlu1 %v8726_v23, %s7797_s15 }
 0x1c9   : > { %v706_v32 = vpop.permute.xlu0 %705  ;;  %v2168_v7 = vld [vmem:[#allocation3 + $0x50] sm:$0xff] }
 0x1ca   : > { %v2068_v60 = vpop.permute.xlu1 %2067  ;;  %788 = vst.msk [vmem:[#allocation3 + $0x70] sm:$0xff] %vm773_vm4, %v706_v32 }
 0x1cb   : > { %2145 = vst.msk [vmem:[#allocation3 + $0x98] sm:$0xff] %vm2125_vm11, %v2068_v60  ;;  %2057 = vrot.lane.b32.xlu0 %v1979_v61, %s7797_s15 }
 0x1cc   : > { %727 = vrot.lane.b32.xlu1 %v8690_v59, %s7789_s25  ;;  %v576_v59 = vld [vmem:[#allocation2 + $0x140] sm:$0xff] }
 0x1cd   : > { %v722_v25 = vpop.permute.xlu0 %721  ;;  %608 = vst.msk [vmem:[#allocation3 + $0xd8] sm:$0xff] %vm460_vm0, %v576_v59  ;;  %v2176_v38 = vld [vmem:[#allocation3 + $0x90] sm:$0xff]  ;;  %vm4357_vm0 = vcmask 1042434  }
 0x1ce   : > { %v708_v12 = vpop.permute.xlu1 %707  ;;  %v2169_v6 = vld [vmem:[#allocation3 + $0x58] sm:$0xff]  ;;  %796 = vst.msk [vmem:[#allocation3 + $0xb0] sm:$0xff] %vm773_vm4, %v722_v25 }
 0x1cf   : > { %789 = vst.msk [vmem:[#allocation3 + $0x78] sm:$0xff] %vm773_vm4, %v708_v12  ;;  %v2195_v11 = vpack.c.bf16 %v2169_v6, %v2168_v7  ;;  %2073 = vrot.lane.b32.xlu0 %v8809_v15, %s7797_s15 }
 0x1d0   : > { %2059 = vrot.lane.b32.xlu1 %v1980_v33, %s7797_s15 }
 0x1d1   : > { %v7382_v26 = vpop.f32.mrf.mxu0  ;;  %7389 = vmatmul.mubr.msk.bf16.gmra.mxu0 %vm2228_vm12, %v2195_v11  ;;  %v895_v41 = vpop.permute.xlu0 %894 }
 0x1d2   : > { %v2327_v10 = vadd.f32 %v7382_v26, %v8819_v36  ;;  %v724_v17 = vpop.permute.xlu1 %723  ;;  %v2177_v22 = vld [vmem:[#allocation3 + $0x98] sm:$0xff]  ;;  %979 = vst.msk [vmem:[#allocation3 + $0x60] sm:$0xff] %vm10387_vm5, %v895_v41 }
 0x1d3   : > { %797 = vst.msk [vmem:[#allocation3 + $0xb8] sm:$0xff] %vm773_vm4, %v724_v17  ;;  %v2318_v24 = vpop.f32.mrf.mxu0  ;;  %v2199_v43 = vpack.c.bf16 %v2177_v22, %v2176_v38  ;;  %729 = vrot.lane.b32.xlu0 %v8775_v31, %s7789_s25 }
 0x1d4   : > { %v2447_v34 = vmax.f32 %v2327_v10, 0.0  ;;  %v2319_v37 = vadd.f32 %v8819_v36, %v2318_v24  ;;  %2075 = vrot.lane.b32.xlu1 %v8827_v14, %s7797_s15 }
 0x1d5   : > { %7397 = vmatmul.mubr.msk.bf16.vlgmr.msra.gmra.mxu1 %vm2228_vm12, %v2199_v43  ;;  %v7383_v44 = vpop.f32.mrf.mxu0  ;;  %v911_v30 = vpop.permute.xlu0 %910 }
 0x1d6   : > { %v2543_v39 = vcombine.high %v2447_v34, %v2447_v34  ;;  %v2550_v40 = vrot.slane %v2447_v34, %v8831_v13  ;;  %v2445_v42 = vmax.f32 %v2319_v37, 0.0  ;;  %v897_v29 = vpop.permute.xlu1 %896  ;;  %987 = vst.msk [vmem:[#allocation3 + $0xa0] sm:$0xff] %vm10387_vm5, %v911_v30  ;;  %v2330_v48 = vadd.f32 %v7383_v44, %v8819_v36 }
 0x1d7   : > { %980 = vst.msk [vmem:[#allocation3 + $0x68] sm:$0xff] %vm10387_vm5, %v897_v29  ;;  %918 = vrot.lane.b32.xlu0 %v8718_v21, %s7790_s26  ;;  %v2321_v29 = vpop.f32.mrf.mxu0 }
 0x1d8   : > { %v2557_v49 = vrot.slane %v2543_v39, %v8831_v13  ;;  %v2558_v50 = vcombine.high %v2550_v40, %v2550_v40  ;;  %v3238_v45 = vsel %vm3181_vm13, %v2550_v40, -inf  ;;  %v2509_v46 = vcombine.high %v2445_v42, %v2445_v42  ;;  %731 = vrot.lane.b32.xlu1 %v8782_v35, %s7789_s25 }
 0x1d9   : > { %v3239_v47 = vrot.slane %v3238_v45, 4  ;;  %v2516_v51 = vrot.slane %v2445_v42, %v8831_v13  ;;  %v899_v61 = vpop.permute.xlu0 %898 }
 0x1da   : > { %v2559_v1 = vcombine.high %v2557_v49, %v2557_v49  ;;  %v3245_v3 = vsel %vm3181_vm13, %v2558_v50, -inf  ;;  %v3252_v53 = vsel %vm3181_vm13, %v2557_v49, -inf  ;;  %v2523_v4 = vrot.slane %v2509_v46, %v8831_v13  ;;  %v913_v5 = vpop.permute.xlu1 %912  ;;  %981 = vst.msk [vmem:[#allocation3 + $0x70] sm:$0xff] %vm10387_vm5, %v899_v61 }
 0x1db   : > { %v3240_v56 = vmax.f32 %v3238_v45, %v3239_v47  ;;  %v3246_v57 = vrot.slane %v3245_v3, 4  ;;  %v3253_v58 = vrot.slane %v3252_v53, 4  ;;  %v2524_v60 = vcombine.high %v2516_v51, %v2516_v51  ;;  %988 = vst.msk [vmem:[#allocation3 + $0xa8] sm:$0xff] %vm10387_vm5, %v913_v5  ;;  %922 = vrot.lane.b32.xlu0 %v8809_v15, %s7790_s26 }
 0x1dc   : > { %v3259_v62 = vsel %vm3181_vm13, %v2559_v1, -inf  ;;  %v2525_v63 = vcombine.high %v2523_v4, %v2523_v4  ;;  %v3182_v21 = vsel %vm3181_vm13, %v2516_v51, -inf  ;;  %v3196_v32 = vsel %vm3181_vm13, %v2523_v4, -inf  ;;  %920 = vrot.lane.b32.xlu1 %v8726_v23, %s7790_s26 }
 0x1dd   : > { %v3241_v2 = vrot.slane %v3240_v56, 2  ;;  %v3247_v7 = vmax.f32 %v3245_v3, %v3246_v57  ;;  %v3254_v18 = vmax.f32 %v3252_v53, %v3253_v58  ;;  %v3260_v33 = vrot.slane %v3259_v62, 4  ;;  %v915_v23 = vpop.permute.xlu0 %914 }
 0x1de   : > { %v3183_v20 = vrot.slane %v3182_v21, 4  ;;  %v3189_v12 = vsel %vm3181_vm13, %v2524_v60, -inf  ;;  %v3197_v16 = vrot.slane %v3196_v32, 4  ;;  %v3203_v6 = vsel %vm3181_vm13, %v2525_v63, -inf  ;;  %v901_v59 = vpop.permute.xlu1 %900  ;;  %989 = vst.msk [vmem:[#allocation3 + $0xb0] sm:$0xff] %vm10387_vm5, %v915_v23 }
 0x1df   : > { %v3242_v25 = vmax.f32 %v3240_v56, %v3241_v2  ;;  %v3248_v11 = vrot.slane %v3247_v7, 2  ;;  %v3255_v38 = vrot.slane %v3254_v18, 2  ;;  %v3261_v26 = vmax.f32 %v3259_v62, %v3260_v33  ;;  %982 = vst.msk [vmem:[#allocation3 + $0x78] sm:$0xff] %vm10387_vm5, %v901_v59  ;;  %1111 = vrot.lane.b32.xlu0 %v8746_v27, %s7791_s27  ;;  %v8892_v59 = vld [vmem:[#allocation2 + $0x151] sm:$0xff] }
 0x1e0   : > { %v3184_v10 = vmax.f32 %v3182_v21, %v3183_v20  ;;  %v3190_v17 = vrot.slane %v3189_v12, 4  ;;  %v3198_v22 = vmax.f32 %v3196_v32, %v3197_v16  ;;  %v3204_v41 = vrot.slane %v3203_v6, 4  ;;  %924 = vrot.lane.b32.xlu1 %v8827_v14, %s7790_s26 }
 0x1e1   : > { %v3243_v24 = vrot.slane %v3242_v25, 1  ;;  %v3249_v43 = vmax.f32 %v3247_v7, %v3248_v11  ;;  %v3256_v34 = vmax.f32 %v3254_v18, %v3255_v38  ;;  %v3262_v37 = vrot.slane %v3261_v26, 2  ;;  %v1088_v47 = vpop.permute.xlu0 %1087 }
 0x1e2   : > { %v3185_v39 = vrot.slane %v3184_v10, 2  ;;  %v3191_v40 = vmax.f32 %v3189_v12, %v3190_v17  ;;  %v3199_v42 = vrot.slane %v3198_v22, 2  ;;  %v3205_v44 = vmax.f32 %v3203_v6, %v3204_v41  ;;  %v917_v30 = vpop.permute.xlu1 %916  ;;  %1172 = vst.msk [vmem:[#allocation3 + $0x60] sm:$0xff] %vm10386_vm6, %v1088_v47 }
 0x1e3   : > { %v3250_v49 = vrot.slane %v3249_v43, 1  ;;  %v3257_v50 = vrot.slane %v3256_v34, 1  ;;  %v3263_v45 = vmax.f32 %v3261_v26, %v3262_v37  ;;  %v2448_v46 = vmax.f32 %v2330_v48, 0.0  ;;  %990 = vst.msk [vmem:[#allocation3 + $0xb8] sm:$0xff] %vm10387_vm5, %v917_v30  ;;  %1115 = vrot.lane.b32.xlu0 %v8640_v52, %s7791_s27  ;;  %v8911_v37 = vld [vmem:[#allocation2 + $0x159] sm:$0xff] }
 0x1e4   : > { %v3186_v51 = vmax.f32 %v3184_v10, %v3185_v39  ;;  %v3192_v1 = vrot.slane %v3191_v40, 2  ;;  %v3200_v3 = vmax.f32 %v3198_v22, %v3199_v42  ;;  %v3206_v53 = vrot.slane %v3205_v44, 2  ;;  %1113 = vrot.lane.b32.xlu1 %v8754_v28, %s7791_s27 }
 0x1e5   : > { %v3244_v27 = vmax.f32 %v3242_v25, %v3243_v24  ;;  %v2322_v4 = vadd.f32 %v8819_v36, %v2321_v29  ;;  %v3264_v5 = vrot.slane %v3263_v45, 1  ;;  %v3251_v60 = vmax.f32 %v3249_v43, %v3250_v49  ;;  %v1104_v63 = vpop.permute.xlu0 %1103 }
 0x1e6   : > { %v3187_v48 = vrot.slane %v3186_v51, 1  ;;  %v3193_v56 = vmax.f32 %v3191_v40, %v3192_v1  ;;  %v3207_v57 = vmax.f32 %v3205_v44, %v3206_v53  ;;  %v1090_v58 = vpop.permute.xlu1 %1089  ;;  %v3201_v61 = vrot.slane %v3200_v3, 1  ;;  %1180 = vst.msk [vmem:[#allocation3 + $0xa0] sm:$0xff] %vm10386_vm6, %v1104_v63 }
 0x1e7   : > { %v2560_v62 = vcombine.high %v2448_v46, %v2448_v46  ;;  %1173 = vst.msk [vmem:[#allocation3 + $0x68] sm:$0xff] %vm10386_vm6, %v1090_v58  ;;  %v3258_v21 = vmax.f32 %v3256_v34, %v3257_v50  ;;  %v2567_v7 = vrot.slane %v2448_v46, %v8831_v13  ;;  %1304 = vrot.lane.b32.xlu0 %v8775_v31, %s7792_s28  ;;  %v8890_v20 = vsel %vm4078_vm14, %v3244_v27, -inf }
 0x1e8   : > { %v3194_v32 = vrot.slane %v3193_v56, 1  ;;  %v3208_v28 = vrot.slane %v3207_v57, 1  ;;  %1117 = vrot.lane.b32.xlu1 %v8649_v54, %s7791_s27  ;;  %v3188_v2 = vmax.f32 %v3186_v51, %v3187_v48  ;;  %v8887_v33 = vmax.f32 %v3263_v45, %v3264_v5 }
 0x1e9   : > { %v2574_v18 = vrot.slane %v2560_v62, %v8831_v13  ;;  %v2446_v16 = vmax.f32 %v2322_v4, 0.0  ;;  %v8895_v25 = vsel %vm4078_vm14, %v3251_v60, -inf  ;;  %v3202_v11 = vmax.f32 %v3200_v3, %v3201_v61  ;;  %v1092_v23 = vpop.permute.xlu0 %1091  ;;  %v8927_v60 = vld [vmem:[#allocation2 + $0x152] sm:$0xff] }
 0x1ea   : > { %v3195_v12 = vmax.f32 %v3193_v56, %v3194_v32  ;;  %v1106_v6 = vpop.permute.xlu1 %1105  ;;  %v2575_v38 = vcombine.high %v2567_v7, %v2567_v7  ;;  %v8899_v31 = vsel %vm4078_vm14, %v3258_v21, -inf  ;;  %v3209_v10 = vmax.f32 %v3207_v57, %v3208_v28  ;;  %1174 = vst.msk [vmem:[#allocation3 + $0x70] sm:$0xff] %vm10386_vm6, %v1092_v23 }
 0x1eb   : > { %v2576_v26 = vcombine.high %v2574_v18, %v2574_v18  ;;  %1181 = vst.msk [vmem:[#allocation3 + $0xa8] sm:$0xff] %vm10386_vm6, %v1106_v6  ;;  %v3266_v17 = vsel %vm3181_vm13, %v2567_v7, -inf  ;;  %v3280_v22 = vsel %vm3181_vm13, %v2574_v18, -inf  ;;  %v4079_v41 = vsel %vm4078_vm14, %v3188_v2, -inf  ;;  %1308 = vrot.lane.b32.xlu0 %v8892_v59, %s7792_s28 }
 0x1ec   : > { %1306 = vrot.lane.b32.xlu1 %v8782_v35, %s7792_s28  ;;  %v4082_v24 = vsel %vm4078_vm14, %v3195_v12, -inf  ;;  %v3267_v43 = vrot.slane %v3266_v17, 4  ;;  %v3273_v34 = vsel %vm3181_vm13, %v2575_v38, -inf  ;;  %v3281_v40 = vrot.slane %v3280_v22, 4 }
 0x1ed   : > { %v3274_v39 = vrot.slane %v3273_v34, 4  ;;  %v3287_v42 = vsel %vm3181_vm13, %v2576_v26, -inf  ;;  %v2526_v44 = vcombine.high %v2446_v16, %v2446_v16  ;;  %v8915_v35 = vsel %vm4078_vm14, %v3202_v11, -inf  ;;  %v1108_v45 = vpop.permute.xlu0 %1107 }
 0x1ee   : > { %v1094_v29 = vpop.permute.xlu1 %1093  ;;  %v3268_v30 = vmax.f32 %v3266_v17, %v3267_v43  ;;  %v3288_v49 = vrot.slane %v3287_v42, 4  ;;  %v2533_v50 = vrot.slane %v2446_v16, %v8831_v13  ;;  %v4084_v46 = vmax.f32 %v4082_v24, %v8895_v25  ;;  %1182 = vst.msk [vmem:[#allocation3 + $0xb0] sm:$0xff] %vm10386_vm6, %v1108_v45  ;;  %v8941_v25 = vld [vmem:[#allocation2 + $0x15a] sm:$0xff] }
 0x1ef   : > { %1175 = vst.msk [vmem:[#allocation3 + $0x78] sm:$0xff] %vm10386_vm6, %v1094_v29  ;;  %v3275_v47 = vmax.f32 %v3273_v34, %v3274_v39  ;;  %v3282_v51 = vmax.f32 %v3280_v22, %v3281_v40  ;;  %v2540_v1 = vrot.slane %v2526_v44, %v8831_v13  ;;  %1497 = vrot.lane.b32.xlu0 %v8809_v15, %s7793_s29  ;;  %v4088_v11 = vsel %vm4078_vm14, %v3209_v10, -inf }
 0x1f0   : > { %1310 = vrot.lane.b32.xlu1 %v8911_v37, %s7792_s28  ;;  %v3269_v3 = vrot.slane %v3268_v30, 2  ;;  %v3289_v53 = vmax.f32 %v3287_v42, %v3288_v49  ;;  %v2541_v27 = vcombine.high %v2533_v50, %v2533_v50  ;;  %v3210_v4 = vsel %vm3181_vm13, %v2533_v50, -inf }
 0x1f1   : > { %v3276_v5 = vrot.slane %v3275_v47, 2  ;;  %v3283_v48 = vrot.slane %v3282_v51, 2  ;;  %v2542_v56 = vcombine.high %v2540_v1, %v2540_v1  ;;  %v3211_v57 = vrot.slane %v3210_v4, 4  ;;  %v1281_v32 = vpop.permute.xlu0 %1280 }
 0x1f2   : > { %v1110_v58 = vpop.permute.xlu1 %1109  ;;  %v3270_v61 = vmax.f32 %v3268_v30, %v3269_v3  ;;  %v3290_v62 = vrot.slane %v3289_v53, 2  ;;  %v3217_v63 = vsel %vm3181_vm13, %v2541_v27, -inf  ;;  %v3224_v21 = vsel %vm3181_vm13, %v2540_v1, -inf  ;;  %1365 = vst.msk [vmem:[#allocation3 + $0x60] sm:$0xff] %vm1352_vm7, %v1281_v32 }
 0x1f3   : > { %1183 = vst.msk [vmem:[#allocation3 + $0xb8] sm:$0xff] %vm10386_vm6, %v1110_v58  ;;  %v3277_v28 = vmax.f32 %v3275_v47, %v3276_v5  ;;  %v3284_v2 = vmax.f32 %v3282_v51, %v3283_v48  ;;  %v3212_v7 = vmax.f32 %v3210_v4, %v3211_v57  ;;  %v3218_v15 = vrot.slane %v3217_v63, 4  ;;  %1501 = vrot.lane.b32.xlu0 %v8927_v60, %s7793_s29 }
 0x1f4   : > { %1499 = vrot.lane.b32.xlu1 %v8827_v14, %s7793_s29  ;;  %v4081_v18 = vmax.f32 %v4079_v41, %v8890_v20  ;;  %v4087_v12 = vmax.f32 %v8915_v35, %v8899_v31  ;;  %v3225_v16 = vrot.slane %v3224_v21, 4  ;;  %v3231_v6 = vsel %vm3181_vm13, %v2542_v56, -inf }
 0x1f5   : > { %v3271_v38 = vrot.slane %v3270_v61, 1  ;;  %v3213_v26 = vrot.slane %v3212_v7, 2  ;;  %v3219_v23 = vmax.f32 %v3217_v63, %v3218_v15  ;;  %v3291_v20 = vmax.f32 %v3289_v53, %v3290_v62  ;;  %v1297_v31 = vpop.permute.xlu0 %1296 }
 0x1f6   : > { %v1283_v17 = vpop.permute.xlu1 %1282  ;;  %v4356_v14 = vsel %vm4355_vm15, %v4084_v46, %v4081_v18  ;;  %v3226_v22 = vmax.f32 %v3224_v21, %v3225_v16  ;;  %v3232_v41 = vrot.slane %v3231_v6, 4  ;;  %v3278_v24 = vrot.slane %v3277_v28, 1  ;;  %1373 = vst.msk [vmem:[#allocation3 + $0xa0] sm:$0xff] %vm1352_vm7, %v1297_v31 }
 0x1f7   : > { %1366 = vst.msk [vmem:[#allocation3 + $0x68] sm:$0xff] %vm1352_vm7, %v1283_v17  ;;  %v3285_v43 = vrot.slane %v3284_v2, 1  ;;  %v3214_v34 = vmax.f32 %v3212_v7, %v3213_v26  ;;  %v3220_v39 = vrot.slane %v3219_v23, 2  ;;  %v4089_v10 = vsel %vm4078_vm14, %v8887_v33, -inf  ;;  %1691 = vrot.lane.b32.xlu0 %v8640_v52, %s7794_s30 }
 0x1f8   : > { %1503 = vrot.lane.b32.xlu1 %v8941_v25, %s7793_s29  ;;  %v3227_v40 = vrot.slane %v3226_v22, 2  ;;  %v3233_v42 = vmax.f32 %v3231_v6, %v3232_v41  ;;  %v4090_v44 = vmax.f32 %v4088_v11, %v4089_v10  ;;  %v3272_v29 = vmax.f32 %v3270_v61, %v3271_v38  ;;  %v8974_v6 = vld [vmem:[#allocation2 + $0x169] sm:$0xff] }
 0x1f9   : > { %v3215_v35 = vrot.slane %v3214_v34, 1  ;;  %v3221_v30 = vmax.f32 %v3219_v23, %v3220_v39  ;;  %v4358_v50 = vsel %vm4357_vm0, %v4087_v12, %v4356_v14  ;;  %v3292_v45 = vrot.slane %v3291_v20, 1  ;;  %v1285_v51 = vpop.permute.xlu0 %1284  ;;  %v9002_v39 = vld [vmem:[#allocation2 + $0x16a] sm:$0xff] }
 0x1fa   : > { %v1299_v49 = vpop.permute.xlu1 %1298  ;;  %v3228_v46 = vmax.f32 %v3226_v22, %v3227_v40  ;;  %v3234_v47 = vrot.slane %v3233_v42, 2  ;;  %v3279_v33 = vmax.f32 %v3277_v28, %v3278_v24  ;;  %v3286_v1 = vmax.f32 %v3284_v2, %v3285_v43  ;;  %1367 = vst.msk [vmem:[#allocation3 + $0x70] sm:$0xff] %vm1352_vm7, %v1285_v51 }
 0x1fb   : > { %1374 = vst.msk [vmem:[#allocation3 + $0xa8] sm:$0xff] %vm1352_vm7, %v1299_v49  ;;  %v3216_v3 = vmax.f32 %v3214_v34, %v3215_v35  ;;  %v3222_v53 = vrot.slane %v3221_v30, 1  ;;  %1695 = vrot.lane.b32.xlu0 %v8693_v8, %s7794_s30  ;;  %v4092_v4 = vsel %vm4078_vm14, %v3272_v29, -inf  ;;  %v4360_v56 = vsel %vm4359_vm1, %v4090_v44, %v4358_v50 }
 0x1fc   : > { %1693 = vrot.lane.b32.xlu1 %v8649_v54, %s7794_s30  ;;  %v3229_v52 = vrot.slane %v3228_v46, 1  ;;  %v3235_v27 = vmax.f32 %v3233_v42, %v3234_v47  ;;  %v3293_v58 = vmax.f32 %v3291_v20, %v3292_v45  ;;  %v4095_v21 = vsel %vm4078_vm14, %v3279_v33, -inf  ;;  %v8986_v20 = vld [vmem:[#allocation2 + $0x171] sm:$0xff] }
 0x1fd   : > { %v3223_v5 = vmax.f32 %v3221_v30, %v3222_v53  ;;  %v4091_v48 = vsel %vm4078_vm14, %v3216_v3, -inf  ;;  %v1301_v54 = vpop.permute.xlu0 %1300  ;;  %v4098_v32 = vsel %vm4078_vm14, %v3286_v1, -inf  ;;  %vm10388_vm6 = vcmask 1046534  }
 0x1fe   : > { %v1287_v57 = vpop.permute.xlu1 %1286  ;;  %v3230_v61 = vmax.f32 %v3228_v46, %v3229_v52  ;;  %v3236_v62 = vrot.slane %v3235_v27, 1  ;;  %v4093_v63 = vmax.f32 %v4091_v48, %v4092_v4  ;;  %1375 = vst.msk [vmem:[#allocation3 + $0xb0] sm:$0xff] %vm1352_vm7, %v1301_v54  ;;  %v4101_v11 = vsel %vm4078_vm14, %v3293_v58, -inf }
 0x1ff   : > { %1368 = vst.msk [vmem:[#allocation3 + $0x78] sm:$0xff] %vm1352_vm7, %v1287_v57  ;;  %v4094_v28 = vsel %vm4078_vm14, %v3223_v5, -inf  ;;  %1884 = vrot.lane.b32.xlu0 %v8892_v59, %s7795_s12  ;;  %vm10389_vm5 = vcmask 1047559  }
 0x200   : > { %1697 = vrot.lane.b32.xlu1 %v8698_v9, %s7794_s30  ;;  %v3237_v2 = vmax.f32 %v3235_v27, %v3236_v62  ;;  %v4096_v7 = vmax.f32 %v4094_v28, %v4095_v21  ;;  %v4097_v15 = vsel %vm4078_vm14, %v3230_v61, -inf  ;;  %v4362_v18 = vsel %vm4361_vm2, %v4093_v63, %v4360_v56 }
 0x201   : > { %v4099_v12 = vmax.f32 %v4097_v15, %v4098_v32  ;;  %v1474_v23 = vpop.permute.xlu0 %1473 }
 0x202   : > { %v1303_v16 = vpop.permute.xlu1 %1302  ;;  %v4100_v38 = vsel %vm4078_vm14, %v3237_v2, -inf  ;;  %v4364_v26 = vsel %vm10390_vm3, %v4096_v7, %v4362_v18  ;;  %1558 = vst.msk [vmem:[#allocation3 + $0x60] sm:$0xff] %vm1545_vm8, %v1474_v23 }
 0x203   : > { %1376 = vst.msk [vmem:[#allocation3 + $0xb8] sm:$0xff] %vm1352_vm7, %v1303_v16  ;;  %v4102_v17 = vmax.f32 %v4100_v38, %v4101_v11  ;;  %v4366_v14 = vsel %vm10388_vm6, %v4099_v12, %v4364_v26  ;;  %1888 = vrot.lane.b32.xlu0 %v8974_v6, %s7795_s12 }
 0x204   : > { %1886 = vrot.lane.b32.xlu1 %v8911_v37, %s7795_s12 }
 0x205   : > { %v4368_v22 = vsel %vm10389_vm5, %v4102_v17, %v4366_v14  ;;  %v1490_v31 = vpop.permute.xlu0 %1489 }
 0x206   : > { %v1476_v41 = vpop.permute.xlu1 %1475  ;;  %4427 = vst.msk [vmem:[#allocation4 + $0x11] sm:$0xff] %vm4078_vm14, %v4368_v22 }
 0x207   : > { %1559 = vst.msk [vmem:[#allocation3 + $0x68] sm:$0xff] %vm1545_vm8, %v1476_v41  ;;  %1566 = vst.msk [vmem:[#allocation3 + $0xa0] sm:$0xff] %vm1545_vm8, %v1490_v31  ;;  %2077 = vrot.lane.b32.xlu0 %v8927_v60, %s7797_s15  ;;  %v9059_v41 = vld [vmem:[#allocation2 + $0x180] sm:$0xff] }
 0x208   : > { %1890 = vrot.lane.b32.xlu1 %v8986_v20, %s7795_s12 }
 0x209   : > { %v1478_v43 = vpop.permute.xlu0 %1477 }
 0x20a   : > { %v1492_v24 = vpop.permute.xlu1 %1491  ;;  %1560 = vst.msk [vmem:[#allocation3 + $0x70] sm:$0xff] %vm1545_vm8, %v1478_v43 }
 0x20b   : > { %1567 = vst.msk [vmem:[#allocation3 + $0xa8] sm:$0xff] %vm1545_vm8, %v1492_v24  ;;  %733 = vrot.lane.b32.xlu0 %v8892_v59, %s7789_s25  ;;  %v9018_v59 = vld [vmem:[#allocation2 + $0x172] sm:$0xff] }
 0x20c   : > { %2079 = vrot.lane.b32.xlu1 %v8941_v25, %s7797_s15 }
 0x20d   : > { %v9004_v10 = vld [vmem:[#allocation4 + $0x11] sm:$0xff]  ;;  %v1494_v42 = vpop.permute.xlu0 %1493 }
 0x20e   : > { %v1480_v34 = vpop.permute.xlu1 %1479  ;;  %v9006_v40 = vld [vmem:[#allocation4 + $0x10] sm:$0xff]  ;;  %4606 = vst.msk [vmem:[#allocation5 + $0x8] sm:$0xff] %vm4078_vm14, %v9004_v10 }
 0x20f   : > { %1561 = vst.msk [vmem:[#allocation3 + $0x78] sm:$0xff] %vm1545_vm8, %v1480_v34  ;;  %1568 = vst.msk [vmem:[#allocation3 + $0xb0] sm:$0xff] %vm1545_vm8, %v1494_v42  ;;  %2081 = vrot.lane.b32.xlu0 %v9002_v39, %s7797_s15 }
 0x210   : > { %4444 = vst.msk [vmem:[#allocation5 + $0x18] sm:$0xff] %vm4078_vm14, %v9006_v40  ;;  %735 = vrot.lane.b32.xlu1 %v8911_v37, %s7789_s25 }
 0x211   : > { %v1668_v29 = vpop.permute.xlu0 %1667 }
 0x212   : > { %v1496_v44 = vpop.permute.xlu1 %1495  ;;  %1752 = vst.msk [vmem:[#allocation3 + $0x60] sm:$0xff] %vm1739_vm9, %v1668_v29 }
 0x213   : > { %1569 = vst.msk [vmem:[#allocation3 + $0xb8] sm:$0xff] %vm1545_vm8, %v1496_v44  ;;  %737 = vrot.lane.b32.xlu0 %v8974_v6, %s7789_s25 }
 0x214   : > { %2083 = vrot.lane.b32.xlu1 %v9018_v59, %s7797_s15 }
 0x215   : > { %v7386_v35 = vpop.f32.mrf.mxu0  ;;  %v1684_v49 = vpop.permute.xlu0 %1683 }
 0x216   : > { %v2343_v37 = vadd.f32 %v7386_v35, %v8819_v36  ;;  %v1670_v30 = vpop.permute.xlu1 %1669  ;;  %1760 = vst.msk [vmem:[#allocation3 + $0xa0] sm:$0xff] %vm1739_vm9, %v1684_v49 }
 0x217   : > { %1753 = vst.msk [vmem:[#allocation3 + $0x68] sm:$0xff] %vm1739_vm9, %v1670_v30  ;;  %v2334_v50 = vpop.f32.mrf.mxu0  ;;  %926 = vrot.lane.b32.xlu0 %v8927_v60, %s7790_s26 }
 0x218   : > { %v2451_v45 = vmax.f32 %v2343_v37, 0.0  ;;  %v2335_v46 = vadd.f32 %v8819_v36, %v2334_v50  ;;  %739 = vrot.lane.b32.xlu1 %v8986_v20, %s7789_s25 }
 0x219   : > { %v7387_v1 = vpop.f32.mrf.mxu0  ;;  %v1672_v53 = vpop.permute.xlu0 %1671 }
 0x21a   : > { %v2611_v47 = vcombine.high %v2451_v45, %v2451_v45  ;;  %v2618_v51 = vrot.slane %v2451_v45, %v8831_v13  ;;  %v2449_v33 = vmax.f32 %v2335_v46, 0.0  ;;  %v1686_v3 = vpop.permute.xlu1 %1685  ;;  %1754 = vst.msk [vmem:[#allocation3 + $0x70] sm:$0xff] %vm1739_vm9, %v1672_v53  ;;  %v2346_v56 = vadd.f32 %v7387_v1, %v8819_v36  ;;  %v9067_v45 = vld [vmem:[#allocation2 + $0x188] sm:$0xff] }
 0x21b   : > { %1761 = vst.msk [vmem:[#allocation3 + $0xa8] sm:$0xff] %vm1739_vm9, %v1686_v3  ;;  %930 = vrot.lane.b32.xlu0 %v9002_v39, %s7790_s26  ;;  %v2337_v1 = vpop.f32.mrf.mxu0 }
 0x21c   : > { %v2625_v52 = vrot.slane %v2611_v47, %v8831_v13  ;;  %v2626_v27 = vcombine.high %v2618_v51, %v2618_v51  ;;  %v3350_v4 = vsel %vm3181_vm13, %v2618_v51, -inf  ;;  %v2577_v5 = vcombine.high %v2449_v33, %v2449_v33  ;;  %928 = vrot.lane.b32.xlu1 %v8941_v25, %s7790_s26 }
 0x21d   : > { %v3351_v60 = vrot.slane %v3350_v4, 4  ;;  %v2584_v48 = vrot.slane %v2449_v33, %v8831_v13  ;;  %v1688_v28 = vpop.permute.xlu0 %1687 }
 0x21e   : > { %v2627_v57 = vcombine.high %v2625_v52, %v2625_v52  ;;  %v3357_v58 = vsel %vm3181_vm13, %v2626_v27, -inf  ;;  %v3364_v61 = vsel %vm3181_vm13, %v2625_v52, -inf  ;;  %v2591_v62 = vrot.slane %v2577_v5, %v8831_v13  ;;  %v1674_v63 = vpop.permute.xlu1 %1673  ;;  %1762 = vst.msk [vmem:[#allocation3 + $0xb0] sm:$0xff] %vm1739_vm9, %v1688_v28 }
 0x21f   : > { %v3352_v54 = vmax.f32 %v3350_v4, %v3351_v60  ;;  %v3358_v21 = vrot.slane %v3357_v58, 4  ;;  %v3365_v32 = vrot.slane %v3364_v61, 4  ;;  %v2592_v25 = vcombine.high %v2584_v48, %v2584_v48  ;;  %1755 = vst.msk [vmem:[#allocation3 + $0x78] sm:$0xff] %vm1739_vm9, %v1674_v63  ;;  %1119 = vrot.lane.b32.xlu0 %v8693_v8, %s7791_s27 }
 0x220   : > { %v3371_v2 = vsel %vm3181_vm13, %v2627_v57, -inf  ;;  %v2593_v7 = vcombine.high %v2591_v62, %v2591_v62  ;;  %v3294_v15 = vsel %vm3181_vm13, %v2584_v48, -inf  ;;  %v3308_v18 = vsel %vm3181_vm13, %v2591_v62, -inf  ;;  %932 = vrot.lane.b32.xlu1 %v9018_v59, %s7790_s26 }
 0x221   : > { %v3353_v12 = vrot.slane %v3352_v54, 2  ;;  %v3359_v16 = vmax.f32 %v3357_v58, %v3358_v21  ;;  %v3366_v11 = vmax.f32 %v3364_v61, %v3365_v32  ;;  %v3372_v38 = vrot.slane %v3371_v2, 4  ;;  %v1861_v42 = vpop.permute.xlu0 %1860  ;;  %v9076_v32 = vld [vmem:[#allocation2 + $0x181] sm:$0xff] }
 0x222   : > { %v3295_v26 = vrot.slane %v3294_v15, 4  ;;  %v3301_v23 = vsel %vm3181_vm13, %v2592_v25, -inf  ;;  %v3309_v17 = vrot.slane %v3308_v18, 4  ;;  %v3315_v14 = vsel %vm3181_vm13, %v2593_v7, -inf  ;;  %v1690_v22 = vpop.permute.xlu1 %1689  ;;  %1945 = vst.msk [vmem:[#allocation3 + $0x60] sm:$0xff] %vm1932_vm10, %v1861_v42 }
 0x223   : > { %v3354_v31 = vmax.f32 %v3352_v54, %v3353_v12  ;;  %v3360_v24 = vrot.slane %v3359_v16, 2  ;;  %v3367_v43 = vrot.slane %v3366_v11, 2  ;;  %v3373_v34 = vmax.f32 %v3371_v2, %v3372_v38  ;;  %1763 = vst.msk [vmem:[#allocation3 + $0xb8] sm:$0xff] %vm1739_vm9, %v1690_v22  ;;  %1123 = vrot.lane.b32.xlu0 %v9059_v41, %s7791_s27 }
 0x224   : > { %v3296_v44 = vmax.f32 %v3294_v15, %v3295_v26  ;;  %v3302_v29 = vrot.slane %v3301_v23, 4  ;;  %v3310_v35 = vmax.f32 %v3308_v18, %v3309_v17  ;;  %v3316_v8 = vrot.slane %v3315_v14, 4  ;;  %1121 = vrot.lane.b32.xlu1 %v8698_v9, %s7791_s27 }
 0x225   : > { %v3355_v37 = vrot.slane %v3354_v31, 1  ;;  %v3361_v30 = vmax.f32 %v3359_v16, %v3360_v24  ;;  %v3368_v49 = vmax.f32 %v3366_v11, %v3367_v43  ;;  %v3374_v50 = vrot.slane %v3373_v34, 2  ;;  %v1877_v9 = vpop.permute.xlu0 %1876  ;;  %v9086_v11 = vld [vmem:[#allocation2 + $0x189] sm:$0xff] }
 0x226   : > { %v3297_v46 = vrot.slane %v3296_v44, 2  ;;  %v3303_v47 = vmax.f32 %v3301_v23, %v3302_v29  ;;  %v3311_v51 = vrot.slane %v3310_v35, 2  ;;  %v3317_v33 = vmax.f32 %v3315_v14, %v3316_v8  ;;  %v1863_v3 = vpop.permute.xlu1 %1862  ;;  %1953 = vst.msk [vmem:[#allocation3 + $0xa0] sm:$0xff] %vm1932_vm10, %v1877_v9 }
 0x227   : > { %v3362_v53 = vrot.slane %v3361_v30, 1  ;;  %v3369_v52 = vrot.slane %v3368_v49, 1  ;;  %v3375_v27 = vmax.f32 %v3373_v34, %v3374_v50  ;;  %v2452_v4 = vmax.f32 %v2346_v56, 0.0  ;;  %1946 = vst.msk [vmem:[#allocation3 + $0x68] sm:$0xff] %vm1932_vm10, %v1863_v3  ;;  %1312 = vrot.lane.b32.xlu0 %v8974_v6, %s7792_s28 }
 0x228   : > { %v3298_v5 = vmax.f32 %v3296_v44, %v3297_v46  ;;  %v3304_v60 = vrot.slane %v3303_v47, 2  ;;  %v3312_v48 = vmax.f32 %v3310_v35, %v3311_v51  ;;  %v3318_v57 = vrot.slane %v3317_v33, 2  ;;  %1125 = vrot.lane.b32.xlu1 %v9067_v45, %s7791_s27 }
 0x229   : > { %v3356_v58 = vmax.f32 %v3354_v31, %v3355_v37  ;;  %v2338_v61 = vadd.f32 %v8819_v36, %v2337_v1  ;;  %v3376_v62 = vrot.slane %v3375_v27, 1  ;;  %v3363_v25 = vmax.f32 %v3361_v30, %v3362_v53  ;;  %v1865_v7 = vpop.permute.xlu0 %1864 }
 0x22a   : > { %v3299_v56 = vrot.slane %v3298_v5, 1  ;;  %v3305_v63 = vmax.f32 %v3303_v47, %v3304_v60  ;;  %v3319_v54 = vmax.f32 %v3317_v33, %v3318_v57  ;;  %v1879_v21 = vpop.permute.xlu1 %1878  ;;  %v3313_v28 = vrot.slane %v3312_v48, 1  ;;  %1947 = vst.msk [vmem:[#allocation3 + $0x70] sm:$0xff] %vm1932_vm10, %v1865_v7  ;;  %v9115_v33 = vld [vmem:[#allocation2 + $0x182] sm:$0xff] }
 0x22b   : > { %v2628_v2 = vcombine.high %v2452_v4, %v2452_v4  ;;  %1954 = vst.msk [vmem:[#allocation3 + $0xa8] sm:$0xff] %vm1932_vm10, %v1879_v21  ;;  %v3370_v15 = vmax.f32 %v3368_v49, %v3369_v52  ;;  %v2635_v6 = vrot.slane %v2452_v4, %v8831_v13  ;;  %1316 = vrot.lane.b32.xlu0 %v9076_v32, %s7792_s28  ;;  %v9091_v26 = vsel %vm4078_vm14, %v3356_v58, -inf }
 0x22c   : > { %v3306_v18 = vrot.slane %v3305_v63, 1  ;;  %v3320_v12 = vrot.slane %v3319_v54, 1  ;;  %1314 = vrot.lane.b32.xlu1 %v8986_v20, %s7792_s28  ;;  %v3300_v36 = vmax.f32 %v3298_v5, %v3299_v56  ;;  %v9088_v38 = vmax.f32 %v3375_v27, %v3376_v62 }
 0x22d   : > { %v2642_v16 = vrot.slane %v2628_v2, %v8831_v13  ;;  %v2450_v17 = vmax.f32 %v2338_v61, 0.0  ;;  %v9094_v20 = vsel %vm4078_vm14, %v3363_v25, -inf  ;;  %v3314_v22 = vmax.f32 %v3312_v48, %v3313_v28  ;;  %v1881_v43 = vpop.permute.xlu0 %1880  ;;  %v9131_v61 = vld [vmem:[#allocation2 + $0x18a] sm:$0xff] }
 0x22e   : > { %v3307_v23 = vmax.f32 %v3305_v63, %v3306_v18  ;;  %v1867_v14 = vpop.permute.xlu1 %1866  ;;  %v2643_v31 = vcombine.high %v2635_v6, %v2635_v6  ;;  %v9098_v34 = vsel %vm4078_vm14, %v3370_v15, -inf  ;;  %v3321_v42 = vmax.f32 %v3319_v54, %v3320_v12  ;;  %1955 = vst.msk [vmem:[#allocation3 + $0xb0] sm:$0xff] %vm1932_vm10, %v1881_v43  ;;  %v1609_v43 = vld [vmem:[#allocation2 + $0x198] sm:$0xff] }
 0x22f   : > { %v2644_v24 = vcombine.high %v2642_v16, %v2642_v16  ;;  %1948 = vst.msk [vmem:[#allocation3 + $0x78] sm:$0xff] %vm1932_vm10, %v1867_v14  ;;  %v3378_v44 = vsel %vm3181_vm13, %v2635_v6, -inf  ;;  %v3392_v29 = vsel %vm3181_vm13, %v2642_v16, -inf  ;;  %v9106_v35 = vsel %vm4078_vm14, %v3300_v36, -inf  ;;  %1505 = vrot.lane.b32.xlu0 %v9002_v39, %s7793_s29 }
 0x230   : > { %1318 = vrot.lane.b32.xlu1 %v9086_v11, %s7792_s28  ;;  %v9109_v8 = vsel %vm4078_vm14, %v3307_v23, -inf  ;;  %v3379_v37 = vrot.slane %v3378_v44, 4  ;;  %v3385_v30 = vsel %vm3181_vm13, %v2643_v31, -inf  ;;  %v3393_v50 = vrot.slane %v3392_v29, 4 }
 0x231   : > { %v3386_v49 = vrot.slane %v3385_v30, 4  ;;  %v3399_v46 = vsel %vm3181_vm13, %v2644_v24, -inf  ;;  %v2594_v47 = vcombine.high %v2450_v17, %v2450_v17  ;;  %v9118_v1 = vsel %vm4078_vm14, %v3314_v22, -inf  ;;  %v2054_v27 = vpop.permute.xlu0 %2053 }
 0x232   : > { %v1883_v51 = vpop.permute.xlu1 %1882  ;;  %v3380_v3 = vmax.f32 %v3378_v44, %v3379_v37  ;;  %v3400_v53 = vrot.slane %v3399_v46, 4  ;;  %v2601_v52 = vrot.slane %v2450_v17, %v8831_v13  ;;  %v4108_v39 = vmax.f32 %v9109_v8, %v9094_v20  ;;  %2138 = vst.msk [vmem:[#allocation3 + $0x60] sm:$0xff] %vm2125_vm11, %v2054_v27 }
 0x233   : > { %1956 = vst.msk [vmem:[#allocation3 + $0xb8] sm:$0xff] %vm1932_vm10, %v1883_v51  ;;  %v3387_v4 = vmax.f32 %v3385_v30, %v3386_v49  ;;  %v3394_v9 = vmax.f32 %v3392_v29, %v3393_v50  ;;  %v2608_v5 = vrot.slane %v2594_v47, %v8831_v13  ;;  %1509 = vrot.lane.b32.xlu0 %v9115_v33, %s7793_s29  ;;  %v4112_v44 = vsel %vm4078_vm14, %v3321_v42, -inf  ;;  %v1610_v47 = vld [vmem:[#allocation2 + $0x1a0] sm:$0xff] }
 0x234   : > { %1507 = vrot.lane.b32.xlu1 %v9018_v59, %s7793_s29  ;;  %v3381_v60 = vrot.slane %v3380_v3, 2  ;;  %v3401_v48 = vmax.f32 %v3399_v46, %v3400_v53  ;;  %v2609_v57 = vcombine.high %v2601_v52, %v2601_v52  ;;  %v3322_v58 = vsel %vm3181_vm13, %v2601_v52, -inf }
 0x235   : > { %v3388_v62 = vrot.slane %v3387_v4, 2  ;;  %v3395_v56 = vrot.slane %v3394_v9, 2  ;;  %v2610_v63 = vcombine.high %v2608_v5, %v2608_v5  ;;  %v3323_v54 = vrot.slane %v3322_v58, 4  ;;  %v2070_v7 = vpop.permute.xlu0 %2069 }
 0x236   : > { %v2056_v21 = vpop.permute.xlu1 %2055  ;;  %v3382_v25 = vmax.f32 %v3380_v3, %v3381_v60  ;;  %v3402_v28 = vrot.slane %v3401_v48, 2  ;;  %v3329_v2 = vsel %vm3181_vm13, %v2609_v57, -inf  ;;  %v3336_v59 = vsel %vm3181_vm13, %v2608_v5, -inf  ;;  %2146 = vst.msk [vmem:[#allocation3 + $0xa0] sm:$0xff] %vm2125_vm11, %v2070_v7  ;;  %v1802_v7 = vld [vmem:[#allocation2 + $0x199] sm:$0xff] }
 0x237   : > { %2139 = vst.msk [vmem:[#allocation3 + $0x68] sm:$0xff] %vm2125_vm11, %v2056_v21  ;;  %v3389_v15 = vmax.f32 %v3387_v4, %v3388_v62  ;;  %v3396_v18 = vmax.f32 %v3394_v9, %v3395_v56  ;;  %v3324_v12 = vmax.f32 %v3322_v58, %v3323_v54  ;;  %v3330_v36 = vrot.slane %v3329_v2, 4  ;;  %1699 = vrot.lane.b32.xlu0 %v9059_v41, %s7794_s30 }
 0x238   : > { %1511 = vrot.lane.b32.xlu1 %v9131_v61, %s7793_s29  ;;  %v4105_v6 = vmax.f32 %v9106_v35, %v9091_v26  ;;  %v3403_v16 = vmax.f32 %v3401_v48, %v3402_v28  ;;  %v3337_v23 = vrot.slane %v3336_v59, 4  ;;  %v3343_v17 = vsel %vm3181_vm13, %v2610_v63, -inf }
 0x239   : > { %v4111_v14 = vmax.f32 %v9118_v1, %v9098_v34  ;;  %v3383_v20 = vrot.slane %v3382_v25, 1  ;;  %v3325_v22 = vrot.slane %v3324_v12, 2  ;;  %v3331_v31 = vmax.f32 %v3329_v2, %v3330_v36  ;;  %v726_v35 = vpop.permute.xlu0 %725  ;;  %v2170_v51 = vld [vmem:[#allocation3 + $0x60] sm:$0xff] }
 0x23a   : > { %v2072_v24 = vpop.permute.xlu1 %2071  ;;  %v3390_v29 = vrot.slane %v3389_v15, 1  ;;  %v3338_v8 = vmax.f32 %v3336_v59, %v3337_v23  ;;  %v3344_v26 = vrot.slane %v3343_v17, 4  ;;  %v4369_v37 = vsel %vm4355_vm15, %v4108_v39, %v4105_v6  ;;  %798 = vst.msk [vmem:[#allocation3 + $0xc0] sm:$0xff] %vm773_vm4, %v726_v35 }
 0x23b   : > { %2147 = vst.msk [vmem:[#allocation3 + $0xa8] sm:$0xff] %vm2125_vm11, %v2072_v24  ;;  %v3397_v30 = vrot.slane %v3396_v18, 1  ;;  %v3326_v41 = vmax.f32 %v3324_v12, %v3325_v22  ;;  %v3332_v49 = vrot.slane %v3331_v31, 2  ;;  %v4113_v34 = vsel %vm4078_vm14, %v9088_v38, -inf  ;;  %1703 = vrot.lane.b32.xlu0 %v1609_v43, %s7794_s30  ;;  %v1803_v24 = vld [vmem:[#allocation2 + $0x1a1] sm:$0xff] }
 0x23c   : > { %1701 = vrot.lane.b32.xlu1 %v9067_v45, %s7794_s30  ;;  %v3404_v42 = vrot.slane %v3403_v16, 1  ;;  %v3339_v50 = vrot.slane %v3338_v8, 2  ;;  %v3345_v46 = vmax.f32 %v3343_v17, %v3344_v26  ;;  %v4114_v1 = vmax.f32 %v4112_v44, %v4113_v34  ;;  %v1995_v34 = vld [vmem:[#allocation2 + $0x19a] sm:$0xff] }
 0x23d   : > { %v3384_v3 = vmax.f32 %v3382_v25, %v3383_v20  ;;  %v3327_v53 = vrot.slane %v3326_v41, 1  ;;  %v3333_v52 = vmax.f32 %v3331_v31, %v3332_v49  ;;  %v4370_v4 = vsel %vm4357_vm0, %v4111_v14, %v4369_v37  ;;  %v2058_v38 = vpop.permute.xlu0 %2057  ;;  %v2178_v62 = vld [vmem:[#allocation3 + $0xa0] sm:$0xff] }
 0x23e   : > { %v728_v27 = vpop.permute.xlu1 %727  ;;  %v2171_v39 = vld [vmem:[#allocation3 + $0x68] sm:$0xff]  ;;  %v3391_v9 = vmax.f32 %v3389_v15, %v3390_v29  ;;  %v3340_v45 = vmax.f32 %v3338_v8, %v3339_v50  ;;  %v3346_v5 = vrot.slane %v3345_v46, 2  ;;  %v3398_v60 = vmax.f32 %v3396_v18, %v3397_v30  ;;  %2140 = vst.msk [vmem:[#allocation3 + $0x70] sm:$0xff] %vm2125_vm11, %v2058_v38 }
 0x23f   : > { %799 = vst.msk [vmem:[#allocation3 + $0xc8] sm:$0xff] %vm773_vm4, %v728_v27  ;;  %v3328_v48 = vmax.f32 %v3326_v41, %v3327_v53  ;;  %v3334_v57 = vrot.slane %v3333_v52, 1  ;;  %v2196_v58 = vpack.c.bf16 %v2171_v39, %v2170_v51  ;;  %v3405_v56 = vmax.f32 %v3403_v16, %v3404_v42  ;;  %1892 = vrot.lane.b32.xlu0 %v9076_v32, %s7795_s12  ;;  %v4451_v27 = vld [vmem:[#allocation4 + $0x1] sm:$0xff] }
 0x240   : > { %1705 = vrot.lane.b32.xlu1 %v1610_v47, %s7794_s30  ;;  %v3341_v63 = vrot.slane %v3340_v45, 1  ;;  %v3347_v54 = vmax.f32 %v3345_v46, %v3346_v5  ;;  %v4116_v21 = vsel %vm4078_vm14, %v3384_v3, -inf  ;;  %v4371_v2 = vsel %vm4359_vm1, %v4114_v1, %v4370_v4 }
 0x241   : > { %v3335_v25 = vmax.f32 %v3333_v52, %v3334_v57  ;;  %v4115_v28 = vsel %vm4078_vm14, %v3328_v48, -inf  ;;  %7392 = vmatprep.mubr.msk.bf16.mxu0 %vm2228_vm12, %v2196_v58  ;;  %v2074_v6 = vpop.permute.xlu0 %2073  ;;  %v4119_v32 = vsel %vm4078_vm14, %v3391_v9, -inf  ;;  %v4122_v23 = vsel %vm4078_vm14, %v3398_v60, -inf  ;;  %v9196_v52 = vld [vmem:[#allocation4 + $0x12] sm:$0xff]  ;;  %v4500_v58 = vld [vmem:[#allocation4 + $0x2] sm:$0xff] }
 0x242   : > { %v2060_v59 = vpop.permute.xlu1 %2059  ;;  %v2179_v15 = vld [vmem:[#allocation3 + $0xa8] sm:$0xff]  ;;  %v3342_v18 = vmax.f32 %v3340_v45, %v3341_v63  ;;  %v3348_v12 = vrot.slane %v3347_v54, 1  ;;  %v4117_v36 = vmax.f32 %v4115_v28, %v4116_v21  ;;  %2148 = vst.msk [vmem:[#allocation3 + $0xb0] sm:$0xff] %vm2125_vm11, %v2074_v6  ;;  %v4125_v29 = vsel %vm4078_vm14, %v3405_v56, -inf }
 0x243   : > { %2141 = vst.msk [vmem:[#allocation3 + $0x78] sm:$0xff] %vm2125_vm11, %v2060_v59  ;;  %v2200_v16 = vpack.c.bf16 %v2179_v15, %v2178_v62  ;;  %v4118_v17 = vsel %vm4078_vm14, %v3335_v25, -inf  ;;  %1896 = vrot.lane.b32.xlu0 %v1802_v7, %s7795_s12  ;;  %v4435_v15 = vld [vmem:[#allocation4] sm:$0xff] }
 0x244   : > { %1894 = vrot.lane.b32.xlu1 %v9086_v11, %s7795_s12  ;;  %v3349_v14 = vmax.f32 %v3347_v54, %v3348_v12  ;;  %v4120_v20 = vmax.f32 %v4118_v17, %v4119_v32  ;;  %v4121_v22 = vsel %vm4078_vm14, %v3342_v18, -inf  ;;  %v4372_v31 = vsel %vm4361_vm2, %v4117_v36, %v4371_v2  ;;  %4443 = vst.msk [vmem:[#allocation5] sm:$0xff] %vm4078_vm14, %v4435_v15 }
 0x245   : > { %7400 = vmatprep.mubr.msk.bf16.mxu1 %vm2228_vm12, %v2200_v16  ;;  %v4123_v43 = vmax.f32 %v4121_v22, %v4122_v23  ;;  %v730_v11 = vpop.permute.xlu0 %729  ;;  %v2172_v30 = vld [vmem:[#allocation3 + $0x70] sm:$0xff] }
 0x246   : > { %v2076_v44 = vpop.permute.xlu1 %2075  ;;  %v4124_v8 = vsel %vm4078_vm14, %v3349_v14, -inf  ;;  %v4373_v26 = vsel %vm10390_vm3, %v4120_v20, %v4372_v31  ;;  %800 = vst.msk [vmem:[#allocation3 + $0xd0] sm:$0xff] %vm773_vm4, %v730_v11 }
 0x247   : > { %2149 = vst.msk [vmem:[#allocation3 + $0xb8] sm:$0xff] %vm2125_vm11, %v2076_v44  ;;  %v4126_v35 = vmax.f32 %v4124_v8, %v4125_v29  ;;  %v4374_v37 = vsel %vm10388_vm6, %v4123_v43, %v4373_v26  ;;  %2085 = vrot.lane.b32.xlu0 %v9115_v33, %s7797_s15  ;;  %vm10393_vm6 = vcmask 72752   ;;  %v1996_v33 = vld [vmem:[#allocation2 + $0x1a2] sm:$0xff] }
 0x248   : > { %1898 = vrot.lane.b32.xlu1 %v1803_v24, %s7795_s12  ;;  %s426_s12 = scalar_lea.vmem %s10385_s11, %s10430_s18 }
 0x249   : > { %v4375_v41 = vsel %vm10389_vm5, %v4126_v35, %v4374_v37  ;;  %v919_v50 = vpop.permute.xlu0 %918  ;;  %v2180_v47 = vld [vmem:[#allocation3 + $0xb0] sm:$0xff]  ;;  %vm10394_vm5 = vmmov %vm10393_vm6 }
 0x24a   : > { %v732_v49 = vpop.permute.xlu1 %731  ;;  %v2173_v42 = vld [vmem:[#allocation3 + $0x78] sm:$0xff]  ;;  %4428 = vst.msk [vmem:[#allocation4 + $0x21] sm:$0xff] %vm4078_vm14, %v4375_v41  ;;  %vm10395_vm3 = vmmov %vm10394_vm5  ;;  %v9255_v41 = vld [vmem:[%s10376_s2] ss:$0 sm:$0xff] }
 0x24b   : > { %801 = vst.msk [vmem:[#allocation3 + $0xd8] sm:$0xff] %vm773_vm4, %v732_v49  ;;  %v2197_v46 = vpack.c.bf16 %v2173_v42, %v2172_v30  ;;  %2089 = vrot.lane.b32.xlu0 %v1995_v34, %s7797_s15 }
 0x24c   : > { %991 = vst.msk [vmem:[#allocation3 + $0xc0] sm:$0xff] %vm10393_vm6, %v919_v50  ;;  %2087 = vrot.lane.b32.xlu1 %v9131_v61, %s7797_s15  ;;  %vm10396_vm6 = vmmov %vm10395_vm3 }
 0x24d   : > { %7393 = vmatmul.mubr.msk.bf16.gmra.mxu0 %vm2228_vm12, %v2197_v46  ;;  %v923_v3 = vpop.permute.xlu0 %922 }
 0x24e   : > { %v921_v51 = vpop.permute.xlu1 %920  ;;  %v2181_v1 = vld [vmem:[#allocation3 + $0xb8] sm:$0xff]  ;;  %993 = vst.msk [vmem:[#allocation3 + $0xd0] sm:$0xff] %vm10395_vm3, %v923_v3 }
 0x24f   : > { %992 = vst.msk [vmem:[#allocation3 + $0xc8] sm:$0xff] %vm10394_vm5, %v921_v51  ;;  %v2201_v53 = vpack.c.bf16 %v2181_v1, %v2180_v47  ;;  %4630 = vrot.lane.b32.xlu0 %v9196_v52, %s7799_s22  ;;  %vm10397_vm5 = vcmask 97352  }
 0x250   : > { %2091 = vrot.lane.b32.xlu1 %v1996_v33, %s7797_s15  ;;  %vm10398_vm3 = vmmov %vm10397_vm5 }
 0x251   : > { %7401 = vmatmul.mubr.msk.bf16.gmra.mxu1 %vm2228_vm12, %v2201_v53  ;;  %v9201_v39 = vld [vmem:[#allocation4 + $0x21] sm:$0xff]  ;;  %v1112_v4 = vpop.permute.xlu0 %1111 }
 0x252   : > { %v925_v61 = vpop.permute.xlu1 %924  ;;  %v4615_v9 = vld [vmem:[#allocation4 + $0x22] sm:$0xff]  ;;  %4607 = vst.msk [vmem:[#allocation5 + $0x20] sm:$0xff] %vm4078_vm14, %v9201_v39 }
 0x253   : > { %994 = vst.msk [vmem:[#allocation3 + $0xd8] sm:$0xff] %vm10396_vm6, %v925_v61  ;;  %v4437_v45 = vld [vmem:[#allocation4 + $0x20] sm:$0xff]  ;;  %4467 = vrot.lane.b32.xlu0 %v4451_v27, %s7799_s22  ;;  %vm10399_vm6 = vmmov %vm10398_vm3 }
 0x254   : > { %v4759_v5 = vld [vmem:[#allocation4 + $0x22] sm:$0xff]  ;;  %1184 = vst.msk [vmem:[#allocation3 + $0xc0] sm:$0xff] %vm10397_vm5, %v1112_v4  ;;  %4632 = vrot.lane.b32.xlu1 %v4615_v9, %s7799_s22  ;;  %vm10400_vm5 = vmmov %vm10398_vm3 }
 0x255   : > { %4445 = vst.msk [vmem:[#allocation5 + $0x30] sm:$0xff] %vm4078_vm14, %v4437_v45  ;;  %4767 = vst.msk [vmem:[#allocation5 + $0x10] sm:$0xff] %vm4078_vm14, %v4759_v5  ;;  %v1116_v60 = vpop.permute.xlu0 %1115  ;;  %v4663_v48 = vld [vmem:[#allocation4 + $0x20] sm:$0xff] }
 0x256   : > { %v1114_v38 = vpop.permute.xlu1 %1113  ;;  %1186 = vst.msk [vmem:[#allocation3 + $0xd0] sm:$0xff] %vm10399_vm6, %v1116_v60 }
 0x257   : > { %1185 = vst.msk [vmem:[#allocation3 + $0xc8] sm:$0xff] %vm10398_vm3, %v1114_v38  ;;  %4679 = vrot.lane.b32.xlu0 %v4663_v48, %s7800_s23  ;;  %vm10401_vm3 = vcmask 72752  }
 0x258   : > { %4469 = vrot.lane.b32.xlu1 %v9004_v10, %s7799_s22  ;;  %vm10402_vm6 = vmmov %vm10401_vm3 }
 0x259   : > { %v1305_v62 = vpop.permute.xlu0 %1304 }
 0x25a   : > { %v1118_v57 = vpop.permute.xlu1 %1117  ;;  %1377 = vst.msk [vmem:[#allocation3 + $0xc0] sm:$0xff] %vm1352_vm7, %v1305_v62 }
 0x25b   : > { %1187 = vst.msk [vmem:[#allocation3 + $0xd8] sm:$0xff] %vm10400_vm5, %v1118_v57  ;;  %4516 = vrot.lane.b32.xlu0 %v4500_v58, %s7800_s23  ;;  %vm10403_vm5 = vmmov %vm10401_vm3 }
 0x25d   : > { %v1309_v63 = vpop.permute.xlu0 %1308 }
 0x25e   : > { %v1307_v56 = vpop.permute.xlu1 %1306  ;;  %1379 = vst.msk [vmem:[#allocation3 + $0xd0] sm:$0xff] %vm1352_vm7, %v1309_v63 }
 0x25f   : > { %1378 = vst.msk [vmem:[#allocation3 + $0xc8] sm:$0xff] %vm1352_vm7, %v1307_v56  ;;  %4727 = vrot.lane.b32.xlu0 %v9201_v39, %s7801_s24 }
 0x261   : > { %v1498_v54 = vpop.permute.xlu0 %1497 }
 0x262   : > { %v1311_v10 = vpop.permute.xlu1 %1310  ;;  %1570 = vst.msk [vmem:[#allocation3 + $0xc0] sm:$0xff] %vm1545_vm8, %v1498_v54 }
 0x263   : > { %1380 = vst.msk [vmem:[#allocation3 + $0xd8] sm:$0xff] %vm1352_vm7, %v1311_v10  ;;  %4565 = vrot.lane.b32.xlu0 %v9006_v40, %s7801_s24 }
 0x265   : > { %v1502_v25 = vpop.permute.xlu0 %1501 }
 0x266   : > { %v1500_v21 = vpop.permute.xlu1 %1499  ;;  %1572 = vst.msk [vmem:[#allocation3 + $0xd0] sm:$0xff] %vm1545_vm8, %v1502_v25 }
 0x267   : > { %1571 = vst.msk [vmem:[#allocation3 + $0xc8] sm:$0xff] %vm1545_vm8, %v1500_v21 }
 0x269   : > { %v1692_v2 = vpop.permute.xlu0 %1691 }
 0x26a   : > { %v1504_v28 = vpop.permute.xlu1 %1503  ;;  %1764 = vst.msk [vmem:[#allocation3 + $0xc0] sm:$0xff] %vm1739_vm9, %v1692_v2 }
 0x26b   : > { %1573 = vst.msk [vmem:[#allocation3 + $0xd8] sm:$0xff] %vm1545_vm8, %v1504_v28 }
 0x26d   : > { %v1696_v7 = vpop.permute.xlu0 %1695 }
 0x26e   : > { %v1694_v59 = vpop.permute.xlu1 %1693  ;;  %1766 = vst.msk [vmem:[#allocation3 + $0xd0] sm:$0xff] %vm1739_vm9, %v1696_v7 }
 0x26f   : > { %1765 = vst.msk [vmem:[#allocation3 + $0xc8] sm:$0xff] %vm1739_vm9, %v1694_v59 }
 0x271   : > { %v1885_v18 = vpop.permute.xlu0 %1884 }
 0x272   : > { %v1698_v40 = vpop.permute.xlu1 %1697  ;;  %1957 = vst.msk [vmem:[#allocation3 + $0xc0] sm:$0xff] %vm1932_vm10, %v1885_v18 }
 0x273   : > { %1767 = vst.msk [vmem:[#allocation3 + $0xd8] sm:$0xff] %vm1739_vm9, %v1698_v40 }
 0x275   : > { %v1889_v36 = vpop.permute.xlu0 %1888 }
 0x276   : > { %v1887_v12 = vpop.permute.xlu1 %1886  ;;  %1959 = vst.msk [vmem:[#allocation3 + $0xd0] sm:$0xff] %vm1932_vm10, %v1889_v36 }
 0x277   : > { %1958 = vst.msk [vmem:[#allocation3 + $0xc8] sm:$0xff] %vm1932_vm10, %v1887_v12 }
 0x279   : > { %v2078_v16 = vpop.permute.xlu0 %2077 }
 0x27a   : > { %v1891_v6 = vpop.permute.xlu1 %1890  ;;  %2150 = vst.msk [vmem:[#allocation3 + $0xc0] sm:$0xff] %vm2125_vm11, %v2078_v16 }
 0x27b   : > { %1960 = vst.msk [vmem:[#allocation3 + $0xd8] sm:$0xff] %vm1932_vm10, %v1891_v6 }
 0x27d   : > { %v734_v23 = vpop.permute.xlu0 %733 }
 0x27e   : > { %v2080_v32 = vpop.permute.xlu1 %2079  ;;  %802 = vst.msk [vmem:[#allocation3 + $0xe0] sm:$0xff] %vm773_vm4, %v734_v23 }
 0x27f   : > { %2151 = vst.msk [vmem:[#allocation3 + $0xc8] sm:$0xff] %vm2125_vm11, %v2080_v32 }
 0x281   : > { %v2082_v14 = vpop.permute.xlu0 %2081  ;;  %v2182_v20 = vld [vmem:[#allocation3 + $0xc0] sm:$0xff] }
 0x282   : > { %v736_v17 = vpop.permute.xlu1 %735  ;;  %2152 = vst.msk [vmem:[#allocation3 + $0xd0] sm:$0xff] %vm2125_vm11, %v2082_v14 }
 0x283   : > { %803 = vst.msk [vmem:[#allocation3 + $0xe8] sm:$0xff] %vm773_vm4, %v736_v17 }
 0x285   : > { %v738_v24 = vpop.permute.xlu0 %737 }
 0x286   : > { %v2084_v22 = vpop.permute.xlu1 %2083  ;;  %v2183_v31 = vld [vmem:[#allocation3 + $0xc8] sm:$0xff]  ;;  %804 = vst.msk [vmem:[#allocation3 + $0xf0] sm:$0xff] %vm773_vm4, %v738_v24 }
 0x287   : > { %2153 = vst.msk [vmem:[#allocation3 + $0xd8] sm:$0xff] %vm2125_vm11, %v2084_v22  ;;  %v2202_v43 = vpack.c.bf16 %v2183_v31, %v2182_v20 }
 0x289   : > { %7404 = vmatprep.mubr.msk.bf16.mxu1 %vm2228_vm12, %v2202_v43  ;;  %v927_v29 = vpop.permute.xlu0 %926  ;;  %v2184_v8 = vld [vmem:[#allocation3 + $0xd0] sm:$0xff] }
 0x28a   : > { %v740_v44 = vpop.permute.xlu1 %739  ;;  %995 = vst.msk [vmem:[#allocation3 + $0xe0] sm:$0xff] %vm10401_vm3, %v927_v29 }
 0x28b   : > { %805 = vst.msk [vmem:[#allocation3 + $0xf8] sm:$0xff] %vm773_vm4, %v740_v44  ;;  %vm10404_vm4 = vmmov %vm10401_vm3  ;;  %vm10405_vm3 = vcmask 97352  }
 0x28d   : > { %v931_v35 = vpop.permute.xlu0 %930 }
 0x28e   : > { %v929_v26 = vpop.permute.xlu1 %928  ;;  %v2185_v11 = vld [vmem:[#allocation3 + $0xd8] sm:$0xff]  ;;  %997 = vst.msk [vmem:[#allocation3 + $0xf0] sm:$0xff] %vm10403_vm5, %v931_v35  ;;  %vm10407_vm5 = vmmov %vm10405_vm3 }
 0x28f   : > { %996 = vst.msk [vmem:[#allocation3 + $0xe8] sm:$0xff] %vm10402_vm6, %v929_v26  ;;  %v2203_v37 = vpack.c.bf16 %v2185_v11, %v2184_v8  ;;  %vm10406_vm6 = vmmov %vm10405_vm3 }
 0x291   : > { %v7390_v30 = vpop.f32.mrf.mxu0  ;;  %7405 = vmatmul.mubr.msk.bf16.gmra.mxu1 %vm2228_vm12, %v2203_v37  ;;  %v1120_v42 = vpop.permute.xlu0 %1119 }
 0x292   : > { %v2359_v49 = vadd.f32 %v9255_v41, %v7390_v30  ;;  %v933_v34 = vpop.permute.xlu1 %932  ;;  %1188 = vst.msk [vmem:[#allocation3 + $0xe0] sm:$0xff] %vm10405_vm3, %v1120_v42 }
 0x293   : > { %998 = vst.msk [vmem:[#allocation3 + $0xf8] sm:$0xff] %vm10404_vm4, %v933_v34  ;;  %v2350_v50 = vpop.f32.mrf.mxu0  ;;  %vm10408_vm4 = vmmov %vm10405_vm3  ;;  %vm10411_vm3 = vcmask 1047559  }
 0x294   : > { %v2455_v46 = vmax.f32 %v2359_v49, 0.0  ;;  %v2351_v47 = vadd.f32 %v9255_v41, %v2350_v50 }
 0x295   : > { %v7391_v33 = vpop.f32.mrf.mxu0  ;;  %v7398_v53 = vpop.f32.mrf.mxu1 }
 0x296   : > { %v2679_v51 = vcombine.high %v2455_v46, %v2455_v46  ;;  %v2686_v1 = vrot.slane %v2455_v46, %v8831_v13  ;;  %v2453_v3 = vmax.f32 %v2351_v47, 0.0  ;;  %v1122_v61 = vpop.permute.xlu1 %1121  ;;  %v1124_v27 = vpop.permute.xlu0 %1123  ;;  %v2362_v48 = vadd.f32 %v9255_v41, %v7391_v33 }
 0x297   : > { %1189 = vst.msk [vmem:[#allocation3 + $0xe8] sm:$0xff] %vm10406_vm6, %v1122_v61  ;;  %v9269_v57 = vadd.f32 %v9255_v41, %v7398_v53 }
 0x298   : > { %v2693_v4 = vrot.slane %v2679_v51, %v8831_v13  ;;  %v2694_v9 = vcombine.high %v2686_v1, %v2686_v1  ;;  %v3462_v45 = vsel %vm3181_vm13, %v2686_v1, -inf  ;;  %v2645_v5 = vcombine.high %v2453_v3, %v2453_v3  ;;  %1190 = vst.msk [vmem:[#allocation3 + $0xf0] sm:$0xff] %vm10407_vm5, %v1124_v27  ;;  %vm10414_vm5 = vmmov %vm10411_vm3 }
 0x299   : > { %v3463_v38 = vrot.slane %v3462_v45, 4  ;;  %v2652_v60 = vrot.slane %v2453_v3, %v8831_v13  ;;  %v2456_v1 = vmax.f32 %v2362_v48, 0.0 }
 0x29a   : > { %v2695_v58 = vcombine.high %v2693_v4, %v2693_v4  ;;  %v3469_v62 = vsel %vm3181_vm13, %v2694_v9, -inf  ;;  %v3476_v56 = vsel %vm3181_vm13, %v2693_v4, -inf  ;;  %v2659_v63 = vrot.slane %v2645_v5, %v8831_v13  ;;  %v1126_v10 = vpop.permute.xlu1 %1125  ;;  %v1313_v2 = vpop.permute.xlu0 %1312 }
 0x29b   : > { %v3464_v54 = vmax.f32 %v3462_v45, %v3463_v38  ;;  %v3470_v21 = vrot.slane %v3469_v62, 4  ;;  %v3477_v25 = vrot.slane %v3476_v56, 4  ;;  %v2660_v28 = vcombine.high %v2652_v60, %v2652_v60  ;;  %1191 = vst.msk [vmem:[#allocation3 + $0xf8] sm:$0xff] %vm10408_vm4, %v1126_v10 }
 0x29c   : > { %v3483_v59 = vsel %vm3181_vm13, %v2695_v58, -inf  ;;  %v2661_v7 = vcombine.high %v2659_v63, %v2659_v63  ;;  %v3406_v15 = vsel %vm3181_vm13, %v2652_v60, -inf  ;;  %v3420_v40 = vsel %vm3181_vm13, %v2659_v63, -inf  ;;  %1381 = vst.msk [vmem:[#allocation3 + $0xe0] sm:$0xff] %vm1352_vm7, %v1313_v2 }
 0x29d   : > { %v3465_v18 = vrot.slane %v3464_v54, 2  ;;  %v3471_v12 = vmax.f32 %v3469_v62, %v3470_v21  ;;  %v3478_v36 = vmax.f32 %v3476_v56, %v3477_v25  ;;  %v3484_v6 = vrot.slane %v3483_v59, 4 }
 0x29e   : > { %v3407_v16 = vrot.slane %v3406_v15, 4  ;;  %v3413_v32 = vsel %vm3181_vm13, %v2660_v28, -inf  ;;  %v3421_v23 = vrot.slane %v3420_v40, 4  ;;  %v3427_v17 = vsel %vm3181_vm13, %v2661_v7, -inf  ;;  %v1315_v14 = vpop.permute.xlu1 %1314  ;;  %v1317_v43 = vpop.permute.xlu0 %1316 }
 0x29f   : > { %v3466_v20 = vmax.f32 %v3464_v54, %v3465_v18  ;;  %v3472_v22 = vrot.slane %v3471_v12, 2  ;;  %v3479_v31 = vrot.slane %v3478_v36, 2  ;;  %v3485_v24 = vmax.f32 %v3483_v59, %v3484_v6  ;;  %1382 = vst.msk [vmem:[#allocation3 + $0xe8] sm:$0xff] %vm1352_vm7, %v1315_v14  ;;  %1383 = vst.msk [vmem:[#allocation3 + $0xf0] sm:$0xff] %vm1352_vm7, %v1317_v43 }
 0x2a0   : > { %v3408_v44 = vmax.f32 %v3406_v15, %v3407_v16  ;;  %v3414_v29 = vrot.slane %v3413_v32, 4  ;;  %v3422_v8 = vmax.f32 %v3420_v40, %v3421_v23  ;;  %v3428_v26 = vrot.slane %v3427_v17, 4 }
 0x2a1   : > { %v3467_v11 = vrot.slane %v3466_v20, 1  ;;  %v3473_v35 = vmax.f32 %v3471_v12, %v3472_v22  ;;  %v3480_v37 = vmax.f32 %v3478_v36, %v3479_v31  ;;  %v3486_v30 = vrot.slane %v3485_v24, 2 }
 0x2a2   : > { %v3409_v49 = vrot.slane %v3408_v44, 2  ;;  %v3415_v34 = vmax.f32 %v3413_v32, %v3414_v29  ;;  %v3423_v42 = vrot.slane %v3422_v8, 2  ;;  %v3429_v50 = vmax.f32 %v3427_v17, %v3428_v26  ;;  %v1319_v46 = vpop.permute.xlu1 %1318  ;;  %v1506_v3 = vpop.permute.xlu0 %1505 }
 0x2a3   : > { %v3474_v47 = vrot.slane %v3473_v35, 1  ;;  %v3481_v33 = vrot.slane %v3480_v37, 1  ;;  %v3487_v51 = vmax.f32 %v3485_v24, %v3486_v30  ;;  %1384 = vst.msk [vmem:[#allocation3 + $0xf8] sm:$0xff] %vm1352_vm7, %v1319_v46  ;;  %v3468_v9 = vmax.f32 %v3466_v20, %v3467_v11 }
 0x2a4   : > { %v3410_v53 = vmax.f32 %v3408_v44, %v3409_v49  ;;  %v3416_v61 = vrot.slane %v3415_v34, 2  ;;  %v3424_v27 = vmax.f32 %v3422_v8, %v3423_v42  ;;  %v3430_v4 = vrot.slane %v3429_v50, 2  ;;  %1574 = vst.msk [vmem:[#allocation3 + $0xe0] sm:$0xff] %vm1545_vm8, %v1506_v3 }
 0x2a5   : > { %v3475_v45 = vmax.f32 %v3473_v35, %v3474_v47  ;;  %v3482_v5 = vmax.f32 %v3480_v37, %v3481_v33  ;;  %v3488_v38 = vrot.slane %v3487_v51, 1  ;;  %v2696_v48 = vcombine.high %v2456_v1, %v2456_v1 }
 0x2a6   : > { %v3411_v60 = vrot.slane %v3410_v53, 1  ;;  %v3417_v58 = vmax.f32 %v3415_v34, %v3416_v61  ;;  %v3425_v62 = vrot.slane %v3424_v27, 1  ;;  %v3431_v56 = vmax.f32 %v3429_v50, %v3430_v4  ;;  %v1508_v63 = vpop.permute.xlu1 %1507  ;;  %v1510_v21 = vpop.permute.xlu0 %1509 }
 0x2a7   : > { %v3489_v10 = vmax.f32 %v3487_v51, %v3488_v38  ;;  %v2463_v54 = vmax.f32 %v9269_v57, 0.0  ;;  %1575 = vst.msk [vmem:[#allocation3 + $0xe8] sm:$0xff] %vm1545_vm8, %v1508_v63  ;;  %1576 = vst.msk [vmem:[#allocation3 + $0xf0] sm:$0xff] %vm1545_vm8, %v1510_v21  ;;  %v9289_v7 = vsel %vm4078_vm14, %v3468_v9, -inf  ;;  %v2703_v15 = vrot.slane %v2456_v1, %v8831_v13 }
 0x2a8   : > { %v3412_v25 = vmax.f32 %v3410_v53, %v3411_v60  ;;  %v3418_v28 = vrot.slane %v3417_v58, 1  ;;  %v3426_v2 = vmax.f32 %v3424_v27, %v3425_v62  ;;  %v3432_v59 = vrot.slane %v3431_v56, 1 }
 0x2a9   : > { %v2710_v40 = vrot.slane %v2696_v48, %v8831_v13  ;;  %v9294_v18 = vsel %vm4078_vm14, %v3475_v45, -inf  ;;  %v9297_v57 = vsel %vm4078_vm14, %v3482_v5, -inf  ;;  %v9303_v16 = vsel %vm4078_vm14, %v3489_v10, -inf }
 0x2aa   : > { %v3419_v12 = vmax.f32 %v3417_v58, %v3418_v28  ;;  %v9300_v36 = vsel %vm4078_vm14, %v3412_v25, -inf  ;;  %v1512_v6 = vpop.permute.xlu1 %1511  ;;  %v2711_v32 = vcombine.high %v2703_v15, %v2703_v15  ;;  %v2815_v17 = vcombine.high %v2463_v54, %v2463_v54  ;;  %v1700_v14 = vpop.permute.xlu0 %1699 }
 0x2ab   : > { %v2712_v23 = vcombine.high %v2710_v40, %v2710_v40  ;;  %1577 = vst.msk [vmem:[#allocation3 + $0xf8] sm:$0xff] %vm1545_vm8, %v1512_v6  ;;  %v3433_v20 = vmax.f32 %v3431_v56, %v3432_v59  ;;  %v9307_v22 = vsel %vm4078_vm14, %v3426_v2, -inf  ;;  %v3490_v31 = vsel %vm3181_vm13, %v2703_v15, -inf }
 0x2ac   : > { %v3504_v24 = vsel %vm3181_vm13, %v2710_v40, -inf  ;;  %1768 = vst.msk [vmem:[#allocation3 + $0xe0] sm:$0xff] %vm1739_vm9, %v1700_v14  ;;  %v4129_v43 = vmax.f32 %v9300_v36, %v9289_v7  ;;  %v4130_v44 = vsel %vm4078_vm14, %v3419_v12, -inf  ;;  %v3491_v29 = vrot.slane %v3490_v31, 4  ;;  %v2382_v7 = vpop.f32.mrf.mxu1 }
 0x2ad   : > { %v3497_v8 = vsel %vm3181_vm13, %v2711_v32, -inf  ;;  %v3505_v11 = vrot.slane %v3504_v24, 4  ;;  %v3511_v35 = vsel %vm3181_vm13, %v2712_v23, -inf  ;;  %v2822_v37 = vrot.slane %v2463_v54, %v8831_v13 }
 0x2ae   : > { %v3498_v26 = vrot.slane %v3497_v8, 4  ;;  %v1702_v30 = vpop.permute.xlu1 %1701  ;;  %v4135_v49 = vmax.f32 %v9307_v22, %v9297_v57  ;;  %v3492_v34 = vmax.f32 %v3490_v31, %v3491_v29  ;;  %v3512_v42 = vrot.slane %v3511_v35, 4  ;;  %v1704_v46 = vpop.permute.xlu0 %1703 }
 0x2af   : > { %v2829_v50 = vrot.slane %v2815_v17, %v8831_v13  ;;  %1769 = vst.msk [vmem:[#allocation3 + $0xe8] sm:$0xff] %vm1739_vm9, %v1702_v30  ;;  %v4132_v47 = vmax.f32 %v4130_v44, %v9294_v18  ;;  %v3506_v51 = vmax.f32 %v3504_v24, %v3505_v11  ;;  %v2830_v1 = vcombine.high %v2822_v37, %v2822_v37  ;;  %v7399_v30 = vpop.f32.mrf.mxu1 }
 0x2b0   : > { %v3499_v33 = vmax.f32 %v3497_v8, %v3498_v26  ;;  %1770 = vst.msk [vmem:[#allocation3 + $0xf0] sm:$0xff] %vm1739_vm9, %v1704_v46  ;;  %v3493_v3 = vrot.slane %v3492_v34, 2  ;;  %v3513_v53 = vmax.f32 %v3511_v35, %v3512_v42  ;;  %v3686_v27 = vsel %vm3181_vm13, %v2822_v37, -inf  ;;  %v2353_v8 = vpop.f32.mrf.mxu0 }
 0x2b1   : > { %v2831_v61 = vcombine.high %v2829_v50, %v2829_v50  ;;  %v3507_v9 = vrot.slane %v3506_v51, 2  ;;  %v3687_v45 = vrot.slane %v3686_v27, 4  ;;  %v3693_v5 = vsel %vm3181_vm13, %v2830_v1, -inf }
 0x2b2   : > { %v3500_v4 = vrot.slane %v3499_v33, 2  ;;  %v1706_v38 = vpop.permute.xlu1 %1705  ;;  %v3494_v60 = vmax.f32 %v3492_v34, %v3493_v3  ;;  %v3514_v58 = vrot.slane %v3513_v53, 2  ;;  %v3694_v62 = vrot.slane %v3693_v5, 4  ;;  %v1893_v63 = vpop.permute.xlu0 %1892 }
 0x2b3   : > { %v3700_v56 = vsel %vm3181_vm13, %v2829_v50, -inf  ;;  %1771 = vst.msk [vmem:[#allocation3 + $0xf8] sm:$0xff] %vm1739_vm9, %v1706_v38  ;;  %v3508_v48 = vmax.f32 %v3506_v51, %v3507_v9  ;;  %v3688_v54 = vmax.f32 %v3686_v27, %v3687_v45  ;;  %v3707_v59 = vsel %vm3181_vm13, %v2831_v61, -inf }
 0x2b4   : > { %v3501_v10 = vmax.f32 %v3499_v33, %v3500_v4  ;;  %v3701_v21 = vrot.slane %v3700_v56, 4  ;;  %1961 = vst.msk [vmem:[#allocation3 + $0xe0] sm:$0xff] %vm1932_vm10, %v1893_v63  ;;  %v3495_v25 = vrot.slane %v3494_v60, 1  ;;  %v3515_v28 = vmax.f32 %v3513_v53, %v3514_v58  ;;  %v2385_v4 = vpop.f32.mrf.mxu1 }
 0x2b5   : > { %v3695_v2 = vmax.f32 %v3693_v5, %v3694_v62  ;;  %v3509_v40 = vrot.slane %v3508_v48, 1  ;;  %v3689_v18 = vrot.slane %v3688_v54, 2  ;;  %v4136_v6 = vsel %vm4078_vm14, %v3433_v20, -inf }
 0x2b6   : > { %v3502_v15 = vrot.slane %v3501_v10, 1  ;;  %v3702_v12 = vmax.f32 %v3700_v56, %v3701_v21  ;;  %v1895_v36 = vpop.permute.xlu1 %1894  ;;  %v3516_v32 = vrot.slane %v3515_v28, 1  ;;  %v3708_v17 = vrot.slane %v3707_v59, 4  ;;  %v1897_v14 = vpop.permute.xlu0 %1896 }
 0x2b7   : > { %v3696_v23 = vrot.slane %v3695_v2, 2  ;;  %1962 = vst.msk [vmem:[#allocation3 + $0xe8] sm:$0xff] %vm1932_vm10, %v1895_v36  ;;  %v4376_v31 = vsel %vm4355_vm15, %v4132_v47, %v4129_v43  ;;  %v3496_v24 = vmax.f32 %v3494_v60, %v3495_v25  ;;  %v3690_v44 = vmax.f32 %v3688_v54, %v3689_v18  ;;  %1963 = vst.msk [vmem:[#allocation3 + $0xf0] sm:$0xff] %vm1932_vm10, %v1897_v14 }
 0x2b8   : > { %v3703_v29 = vrot.slane %v3702_v12, 2  ;;  %v3503_v26 = vmax.f32 %v3501_v10, %v3502_v15  ;;  %v3510_v11 = vmax.f32 %v3508_v48, %v3509_v40  ;;  %v3709_v37 = vmax.f32 %v3707_v59, %v3708_v17 }
 0x2b9   : > { %v3697_v35 = vmax.f32 %v3695_v2, %v3696_v23  ;;  %vm4491_vm7 = vcmask 523520   ;;  %v4138_v20 = vmax.f32 %v4136_v6, %v9303_v16  ;;  %v3517_v34 = vmax.f32 %v3515_v28, %v3516_v32 }
 0x2ba   : > { %v3691_v42 = vrot.slane %v3690_v44, 1  ;;  %v3704_v50 = vmax.f32 %v3702_v12, %v3703_v29  ;;  %v1899_v46 = vpop.permute.xlu1 %1898  ;;  %v4377_v43 = vsel %vm4357_vm0, %v4135_v49, %v4376_v31  ;;  %v3710_v33 = vrot.slane %v3709_v37, 2  ;;  %v2086_v1 = vpop.permute.xlu0 %2085 }
 0x2bb   : > { %v3698_v47 = vrot.slane %v3697_v35, 1  ;;  %v2354_v51 = vadd.f32 %v9255_v41, %v2353_v8  ;;  %1964 = vst.msk [vmem:[#allocation3 + $0xf8] sm:$0xff] %vm1932_vm10, %v1899_v46  ;;  %v9342_v3 = vsel %vm4078_vm14, %v3496_v24, -inf  ;;  %v2383_v61 = vadd.f32 %v9255_v41, %v2382_v7 }
 0x2bc   : > { %v3692_v16 = vmax.f32 %v3690_v44, %v3691_v42  ;;  %v3705_v53 = vrot.slane %v3704_v50, 1  ;;  %2154 = vst.msk [vmem:[#allocation3 + $0xe0] sm:$0xff] %vm2125_vm11, %v2086_v1  ;;  %v9347_v57 = vsel %vm4078_vm14, %v3503_v26, -inf  ;;  %v9350_v22 = vsel %vm4078_vm14, %v3510_v11, -inf }
 0x2bd   : > { %v9352_v49 = vmax.f32 %v3709_v37, %v3710_v33  ;;  %v2454_v27 = vmax.f32 %v2354_v51, 0.0  ;;  %v9355_v9 = vsel %vm4078_vm14, %v3517_v34, -inf  ;;  %v9357_v45 = vmax.f32 %v3697_v35, %v3698_v47 }
 0x2be   : > { %v9360_v5 = vsel %vm4359_vm1, %v4138_v20, %v4377_v43  ;;  %v2461_v38 = vmax.f32 %v2383_v61, 0.0  ;;  %v2088_v60 = vpop.permute.xlu1 %2087  ;;  %v9362_v58 = vmax.f32 %v3704_v50, %v3705_v53  ;;  %v2394_v63 = vadd.f32 %v9255_v41, %v7399_v30  ;;  %v2090_v10 = vpop.permute.xlu0 %2089 }
 0x2bf   : > { %v2662_v62 = vcombine.high %v2454_v27, %v2454_v27  ;;  %v2669_v56 = vrot.slane %v2454_v27, %v8831_v13  ;;  %2155 = vst.msk [vmem:[#allocation3 + $0xe8] sm:$0xff] %vm2125_vm11, %v2088_v60  ;;  %v9368_v48 = vsel %vm4078_vm14, %v3692_v16, -inf  ;;  %v9372_v25 = vadd.f32 %v9255_v41, %v2385_v4  ;;  %2156 = vst.msk [vmem:[#allocation3 + $0xf0] sm:$0xff] %vm2125_vm11, %v2090_v10 }
 0x2c0   : > { %v2781_v54 = vcombine.high %v2461_v38, %v2461_v38  ;;  %v2788_v21 = vrot.slane %v2461_v38, %v8831_v13  ;;  %v3712_v28 = vrot.slane %v9352_v49, 1  ;;  %vm4540_vm8 = vcmask 785920  }
 0x2c1   : > { %v2676_v2 = vrot.slane %v2662_v62, %v8831_v13  ;;  %v2677_v59 = vcombine.high %v2669_v56, %v2669_v56  ;;  %v3434_v7 = vsel %vm3181_vm13, %v2669_v56, -inf  ;;  %v9382_v17 = vmax.f32 %v2394_v63, 0.0 }
 0x2c2   : > { %v3435_v15 = vrot.slane %v3434_v7, 4  ;;  %v2795_v40 = vrot.slane %v2781_v54, %v8831_v13  ;;  %v2796_v18 = vcombine.high %v2788_v21, %v2788_v21  ;;  %v3630_v12 = vsel %vm3181_vm13, %v2788_v21, -inf  ;;  %v2092_v36 = vpop.permute.xlu1 %2091  ;;  %v4631_v14 = vpop.permute.xlu0 %4630 }
 0x2c3   : > { %v2678_v6 = vcombine.high %v2676_v2, %v2676_v2  ;;  %v3441_v32 = vsel %vm3181_vm13, %v2677_v59, -inf  ;;  %v3448_v23 = vsel %vm3181_vm13, %v2676_v2, -inf  ;;  %2157 = vst.msk [vmem:[#allocation3 + $0xf8] sm:$0xff] %vm2125_vm11, %v2092_v36  ;;  %v3631_v26 = vrot.slane %v3630_v12, 4 }
 0x2c4   : > { %v3436_v31 = vmax.f32 %v3434_v7, %v3435_v15  ;;  %v3442_v24 = vrot.slane %v3441_v32, 4  ;;  %v3449_v44 = vrot.slane %v3448_v23, 4  ;;  %v2797_v29 = vcombine.high %v2795_v40, %v2795_v40  ;;  %4654 = vst.msk [vmem:[#allocation5 + $0x8] sm:$0xff] %vm4491_vm7, %v4631_v14 }
 0x2c5   : > { %v3455_v8 = vsel %vm3181_vm13, %v2678_v6, -inf  ;;  %v3637_v11 = vsel %vm3181_vm13, %v2796_v18, -inf  ;;  %v3644_v35 = vsel %vm3181_vm13, %v2795_v40, -inf  ;;  %v3632_v50 = vmax.f32 %v3630_v12, %v3631_v26 }
 0x2c6   : > { %v3437_v37 = vrot.slane %v3436_v31, 2  ;;  %v3443_v30 = vmax.f32 %v3441_v32, %v3442_v24  ;;  %v3450_v20 = vmax.f32 %v3448_v23, %v3449_v44  ;;  %v3456_v34 = vrot.slane %v3455_v8, 4  ;;  %v4633_v42 = vpop.permute.xlu1 %4632  ;;  %v4468_v33 = vpop.permute.xlu0 %4467 }
 0x2c7   : > { %v3638_v46 = vrot.slane %v3637_v11, 4  ;;  %v3645_v43 = vrot.slane %v3644_v35, 4  ;;  %v3651_v47 = vsel %vm3181_vm13, %v2797_v29, -inf  ;;  %4655 = vst.msk [vmem:[#allocation5 + $0x20] sm:$0xff] %vm4491_vm7, %v4633_v42  ;;  %4492 = vst.msk [vmem:[#allocation5] sm:$0xff] %vm4491_vm7, %v4468_v33  ;;  %v3633_v61 = vrot.slane %v3632_v50, 2 }
 0x2c8   : > { %v3438_v51 = vmax.f32 %v3436_v31, %v3437_v37  ;;  %v3444_v1 = vrot.slane %v3443_v30, 2  ;;  %v3451_v16 = vrot.slane %v3450_v20, 2  ;;  %v3457_v53 = vmax.f32 %v3455_v8, %v3456_v34 }
 0x2c9   : > { %v3639_v27 = vmax.f32 %v3637_v11, %v3638_v46  ;;  %v3646_v4 = vmax.f32 %v3644_v35, %v3645_v43  ;;  %v3652_v38 = vrot.slane %v3651_v47, 4  ;;  %vm4589_vm9 = vcmask 1048320  }
 0x2ca   : > { %v3439_v60 = vrot.slane %v3438_v51, 1  ;;  %v3445_v62 = vmax.f32 %v3443_v30, %v3444_v1  ;;  %v3452_v56 = vmax.f32 %v3450_v20, %v3451_v16  ;;  %v3458_v63 = vrot.slane %v3457_v53, 2  ;;  %v4470_v10 = vpop.permute.xlu1 %4469  ;;  %v4680_v7 = vpop.permute.xlu0 %4679 }
 0x2cb   : > { %v3634_v54 = vmax.f32 %v3632_v50, %v3633_v61  ;;  %v3640_v21 = vrot.slane %v3639_v27, 2  ;;  %v3647_v2 = vrot.slane %v3646_v4, 2  ;;  %v3653_v59 = vmax.f32 %v3651_v47, %v3652_v38  ;;  %4493 = vst.msk [vmem:[#allocation5 + $0x18] sm:$0xff] %vm4491_vm7, %v4470_v10  ;;  %v2187_v61 = vld [vmem:[#allocation3 + $0xe8] sm:$0xff] }
 0x2cc   : > { %v3440_v15 = vmax.f32 %v3438_v51, %v3439_v60  ;;  %v3446_v40 = vrot.slane %v3445_v62, 1  ;;  %v3453_v18 = vrot.slane %v3452_v56, 1  ;;  %v3459_v12 = vmax.f32 %v3457_v53, %v3458_v63  ;;  %4703 = vst.msk [vmem:[#allocation5 + $0x8] sm:$0xff] %vm4540_vm8, %v4680_v7  ;;  %v2189_v63 = vld [vmem:[#allocation3 + $0xf8] sm:$0xff] }
 0x2cd   : > { %v3635_v36 = vrot.slane %v3634_v54, 1  ;;  %v3641_v6 = vmax.f32 %v3639_v27, %v3640_v21  ;;  %v3648_v32 = vmax.f32 %v3646_v4, %v3647_v2  ;;  %v3654_v23 = vrot.slane %v3653_v59, 2 }
 0x2ce   : > { %v3447_v14 = vmax.f32 %v3445_v62, %v3446_v40  ;;  %v3454_v31 = vmax.f32 %v3452_v56, %v3453_v18  ;;  %v3460_v24 = vrot.slane %v3459_v12, 1  ;;  %v4139_v44 = vsel %vm4078_vm14, %v3440_v15, -inf  ;;  %v4517_v35 = vpop.permute.xlu0 %4516  ;;  %v2188_v56 = vld [vmem:[#allocation3 + $0xf0] sm:$0xff] }
 0x2cf   : > { %v4141_v29 = vmax.f32 %v4139_v44, %v9342_v3  ;;  %v3636_v8 = vmax.f32 %v3634_v54, %v3635_v36  ;;  %v3642_v26 = vrot.slane %v3641_v6, 1  ;;  %v3649_v11 = vrot.slane %v3648_v32, 1  ;;  %4541 = vst.msk [vmem:[#allocation5] sm:$0xff] %vm4540_vm8, %v4517_v35 }
 0x2d0   : > { %v3461_v37 = vmax.f32 %v3459_v12, %v3460_v24  ;;  %v4142_v30 = vsel %vm4078_vm14, %v3447_v14, -inf  ;;  %v4145_v20 = vsel %vm4078_vm14, %v3454_v31, -inf  ;;  %v3655_v34 = vmax.f32 %v3653_v59, %v3654_v23 }
 0x2d1   : > { %v4144_v42 = vmax.f32 %v4142_v30, %v9347_v57  ;;  %v4147_v50 = vmax.f32 %v4145_v20, %v9350_v22  ;;  %v4379_v46 = vsel %vm4361_vm2, %v4141_v29, %v9360_v5  ;;  %v3643_v3 = vmax.f32 %v3641_v6, %v3642_v26  ;;  %v2186_v22 = vld [vmem:[#allocation3 + $0xe0] sm:$0xff] }
 0x2d2   : > { %v4179_v43 = vsel %vm4078_vm14, %v9357_v45, -inf  ;;  %v4148_v47 = vsel %vm4078_vm14, %v3461_v37, -inf  ;;  %v3650_v33 = vmax.f32 %v3648_v32, %v3649_v11  ;;  %v3656_v51 = vrot.slane %v3655_v34, 1  ;;  %v4728_v27 = vpop.permute.xlu0 %4727  ;;  %v7498_v30 = vld [vmem:[#allocation9 + $0x78] sm:$0xff]  }
 0x2d3   : > { %v4150_v1 = vmax.f32 %v4148_v47, %v9355_v9  ;;  %vm10409_vm10 = vcmask 1045509   ;;  %v4175_v53 = vsel %vm4078_vm14, %v3636_v8, -inf  ;;  %v4178_v57 = vsel %vm4078_vm14, %v3643_v3, -inf  ;;  %4751 = vst.msk [vmem:[#allocation5 + $0x8] sm:$0xff] %vm4589_vm9, %v4728_v27  ;;  %7259 = vmatprep.subr.bf16.mxu1 %v7498_v30 }
 0x2d4   : > { %v4380_v16 = vsel %vm10409_vm10, %v4144_v42, %v4379_v46  ;;  %v9412_v5 = vsel %vm4078_vm14, %v9362_v58, -inf  ;;  %vm10410_vm11 = vcmask 1046534   ;;  %v3657_v4 = vmax.f32 %v3655_v34, %v3656_v51  ;;  %vm10415_vm4 = vmmov %vm10409_vm10 }
 0x2d5   : > { %v4381_v45 = vsel %vm10410_vm11, %v4147_v50, %v4380_v16  ;;  %v9416_v38 = vsel %vm4078_vm14, %v3650_v33, -inf  ;;  %v9422_v9 = vmax.f32 %v9352_v49, %v3712_v28  ;;  %v2832_v62 = vcombine.high %v9382_v17, %v9382_v17  ;;  %v7499_v16 = vld [vmem:[#allocation9 + $0x38] sm:$0xff]   ;;  %vm10413_vm6 = vmmov %vm10410_vm11 }
 0x2d6   : > { %v4382_v60 = vsel %vm10411_vm3, %v4150_v1, %v4381_v45  ;;  %v2839_v58 = vrot.slane %v9382_v17, %v8831_v13  ;;  %v4177_v10 = vmax.f32 %v4175_v53, %v9368_v48  ;;  %v4180_v54 = vmax.f32 %v4178_v57, %v4179_v43  ;;  %v4566_v17 = vpop.permute.xlu0 %4565  ;;  %7260 = vmatpush3.bf16.msra.mxu1 %v7499_v16  ;;  %vm10417_vm11 = vmmov %vm10411_vm3 }
 0x2d7   : > { %4429 = vst.msk [vmem:[#allocation4 + $0x31] sm:$0xff] %vm4078_vm14, %v4382_v60  ;;  %v2462_v21 = vmax.f32 %v9372_v25, 0.0  ;;  %v2204_v2 = vpack.c.bf16 %v2187_v61, %v2186_v22  ;;  %v4183_v49 = vmax.f32 %v9416_v38, %v9412_v5  ;;  %v9435_v28 = vsel %vm4078_vm14, %v3657_v4, -inf  ;;  %vm10418_vm3 = vmmov %vm10415_vm4 }
 0x2d8   : > { %v2846_v59 = vrot.slane %v2832_v62, %v8831_v13  ;;  %v2847_v7 = vcombine.high %v2839_v58, %v2839_v58  ;;  %v3714_v15 = vsel %vm3181_vm13, %v2839_v58, -inf  ;;  %v2205_v48 = vpack.c.bf16 %v2189_v63, %v2188_v56  ;;  %4590 = vst.msk [vmem:[#allocation5] sm:$0xff] %vm4589_vm9, %v4566_v17  ;;  %v7500_v56 = vld [vmem:[#allocation9 + $0x70] sm:$0xff]  }
 0x2d9   : > { %v2798_v40 = vcombine.high %v2462_v21, %v2462_v21  ;;  %v2805_v18 = vrot.slane %v2462_v21, %v8831_v13  ;;  %7408 = vmatprep.mubr.msk.bf16.mxu1 %vm2228_vm12, %v2204_v2  ;;  %v3715_v12 = vrot.slane %v3714_v15, 4  ;;  %v4390_v24 = vsel %vm4355_vm15, %v4180_v54, %v4177_v10  ;;  %v7501_v2 = vld [vmem:[#allocation9 + $0x30] sm:$0xff]   ;;  %7261 = vmatprep.subr.bf16.mxu1 %v7500_v56 }
 0x2da   : > { %v2848_v25 = vcombine.high %v2846_v59, %v2846_v59  ;;  %v3721_v36 = vsel %vm3181_vm13, %v2847_v7, -inf  ;;  %v3728_v6 = vsel %vm3181_vm13, %v2846_v59, -inf  ;;  %7409 = vmatmul.mubr.msk.bf16.gmra.mxu1 %vm2228_vm12, %v2205_v48  ;;  %v4185_v59 = vsel %vm4078_vm14, %v9422_v9, -inf  ;;  %vm10412_vm12 = vmmov %vm10409_vm10 }
 0x2db   : > { %v3722_v32 = vrot.slane %v3721_v36, 4  ;;  %v3729_v23 = vrot.slane %v3728_v6, 4  ;;  %v2812_v14 = vrot.slane %v2798_v40, %v8831_v13  ;;  %v2813_v31 = vcombine.high %v2805_v18, %v2805_v18  ;;  %7262 = vmatpush3.bf16.msra.mxu1 %v7501_v2  ;;  %v7512_v2 = vld [vmem:[#allocation9 + $0x40] sm:$0xff]   ;;  %vm10416_vm10 = vmmov %vm10413_vm6 }
 0x2dc   : > { %v3716_v44 = vmax.f32 %v3714_v15, %v3715_v12  ;;  %v3735_v29 = vsel %vm3181_vm13, %v2848_v25, -inf  ;;  %v3658_v8 = vsel %vm3181_vm13, %v2805_v18, -inf  ;;  %v4186_v12 = vmax.f32 %v9435_v28, %v4185_v59 }
 0x2dd   : > { %v3723_v26 = vmax.f32 %v3721_v36, %v3722_v32  ;;  %v3730_v11 = vmax.f32 %v3728_v6, %v3729_v23  ;;  %v3736_v35 = vrot.slane %v3735_v29, 4  ;;  %v2814_v37 = vcombine.high %v2812_v14, %v2812_v14  ;;  %v7502_v32 = vld [vmem:[#allocation9 + $0x68] sm:$0xff]  }
 0x2de   : > { %v3717_v20 = vrot.slane %v3716_v44, 2  ;;  %v3659_v34 = vrot.slane %v3658_v8, 4  ;;  %v3665_v42 = vsel %vm3181_vm13, %v2813_v31, -inf  ;;  %v3672_v50 = vsel %vm3181_vm13, %v2812_v14, -inf  ;;  %v9451_v46 = vld [vmem:[#allocation4 + $0x32] sm:$0xff]  ;;  %7263 = vmatprep.subr.bf16.mxu1 %v7502_v32 }
 0x2df   : > { %v9453_v3 = vld [vmem:[#allocation4 + $0x30] sm:$0xff]  ;;  %v3724_v43 = vrot.slane %v3723_v26, 2  ;;  %v3731_v47 = vrot.slane %v3730_v11, 2  ;;  %v3737_v33 = vmax.f32 %v3735_v29, %v3736_v35  ;;  %v3666_v51 = vrot.slane %v3665_v42, 4  ;;  %4634 = vrot.lane.b32.xlu0 %v9451_v46, %s7799_s22 }
 0x2e0   : > { %4681 = vrot.lane.b32.xlu1 %v9453_v3, %s7800_s23  ;;  %v9459_v1 = vld [vmem:[#allocation4 + $0x31] sm:$0xff]  ;;  %v3718_v57 = vmax.f32 %v3716_v44, %v3717_v20  ;;  %v3660_v22 = vmax.f32 %v3658_v8, %v3659_v34  ;;  %v3673_v61 = vrot.slane %v3672_v50, 4  ;;  %v3679_v27 = vsel %vm3181_vm13, %v2814_v37, -inf  ;;  %v7505_v34 = vld [vmem:[#allocation9 + $0x20] sm:$0xff]  }
 0x2e1   : > { %v4438_v53 = vld [vmem:[#allocation4 + $0x30] sm:$0xff]  ;;  %4608 = vst.msk [vmem:[#allocation5 + $0x38] sm:$0xff] %vm4078_vm14, %v9459_v1  ;;  %v3725_v4 = vmax.f32 %v3723_v26, %v3724_v43  ;;  %v3732_v60 = vmax.f32 %v3730_v11, %v3731_v47  ;;  %v3738_v62 = vrot.slane %v3737_v33, 2  ;;  %v3667_v58 = vmax.f32 %v3665_v42, %v3666_v51  ;;  %v7504_v11 = vld [vmem:[#allocation9 + $0x60] sm:$0xff]  }
 0x2e2   : > { %4446 = vst.msk [vmem:[#allocation5 + $0x48] sm:$0xff] %vm4078_vm14, %v4438_v53  ;;  %v4760_v45 = vld [vmem:[#allocation4 + $0x32] sm:$0xff]  ;;  %v3719_v63 = vrot.slane %v3718_v57, 1  ;;  %v3661_v10 = vrot.slane %v3660_v22, 2  ;;  %v3674_v54 = vmax.f32 %v3672_v50, %v3673_v61  ;;  %v3680_v21 = vrot.slane %v3679_v27, 4  ;;  %v7687_v47 = vld [vmem:[#allocation4 + $0x20] sm:$0xff] }
 0x2e3   : > { %4768 = vst.msk [vmem:[#allocation5 + $0x28] sm:$0xff] %vm4078_vm14, %v4760_v45  ;;  %v3726_v7 = vrot.slane %v3725_v4, 1  ;;  %v3739_v17 = vmax.f32 %v3737_v33, %v3738_v62  ;;  %v3668_v15 = vrot.slane %v3667_v58, 2  ;;  %4471 = vrot.lane.b32.xlu0 %v9201_v39, %s7799_s22  ;;  %v3733_v40 = vrot.slane %v3732_v60, 1  ;;  %v7503_v31 = vld [vmem:[#allocation9 + $0x28] sm:$0xff]   ;;  %v7506_v61 = vld [vmem:[#allocation9 + $0x58] sm:$0xff]  }
 0x2e4   : > { %4518 = vrot.lane.b32.xlu1 %v9196_v52, %s7800_s23  ;;  %v3662_v18 = vmax.f32 %v3660_v22, %v3661_v10  ;;  %v3675_v48 = vrot.slane %v3674_v54, 2  ;;  %v3681_v25 = vmax.f32 %v3679_v27, %v3680_v21  ;;  %v4391_v9 = vsel %vm4357_vm0, %v4183_v49, %v4390_v24  ;;  %7264 = vmatpush3.bf16.msra.mxu1 %v7503_v31  ;;  %v7508_v62 = vld [vmem:[#allocation9 + $0x50] sm:$0xff]   ;;  %v7511_v21 = vld [vmem:[#allocation9 + $0x8] sm:$0xff]  }
 0x2e5   : > { %v3720_v36 = vmax.f32 %v3718_v57, %v3719_v63  ;;  %v3669_v6 = vmax.f32 %v3667_v58, %v3668_v15  ;;  %v3740_v39 = vrot.slane %v3739_v17, 1  ;;  %v3727_v44 = vmax.f32 %v3725_v4, %v3726_v7  ;;  %7265 = vmatprep.subr.bf16.mxu1 %v7504_v11  ;;  %v7509_v10 = vld [vmem:[#allocation9 + $0x10] sm:$0xff]   ;;  %v7513_v7 = vld [vmem:[#allocation9] sm:$0xff]  }
 0x2e6   : > { %v3663_v23 = vrot.slane %v3662_v18, 1  ;;  %v3676_v14 = vmax.f32 %v3674_v54, %v3675_v48  ;;  %v3682_v52 = vrot.slane %v3681_v25, 2  ;;  %v3734_v28 = vmax.f32 %v3732_v60, %v3733_v40  ;;  %v7507_v60 = vld [vmem:[#allocation9 + $0x18] sm:$0xff]   ;;  %v7510_v54 = vld [vmem:[#allocation9 + $0x48] sm:$0xff]  }
 0x2e7   : > { %v3670_v29 = vrot.slane %v3669_v6, 1  ;;  %v4188_v49 = vsel %vm4078_vm14, %v3720_v36, -inf  ;;  %v4392_v26 = vsel %vm4359_vm1, %v4186_v12, %v4391_v9  ;;  %v3741_v35 = vmax.f32 %v3739_v17, %v3740_v39 }
 0x2e8   : > { %4729 = vrot.lane.b32.xlu1 %v9459_v1, %s7801_s24  ;;  %v3664_v8 = vmax.f32 %v3662_v18, %v3663_v23  ;;  %v3677_v5 = vrot.slane %v3676_v14, 1  ;;  %v3683_v38 = vmax.f32 %v3681_v25, %v3682_v52  ;;  %v4191_v42 = vsel %vm4078_vm14, %v3727_v44, -inf  ;;  %7266 = vmatpush3.bf16.msra.mxu1 %v7505_v34 }
 0x2e9   : > { %v3671_v24 = vmax.f32 %v3669_v6, %v3670_v29  ;;  %v4194_v33 = vsel %vm4078_vm14, %v3734_v28, -inf  ;;  %v4197_v27 = vsel %vm4078_vm14, %v3741_v35, -inf  ;;  %7267 = vmatprep.subr.bf16.mxu1 %v7506_v61 }
 0x2ea   : > { %v3678_v37 = vmax.f32 %v3676_v14, %v3677_v5  ;;  %v3684_v30 = vrot.slane %v3683_v38, 1  ;;  %v4187_v20 = vsel %vm4078_vm14, %v3664_v8, -inf }
 0x2eb   : > { %v4189_v50 = vmax.f32 %v4187_v20, %v4188_v49  ;;  %v4190_v43 = vsel %vm4078_vm14, %v3671_v24, -inf }
 0x2ec   : > { %4567 = vrot.lane.b32.xlu1 %v7687_v47, %s7801_s24  ;;  %v3685_v51 = vmax.f32 %v3683_v38, %v3684_v30  ;;  %v4192_v16 = vmax.f32 %v4190_v43, %v4191_v42  ;;  %v4193_v53 = vsel %vm4078_vm14, %v3678_v37, -inf  ;;  %7268 = vmatpush3.bf16.msra.mxu1 %v7507_v60 }
 0x2ed   : > { %v4195_v57 = vmax.f32 %v4193_v53, %v4194_v33  ;;  %v4393_v22 = vsel %vm4361_vm2, %v4189_v50, %v4392_v26  ;;  %7269 = vmatprep.subr.bf16.mxu1 %v7508_v62 }
 0x2ee   : > { %v4196_v45 = vsel %vm4078_vm14, %v3685_v51, -inf  ;;  %v4394_v4 = vsel %vm10412_vm12, %v4192_v16, %v4393_v22  ;;  %vm10419_vm12 = vmmov %vm10413_vm6 }
 0x2ef   : > { %v4198_v58 = vmax.f32 %v4196_v45, %v4197_v27  ;;  %v4395_v56 = vsel %vm10413_vm6, %v4195_v57, %v4394_v4  ;;  %vm10420_vm6 = vmmov %vm10414_vm5 }
 0x2f0   : > { %7270 = vmatpush3.bf16.msra.mxu1 %v7509_v10 }
 0x2f1   : > { %v4396_v63 = vsel %vm10414_vm5, %v4198_v58, %v4395_v56  ;;  %7271 = vmatprep.subr.bf16.mxu1 %v7510_v54  ;;  %vm10421_vm5 = vmmov %vm10418_vm3 }
 0x2f2   : > { %4431 = vst.msk [vmem:[#allocation4 + $0x51] sm:$0xff] %vm4078_vm14, %v4396_v63 }
 0x2f4   : > { %7272 = vmatpush3.bf16.msra.mxu1 %v7511_v21 }
 0x2f5   : > { %7273 = vmatprep.subr.bf16.mxu1 %v7512_v2 }
 0x2f8   : > { %7274 = vmatpush3.bf16.msra.mxu1 %v7513_v7 }
 0x2f9   : > { %v9494_v59 = vld [vmem:[#allocation4 + $0x50] sm:$0xff] }
 0x2fa   : > { %v9496_v17 = vld [vmem:[#allocation4 + $0x51] sm:$0xff]  ;;  %4448 = vst.msk [vmem:[#allocation5 + $0x78] sm:$0xff] %vm4078_vm14, %v9494_v59 }
 0x2fb   : > { %4610 = vst.msk [vmem:[#allocation5 + $0x68] sm:$0xff] %vm4078_vm14, %v9496_v17  ;;  %v4762_v15 = vld [vmem:[#allocation4 + $0x52] sm:$0xff] }
 0x2fc   : > { %4770 = vst.msk [vmem:[#allocation5 + $0x58] sm:$0xff] %vm4078_vm14, %v4762_v15 }
 0x30d   : > { %v7394_v40 = vpop.f32.mrf.mxu0 }
 0x30e   : > { %v2375_v18 = vadd.f32 %v9255_v41, %v7394_v40 }
 0x30f   : > { %v2366_v48 = vpop.f32.mrf.mxu0 }
 0x310   : > { %v2459_v25 = vmax.f32 %v2375_v18, 0.0  ;;  %v2367_v12 = vadd.f32 %v9255_v41, %v2366_v48 }
 0x311   : > { %v7395_v9 = vpop.f32.mrf.mxu0  ;;  %v7402_v36 = vpop.f32.mrf.mxu1 }
 0x312   : > { %v2747_v6 = vcombine.high %v2459_v25, %v2459_v25  ;;  %v2754_v32 = vrot.slane %v2459_v25, %v8831_v13  ;;  %v2457_v39 = vmax.f32 %v2367_v12, 0.0  ;;  %v2378_v23 = vadd.f32 %v9255_v41, %v7395_v9 }
 0x313   : > { %v2407_v14 = vadd.f32 %v9255_v41, %v7402_v36 }
 0x314   : > { %v2761_v52 = vrot.slane %v2747_v6, %v8831_v13  ;;  %v2762_v31 = vcombine.high %v2754_v32, %v2754_v32  ;;  %v3574_v44 = vsel %vm3181_vm13, %v2754_v32, -inf  ;;  %v2713_v29 = vcombine.high %v2457_v39, %v2457_v39 }
 0x315   : > { %v3575_v28 = vrot.slane %v3574_v44, 4  ;;  %v2720_v8 = vrot.slane %v2457_v39, %v8831_v13  ;;  %v9511_v5 = vmax.f32 %v2378_v23, 0.0  ;;  %v9513_v38 = vmax.f32 %v2407_v14, 0.0 }
 0x316   : > { %v2763_v49 = vcombine.high %v2761_v52, %v2761_v52  ;;  %v3581_v24 = vsel %vm3181_vm13, %v2762_v31, -inf  ;;  %v3588_v26 = vsel %vm3181_vm13, %v2761_v52, -inf  ;;  %v2727_v41 = vrot.slane %v2713_v29, %v8831_v13 }
 0x317   : > { %v3576_v11 = vmax.f32 %v3574_v44, %v3575_v28  ;;  %v3582_v35 = vrot.slane %v3581_v24, 4  ;;  %v3589_v37 = vrot.slane %v3588_v26, 4  ;;  %v2728_v30 = vcombine.high %v2720_v8, %v2720_v8 }
 0x318   : > { %v3595_v20 = vsel %vm3181_vm13, %v2763_v49, -inf  ;;  %v2729_v34 = vcombine.high %v2727_v41, %v2727_v41  ;;  %v3518_v42 = vsel %vm3181_vm13, %v2720_v8, -inf  ;;  %v3532_v50 = vsel %vm3181_vm13, %v2727_v41, -inf }
 0x319   : > { %v3577_v43 = vrot.slane %v3576_v11, 2  ;;  %v3583_v47 = vmax.f32 %v3581_v24, %v3582_v35  ;;  %v3590_v33 = vmax.f32 %v3588_v26, %v3589_v37  ;;  %v3596_v51 = vrot.slane %v3595_v20, 4 }
 0x31a   : > { %v3519_v16 = vrot.slane %v3518_v42, 4  ;;  %v3525_v53 = vsel %vm3181_vm13, %v2728_v30, -inf  ;;  %v3533_v57 = vrot.slane %v3532_v50, 4  ;;  %v3539_v22 = vsel %vm3181_vm13, %v2729_v34, -inf }
 0x31b   : > { %v3578_v61 = vmax.f32 %v3576_v11, %v3577_v43  ;;  %v3584_v27 = vrot.slane %v3583_v47, 2  ;;  %v3591_v45 = vrot.slane %v3590_v33, 2  ;;  %v3597_v4 = vmax.f32 %v3595_v20, %v3596_v51 }
 0x31c   : > { %v3520_v60 = vmax.f32 %v3518_v42, %v3519_v16  ;;  %v3526_v62 = vrot.slane %v3525_v53, 4  ;;  %v3534_v58 = vmax.f32 %v3532_v50, %v3533_v57  ;;  %v3540_v56 = vrot.slane %v3539_v22, 4 }
 0x31d   : > { %v3579_v63 = vrot.slane %v3578_v61, 1  ;;  %v3585_v10 = vmax.f32 %v3583_v47, %v3584_v27  ;;  %v3592_v54 = vmax.f32 %v3590_v33, %v3591_v45  ;;  %v3598_v21 = vrot.slane %v3597_v4, 2 }
 0x31e   : > { %v3521_v2 = vrot.slane %v3520_v60, 2  ;;  %v3527_v7 = vmax.f32 %v3525_v53, %v3526_v62  ;;  %v3535_v15 = vrot.slane %v3534_v58, 2  ;;  %v3541_v40 = vmax.f32 %v3539_v22, %v3540_v56 }
 0x31f   : > { %v3580_v18 = vmax.f32 %v3578_v61, %v3579_v63  ;;  %v3586_v48 = vrot.slane %v3585_v10, 1  ;;  %v3593_v25 = vrot.slane %v3592_v54, 1  ;;  %v3599_v12 = vmax.f32 %v3597_v4, %v3598_v21 }
 0x320   : > { %v3522_v9 = vmax.f32 %v3520_v60, %v3521_v2  ;;  %v3528_v36 = vrot.slane %v3527_v7, 2  ;;  %v3536_v6 = vmax.f32 %v3534_v58, %v3535_v15  ;;  %v3542_v32 = vrot.slane %v3541_v40, 2 }
 0x321   : > { %v3587_v39 = vmax.f32 %v3585_v10, %v3586_v48  ;;  %v3594_v23 = vmax.f32 %v3592_v54, %v3593_v25  ;;  %v3600_v14 = vrot.slane %v3599_v12, 1  ;;  %v4152_v52 = vsel %vm4078_vm14, %v3580_v18, -inf }
 0x322   : > { %v3523_v31 = vrot.slane %v3522_v9, 1  ;;  %v3529_v44 = vmax.f32 %v3527_v7, %v3528_v36  ;;  %v3537_v29 = vrot.slane %v3536_v6, 1  ;;  %v3543_v28 = vmax.f32 %v3541_v40, %v3542_v32 }
 0x323   : > { %v3601_v8 = vmax.f32 %v3599_v12, %v3600_v14  ;;  %v4155_v49 = vsel %vm4078_vm14, %v3587_v39, -inf  ;;  %v4158_v24 = vsel %vm4078_vm14, %v3594_v23, -inf  ;;  %v2764_v26 = vcombine.high %v9511_v5, %v9511_v5 }
 0x324   : > { %v3524_v41 = vmax.f32 %v3522_v9, %v3523_v31  ;;  %v3530_v11 = vrot.slane %v3529_v44, 1  ;;  %v3538_v35 = vmax.f32 %v3536_v6, %v3537_v29  ;;  %v3544_v37 = vrot.slane %v3543_v28, 1 }
 0x325   : > { %v9529_v30 = vsel %vm4078_vm14, %v3601_v8, -inf  ;;  %v2771_v20 = vrot.slane %v9511_v5, %v8831_v13  ;;  %v2778_v34 = vrot.slane %v2764_v26, %v8831_v13  ;;  %v2883_v42 = vcombine.high %v9513_v38, %v9513_v38 }
 0x326   : > { %v3531_v50 = vmax.f32 %v3529_v44, %v3530_v11  ;;  %v3545_v43 = vmax.f32 %v3543_v28, %v3544_v37  ;;  %v4151_v47 = vsel %vm4078_vm14, %v3524_v41, -inf  ;;  %v4157_v33 = vsel %vm4078_vm14, %v3538_v35, -inf  ;;  %v2398_v44 = vpop.f32.mrf.mxu1 }
 0x327   : > { %v4153_v51 = vmax.f32 %v4151_v47, %v4152_v52  ;;  %v4159_v16 = vmax.f32 %v4157_v33, %v4158_v24  ;;  %v2779_v53 = vcombine.high %v2771_v20, %v2771_v20  ;;  %v2780_v57 = vcombine.high %v2778_v34, %v2778_v34 }
 0x328   : > { %v4154_v22 = vsel %vm4078_vm14, %v3531_v50, -inf  ;;  %v9540_v61 = vsel %vm4078_vm14, %v3545_v43, -inf  ;;  %v3602_v5 = vsel %vm3181_vm13, %v2771_v20, -inf  ;;  %v3616_v27 = vsel %vm3181_vm13, %v2778_v34, -inf  ;;  %v7403_v33 = vpop.f32.mrf.mxu1 }
 0x329   : > { %v4156_v45 = vmax.f32 %v4154_v22, %v4155_v49  ;;  %v4162_v4 = vmax.f32 %v9540_v61, %v9529_v30  ;;  %v3603_v60 = vrot.slane %v3602_v5, 4  ;;  %v3609_v62 = vsel %vm3181_vm13, %v2779_v53, -inf  ;;  %v2369_v22 = vpop.f32.mrf.mxu0 }
 0x32a   : > { %v3610_v58 = vrot.slane %v3609_v62, 4  ;;  %v3617_v56 = vrot.slane %v3616_v27, 4  ;;  %v3623_v63 = vsel %vm3181_vm13, %v2780_v57, -inf  ;;  %v2890_v10 = vrot.slane %v9513_v38, %v8831_v13 }
 0x32b   : > { %v4383_v54 = vsel %vm4355_vm15, %v4156_v45, %v4153_v51  ;;  %v3604_v21 = vmax.f32 %v3602_v5, %v3603_v60  ;;  %v3624_v2 = vrot.slane %v3623_v63, 4  ;;  %v2897_v7 = vrot.slane %v2883_v42, %v8831_v13 }
 0x32c   : > { %v4384_v15 = vsel %vm4357_vm0, %v4159_v16, %v4383_v54  ;;  %v3611_v40 = vmax.f32 %v3609_v62, %v3610_v58  ;;  %v3618_v18 = vmax.f32 %v3616_v27, %v3617_v56  ;;  %v2898_v48 = vcombine.high %v2890_v10, %v2890_v10 }
 0x32d   : > { %v3605_v25 = vrot.slane %v3604_v21, 2  ;;  %v3625_v12 = vmax.f32 %v3623_v63, %v3624_v2  ;;  %v2899_v9 = vcombine.high %v2897_v7, %v2897_v7  ;;  %v3798_v36 = vsel %vm3181_vm13, %v2890_v10, -inf  ;;  %v9572_v2 = vld [vmem:[%s10376_s2] ss:$0 sm:$0xff] }
 0x32e   : > { %v3612_v6 = vrot.slane %v3611_v40, 2  ;;  %v3619_v32 = vrot.slane %v3618_v18, 2  ;;  %v3799_v39 = vrot.slane %v3798_v36, 4  ;;  %v3805_v38 = vsel %vm3181_vm13, %v2898_v48, -inf }
 0x32f   : > { %v3606_v23 = vmax.f32 %v3604_v21, %v3605_v25  ;;  %v3626_v14 = vrot.slane %v3625_v12, 2  ;;  %v3806_v52 = vrot.slane %v3805_v38, 4  ;;  %v3812_v31 = vsel %vm3181_vm13, %v2897_v7, -inf }
 0x330   : > { %v3613_v29 = vmax.f32 %v3611_v40, %v3612_v6  ;;  %v3620_v28 = vmax.f32 %v3618_v18, %v3619_v32  ;;  %v3800_v8 = vmax.f32 %v3798_v36, %v3799_v39  ;;  %v3813_v49 = vrot.slane %v3812_v31, 4  ;;  %v2401_v40 = vpop.f32.mrf.mxu1 }
 0x331   : > { %v3607_v24 = vrot.slane %v3606_v23, 1  ;;  %v3627_v26 = vmax.f32 %v3625_v12, %v3626_v14  ;;  %v3807_v41 = vmax.f32 %v3805_v38, %v3806_v52  ;;  %v3819_v11 = vsel %vm3181_vm13, %v2899_v9, -inf }
 0x332   : > { %v3614_v35 = vrot.slane %v3613_v29, 1  ;;  %v3621_v37 = vrot.slane %v3620_v28, 1  ;;  %v3801_v20 = vrot.slane %v3800_v8, 2  ;;  %v3814_v34 = vmax.f32 %v3812_v31, %v3813_v49 }
 0x333   : > { %v3608_v42 = vmax.f32 %v3606_v23, %v3607_v24  ;;  %v3628_v50 = vrot.slane %v3627_v26, 1  ;;  %v3808_v43 = vrot.slane %v3807_v41, 2  ;;  %v3820_v47 = vrot.slane %v3819_v11, 4 }
 0x334   : > { %v3615_v51 = vmax.f32 %v3613_v29, %v3614_v35  ;;  %v3622_v16 = vmax.f32 %v3620_v28, %v3621_v37  ;;  %v3802_v53 = vmax.f32 %v3800_v8, %v3801_v20  ;;  %v3815_v57 = vrot.slane %v3814_v34, 2 }
 0x335   : > { %v3629_v5 = vmax.f32 %v3627_v26, %v3628_v50  ;;  %v9558_v27 = vsel %vm4078_vm14, %v3608_v42, -inf  ;;  %v3809_v45 = vmax.f32 %v3807_v41, %v3808_v43  ;;  %v3821_v60 = vmax.f32 %v3819_v11, %v3820_v47 }
 0x336   : > { %v9561_v62 = vsel %vm4078_vm14, %v3615_v51, -inf  ;;  %v9564_v58 = vsel %vm4078_vm14, %v3622_v16, -inf  ;;  %v3803_v56 = vrot.slane %v3802_v53, 1  ;;  %v3816_v63 = vmax.f32 %v3814_v34, %v3815_v57 }
 0x337   : > { %v9567_v10 = vsel %vm4078_vm14, %v3629_v5, -inf  ;;  %v3810_v54 = vrot.slane %v3809_v45, 1  ;;  %v3822_v21 = vrot.slane %v3821_v60, 2  ;;  %v2370_v7 = vadd.f32 %v9572_v2, %v2369_v22 }
 0x338   : > { %v3804_v18 = vmax.f32 %v3802_v53, %v3803_v56  ;;  %v3817_v48 = vrot.slane %v3816_v63, 1  ;;  %v9579_v25 = vsel %vm4359_vm1, %v4162_v4, %v4384_v15  ;;  %v2399_v12 = vadd.f32 %v9572_v2, %v2398_v44 }
 0x339   : > { %v3811_v9 = vmax.f32 %v3809_v45, %v3810_v54  ;;  %v3823_v36 = vmax.f32 %v3821_v60, %v3822_v21  ;;  %v2458_v6 = vmax.f32 %v2370_v7, 0.0  ;;  %v2410_v32 = vadd.f32 %v9572_v2, %v7403_v33 }
 0x33a   : > { %v3818_v39 = vmax.f32 %v3816_v63, %v3817_v48  ;;  %v9584_v38 = vsel %vm4078_vm14, %v3804_v18, -inf  ;;  %v2465_v23 = vmax.f32 %v2399_v12, 0.0  ;;  %v9587_v14 = vadd.f32 %v9572_v2, %v2401_v40 }
 0x33b   : > { %v3824_v52 = vrot.slane %v3823_v36, 1  ;;  %v9590_v30 = vsel %vm4078_vm14, %v3811_v9, -inf  ;;  %v2730_v61 = vcombine.high %v2458_v6, %v2458_v6  ;;  %v2737_v4 = vrot.slane %v2458_v6, %v8831_v13 }
 0x33c   : > { %v9594_v15 = vsel %vm4078_vm14, %v3818_v39, -inf  ;;  %v2849_v31 = vcombine.high %v2465_v23, %v2465_v23  ;;  %v2856_v44 = vrot.slane %v2465_v23, %v8831_v13  ;;  %v9597_v29 = vmax.f32 %v2410_v32, 0.0 }
 0x33d   : > { %v3825_v28 = vmax.f32 %v3823_v36, %v3824_v52  ;;  %v2744_v8 = vrot.slane %v2730_v61, %v8831_v13  ;;  %v2745_v49 = vcombine.high %v2737_v4, %v2737_v4  ;;  %v3546_v24 = vsel %vm3181_vm13, %v2737_v4, -inf }
 0x33e   : > { %v3547_v26 = vrot.slane %v3546_v24, 4  ;;  %v2863_v41 = vrot.slane %v2849_v31, %v8831_v13  ;;  %v2864_v11 = vcombine.high %v2856_v44, %v2856_v44  ;;  %v3742_v35 = vsel %vm3181_vm13, %v2856_v44, -inf }
 0x33f   : > { %v9604_v37 = vsel %vm4078_vm14, %v3825_v28, -inf  ;;  %v2746_v20 = vcombine.high %v2744_v8, %v2744_v8  ;;  %v3553_v34 = vsel %vm3181_vm13, %v2745_v49, -inf  ;;  %v3560_v42 = vsel %vm3181_vm13, %v2744_v8, -inf }
 0x340   : > { %v3548_v50 = vmax.f32 %v3546_v24, %v3547_v26  ;;  %v3554_v43 = vrot.slane %v3553_v34, 4  ;;  %v3561_v47 = vrot.slane %v3560_v42, 4  ;;  %v2865_v33 = vcombine.high %v2863_v41, %v2863_v41 }
 0x341   : > { %v3567_v51 = vsel %vm3181_vm13, %v2746_v20, -inf  ;;  %v3743_v16 = vrot.slane %v3742_v35, 4  ;;  %v3749_v53 = vsel %vm3181_vm13, %v2864_v11, -inf  ;;  %v3756_v57 = vsel %vm3181_vm13, %v2863_v41, -inf }
 0x342   : > { %v3549_v22 = vrot.slane %v3548_v50, 2  ;;  %v3555_v5 = vmax.f32 %v3553_v34, %v3554_v43  ;;  %v3562_v45 = vmax.f32 %v3560_v42, %v3561_v47  ;;  %v3568_v60 = vrot.slane %v3567_v51, 4 }
 0x343   : > { %v3744_v56 = vmax.f32 %v3742_v35, %v3743_v16  ;;  %v3750_v63 = vrot.slane %v3749_v53, 4  ;;  %v3757_v54 = vrot.slane %v3756_v57, 4  ;;  %v3763_v21 = vsel %vm3181_vm13, %v2865_v33, -inf }
 0x344   : > { %v3550_v7 = vmax.f32 %v3548_v50, %v3549_v22  ;;  %v3556_v40 = vrot.slane %v3555_v5, 2  ;;  %v3563_v18 = vrot.slane %v3562_v45, 2  ;;  %v3569_v48 = vmax.f32 %v3567_v51, %v3568_v60 }
 0x345   : > { %v3745_v12 = vrot.slane %v3744_v56, 2  ;;  %v3751_v9 = vmax.f32 %v3749_v53, %v3750_v63  ;;  %v3758_v36 = vmax.f32 %v3756_v57, %v3757_v54  ;;  %v3764_v6 = vrot.slane %v3763_v21, 4 }
 0x346   : > { %v3551_v32 = vrot.slane %v3550_v7, 1  ;;  %v3557_v39 = vmax.f32 %v3555_v5, %v3556_v40  ;;  %v3564_v23 = vmax.f32 %v3562_v45, %v3563_v18  ;;  %v3570_v52 = vrot.slane %v3569_v48, 2 }
 0x347   : > { %v3746_v61 = vmax.f32 %v3744_v56, %v3745_v12  ;;  %v3752_v4 = vrot.slane %v3751_v9, 2  ;;  %v3759_v31 = vrot.slane %v3758_v36, 2  ;;  %v3765_v44 = vmax.f32 %v3763_v21, %v3764_v6 }
 0x348   : > { %v3552_v28 = vmax.f32 %v3550_v7, %v3551_v32  ;;  %v3558_v8 = vrot.slane %v3557_v39, 1  ;;  %v3565_v49 = vrot.slane %v3564_v23, 1  ;;  %v3571_v24 = vmax.f32 %v3569_v48, %v3570_v52 }
 0x349   : > { %v3747_v26 = vrot.slane %v3746_v61, 1  ;;  %v3753_v41 = vmax.f32 %v3751_v9, %v3752_v4  ;;  %v3760_v11 = vmax.f32 %v3758_v36, %v3759_v31  ;;  %v3766_v35 = vrot.slane %v3765_v44, 2 }
 0x34a   : > { %v3559_v20 = vmax.f32 %v3557_v39, %v3558_v8  ;;  %v3566_v34 = vmax.f32 %v3564_v23, %v3565_v49  ;;  %v3572_v42 = vrot.slane %v3571_v24, 1  ;;  %v4163_v50 = vsel %vm4078_vm14, %v3552_v28, -inf }
 0x34b   : > { %v4165_v43 = vmax.f32 %v4163_v50, %v9558_v27  ;;  %v3748_v47 = vmax.f32 %v3746_v61, %v3747_v26  ;;  %v3754_v33 = vrot.slane %v3753_v41, 1  ;;  %v3761_v51 = vrot.slane %v3760_v11, 1 }
 0x34c   : > { %v3573_v16 = vmax.f32 %v3571_v24, %v3572_v42  ;;  %v4166_v53 = vsel %vm4078_vm14, %v3559_v20, -inf  ;;  %v4169_v57 = vsel %vm4078_vm14, %v3566_v34, -inf  ;;  %v3767_v22 = vmax.f32 %v3765_v44, %v3766_v35 }
 0x34d   : > { %v4168_v5 = vmax.f32 %v4166_v53, %v9561_v62  ;;  %v4171_v45 = vmax.f32 %v4169_v57, %v9564_v58  ;;  %v4386_v60 = vsel %vm4361_vm2, %v4165_v43, %v9579_v25  ;;  %v3755_v56 = vmax.f32 %v3753_v41, %v3754_v33 }
 0x34e   : > { %v4172_v63 = vsel %vm4078_vm14, %v3573_v16, -inf  ;;  %v3762_v27 = vmax.f32 %v3760_v11, %v3761_v51  ;;  %v3768_v54 = vrot.slane %v3767_v22, 1  ;;  %v4199_v21 = vsel %vm4078_vm14, %v3748_v47, -inf }
 0x34f   : > { %v4174_v7 = vmax.f32 %v4172_v63, %v9567_v10  ;;  %v4387_v40 = vsel %vm10415_vm4, %v4168_v5, %v4386_v60  ;;  %v4201_v18 = vmax.f32 %v4199_v21, %v9584_v38  ;;  %v4202_v62 = vsel %vm4078_vm14, %v3755_v56, -inf  ;;  %vm10422_vm4 = vmmov %vm10416_vm10 }
 0x350   : > { %v4388_v58 = vsel %vm10416_vm10, %v4171_v45, %v4387_v40  ;;  %v3769_v48 = vmax.f32 %v3767_v22, %v3768_v54  ;;  %v4204_v25 = vmax.f32 %v4202_v62, %v9590_v30  ;;  %v4205_v12 = vsel %vm4078_vm14, %v3762_v27, -inf  ;;  %vm10423_vm10 = vmmov %vm10420_vm6 }
 0x351   : > { %v4635_v9 = vpop.permute.xlu0 %4634  ;;  %v4389_v6 = vsel %vm10417_vm11, %v4174_v7, %v4388_v58  ;;  %v4207_v32 = vmax.f32 %v4205_v12, %v9594_v15  ;;  %v2900_v10 = vcombine.high %v9597_v29, %v9597_v29  ;;  %v2907_v38 = vrot.slane %v9597_v29, %v8831_v13  ;;  %v7406_v39 = vpop.f32.mrf.mxu1  ;;  %vm10425_vm11 = vmmov %vm10422_vm4 }
 0x352   : > { %v4682_v36 = vpop.permute.xlu1 %4681  ;;  %4656 = vst.msk [vmem:[#allocation5 + $0x38] sm:$0xff] %vm4491_vm7, %v4635_v9  ;;  %v4208_v30 = vsel %vm4078_vm14, %v3769_v48, -inf  ;;  %v4397_v23 = vsel %vm4355_vm15, %v4204_v25, %v4201_v18  ;;  %v2466_v52 = vmax.f32 %v9587_v14, 0.0  ;;  %v2423_v15 = vadd.f32 %v9572_v2, %v7406_v39 }
 0x353   : > { %4704 = vst.msk [vmem:[#allocation5 + $0x20] sm:$0xff] %vm4540_vm8, %v4682_v36  ;;  %v4210_v61 = vmax.f32 %v4208_v30, %v9604_v37  ;;  %v4398_v4 = vsel %vm4357_vm0, %v4207_v32, %v4397_v23  ;;  %v2914_v29 = vrot.slane %v2900_v10, %v8831_v13  ;;  %v2915_v31 = vcombine.high %v2907_v38, %v2907_v38 }
 0x354   : > { %4430 = vst.msk [vmem:[#allocation4 + $0x41] sm:$0xff] %vm4078_vm14, %v4389_v6  ;;  %v3826_v44 = vsel %vm3181_vm13, %v2907_v38, -inf  ;;  %v2866_v28 = vcombine.high %v2466_v52, %v2466_v52  ;;  %v2873_v8 = vrot.slane %v2466_v52, %v8831_v13  ;;  %v9647_v26 = vmax.f32 %v2423_v15, 0.0  ;;  %v4502_v52 = vld [vmem:[#allocation4 + $0x22] sm:$0xff] }
 0x355   : > { %v4472_v49 = vpop.permute.xlu0 %4471  ;;  %v2916_v41 = vcombine.high %v2914_v29, %v2914_v29  ;;  %v3827_v14 = vrot.slane %v3826_v44, 4  ;;  %v3833_v11 = vsel %vm3181_vm13, %v2915_v31, -inf  ;;  %v3840_v37 = vsel %vm3181_vm13, %v2914_v29, -inf }
 0x356   : > { %v4519_v24 = vpop.permute.xlu1 %4518  ;;  %4494 = vst.msk [vmem:[#allocation5 + $0x30] sm:$0xff] %vm4491_vm7, %v4472_v49  ;;  %v3834_v35 = vrot.slane %v3833_v11, 4  ;;  %v3841_v20 = vrot.slane %v3840_v37, 4  ;;  %v2880_v34 = vrot.slane %v2866_v28, %v8831_v13  ;;  %v2881_v42 = vcombine.high %v2873_v8, %v2873_v8 }
 0x357   : > { %4542 = vst.msk [vmem:[#allocation5 + $0x18] sm:$0xff] %vm4540_vm8, %v4519_v24  ;;  %v3828_v50 = vmax.f32 %v3826_v44, %v3827_v14  ;;  %v3847_v43 = vsel %vm3181_vm13, %v2916_v41, -inf  ;;  %v3770_v47 = vsel %vm3181_vm13, %v2873_v8, -inf  ;;  %v9657_v33 = vsel %vm4359_vm1, %v4210_v61, %v4398_v4 }
 0x358   : > { %v3835_v51 = vmax.f32 %v3833_v11, %v3834_v35  ;;  %v3842_v16 = vmax.f32 %v3840_v37, %v3841_v20  ;;  %v3848_v53 = vrot.slane %v3847_v43, 4  ;;  %v2882_v57 = vcombine.high %v2880_v34, %v2880_v34 }
 0x359   : > { %v3829_v5 = vrot.slane %v3828_v50, 2  ;;  %v3771_v45 = vrot.slane %v3770_v47, 4  ;;  %v3777_v60 = vsel %vm3181_vm13, %v2881_v42, -inf  ;;  %v3784_v56 = vsel %vm3181_vm13, %v2880_v34, -inf }
 0x35a   : > { %v4730_v22 = vpop.permute.xlu1 %4729  ;;  %v3836_v54 = vrot.slane %v3835_v51, 2  ;;  %v3843_v21 = vrot.slane %v3842_v16, 2  ;;  %v3849_v7 = vmax.f32 %v3847_v43, %v3848_v53  ;;  %v3778_v40 = vrot.slane %v3777_v60, 4 }
 0x35b   : > { %4752 = vst.msk [vmem:[#allocation5 + $0x20] sm:$0xff] %vm4589_vm9, %v4730_v22  ;;  %v9662_v63 = vld [vmem:[#allocation4 + $0x40] sm:$0xff]  ;;  %v3830_v58 = vmax.f32 %v3828_v50, %v3829_v5  ;;  %v3772_v48 = vmax.f32 %v3770_v47, %v3771_v45  ;;  %v3785_v25 = vrot.slane %v3784_v56, 4  ;;  %v3791_v12 = vsel %vm3181_vm13, %v2882_v57, -inf  ;;  %v4776_v47 = vld [vmem:[#allocation5 + $0x8] sm:$0xff] }
 0x35c   : > { %v9664_v27 = vld [vmem:[#allocation4 + $0x42] sm:$0xff]  ;;  %4683 = vrot.lane.b32.xlu0 %v9662_v63, %s7800_s23  ;;  %4447 = vst.msk [vmem:[#allocation5 + $0x60] sm:$0xff] %vm4078_vm14, %v9662_v63  ;;  %v3837_v9 = vmax.f32 %v3835_v51, %v3836_v54  ;;  %v3844_v36 = vmax.f32 %v3842_v16, %v3843_v21  ;;  %v3850_v6 = vrot.slane %v3849_v7, 2  ;;  %v3779_v32 = vmax.f32 %v3777_v60, %v3778_v40  ;;  %v2414_v21 = vpop.f32.mrf.mxu1 }
 0x35d   : > { %4636 = vrot.lane.b32.xlu1 %v9664_v27, %s7799_s22  ;;  %v9670_v18 = vld [vmem:[#allocation4 + $0x41] sm:$0xff]  ;;  %v3831_v38 = vrot.slane %v3830_v58, 1  ;;  %v3773_v39 = vrot.slane %v3772_v48, 2  ;;  %v3786_v30 = vmax.f32 %v3784_v56, %v3785_v25  ;;  %v3792_v23 = vrot.slane %v3791_v12, 4 }
 0x35e   : > { %v4761_v62 = vld [vmem:[#allocation4 + $0x42] sm:$0xff]  ;;  %4609 = vst.msk [vmem:[#allocation5 + $0x50] sm:$0xff] %vm4078_vm14, %v9670_v18  ;;  %v4568_v10 = vpop.permute.xlu1 %4567  ;;  %v3838_v15 = vrot.slane %v3837_v9, 1  ;;  %v3845_v61 = vrot.slane %v3844_v36, 1  ;;  %v3851_v4 = vmax.f32 %v3849_v7, %v3850_v6  ;;  %v3780_v29 = vrot.slane %v3779_v32, 2 }
 0x35f   : > { %4769 = vst.msk [vmem:[#allocation5 + $0x40] sm:$0xff] %vm4078_vm14, %v4761_v62  ;;  %v3832_v31 = vmax.f32 %v3830_v58, %v3831_v38  ;;  %v3774_v44 = vmax.f32 %v3772_v48, %v3773_v39  ;;  %v3787_v28 = vrot.slane %v3786_v30, 2  ;;  %v3793_v8 = vmax.f32 %v3791_v12, %v3792_v23  ;;  %v4775_v45 = vld [vmem:[#allocation5] sm:$0xff] }
 0x360   : > { %4591 = vst.msk [vmem:[#allocation5 + $0x18] sm:$0xff] %vm4589_vm9, %v4568_v10  ;;  %4520 = vrot.lane.b32.xlu0 %v4502_v52, %s7800_s23  ;;  %v3839_v49 = vmax.f32 %v3837_v9, %v3838_v15  ;;  %v3846_v24 = vmax.f32 %v3844_v36, %v3845_v61  ;;  %v3852_v41 = vrot.slane %v3851_v4, 1  ;;  %v3781_v14 = vmax.f32 %v3779_v32, %v3780_v29  ;;  %v9707_v52 = vld [vmem:[#allocation4 + $0x52] sm:$0xff] }
 0x361   : > { %4473 = vrot.lane.b32.xlu1 %v9459_v1, %s7799_s22  ;;  %v4212_v37 = vsel %vm4078_vm14, %v3832_v31, -inf  ;;  %v3775_v35 = vrot.slane %v3774_v44, 1  ;;  %v3788_v20 = vmax.f32 %v3786_v30, %v3787_v28  ;;  %v3794_v34 = vrot.slane %v3793_v8, 2 }
 0x362   : > { %v4779_v11 = vld [vmem:[#allocation5 + $0x20] sm:$0xff]  ;;  %v3853_v42 = vmax.f32 %v3851_v4, %v3852_v41  ;;  %v4215_v50 = vsel %vm4078_vm14, %v3839_v49, -inf  ;;  %v4218_v43 = vsel %vm4078_vm14, %v3846_v24, -inf  ;;  %v3782_v1 = vrot.slane %v3781_v14, 1 }
 0x363   : > { %v3776_v51 = vmax.f32 %v3774_v44, %v3775_v35  ;;  %v3789_v16 = vrot.slane %v3788_v20, 1  ;;  %v3795_v53 = vmax.f32 %v3793_v8, %v3794_v34  ;;  %v4800_v57 = vpack.c.bf16 %v4779_v11, %v4776_v47 }
 0x364   : > { %4731 = vrot.lane.b32.xlu0 %v9670_v18, %s7801_s24  ;;  %v4221_v22 = vsel %vm4078_vm14, %v3853_v42, -inf  ;;  %v3783_v5 = vmax.f32 %v3781_v14, %v3782_v1  ;;  %v2951_v56 = vcombine.high %v9647_v26, %v9647_v26  ;;  %v2958_v54 = vrot.slane %v9647_v26, %v8831_v13 }
 0x365   : > { %4685 = vrot.lane.b32.xlu1 %v9494_v59, %s7800_s23  ;;  %v3790_v7 = vmax.f32 %v3788_v20, %v3789_v16  ;;  %v3796_v40 = vrot.slane %v3795_v53, 1  ;;  %v4211_v62 = vsel %vm4078_vm14, %v3776_v51, -inf  ;;  %5006 = vmatprep.mubr.bf16.mxu1 %v4800_v57  ;;  %v2415_v8 = vadd.f32 %v9572_v2, %v2414_v21 }
 0x366   : > { %v4213_v48 = vmax.f32 %v4211_v62, %v4212_v37  ;;  %v4214_v25 = vsel %vm4078_vm14, %v3783_v5, -inf  ;;  %v2965_v12 = vrot.slane %v2951_v56, %v8831_v13  ;;  %v2966_v9 = vcombine.high %v2958_v54, %v2958_v54 }
 0x367   : > { %v4778_v60 = vld [vmem:[#allocation5 + $0x18] sm:$0xff]  ;;  %v3797_v26 = vmax.f32 %v3795_v53, %v3796_v40  ;;  %v4216_v36 = vmax.f32 %v4214_v25, %v4215_v50  ;;  %v4217_v6 = vsel %vm4078_vm14, %v3790_v7, -inf  ;;  %v3910_v32 = vsel %vm3181_vm13, %v2958_v54, -inf }
 0x368   : > { %v4799_v58 = vpack.c.bf16 %v4778_v60, %v4775_v45  ;;  %4569 = vrot.lane.b32.xlu0 %v9453_v3, %s7801_s24  ;;  %v4219_v10 = vmax.f32 %v4217_v6, %v4218_v43  ;;  %v4400_v38 = vsel %vm4361_vm2, %v4213_v48, %v9657_v33  ;;  %v2967_v39 = vcombine.high %v2965_v12, %v2965_v12  ;;  %v7407_v3 = vpop.f32.mrf.mxu1 }
 0x369   : > { %4522 = vrot.lane.b32.xlu1 %v9451_v46, %s7800_s23  ;;  %v3911_v30 = vrot.slane %v3910_v32, 4  ;;  %v4220_v23 = vsel %vm4078_vm14, %v3797_v26, -inf  ;;  %v4401_v46 = vsel %vm10418_vm3, %v4216_v36, %v4400_v38  ;;  %v3917_v15 = vsel %vm3181_vm13, %v2966_v9, -inf }
 0x36a   : > { %5007 = vmatmul.mubr.bf16.vlgmr.msra.gmra.mxu1 %v4799_v58  ;;  %v3924_v61 = vsel %vm3181_vm13, %v2965_v12, -inf  ;;  %v4222_v4 = vmax.f32 %v4220_v23, %v4221_v22  ;;  %v4402_v29 = vsel %vm10419_vm12, %v4219_v10, %v4401_v46  ;;  %v3918_v31 = vrot.slane %v3917_v15, 4  ;;  %v2417_v22 = vpop.f32.mrf.mxu1 }
 0x36b   : > { %v3912_v33 = vmax.f32 %v3910_v32, %v3911_v30  ;;  %v3925_v44 = vrot.slane %v3924_v61, 4  ;;  %v3931_v28 = vsel %vm3181_vm13, %v2967_v39, -inf  ;;  %v2426_v49 = vadd.f32 %v9572_v2, %v7407_v3 }
 0x36c   : > { %4638 = vrot.lane.b32.xlu0 %v9707_v52, %s7799_s22  ;;  %v4403_v24 = vsel %vm10420_vm6, %v4222_v4, %v4402_v29  ;;  %v3919_v41 = vmax.f32 %v3917_v15, %v3918_v31  ;;  %v3932_v14 = vrot.slane %v3931_v28, 4  ;;  %v2469_v11 = vmax.f32 %v2415_v8, 0.0 }
 0x36d   : > { %4733 = vrot.lane.b32.xlu1 %v9496_v17, %s7801_s24  ;;  %4432 = vst.msk [vmem:[#allocation4 + $0x61] sm:$0xff] %vm4078_vm14, %v4403_v24  ;;  %v3913_v37 = vrot.slane %v3912_v33, 2  ;;  %v3926_v35 = vmax.f32 %v3924_v61, %v3925_v44  ;;  %v2472_v20 = vmax.f32 %v2426_v49, 0.0  ;;  %v2418_v12 = vadd.f32 %v9572_v2, %v2417_v22  ;;  %v4766_v61 = vld [vmem:[#allocation4 + $0x92] sm:$0xff] }
 0x36e   : > { %v3920_v34 = vrot.slane %v3919_v41, 2  ;;  %v2917_v42 = vcombine.high %v2469_v11, %v2469_v11  ;;  %v2924_v50 = vrot.slane %v2469_v11, %v8831_v13  ;;  %v3933_v43 = vmax.f32 %v3931_v28, %v3932_v14  ;;  %4774 = vst.msk [vmem:[#allocation5 + $0xb8] sm:$0xff] %vm4078_vm14, %v4766_v61 }
 0x36f   : > { %v3914_v16 = vmax.f32 %v3912_v33, %v3913_v37  ;;  %v3927_v53 = vrot.slane %v3926_v35, 2  ;;  %v2975_v40 = vrot.slane %v2472_v20, %v8831_v13 }
 0x370   : > { %4475 = vrot.lane.b32.xlu0 %v9670_v18, %s7799_s22  ;;  %v2931_v1 = vrot.slane %v2917_v42, %v8831_v13  ;;  %v2932_v47 = vcombine.high %v2924_v50, %v2924_v50  ;;  %v3854_v51 = vsel %vm3181_vm13, %v2924_v50, -inf  ;;  %v2968_v18 = vcombine.high %v2472_v20, %v2472_v20 }
 0x371   : > { %4571 = vrot.lane.b32.xlu1 %v9662_v63, %s7801_s24  ;;  %v3855_v57 = vrot.slane %v3854_v51, 4  ;;  %v3921_v5 = vmax.f32 %v3919_v41, %v3920_v34  ;;  %v3934_v21 = vrot.slane %v3933_v43, 2  ;;  %v3915_v26 = vrot.slane %v3914_v16, 1 }
 0x372   : > { %v2933_v63 = vcombine.high %v2931_v1, %v2931_v1  ;;  %v3861_v45 = vsel %vm3181_vm13, %v2932_v47, -inf  ;;  %v3868_v60 = vsel %vm3181_vm13, %v2931_v1, -inf  ;;  %v3928_v36 = vmax.f32 %v3926_v35, %v3927_v53 }
 0x373   : > { %v3856_v7 = vmax.f32 %v3854_v51, %v3855_v57  ;;  %v3862_v58 = vrot.slane %v3861_v45, 4  ;;  %v3869_v48 = vrot.slane %v3868_v60, 4  ;;  %v3922_v10 = vrot.slane %v3921_v5, 1 }
 0x374   : > { %v9730_v56 = vld [vmem:[#allocation4 + $0x60] sm:$0xff]  ;;  %v3875_v25 = vsel %vm3181_vm13, %v2933_v63, -inf  ;;  %v2982_v30 = vrot.slane %v2968_v18, %v8831_v13  ;;  %v3935_v3 = vmax.f32 %v3933_v43, %v3934_v21  ;;  %v2983_v15 = vcombine.high %v2975_v40, %v2975_v40 }
 0x375   : > { %v9732_v54 = vld [vmem:[#allocation4 + $0x62] sm:$0xff]  ;;  %4687 = vrot.lane.b32.xlu0 %v9730_v56, %s7800_s23  ;;  %4449 = vst.msk [vmem:[#allocation5 + $0x90] sm:$0xff] %vm4078_vm14, %v9730_v56  ;;  %v3857_v6 = vrot.slane %v3856_v7, 2  ;;  %v3876_v32 = vrot.slane %v3875_v25, 4  ;;  %v3863_v38 = vmax.f32 %v3861_v45, %v3862_v58  ;;  %v3870_v39 = vmax.f32 %v3868_v60, %v3869_v48 }
 0x376   : > { %v9735_v62 = vld [vmem:[#allocation4 + $0x61] sm:$0xff]  ;;  %4640 = vrot.lane.b32.xlu1 %v9732_v54, %s7799_s22  ;;  %v2984_v33 = vcombine.high %v2982_v30, %v2982_v30  ;;  %v3938_v31 = vsel %vm3181_vm13, %v2975_v40, -inf  ;;  %v3929_v44 = vrot.slane %v3928_v36, 1  ;;  %v3945_v49 = vsel %vm3181_vm13, %v2983_v15, -inf }
 0x377   : > { %4611 = vst.msk [vmem:[#allocation5 + $0x80] sm:$0xff] %vm4078_vm14, %v9735_v62  ;;  %v4763_v9 = vld [vmem:[#allocation4 + $0x62] sm:$0xff]  ;;  %v3858_v23 = vmax.f32 %v3856_v7, %v3857_v6  ;;  %v3877_v46 = vmax.f32 %v3875_v25, %v3876_v32  ;;  %v3864_v4 = vrot.slane %v3863_v38, 2  ;;  %v3871_v29 = vrot.slane %v3870_v39, 2 }
 0x378   : > { %4771 = vst.msk [vmem:[#allocation5 + $0x70] sm:$0xff] %vm4078_vm14, %v4763_v9  ;;  %v3939_v8 = vrot.slane %v3938_v31, 4  ;;  %v3946_v14 = vrot.slane %v3945_v49, 4  ;;  %v3952_v11 = vsel %vm3181_vm13, %v2982_v30, -inf  ;;  %v3936_v37 = vrot.slane %v3935_v3, 1 }
 0x379   : > { %4524 = vrot.lane.b32.xlu0 %v9664_v27, %s7800_s23  ;;  %v3878_v28 = vrot.slane %v3877_v46, 2  ;;  %v3865_v24 = vmax.f32 %v3863_v38, %v3864_v4  ;;  %v3872_v41 = vmax.f32 %v3870_v39, %v3871_v29  ;;  %v3859_v27 = vrot.slane %v3858_v23, 1 }
 0x37a   : > { %4477 = vrot.lane.b32.xlu1 %v9496_v17, %s7799_s22  ;;  %v3940_v20 = vmax.f32 %v3938_v31, %v3939_v8  ;;  %v3953_v42 = vrot.slane %v3952_v11, 4  ;;  %v3959_v50 = vsel %vm3181_vm13, %v2984_v33, -inf  ;;  %v3916_v43 = vmax.f32 %v3914_v16, %v3915_v26 }
 0x37b   : > { %v3879_v35 = vmax.f32 %v3877_v46, %v3878_v28  ;;  %v3866_v17 = vrot.slane %v3865_v24, 1  ;;  %v3873_v34 = vrot.slane %v3872_v41, 1  ;;  %v3923_v1 = vmax.f32 %v3921_v5, %v3922_v10 }
 0x37c   : > { %v3930_v47 = vmax.f32 %v3928_v36, %v3929_v44  ;;  %v3947_v53 = vmax.f32 %v3945_v49, %v3946_v14  ;;  %v3937_v57 = vmax.f32 %v3935_v3, %v3936_v37  ;;  %v3860_v18 = vmax.f32 %v3858_v23, %v3859_v27 }
 0x37d   : > { %4735 = vrot.lane.b32.xlu0 %v9735_v62, %s7801_s24  ;;  %v3867_v51 = vmax.f32 %v3865_v24, %v3866_v17  ;;  %v3880_v22 = vrot.slane %v3879_v35, 1  ;;  %v3960_v63 = vrot.slane %v3959_v50, 4  ;;  %v3874_v45 = vmax.f32 %v3872_v41, %v3873_v34 }
 0x37e   : > { %v3941_v60 = vrot.slane %v3940_v20, 2  ;;  %v3954_v21 = vmax.f32 %v3952_v11, %v3953_v42  ;;  %v2470_v7 = vmax.f32 %v2418_v12, 0.0  ;;  %v4224_v40 = vsel %vm4078_vm14, %v3916_v43, -inf }
 0x37f   : > { %v4227_v58 = vsel %vm4078_vm14, %v3923_v1, -inf  ;;  %v4230_v16 = vsel %vm4078_vm14, %v3930_v47, -inf  ;;  %v4226_v5 = vsel %vm4078_vm14, %v3867_v51, -inf  ;;  %v3948_v48 = vrot.slane %v3947_v53, 2 }
 0x380   : > { %v3961_v25 = vmax.f32 %v3959_v50, %v3960_v63  ;;  %v4233_v9 = vsel %vm4078_vm14, %v3937_v57, -inf  ;;  %v4223_v26 = vsel %vm4078_vm14, %v3860_v18, -inf  ;;  %v2934_v36 = vcombine.high %v2470_v7, %v2470_v7 }
 0x381   : > { %4573 = vrot.lane.b32.xlu0 %v9494_v59, %s7801_s24  ;;  %v2941_v12 = vrot.slane %v2470_v7, %v8831_v13  ;;  %v3881_v6 = vmax.f32 %v3879_v35, %v3880_v22  ;;  %v4229_v59 = vsel %vm4078_vm14, %v3874_v45, -inf  ;;  %v3942_v32 = vmax.f32 %v3940_v20, %v3941_v60 }
 0x382   : > { %v3955_v10 = vrot.slane %v3954_v21, 2  ;;  %v4228_v38 = vmax.f32 %v4226_v5, %v4227_v58  ;;  %v2948_v39 = vrot.slane %v2934_v36, %v8831_v13  ;;  %v4225_v23 = vmax.f32 %v4223_v26, %v4224_v40 }
 0x383   : > { %v2949_v30 = vcombine.high %v2941_v12, %v2941_v12  ;;  %v3882_v3 = vsel %vm3181_vm13, %v2941_v12, -inf  ;;  %v3949_v46 = vmax.f32 %v3947_v53, %v3948_v48  ;;  %v3962_v15 = vrot.slane %v3961_v25, 2 }
 0x384   : > { %v3883_v61 = vrot.slane %v3882_v3, 4  ;;  %v4231_v4 = vmax.f32 %v4229_v59, %v4230_v16  ;;  %v2950_v29 = vcombine.high %v2948_v39, %v2948_v39  ;;  %v3896_v31 = vsel %vm3181_vm13, %v2948_v39, -inf }
 0x385   : > { %v3889_v33 = vsel %vm3181_vm13, %v2949_v30, -inf  ;;  %v4232_v44 = vsel %vm4078_vm14, %v3881_v6, -inf  ;;  %v3943_v28 = vrot.slane %v3942_v32, 1  ;;  %v4404_v24 = vsel %vm4355_vm15, %v4228_v38, %v4225_v23 }
 0x386   : > { %v3884_v8 = vmax.f32 %v3882_v3, %v3883_v61  ;;  %v3890_v49 = vrot.slane %v3889_v33, 4  ;;  %v3956_v41 = vmax.f32 %v3954_v21, %v3955_v10  ;;  %v3897_v14 = vrot.slane %v3896_v31, 4 }
 0x387   : > { %v3903_v11 = vsel %vm3181_vm13, %v2950_v29, -inf  ;;  %v3963_v37 = vmax.f32 %v3961_v25, %v3962_v15  ;;  %v4234_v17 = vmax.f32 %v4232_v44, %v4233_v9  ;;  %v3950_v42 = vrot.slane %v3949_v46, 1 }
 0x388   : > { %v3885_v27 = vrot.slane %v3884_v8, 2  ;;  %v3891_v35 = vmax.f32 %v3889_v33, %v3890_v49  ;;  %v3904_v20 = vrot.slane %v3903_v11, 4  ;;  %v3898_v34 = vmax.f32 %v3896_v31, %v3897_v14 }
 0x389   : > { %v4405_v47 = vsel %vm4357_vm0, %v4231_v4, %v4404_v24  ;;  %v3944_v51 = vmax.f32 %v3942_v32, %v3943_v28  ;;  %v3957_v53 = vrot.slane %v3956_v41, 1  ;;  %v3964_v18 = vrot.slane %v3963_v37, 1 }
 0x38a   : > { %v3886_v50 = vmax.f32 %v3884_v8, %v3885_v27  ;;  %v3892_v43 = vrot.slane %v3891_v35, 2  ;;  %v3905_v1 = vmax.f32 %v3903_v11, %v3904_v20  ;;  %v3899_v57 = vrot.slane %v3898_v34, 2 }
 0x38b   : > { %v3951_v21 = vmax.f32 %v3949_v46, %v3950_v42  ;;  %v3958_v16 = vmax.f32 %v3956_v41, %v3957_v53  ;;  %v4236_v5 = vsel %vm4078_vm14, %v3944_v51, -inf  ;;  %v4406_v25 = vsel %vm4359_vm1, %v4234_v17, %v4405_v47 }
 0x38c   : > { %v3887_v22 = vrot.slane %v3886_v50, 1  ;;  %v3893_v63 = vmax.f32 %v3891_v35, %v3892_v43  ;;  %v3906_v45 = vrot.slane %v3905_v1, 2  ;;  %v3900_v60 = vmax.f32 %v3898_v34, %v3899_v57 }
 0x38d   : > { %v3965_v9 = vmax.f32 %v3963_v37, %v3964_v18  ;;  %v4239_v32 = vsel %vm4078_vm14, %v3951_v21, -inf  ;;  %v4242_v39 = vsel %vm4078_vm14, %v3958_v16, -inf }
 0x38e   : > { %v3888_v7 = vmax.f32 %v3886_v50, %v3887_v22  ;;  %v3894_v40 = vrot.slane %v3893_v63, 1  ;;  %v3907_v58 = vmax.f32 %v3905_v1, %v3906_v45  ;;  %v3901_v48 = vrot.slane %v3900_v60, 1 }
 0x38f   : > { %v4245_v46 = vsel %vm4078_vm14, %v3965_v9, -inf }
 0x390   : > { %v3895_v26 = vmax.f32 %v3893_v63, %v3894_v40  ;;  %v3908_v36 = vrot.slane %v3907_v58, 1  ;;  %v4235_v12 = vsel %vm4078_vm14, %v3888_v7, -inf  ;;  %v3902_v6 = vmax.f32 %v3900_v60, %v3901_v48 }
 0x391   : > { %v4237_v59 = vmax.f32 %v4235_v12, %v4236_v5 }
 0x392   : > { %v3909_v10 = vmax.f32 %v3907_v58, %v3908_v36  ;;  %v4238_v38 = vsel %vm4078_vm14, %v3895_v26, -inf  ;;  %v4241_v3 = vsel %vm4078_vm14, %v3902_v6, -inf }
 0x393   : > { %v4240_v30 = vmax.f32 %v4238_v38, %v4239_v32  ;;  %v4407_v23 = vsel %vm4361_vm2, %v4237_v59, %v4406_v25  ;;  %v4243_v15 = vmax.f32 %v4241_v3, %v4242_v39 }
 0x394   : > { %v4244_v61 = vsel %vm4078_vm14, %v3909_v10, -inf }
 0x395   : > { %v4246_v4 = vmax.f32 %v4244_v61, %v4245_v46  ;;  %v4408_v29 = vsel %vm10421_vm5, %v4240_v30, %v4407_v23 }
 0x396   : > { %v4409_v33 = vsel %vm10422_vm4, %v4243_v15, %v4408_v29 }
 0x397   : > { %v4410_v31 = vsel %vm10423_vm10, %v4246_v4, %v4409_v33 }
 0x398   : > { %4433 = vst.msk [vmem:[#allocation4 + $0x71] sm:$0xff] %vm4078_vm14, %v4410_v31 }
 0x39a   : > { %v7410_v44 = vpop.f32.mrf.mxu1 }
 0x39b   : > { %v2439_v28 = vadd.f32 %v9572_v2, %v7410_v44 }
 0x39c   : > { %v2430_v8 = vpop.f32.mrf.mxu1 }
 0x39d   : > { %v2475_v49 = vmax.f32 %v2439_v28, 0.0  ;;  %v2431_v24 = vadd.f32 %v9572_v2, %v2430_v8 }
 0x39e   : > { %v7411_v37 = vpop.f32.mrf.mxu1 }
 0x39f   : > { %v3019_v41 = vcombine.high %v2475_v49, %v2475_v49  ;;  %v3026_v14 = vrot.slane %v2475_v49, %v8831_v13  ;;  %v2473_v11 = vmax.f32 %v2431_v24, 0.0  ;;  %v9797_v34 = vld [vmem:[#allocation4 + $0x72] sm:$0xff]  ;;  %v2442_v47 = vadd.f32 %v9572_v2, %v7411_v37 }
 0x3a0   : > { %v9799_v42 = vld [vmem:[#allocation4 + $0x70] sm:$0xff]  ;;  %4642 = vrot.lane.b32.xlu0 %v9797_v34, %s7799_s22  ;;  %4772 = vst.msk [vmem:[#allocation5 + $0x88] sm:$0xff] %vm4078_vm14, %v9797_v34  ;;  %v2433_v33 = vpop.f32.mrf.mxu1 }
 0x3a1   : > { %v3033_v27 = vrot.slane %v3019_v41, %v8831_v13  ;;  %v3034_v35 = vcombine.high %v3026_v14, %v3026_v14  ;;  %v4022_v20 = vsel %vm3181_vm13, %v3026_v14, -inf  ;;  %v2985_v17 = vcombine.high %v2473_v11, %v2473_v11  ;;  %v9801_v50 = vld [vmem:[#allocation4 + $0x71] sm:$0xff]  ;;  %4689 = vrot.lane.b32.xlu1 %v9799_v42, %s7800_s23  ;;  %4450 = vst.msk [vmem:[#allocation5 + $0xa8] sm:$0xff] %vm4078_vm14, %v9799_v42 }
 0x3a2   : > { %v4023_v43 = vrot.slane %v4022_v20, 4  ;;  %v2992_v1 = vrot.slane %v2473_v11, %v8831_v13  ;;  %4612 = vst.msk [vmem:[#allocation5 + $0x98] sm:$0xff] %vm4078_vm14, %v9801_v50  ;;  %v2476_v8 = vmax.f32 %v2442_v47, 0.0  ;;  %v2434_v37 = vadd.f32 %v9572_v2, %v2433_v33 }
 0x3a3   : > { %v3035_v51 = vcombine.high %v3033_v27, %v3033_v27  ;;  %v4029_v53 = vsel %vm3181_vm13, %v3034_v35, -inf  ;;  %v4036_v57 = vsel %vm3181_vm13, %v3033_v27, -inf  ;;  %v2999_v18 = vrot.slane %v2985_v17, %v8831_v13 }
 0x3a4   : > { %v4024_v22 = vmax.f32 %v4022_v20, %v4023_v43  ;;  %v4030_v63 = vrot.slane %v4029_v53, 4  ;;  %v4037_v45 = vrot.slane %v4036_v57, 4  ;;  %v3000_v60 = vcombine.high %v2992_v1, %v2992_v1  ;;  %4479 = vrot.lane.b32.xlu0 %v9735_v62, %s7799_s22 }
 0x3a5   : > { %v4043_v21 = vsel %vm3181_vm13, %v3035_v51, -inf  ;;  %v3001_v7 = vcombine.high %v2999_v18, %v2999_v18  ;;  %v3966_v40 = vsel %vm3181_vm13, %v2992_v1, -inf  ;;  %v3980_v58 = vsel %vm3181_vm13, %v2999_v18, -inf  ;;  %4526 = vrot.lane.b32.xlu1 %v9707_v52, %s7800_s23 }
 0x3a6   : > { %v4025_v16 = vrot.slane %v4024_v22, 2  ;;  %v4031_v5 = vmax.f32 %v4029_v53, %v4030_v63  ;;  %v4038_v48 = vmax.f32 %v4036_v57, %v4037_v45  ;;  %v4044_v25 = vrot.slane %v4043_v21, 4 }
 0x3a7   : > { %v3967_v9 = vrot.slane %v3966_v40, 4  ;;  %v3973_v26 = vsel %vm3181_vm13, %v3000_v60, -inf  ;;  %v3981_v36 = vrot.slane %v3980_v58, 4  ;;  %v3987_v12 = vsel %vm3181_vm13, %v3001_v7, -inf }
 0x3a8   : > { %v4026_v6 = vmax.f32 %v4024_v22, %v4025_v16  ;;  %v4032_v59 = vrot.slane %v4031_v5, 2  ;;  %v4039_v32 = vrot.slane %v4038_v48, 2  ;;  %v4045_v10 = vmax.f32 %v4043_v21, %v4044_v25 }
 0x3a9   : > { %v3968_v38 = vmax.f32 %v3966_v40, %v3967_v9  ;;  %v3974_v39 = vrot.slane %v3973_v26, 4  ;;  %v3982_v30 = vmax.f32 %v3980_v58, %v3981_v36  ;;  %v3988_v3 = vrot.slane %v3987_v12, 4  ;;  %4737 = vrot.lane.b32.xlu1 %v9801_v50, %s7801_s24 }
 0x3aa   : > { %v4027_v23 = vrot.slane %v4026_v6, 1  ;;  %v4033_v46 = vmax.f32 %v4031_v5, %v4032_v59  ;;  %v4040_v62 = vmax.f32 %v4038_v48, %v4039_v32  ;;  %v4046_v15 = vrot.slane %v4045_v10, 2 }
 0x3ab   : > { %v3969_v52 = vrot.slane %v3968_v38, 2  ;;  %v3975_v61 = vmax.f32 %v3973_v26, %v3974_v39  ;;  %v3983_v4 = vrot.slane %v3982_v30, 2  ;;  %v3989_v29 = vmax.f32 %v3987_v12, %v3988_v3 }
 0x3ac   : > { %v4034_v31 = vrot.slane %v4033_v46, 1  ;;  %v4041_v44 = vrot.slane %v4040_v62, 1  ;;  %v4047_v28 = vmax.f32 %v4045_v10, %v4046_v15  ;;  %v4028_v11 = vmax.f32 %v4026_v6, %v4027_v23 }
 0x3ad   : > { %v3970_v49 = vmax.f32 %v3968_v38, %v3969_v52  ;;  %v3976_v24 = vrot.slane %v3975_v61, 2  ;;  %v3984_v41 = vmax.f32 %v3982_v30, %v3983_v4  ;;  %v3990_v14 = vrot.slane %v3989_v29, 2  ;;  %4575 = vrot.lane.b32.xlu1 %v9730_v56, %s7801_s24 }
 0x3ae   : > { %v4048_v27 = vrot.slane %v4047_v28, 1  ;;  %v4035_v43 = vmax.f32 %v4033_v46, %v4034_v31  ;;  %v3036_v51 = vcombine.high %v2476_v8, %v2476_v8  ;;  %v4042_v53 = vmax.f32 %v4040_v62, %v4041_v44 }
 0x3af   : > { %v3971_v35 = vrot.slane %v3970_v49, 1  ;;  %v3977_v20 = vmax.f32 %v3975_v61, %v3976_v24  ;;  %v3991_v17 = vmax.f32 %v3989_v29, %v3990_v14  ;;  %v3985_v1 = vrot.slane %v3984_v41, 1 }
 0x3b0   : > { %v3043_v22 = vrot.slane %v2476_v8, %v8831_v13  ;;  %v3050_v63 = vrot.slane %v3036_v51, %v8831_v13  ;;  %v4049_v45 = vmax.f32 %v4047_v28, %v4048_v27  ;;  %v4248_v2 = vsel %vm4078_vm14, %v4028_v11, -inf }
 0x3b1   : > { %v3978_v57 = vrot.slane %v3977_v20, 1  ;;  %v3992_v47 = vrot.slane %v3991_v17, 1  ;;  %v3972_v18 = vmax.f32 %v3970_v49, %v3971_v35  ;;  %v2474_v56 = vmax.f32 %v2434_v37, 0.0 }
 0x3b2   : > { %v4251_v21 = vsel %vm4078_vm14, %v4035_v43, -inf  ;;  %v3986_v7 = vmax.f32 %v3984_v41, %v3985_v1  ;;  %v3051_v40 = vcombine.high %v3043_v22, %v3043_v22  ;;  %v3052_v58 = vcombine.high %v3050_v63, %v3050_v63 }
 0x3b3   : > { %v3979_v60 = vmax.f32 %v3977_v20, %v3978_v57  ;;  %v4254_v16 = vsel %vm4078_vm14, %v4042_v53, -inf  ;;  %v3993_v5 = vmax.f32 %v3991_v17, %v3992_v47  ;;  %v4050_v48 = vsel %vm3181_vm13, %v3043_v22, -inf }
 0x3b4   : > { %v4064_v25 = vsel %vm3181_vm13, %v3050_v63, -inf  ;;  %v4247_v9 = vsel %vm4078_vm14, %v3972_v18, -inf  ;;  %v4051_v36 = vrot.slane %v4050_v48, 4  ;;  %v4057_v12 = vsel %vm3181_vm13, %v3051_v40, -inf }
 0x3b5   : > { %v4250_v26 = vsel %vm4078_vm14, %v3979_v60, -inf  ;;  %v4058_v6 = vrot.slane %v4057_v12, 4  ;;  %v4065_v59 = vrot.slane %v4064_v25, 4  ;;  %v4071_v32 = vsel %vm3181_vm13, %v3052_v58, -inf }
 0x3b6   : > { %v3002_v10 = vcombine.high %v2474_v56, %v2474_v56  ;;  %v4253_v38 = vsel %vm4078_vm14, %v3986_v7, -inf  ;;  %v4052_v39 = vmax.f32 %v4050_v48, %v4051_v36  ;;  %v4072_v30 = vrot.slane %v4071_v32, 4 }
 0x3b7   : > { %v3009_v3 = vrot.slane %v2474_v56, %v8831_v13  ;;  %v4252_v23 = vmax.f32 %v4250_v26, %v4251_v21  ;;  %v4059_v46 = vmax.f32 %v4057_v12, %v4058_v6  ;;  %v4066_v62 = vmax.f32 %v4064_v25, %v4065_v59 }
 0x3b8   : > { %v3016_v15 = vrot.slane %v3002_v10, %v8831_v13  ;;  %v4053_v52 = vrot.slane %v4052_v39, 2  ;;  %v4073_v61 = vmax.f32 %v4071_v32, %v4072_v30  ;;  %v4249_v35 = vmax.f32 %v4247_v9, %v4248_v2 }
 0x3b9   : > { %v3017_v4 = vcombine.high %v3009_v3, %v3009_v3  ;;  %v3994_v29 = vsel %vm3181_vm13, %v3009_v3, -inf  ;;  %v4060_v33 = vrot.slane %v4059_v46, 2  ;;  %v4067_v31 = vrot.slane %v4066_v62, 2 }
 0x3ba   : > { %v3018_v44 = vcombine.high %v3016_v15, %v3016_v15  ;;  %v3995_v28 = vrot.slane %v3994_v29, 4  ;;  %v4054_v8 = vmax.f32 %v4052_v39, %v4053_v52  ;;  %v4074_v49 = vrot.slane %v4073_v61, 2 }
 0x3bb   : > { %v4001_v24 = vsel %vm3181_vm13, %v3017_v4, -inf  ;;  %v4008_v41 = vsel %vm3181_vm13, %v3016_v15, -inf  ;;  %v4061_v14 = vmax.f32 %v4059_v46, %v4060_v33  ;;  %v4068_v11 = vmax.f32 %v4066_v62, %v4067_v31 }
 0x3bc   : > { %v3996_v37 = vmax.f32 %v3994_v29, %v3995_v28  ;;  %v4002_v27 = vrot.slane %v4001_v24, 4  ;;  %v4255_v20 = vmax.f32 %v4253_v38, %v4254_v16  ;;  %v4009_v17 = vrot.slane %v4008_v41, 4 }
 0x3bd   : > { %v4015_v43 = vsel %vm3181_vm13, %v3018_v44, -inf  ;;  %v4256_v1 = vsel %vm4078_vm14, %v3993_v5, -inf  ;;  %v4055_v51 = vrot.slane %v4054_v8, 1  ;;  %v4411_v47 = vsel %vm4355_vm15, %v4252_v23, %v4249_v35  ;;  %vm10424_vm13 = vmmov %vm10418_vm3 }
 0x3be   : > { %v3997_v53 = vrot.slane %v3996_v37, 2  ;;  %v4003_v57 = vmax.f32 %v4001_v24, %v4002_v27  ;;  %v4075_v18 = vmax.f32 %v4073_v61, %v4074_v49  ;;  %v4010_v22 = vmax.f32 %v4008_v41, %v4009_v17  ;;  %vm10426_vm3 = vmmov %vm10420_vm6 }
 0x3bf   : > { %v4016_v63 = vrot.slane %v4015_v43, 4  ;;  %v4062_v60 = vrot.slane %v4061_v14, 1  ;;  %v4069_v56 = vrot.slane %v4068_v11, 1  ;;  %v4257_v2 = vsel %vm4078_vm14, %v4049_v45, -inf }
 0x3c0   : > { %v3998_v21 = vmax.f32 %v3996_v37, %v3997_v53  ;;  %v4004_v7 = vrot.slane %v4003_v57, 2  ;;  %v4011_v40 = vrot.slane %v4010_v22, 2  ;;  %v4258_v16 = vmax.f32 %v4256_v1, %v4257_v2 }
 0x3c1   : > { %v4017_v58 = vmax.f32 %v4015_v43, %v4016_v63  ;;  %v4056_v48 = vmax.f32 %v4054_v8, %v4055_v51  ;;  %v4412_v9 = vsel %vm4357_vm0, %v4255_v20, %v4411_v47  ;;  %v4076_v26 = vrot.slane %v4075_v18, 1  ;;  %v7514_v20 = vld [vmem:[#allocation9 + $0x88] sm:$0xff]  }
 0x3c2   : > { %v3999_v25 = vrot.slane %v3998_v21, 1  ;;  %v4005_v5 = vmax.f32 %v4003_v57, %v4004_v7  ;;  %v4012_v36 = vmax.f32 %v4010_v22, %v4011_v40  ;;  %v4063_v6 = vmax.f32 %v4061_v14, %v4062_v60  ;;  %7412 = vmatprep.subr.bf16.mxu1 %v7514_v20 }
 0x3c3   : > { %v4018_v12 = vrot.slane %v4017_v58, 2  ;;  %v4070_v59 = vmax.f32 %v4068_v11, %v4069_v56  ;;  %v4260_v30 = vsel %vm4078_vm14, %v4056_v48, -inf  ;;  %v4413_v23 = vsel %vm4359_vm1, %v4258_v16, %v4412_v9  ;;  %7413 = vmatpush3.bf16.msra.mxu1 %v7514_v20  ;;  %v4670_v56 = vld [vmem:[#allocation4 + $0x90] sm:$0xff]  ;;  %v4783_v20 = vld [vmem:[#allocation5 + $0x40] sm:$0xff] }
 0x3c4   : > { %v4000_v32 = vmax.f32 %v3998_v21, %v3999_v25  ;;  %v4006_v10 = vrot.slane %v4005_v5, 1  ;;  %v4013_v38 = vrot.slane %v4012_v36, 1  ;;  %v4077_v46 = vmax.f32 %v4075_v18, %v4076_v26  ;;  %v7515_v21 = vld [vmem:[#allocation9 + $0x80] sm:$0xff]  }
 0x3c5   : > { %v4019_v39 = vmax.f32 %v4017_v58, %v4018_v12  ;;  %v4263_v61 = vsel %vm4078_vm14, %v4063_v6, -inf  ;;  %v4266_v4 = vsel %vm4078_vm14, %v4070_v59, -inf  ;;  %7414 = vmatprep.subr.bf16.mxu1 %v7515_v21  ;;  %v4718_v58 = vld [vmem:[#allocation4 + $0x91] sm:$0xff] }
 0x3c6   : > { %v4007_v45 = vmax.f32 %v4005_v5, %v4006_v10  ;;  %v4259_v3 = vsel %vm4078_vm14, %v4000_v32, -inf  ;;  %v4014_v62 = vmax.f32 %v4012_v36, %v4013_v38  ;;  %v4269_v49 = vsel %vm4078_vm14, %v4077_v46, -inf }
 0x3c7   : > { %v4020_v15 = vrot.slane %v4019_v39, 1  ;;  %v4261_v52 = vmax.f32 %v4259_v3, %v4260_v30  ;;  %7415 = vmatpush3.bf16.msra.mxu1 %v7515_v21 }
 0x3c8   : > { %v4262_v29 = vsel %vm4078_vm14, %v4007_v45, -inf  ;;  %v4265_v44 = vsel %vm4078_vm14, %v4014_v62, -inf }
 0x3c9   : > { %v4021_v33 = vmax.f32 %v4019_v39, %v4020_v15  ;;  %v4264_v31 = vmax.f32 %v4262_v29, %v4263_v61  ;;  %v4414_v28 = vsel %vm4361_vm2, %v4261_v52, %v4413_v23  ;;  %v4267_v8 = vmax.f32 %v4265_v44, %v4266_v4 }
 0x3ca   : > { %vm5562_vm2 = vcmask 521216  }
 0x3cb   : > { %v4268_v24 = vsel %vm4078_vm14, %v4021_v33, -inf  ;;  %v4415_v41 = vsel %vm10424_vm13, %v4264_v31, %v4414_v28  ;;  %5565 = vst.msk [vmem:[#allocation6 + $0x10] sm:$0x3f] %vm5562_vm2, %v7788_v0  ;;  %5563 = vst.msk [vmem:[#allocation6] sm:$0x3f] %vm5562_vm2, %v7788_v0 }
 0x3cc   : > { %v4270_v37 = vmax.f32 %v4268_v24, %v4269_v49  ;;  %v4416_v27 = vsel %vm10425_vm11, %v4267_v8, %v4415_v41  ;;  %v4780_v41 = vld [vmem:[#allocation5 + $0x28] sm:$0xff]  ;;  %5564 = vst.msk [vmem:[#allocation6 + $0x8] sm:$0x3f] %vm5562_vm2, %v7788_v0  ;;  %5566 = vst.msk [vmem:[#allocation6 + $0x18] sm:$0x3f] %vm5562_vm2, %v7788_v0 }
 0x3cd   : > { %5567 = vst.msk [vmem:[#allocation6 + $0x20] sm:$0x3f] %vm5562_vm2, %v7788_v0  ;;  %5568 = vst.msk [vmem:[#allocation6 + $0x28] sm:$0x3f] %vm5562_vm2, %v7788_v0 }
 0x3ce   : > { %v4684_v14 = vpop.permute.xlu0 %4683  ;;  %v4417_v35 = vsel %vm10426_vm3, %v4270_v37, %v4416_v27  ;;  %v4777_v27 = vld [vmem:[#allocation5 + $0x10] sm:$0xff] }
 0x3cf   : > { %v4637_v11 = vpop.permute.xlu1 %4636  ;;  %4705 = vst.msk [vmem:[#allocation5 + $0x38] sm:$0xff] %vm4540_vm8, %v4684_v14 }
 0x3d0   : > { %4657 = vst.msk [vmem:[#allocation5 + $0x50] sm:$0xff] %vm4491_vm7, %v4637_v11 }
 0x3d1   : > { %4434 = vst.msk [vmem:[#allocation4 + $0x81] sm:$0xff] %vm4078_vm14, %v4417_v35  ;;  %v4801_v35 = vpack.c.bf16 %v4780_v41, %v4777_v27 }
 0x3d2   : > { %v4521_v17 = vpop.permute.xlu0 %4520 }
 0x3d3   : > { %v4474_v43 = vpop.permute.xlu1 %4473  ;;  %4543 = vst.msk [vmem:[#allocation5 + $0x30] sm:$0xff] %vm4540_vm8, %v4521_v17  ;;  %v4792_v17 = vld [vmem:[#allocation5 + $0x88] sm:$0xff] }
 0x3d4   : > { %4495 = vst.msk [vmem:[#allocation5 + $0x48] sm:$0xff] %vm4491_vm7, %v4474_v43  ;;  %v4786_v43 = vld [vmem:[#allocation5 + $0x58] sm:$0xff] }
 0x3d6   : > { %v4732_v1 = vpop.permute.xlu0 %4731 }
 0x3d7   : > { %v4686_v51 = vpop.permute.xlu1 %4685  ;;  %4753 = vst.msk [vmem:[#allocation5 + $0x38] sm:$0xff] %vm4589_vm9, %v4732_v1  ;;  %v4804_v1 = vpack.c.bf16 %v4786_v43, %v4783_v20 }
 0x3d8   : > { %4706 = vst.msk [vmem:[#allocation5 + $0x50] sm:$0xff] %vm4540_vm8, %v4686_v51  ;;  %v4669_v53 = vld [vmem:[#allocation4 + $0x80] sm:$0xff]  ;;  %v4789_v51 = vld [vmem:[#allocation5 + $0x70] sm:$0xff] }
 0x3d9   : > { %v4621_v57 = vld [vmem:[#allocation4 + $0x82] sm:$0xff]  ;;  %4691 = vrot.lane.b32.xlu0 %v4669_v53, %s7800_s23 }
 0x3da   : > { %v4717_v47 = vld [vmem:[#allocation4 + $0x81] sm:$0xff]  ;;  %v4570_v18 = vpop.permute.xlu0 %4569  ;;  %4644 = vrot.lane.b32.xlu1 %v4621_v57, %s7799_s22  ;;  %4773 = vst.msk [vmem:[#allocation5 + $0xa0] sm:$0xff] %vm4078_vm14, %v4621_v57 }
 0x3db   : > { %v4523_v22 = vpop.permute.xlu1 %4522  ;;  %4613 = vst.msk [vmem:[#allocation5 + $0xb0] sm:$0xff] %vm4078_vm14, %v4717_v47 }
 0x3dc   : > { %4592 = vst.msk [vmem:[#allocation5 + $0x30] sm:$0xff] %vm4589_vm9, %v4570_v18 }
 0x3dd   : > { %4544 = vst.msk [vmem:[#allocation5 + $0x48] sm:$0xff] %vm4540_vm8, %v4523_v22  ;;  %4528 = vrot.lane.b32.xlu0 %v9732_v54, %s7800_s23 }
 0x3de   : > { %v4639_v63 = vpop.permute.xlu0 %4638  ;;  %4481 = vrot.lane.b32.xlu1 %v9801_v50, %s7799_s22  ;;  %v4782_v54 = vld [vmem:[#allocation5 + $0x38] sm:$0xff] }
 0x3df   : > { %v4734_v60 = vpop.permute.xlu1 %4733  ;;  %4658 = vst.msk [vmem:[#allocation5 + $0x68] sm:$0xff] %vm4491_vm7, %v4639_v63 }
 0x3e0   : > { %4754 = vst.msk [vmem:[#allocation5 + $0x50] sm:$0xff] %vm4589_vm9, %v4734_v60 }
 0x3e1   : > { %4739 = vrot.lane.b32.xlu0 %v4717_v47, %s7801_s24  ;;  %v4795_v57 = vld [vmem:[#allocation5 + $0xa0] sm:$0xff]  ;;  %v4798_v47 = vld [vmem:[#allocation5 + $0xb8] sm:$0xff] }
 0x3e2   : > { %v4476_v7 = vpop.permute.xlu0 %4475  ;;  %4693 = vrot.lane.b32.xlu1 %v4670_v56, %s7800_s23  ;;  %v4810_v18 = vpack.c.bf16 %v4798_v47, %v4795_v57 }
 0x3e3   : > { %v4572_v2 = vpop.permute.xlu1 %4571  ;;  %4496 = vst.msk [vmem:[#allocation5 + $0x60] sm:$0xff] %vm4491_vm7, %v4476_v7  ;;  %v4781_v25 = vld [vmem:[#allocation5 + $0x30] sm:$0xff] }
 0x3e4   : > { %4593 = vst.msk [vmem:[#allocation5 + $0x48] sm:$0xff] %vm4589_vm9, %v4572_v2 }
 0x3e5   : > { %4577 = vrot.lane.b32.xlu0 %v9799_v42, %s7801_s24 }
 0x3e6   : > { %4530 = vrot.lane.b32.xlu1 %v9797_v34, %s7800_s23 }
 0x3e7   : > { %v4785_v50 = vld [vmem:[#allocation5 + $0x50] sm:$0xff]  ;;  %v4688_v16 = vpop.permute.xlu0 %4687 }
 0x3e8   : > { %v4803_v40 = vpack.c.bf16 %v4785_v50, %v4782_v54  ;;  %v4641_v48 = vpop.permute.xlu1 %4640  ;;  %4707 = vst.msk [vmem:[#allocation5 + $0x68] sm:$0xff] %vm4540_vm8, %v4688_v16  ;;  %v7524_v16 = vld [vmem:[#allocation11 + $0x78] sm:$0xff]  }
 0x3e9   : > { %4659 = vst.msk [vmem:[#allocation5 + $0x80] sm:$0xff] %vm4491_vm7, %v4641_v48  ;;  %v7525_v48 = vld [vmem:[#allocation11 + $0x38] sm:$0xff]   ;;  %7305 = vmatprep.subr.bf16.mxu0 %v7524_v16 }
 0x3ea   : > { %5014 = vmatprep.mubr.bf16.mxu1 %v4803_v40  ;;  %4741 = vrot.lane.b32.xlu1 %v4718_v58, %s7801_s24 }
 0x3eb   : > { %v4784_v5 = vld [vmem:[#allocation5 + $0x48] sm:$0xff]  ;;  %v4525_v42 = vpop.permute.xlu0 %4524  ;;  %7306 = vmatpush3.bf16.msra.mxu0 %v7525_v48 }
 0x3ec   : > { %v4802_v9 = vpack.c.bf16 %v4784_v5, %v4781_v25  ;;  %v4478_v26 = vpop.permute.xlu1 %4477  ;;  %4545 = vst.msk [vmem:[#allocation5 + $0x60] sm:$0xff] %vm4540_vm8, %v4525_v42  ;;  %v7526_v25 = vld [vmem:[#allocation11 + $0x70] sm:$0xff]   ;;  %v7531_v42 = vld [vmem:[#allocation11 + $0xb8] sm:$0xff]  }
 0x3ed   : > { %4497 = vst.msk [vmem:[#allocation5 + $0x78] sm:$0xff] %vm4491_vm7, %v4478_v26  ;;  %7307 = vmatprep.subr.bf16.mxu0 %v7526_v25 }
 0x3ee   : > { %5015 = vmatmul.mubr.bf16.gmra.mxu1 %v4802_v9  ;;  %4579 = vrot.lane.b32.xlu1 %v4669_v53, %s7801_s24  ;;  %v4807_v53 = vpack.c.bf16 %v4792_v17, %v4789_v51  ;;  %v7530_v9 = vld [vmem:[#allocation11 + $0xf8] sm:$0xff]  }
 0x3ef   : > { %v4736_v34 = vpop.permute.xlu0 %4735  ;;  %7327 = vmatprep.subr.bf16.mxu1 %v7530_v9 }
 0x3f0   : > { %4755 = vst.msk [vmem:[#allocation5 + $0x68] sm:$0xff] %vm4589_vm9, %v4736_v34  ;;  %v7527_v34 = vld [vmem:[#allocation11 + $0x30] sm:$0xff]  }
 0x3f1   : > { %7308 = vmatpush3.bf16.msra.mxu0 %v7527_v34 }
 0x3f3   : > { %v4574_v36 = vpop.permute.xlu0 %4573 }
 0x3f4   : > { %4594 = vst.msk [vmem:[#allocation5 + $0x60] sm:$0xff] %vm4589_vm9, %v4574_v36  ;;  %v7528_v36 = vld [vmem:[#allocation11 + $0x68] sm:$0xff]  }
 0x3f5   : > { %7309 = vmatprep.subr.bf16.mxu0 %v7528_v36 }
 0x3f7   : > { %v4788_v39 = vld [vmem:[#allocation5 + $0x68] sm:$0xff] }
 0x3fb   : > { %v4787_v3 = vld [vmem:[#allocation5 + $0x60] sm:$0xff] }
 0x412   : > { %v4643_v12 = vpop.permute.xlu0 %4642 }
 0x413   : > { %v4690_v6 = vpop.permute.xlu1 %4689  ;;  %4660 = vst.msk [vmem:[#allocation5 + $0x98] sm:$0xff] %vm4491_vm7, %v4643_v12 }
 0x414   : > { %4708 = vst.msk [vmem:[#allocation5 + $0x80] sm:$0xff] %vm4540_vm8, %v4690_v6 }
 0x416   : > { %v4480_v59 = vpop.permute.xlu0 %4479 }
 0x417   : > { %v4527_v32 = vpop.permute.xlu1 %4526  ;;  %4498 = vst.msk [vmem:[#allocation5 + $0x90] sm:$0xff] %vm4491_vm7, %v4480_v59 }
 0x418   : > { %4546 = vst.msk [vmem:[#allocation5 + $0x78] sm:$0xff] %vm4540_vm8, %v4527_v32  ;;  %v7529_v32 = vld [vmem:[#allocation11 + $0x28] sm:$0xff]  }
 0x419   : > { %7310 = vmatpush3.bf16.msra.mxu0 %v7529_v32 }
 0x41b   : > { %v4738_v10 = vpop.permute.xlu1 %4737 }
 0x41c   : > { %4756 = vst.msk [vmem:[#allocation5 + $0x80] sm:$0xff] %vm4589_vm9, %v4738_v10 }
 0x41f   : > { %v4576_v38 = vpop.permute.xlu1 %4575 }
 0x420   : > { %4595 = vst.msk [vmem:[#allocation5 + $0x78] sm:$0xff] %vm4589_vm9, %v4576_v38 }
 0x423   : > { %v4791_v30 = vld [vmem:[#allocation5 + $0x80] sm:$0xff] }
 0x424   : > { %v4806_v45 = vpack.c.bf16 %v4791_v30, %v4788_v39  ;;  %v9931_v39 = vld [vmem:[%s10378_s4] ss:$0 sm:$0xff] }
 0x426   : > { %5022 = vmatprep.mubr.bf16.mxu1 %v4806_v45 }
 0x427   : > { %v4790_v23 = vld [vmem:[#allocation5 + $0x78] sm:$0xff] }
 0x428   : > { %v4805_v46 = vpack.c.bf16 %v4790_v23, %v4787_v3 }
 0x42a   : > { %5023 = vmatmul.mubr.bf16.gmra.mxu1 %v4805_v46  ;;  %v7275_v22 = vpop.f32.mrf.mxu1 }
 0x42c   : > { %v7276_v63 = vpop.f32.mrf.mxu1 }
 0x42d   : > { %v7277_v10 = vadd.f32 %v7276_v63, %v7275_v22 }
 0x42e   : > { %v7278_v60 = vpop.f32.mrf.mxu1 }
 0x42f   : > { %v5009_v46 = vadd.f32 %v7277_v10, %v9931_v39 }
 0x430   : > { %v7279_v56 = vpop.f32.mrf.mxu1 }
 0x44b   : > { %v4692_v62 = vpop.permute.xlu0 %4691 }
 0x44c   : > { %v4645_v15 = vpop.permute.xlu1 %4644  ;;  %4709 = vst.msk [vmem:[#allocation5 + $0x98] sm:$0xff] %vm4540_vm8, %v4692_v62  ;;  %v7280_v62 = vadd.f32 %v7279_v56, %v7278_v60 }
 0x44d   : > { %4661 = vst.msk [vmem:[#allocation5 + $0xb0] sm:$0xff] %vm4491_vm7, %v4645_v15 }
 0x44f   : > { %v4529_v52 = vpop.permute.xlu0 %4528 }
 0x450   : > { %v4482_v61 = vpop.permute.xlu1 %4481  ;;  %4547 = vst.msk [vmem:[#allocation5 + $0x90] sm:$0xff] %vm4540_vm8, %v4529_v52 }
 0x451   : > { %4499 = vst.msk [vmem:[#allocation5 + $0xa8] sm:$0xff] %vm4491_vm7, %v4482_v61  ;;  %vm5513_vm7 = vcmask 523264  }
 0x453   : > { %v4740_v4 = vpop.permute.xlu0 %4739 }
 0x454   : > { %v4694_v29 = vpop.permute.xlu1 %4693  ;;  %4757 = vst.msk [vmem:[#allocation5 + $0x98] sm:$0xff] %vm4589_vm9, %v4740_v4 }
 0x455   : > { %4710 = vst.msk [vmem:[#allocation5 + $0xb0] sm:$0xff] %vm4540_vm8, %v4694_v29 }
 0x457   : > { %v4578_v33 = vpop.permute.xlu0 %4577 }
 0x458   : > { %v4531_v31 = vpop.permute.xlu1 %4530  ;;  %4596 = vst.msk [vmem:[#allocation5 + $0x90] sm:$0xff] %vm4589_vm9, %v4578_v33 }
 0x459   : > { %4548 = vst.msk [vmem:[#allocation5 + $0xa8] sm:$0xff] %vm4540_vm8, %v4531_v31  ;;  %vm5602_vm8 = vcmask 519168  }
 0x45b   : > { %v4794_v8 = vld [vmem:[#allocation5 + $0x98] sm:$0xff] }
 0x45c   : > { %v4742_v44 = vpop.permute.xlu1 %4741 }
 0x45d   : > { %4758 = vst.msk [vmem:[#allocation5 + $0xb0] sm:$0xff] %vm4589_vm9, %v4742_v44 }
 0x45f   : > { %v4793_v14 = vld [vmem:[#allocation5 + $0x90] sm:$0xff] }
 0x460   : > { %v4580_v28 = vpop.permute.xlu1 %4579 }
 0x461   : > { %4597 = vst.msk [vmem:[#allocation5 + $0xa8] sm:$0xff] %vm4589_vm9, %v4580_v28  ;;  %vm10345_vm9 = vcmp.lt.s32.totalorder %v2513_v55, 128 }
 0x464   : > { %v4797_v49 = vld [vmem:[#allocation5 + $0xb0] sm:$0xff] }
 0x465   : > { %v4809_v24 = vpack.c.bf16 %v4797_v49, %v4794_v8 }
 0x467   : > { %5030 = vmatprep.mubr.bf16.mxu1 %v4809_v24 }
 0x468   : > { %v4796_v11 = vld [vmem:[#allocation5 + $0xa8] sm:$0xff] }
 0x469   : > { %v4808_v37 = vpack.c.bf16 %v4796_v11, %v4793_v14  ;;  %v5012_v14 = vadd.f32 %v7280_v62, %v9931_v39 }
 0x46b   : > { %5031 = vmatmul.mubr.bf16.gmra.mxu1 %v4808_v37 }
 0x46c   : > { %7416 = vmatprep.mubr.msk.bf16.mxu1 %vm4078_vm14, %v4801_v35 }
 0x473   : > { %7417 = vmatmul.mubr.msk.bf16.vlgmr.msra.gmra.mxu1 %vm4078_vm14, %v4804_v1 }
 0x474   : > { %7420 = vmatprep.mubr.msk.bf16.mxu1 %vm4078_vm14, %v4807_v53  ;;  %7328 = vmatpush3.bf16.msra.mxu1 %v7531_v42 }
 0x47b   : > { %7421 = vmatmul.mubr.msk.bf16.gmra.mxu1 %vm4078_vm14, %v4810_v18  ;;  %vm5288_vm14 = vcmask 517120  }
 0x4ae   : > { %v7281_v21 = vpop.f32.mrf.mxu1 }
 0x4b0   : > { %v7282_v7 = vpop.f32.mrf.mxu1 }
 0x4b1   : > { %v7283_v6 = vadd.f32 %v7282_v7, %v7281_v21 }
 0x4b2   : > { %v7284_v2 = vpop.f32.mrf.mxu1 }
 0x4b3   : > { %v5017_v45 = vadd.f32 %v7283_v6, %v9931_v39 }
 0x4b4   : > { %v7285_v54 = vpop.f32.mrf.mxu1 }
 0x4b5   : > { %v7286_v30 = vadd.f32 %v7285_v54, %v7284_v2 }
 0x4b7   : > { %v5020_v33 = vadd.f32 %v7286_v30, %v9931_v39 }
 0x4ea   : > { %v7287_v50 = vpop.f32.mrf.mxu1 }
 0x4ec   : > { %v7288_v40 = vpop.f32.mrf.mxu1 }
 0x4ed   : > { %v7289_v15 = vadd.f32 %v7288_v40, %v7287_v50 }
 0x4ee   : > { %v7290_v58 = vpop.f32.mrf.mxu1 }
 0x4ef   : > { %v9944_v37 = vadd.f32 %v7289_v15, %v9931_v39 }
 0x4f0   : > { %v7291_v5 = vpop.f32.mrf.mxu1 }
 0x4f1   : > { %v9937_v41 = vadd.f32 %v7291_v5, %v7290_v58 }
 0x52b   : > { %v7293_v26 = vpop.f32.mrf.mxu1 }
 0x52d   : > { %v7294_v12 = vpop.f32.mrf.mxu1 }
 0x52e   : > { %v7295_v52 = vadd.f32 %v7294_v12, %v7293_v26 }
 0x52f   : > { %v7296_v59 = vpop.f32.mrf.mxu1 }
 0x530   : > { %v9941_v11 = vadd.f32 %v7295_v52, %v9931_v39 }
 0x531   : > { %v7297_v38 = vpop.f32.mrf.mxu1 }
 0x532   : > { %v7298_v31 = vadd.f32 %v7297_v38, %v7296_v59 }
 0x533   : > { %v7418_v3 = vpop.f32.mrf.mxu1 }
 0x534   : > { %v5082_v23 = vadd.f32 %v7418_v3, %v5017_v45  ;;  %v9952_v53 = vadd.f32 %v7298_v31, %v9931_v39 }
 0x535   : > { %v5073_v61 = vpop.f32.mrf.mxu1 }
 0x536   : > { %v5106_v4 = vmax.f32 %v5082_v23, 0.0  ;;  %v5074_v29 = vadd.f32 %v5073_v61, %v5009_v46 }
 0x537   : > { %v7419_v44 = vpop.f32.mrf.mxu1 }
 0x538   : > { %v5154_v28 = vcombine.high %v5106_v4, %v5106_v4  ;;  %v5161_v8 = vrot.slane %v5106_v4, %v8831_v13  ;;  %v5104_v49 = vmax.f32 %v5074_v29, 0.0  ;;  %v5085_v24 = vadd.f32 %v7419_v44, %v5020_v33 }
 0x539   : > { %v5076_v52 = vpop.f32.mrf.mxu1 }
 0x53a   : > { %v5168_v27 = vrot.slane %v5154_v28, %v8831_v13  ;;  %v5169_v35 = vcombine.high %v5161_v8, %v5161_v8  ;;  %v5345_v20 = vsel %vm5288_vm14, %v5161_v8, -inf  ;;  %v5120_v17 = vcombine.high %v5104_v49, %v5104_v49 }
 0x53b   : > { %v5346_v43 = vrot.slane %v5345_v20, 4  ;;  %v5127_v1 = vrot.slane %v5104_v49, %v8831_v13  ;;  %v9949_v51 = vmax.f32 %v5085_v24, 0.0 }
 0x53c   : > { %v5170_v57 = vcombine.high %v5168_v27, %v5168_v27  ;;  %v5352_v47 = vsel %vm5288_vm14, %v5169_v35, -inf  ;;  %v5359_v18 = vsel %vm5288_vm14, %v5168_v27, -inf  ;;  %v5134_v22 = vrot.slane %v5120_v17, %v8831_v13 }
 0x53d   : > { %v5347_v63 = vmax.f32 %v5345_v20, %v5346_v43  ;;  %v5353_v60 = vrot.slane %v5352_v47, 4  ;;  %v5360_v56 = vrot.slane %v5359_v18, 4  ;;  %v5135_v21 = vcombine.high %v5127_v1, %v5127_v1 }
 0x53e   : > { %v5366_v7 = vsel %vm5288_vm14, %v5170_v57, -inf  ;;  %v5136_v2 = vcombine.high %v5134_v22, %v5134_v22  ;;  %v5289_v54 = vsel %vm5288_vm14, %v5127_v1, -inf  ;;  %v5303_v50 = vsel %vm5288_vm14, %v5134_v22, -inf }
 0x53f   : > { %v5348_v40 = vrot.slane %v5347_v63, 2  ;;  %v5354_v58 = vmax.f32 %v5352_v47, %v5353_v60  ;;  %v5361_v16 = vmax.f32 %v5359_v18, %v5360_v56  ;;  %v5367_v48 = vrot.slane %v5366_v7, 4 }
 0x540   : > { %v5290_v25 = vrot.slane %v5289_v54, 4  ;;  %v5296_v5 = vsel %vm5288_vm14, %v5135_v21, -inf  ;;  %v5304_v9 = vrot.slane %v5303_v50, 4  ;;  %v5310_v42 = vsel %vm5288_vm14, %v5136_v2, -inf }
 0x541   : > { %v5349_v26 = vmax.f32 %v5347_v63, %v5348_v40  ;;  %v5355_v34 = vrot.slane %v5354_v58, 2  ;;  %v5362_v36 = vrot.slane %v5361_v16, 2  ;;  %v5368_v12 = vmax.f32 %v5366_v7, %v5367_v48 }
 0x542   : > { %v5291_v6 = vmax.f32 %v5289_v54, %v5290_v25  ;;  %v5297_v59 = vrot.slane %v5296_v5, 4  ;;  %v5305_v32 = vmax.f32 %v5303_v50, %v5304_v9  ;;  %v5311_v10 = vrot.slane %v5310_v42, 4 }
 0x543   : > { %v5350_v38 = vrot.slane %v5349_v26, 1  ;;  %v5356_v30 = vmax.f32 %v5354_v58, %v5355_v34  ;;  %v5363_v45 = vmax.f32 %v5361_v16, %v5362_v36  ;;  %v5369_v3 = vrot.slane %v5368_v12, 2  ;;  %v7422_v36 = vpop.f32.mrf.mxu1 }
 0x544   : > { %v5292_v23 = vrot.slane %v5291_v6, 2  ;;  %v5298_v46 = vmax.f32 %v5296_v5, %v5297_v59  ;;  %v5306_v62 = vrot.slane %v5305_v32, 2  ;;  %v5312_v15 = vmax.f32 %v5310_v42, %v5311_v10 }
 0x545   : > { %v5351_v61 = vmax.f32 %v5349_v26, %v5350_v38  ;;  %v5357_v4 = vrot.slane %v5356_v30, 1  ;;  %v5364_v29 = vrot.slane %v5363_v45, 1  ;;  %v5370_v33 = vmax.f32 %v5368_v12, %v5369_v3 }
 0x546   : > { %v5293_v31 = vmax.f32 %v5291_v6, %v5292_v23  ;;  %v5299_v44 = vrot.slane %v5298_v46, 2  ;;  %v5307_v28 = vmax.f32 %v5305_v32, %v5306_v62  ;;  %v5313_v8 = vrot.slane %v5312_v15, 2 }
 0x547   : > { %v5358_v49 = vmax.f32 %v5356_v30, %v5357_v4  ;;  %v5365_v24 = vmax.f32 %v5363_v45, %v5364_v29  ;;  %v5371_v27 = vrot.slane %v5370_v33, 1  ;;  %v5077_v35 = vadd.f32 %v5076_v52, %v5012_v14 }
 0x548   : > { %v5294_v20 = vrot.slane %v5293_v31, 1  ;;  %v5300_v17 = vmax.f32 %v5298_v46, %v5299_v44  ;;  %v5308_v43 = vrot.slane %v5307_v28, 1  ;;  %v5314_v1 = vmax.f32 %v5312_v15, %v5313_v8 }
 0x549   : > { %v5372_v57 = vmax.f32 %v5370_v33, %v5371_v27  ;;  %v9963_v47 = vsel %vm5513_vm7, %v5351_v61, -inf  ;;  %v9966_v18 = vsel %vm5513_vm7, %v5358_v49, -inf  ;;  %v5171_v22 = vcombine.high %v9949_v51, %v9949_v51 }
 0x54a   : > { %v5295_v63 = vmax.f32 %v5293_v31, %v5294_v20  ;;  %v5301_v60 = vrot.slane %v5300_v17, 1  ;;  %v5309_v56 = vmax.f32 %v5307_v28, %v5308_v43  ;;  %v5315_v21 = vrot.slane %v5314_v1, 1 }
 0x54b   : > { %v9971_v14 = vsel %vm5513_vm7, %v5365_v24, -inf  ;;  %v5178_v7 = vrot.slane %v9949_v51, %v8831_v13  ;;  %v5185_v2 = vrot.slane %v5171_v22, %v8831_v13  ;;  %v5105_v54 = vmax.f32 %v5077_v35, 0.0 }
 0x54c   : > { %v9977_v50 = vsel %vm5513_vm7, %v5372_v57, -inf  ;;  %v5302_v40 = vmax.f32 %v5300_v17, %v5301_v60  ;;  %v9979_v58 = vmax.f32 %v5314_v1, %v5315_v21  ;;  %v9982_v16 = vsel %vm5513_vm7, %v5295_v63, -inf }
 0x54d   : > { %v5186_v48 = vcombine.high %v5178_v7, %v5178_v7  ;;  %v5187_v25 = vcombine.high %v5185_v2, %v5185_v2  ;;  %v5373_v5 = vsel %vm5288_vm14, %v5178_v7, -inf  ;;  %v5387_v9 = vsel %vm5288_vm14, %v5185_v2, -inf }
 0x54e   : > { %v9987_v51 = vsel %vm5513_vm7, %v5302_v40, -inf  ;;  %v9990_v42 = vsel %vm5513_vm7, %v5309_v56, -inf  ;;  %v5374_v26 = vrot.slane %v5373_v5, 4  ;;  %v5388_v34 = vrot.slane %v5387_v9, 4 }
 0x54f   : > { %v5380_v12 = vsel %vm5288_vm14, %v5186_v48, -inf  ;;  %v5394_v6 = vsel %vm5288_vm14, %v5187_v25, -inf  ;;  %v5137_v59 = vcombine.high %v5105_v54, %v5105_v54  ;;  %v5144_v32 = vrot.slane %v5105_v54, %v8831_v13 }
 0x550   : > { %v5375_v10 = vmax.f32 %v5373_v5, %v5374_v26  ;;  %v5381_v38 = vrot.slane %v5380_v12, 4  ;;  %v5389_v30 = vmax.f32 %v5387_v9, %v5388_v34  ;;  %v5395_v45 = vrot.slane %v5394_v6, 4 }
 0x551   : > { %v5151_v3 = vrot.slane %v5137_v59, %v8831_v13  ;;  %v5152_v23 = vcombine.high %v5144_v32, %v5144_v32  ;;  %v5317_v46 = vsel %vm5288_vm14, %v5144_v32, -inf  ;;  %v5098_v62 = vadd.f32 %v7422_v36, %v9941_v11 }
 0x552   : > { %v5376_v15 = vrot.slane %v5375_v10, 2  ;;  %v5382_v52 = vmax.f32 %v5380_v12, %v5381_v38  ;;  %v5390_v61 = vrot.slane %v5389_v30, 2  ;;  %v5396_v4 = vmax.f32 %v5394_v6, %v5395_v45 }
 0x553   : > { %v5153_v29 = vcombine.high %v5151_v3, %v5151_v3  ;;  %v5318_v33 = vrot.slane %v5317_v46, 4  ;;  %v5324_v31 = vsel %vm5288_vm14, %v5152_v23, -inf  ;;  %v5331_v44 = vsel %vm5288_vm14, %v5151_v3, -inf }
 0x554   : > { %v5377_v28 = vmax.f32 %v5375_v10, %v5376_v15  ;;  %v5383_v8 = vrot.slane %v5382_v52, 2  ;;  %v5391_v49 = vmax.f32 %v5389_v30, %v5390_v61  ;;  %v5397_v24 = vrot.slane %v5396_v4, 2  ;;  %v5089_v10 = vpop.f32.mrf.mxu1 }
 0x555   : > { %v5319_v27 = vmax.f32 %v5317_v46, %v5318_v33  ;;  %v5325_v35 = vrot.slane %v5324_v31, 4  ;;  %v5332_v20 = vrot.slane %v5331_v44, 4  ;;  %v5338_v17 = vsel %vm5288_vm14, %v5153_v29, -inf }
 0x556   : > { %v5378_v11 = vrot.slane %v5377_v28, 1  ;;  %v5384_v43 = vmax.f32 %v5382_v52, %v5383_v8  ;;  %v5392_v1 = vrot.slane %v5391_v49, 1  ;;  %v5398_v57 = vmax.f32 %v5396_v4, %v5397_v24 }
 0x557   : > { %v5320_v22 = vrot.slane %v5319_v27, 2  ;;  %v5326_v63 = vmax.f32 %v5324_v31, %v5325_v35  ;;  %v5333_v60 = vmax.f32 %v5331_v44, %v5332_v20  ;;  %v5339_v56 = vrot.slane %v5338_v17, 4 }
 0x558   : > { %v5379_v21 = vmax.f32 %v5377_v28, %v5378_v11  ;;  %v5385_v7 = vrot.slane %v5384_v43, 1  ;;  %v5393_v2 = vmax.f32 %v5391_v49, %v5392_v1  ;;  %v5399_v54 = vrot.slane %v5398_v57, 1 }
 0x559   : > { %v5321_v40 = vmax.f32 %v5319_v27, %v5320_v22  ;;  %v5327_v48 = vrot.slane %v5326_v63, 2  ;;  %v5334_v25 = vrot.slane %v5333_v60, 2  ;;  %v5340_v5 = vmax.f32 %v5338_v17, %v5339_v56  ;;  %v7534_v56 = vld [vmem:[#allocation11 + $0x20] sm:$0xff]  }
 0x55a   : > { %v5386_v9 = vmax.f32 %v5384_v43, %v5385_v7  ;;  %v5400_v26 = vmax.f32 %v5398_v57, %v5399_v54  ;;  %v5527_v34 = vsel %vm5513_vm7, %v5379_v21, -inf  ;;  %v5533_v36 = vsel %vm5513_vm7, %v5393_v2, -inf  ;;  %v7535_v21 = vld [vmem:[#allocation11 + $0xf0] sm:$0xff]  }
 0x55b   : > { %v5528_v12 = vmax.f32 %v9963_v47, %v5527_v34  ;;  %v5534_v6 = vmax.f32 %v9971_v14, %v5533_v36  ;;  %v5322_v59 = vrot.slane %v5321_v40, 1  ;;  %v5328_v32 = vmax.f32 %v5326_v63, %v5327_v48  ;;  %v7536_v54 = vld [vmem:[#allocation11 + $0xb0] sm:$0xff]   ;;  %7329 = vmatprep.subr.bf16.mxu1 %v7535_v21 }
 0x55c   : > { %v5530_v38 = vsel %vm5513_vm7, %v5386_v9, -inf  ;;  %v5536_v30 = vsel %vm5513_vm7, %v5400_v26, -inf  ;;  %v5335_v45 = vmax.f32 %v5333_v60, %v5334_v25  ;;  %v5341_v3 = vrot.slane %v5340_v5, 2  ;;  %v7533_v60 = vld [vmem:[#allocation11 + $0x60] sm:$0xff]   ;;  %7330 = vmatpush3.bf16.msra.mxu1 %v7536_v54 }
 0x55d   : > { %v5531_v23 = vmax.f32 %v9966_v18, %v5530_v38  ;;  %v5537_v46 = vmax.f32 %v9977_v50, %v5536_v30  ;;  %v5323_v15 = vmax.f32 %v5321_v40, %v5322_v59  ;;  %v5329_v52 = vrot.slane %v5328_v32, 1  ;;  %7311 = vmatprep.subr.bf16.mxu0 %v7533_v60  ;;  %v7539_v38 = vld [vmem:[#allocation11 + $0x18] sm:$0xff]   ;;  %v7540_v30 = vld [vmem:[#allocation11 + $0xe8] sm:$0xff]  }
 0x55e   : > { %v5336_v61 = vrot.slane %v5335_v45, 1  ;;  %v5342_v4 = vmax.f32 %v5340_v5, %v5341_v3  ;;  %v5110_v47 = vmax.f32 %v5098_v62, 0.0  ;;  %v5090_v14 = vadd.f32 %v5089_v10, %v9944_v37  ;;  %7312 = vmatpush3.bf16.msra.mxu0 %v7534_v56  ;;  %v7538_v10 = vld [vmem:[#allocation11 + $0x58] sm:$0xff]   ;;  %7331 = vmatprep.subr.bf16.mxu1 %v7540_v30 }
 0x55f   : > { %v5523_v29 = vsel %vm5513_vm7, %v9979_v58, -inf  ;;  %v5588_v33 = vsel %vm4355_vm15, %v5531_v23, %v5528_v12  ;;  %v5330_v31 = vmax.f32 %v5328_v32, %v5329_v52  ;;  %v5515_v44 = vsel %vm5513_vm7, %v5323_v15, -inf  ;;  %7313 = vmatprep.subr.bf16.mxu0 %v7538_v10 }
 0x560   : > { %v5589_v28 = vsel %vm4357_vm0, %v5534_v6, %v5588_v33  ;;  %v5337_v18 = vmax.f32 %v5335_v45, %v5336_v61  ;;  %v5343_v8 = vrot.slane %v5342_v4, 1  ;;  %v5516_v50 = vmax.f32 %v9982_v16, %v5515_v44  ;;  %v7541_v44 = vld [vmem:[#allocation11 + $0xa8] sm:$0xff]  }
 0x561   : > { %v5590_v49 = vsel %vm4359_vm1, %v5537_v46, %v5589_v28  ;;  %v5518_v62 = vsel %vm5513_vm7, %v5330_v31, -inf  ;;  %v5222_v24 = vcombine.high %v5110_v47, %v5110_v47  ;;  %v5229_v37 = vrot.slane %v5110_v47, %v8831_v13  ;;  %v7423_v31 = vpop.f32.mrf.mxu1  ;;  %7332 = vmatpush3.bf16.msra.mxu1 %v7541_v44 }
 0x562   : > { %5604 = vst.msk [vmem:[#allocation6 + $0x11] sm:$0xf] %vm5602_vm8, %v5590_v49  ;;  %v5344_v58 = vmax.f32 %v5342_v4, %v5343_v8  ;;  %v5519_v27 = vmax.f32 %v9987_v51, %v5518_v62  ;;  %v5521_v35 = vsel %vm5513_vm7, %v5337_v18, -inf  ;;  %v5108_v20 = vmax.f32 %v5090_v14, 0.0  ;;  %7314 = vmatpush3.bf16.msra.mxu0 %v7539_v38 }
 0x563   : > { %v5522_v17 = vmax.f32 %v9990_v42, %v5521_v35  ;;  %v5236_v11 = vrot.slane %v5222_v24, %v8831_v13  ;;  %v5237_v16 = vcombine.high %v5229_v37, %v5229_v37  ;;  %v5457_v43 = vsel %vm5288_vm14, %v5229_v37, -inf }
 0x564   : > { %v5524_v1 = vsel %vm5513_vm7, %v5344_v58, -inf  ;;  %v5585_v57 = vsel %vm4355_vm15, %v5519_v27, %v5516_v50  ;;  %v5458_v22 = vrot.slane %v5457_v43, 4  ;;  %v5188_v63 = vcombine.high %v5108_v20, %v5108_v20 }
 0x565   : > { %v5525_v51 = vmax.f32 %v5523_v29, %v5524_v1  ;;  %v5586_v7 = vsel %vm4357_vm0, %v5522_v17, %v5585_v57  ;;  %v5238_v2 = vcombine.high %v5236_v11, %v5236_v11  ;;  %v5464_v42 = vsel %vm5288_vm14, %v5237_v16, -inf }
 0x566   : > { %v5459_v40 = vmax.f32 %v5457_v43, %v5458_v22  ;;  %v5465_v48 = vrot.slane %v5464_v42, 4  ;;  %v5471_v25 = vsel %vm5288_vm14, %v5236_v11, -inf  ;;  %v5195_v5 = vrot.slane %v5108_v20, %v8831_v13 }
 0x567   : > { %v5587_v9 = vsel %vm4359_vm1, %v5525_v51, %v5586_v7  ;;  %v5472_v26 = vrot.slane %v5471_v25, 4  ;;  %v5478_v34 = vsel %vm5288_vm14, %v5238_v2, -inf  ;;  %v5202_v36 = vrot.slane %v5188_v63, %v8831_v13 }
 0x568   : > { %5603 = vst.msk [vmem:[#allocation6 + $0x9] sm:$0xf] %vm5602_vm8, %v5587_v9  ;;  %v5460_v12 = vrot.slane %v5459_v40, 2  ;;  %v5466_v6 = vmax.f32 %v5464_v42, %v5465_v48  ;;  %v5479_v59 = vrot.slane %v5478_v34, 4  ;;  %v5203_v32 = vcombine.high %v5195_v5, %v5195_v5  ;;  %v5092_v42 = vpop.f32.mrf.mxu1 }
 0x569   : > { %v5473_v45 = vmax.f32 %v5471_v25, %v5472_v26  ;;  %v5204_v3 = vcombine.high %v5202_v36, %v5202_v36  ;;  %v5401_v23 = vsel %vm5288_vm14, %v5195_v5, -inf  ;;  %v5415_v46 = vsel %vm5288_vm14, %v5202_v36, -inf }
 0x56a   : > { %v5461_v15 = vmax.f32 %v5459_v40, %v5460_v12  ;;  %v5467_v52 = vrot.slane %v5466_v6, 2  ;;  %v5480_v61 = vmax.f32 %v5478_v34, %v5479_v59  ;;  %v5402_v4 = vrot.slane %v5401_v23, 4 }
 0x56b   : > { %v5474_v47 = vrot.slane %v5473_v45, 2  ;;  %v5408_v14 = vsel %vm5288_vm14, %v5203_v32, -inf  ;;  %v5416_v29 = vrot.slane %v5415_v46, 4  ;;  %v5422_v33 = vsel %vm5288_vm14, %v5204_v3, -inf }
 0x56c   : > { %v5462_v28 = vrot.slane %v5461_v15, 1  ;;  %v5468_v18 = vmax.f32 %v5466_v6, %v5467_v52  ;;  %v5481_v8 = vrot.slane %v5480_v61, 2  ;;  %v5403_v50 = vmax.f32 %v5401_v23, %v5402_v4 }
 0x56d   : > { %v5475_v49 = vmax.f32 %v5473_v45, %v5474_v47  ;;  %v5409_v62 = vrot.slane %v5408_v14, 4  ;;  %v5417_v24 = vmax.f32 %v5415_v46, %v5416_v29  ;;  %v5423_v37 = vrot.slane %v5422_v33, 4 }
 0x56e   : > { %v5469_v58 = vrot.slane %v5468_v18, 1  ;;  %v5482_v27 = vmax.f32 %v5480_v61, %v5481_v8  ;;  %v5404_v35 = vrot.slane %v5403_v50, 2  ;;  %v5101_v20 = vadd.f32 %v7423_v31, %v9952_v53 }
 0x56f   : > { %v5476_v17 = vrot.slane %v5475_v49, 1  ;;  %v5410_v11 = vmax.f32 %v5408_v14, %v5409_v62  ;;  %v5418_v16 = vrot.slane %v5417_v24, 2  ;;  %v5424_v43 = vmax.f32 %v5422_v33, %v5423_v37  ;;  %v7516_v1 = vld [vmem:[#allocation6 + $0x8] ss:$8 sps:$4 sm:$0xff]  }
 0x570   : > { %v5463_v57 = vmax.f32 %v5461_v15, %v5462_v28  ;;  %v5483_v22 = vrot.slane %v5482_v27, 1  ;;  %v5405_v63 = vmax.f32 %v5403_v50, %v5404_v35  ;;  %v5470_v60 = vmax.f32 %v5468_v18, %v5469_v58  ;;  %5664 = vrot.lane.b32.xlu0 %v7516_v1, %s7800_s23  ;;  %v7517_v54 = vld [vmem:[#allocation6 + $0x1] ss:$8 sps:$4 sm:$0xff]  }
 0x571   : > { %v5411_v56 = vrot.slane %v5410_v11, 2  ;;  %v5419_v21 = vmax.f32 %v5417_v24, %v5418_v16  ;;  %v5425_v51 = vrot.slane %v5424_v43, 2  ;;  %v5477_v7 = vmax.f32 %v5475_v49, %v5476_v17  ;;  %v7532_v5 = vld [vmem:[#allocation6 + $0x2] ss:$8 sps:$4 sm:$0xff]  }
 0x572   : > { %v5111_v2 = vmax.f32 %v5101_v20, 0.0  ;;  %v5484_v40 = vmax.f32 %v5482_v27, %v5483_v22  ;;  %v5406_v53 = vrot.slane %v5405_v63, 1  ;;  %v5028_v25 = vadd.f32 %v9937_v41, %v9931_v39  ;;  %v7537_v36 = vld [vmem:[#allocation6] ss:$8 sps:$4 sm:$0xff]   ;;  %5652 = vst.msk [vmem:[#allocation7 + $0x8] sm:$0xff] %vm5513_vm7, %v7532_v5 }
 0x573   : > { %v5412_v48 = vmax.f32 %v5410_v11, %v5411_v56  ;;  %v10044_v9 = vsel %vm5513_vm7, %v5463_v57, -inf  ;;  %v10048_v12 = vsel %vm5513_vm7, %v5470_v60, -inf  ;;  %v5420_v6 = vrot.slane %v5419_v21, 1  ;;  %v7549_v39 = vld [vmem:[#allocation6 + $0x9] ss:$8 sps:$4 sm:$0xff]   ;;  %5619 = vst.msk [vmem:[#allocation7] sm:$0xff] %vm5513_vm7, %v7537_v36 }
 0x574   : > { %v5239_v26 = vcombine.high %v5111_v2, %v5111_v2  ;;  %v5246_v34 = vrot.slane %v5111_v2, %v8831_v13  ;;  %v10050_v59 = vmax.f32 %v5424_v43, %v5425_v51  ;;  %v5093_v32 = vadd.f32 %v5092_v42, %v5028_v25  ;;  %5631 = vrot.lane.b32.xlu0 %v7517_v54, %s7800_s23 }
 0x575   : > { %v10055_v41 = vsel %vm5513_vm7, %v5477_v7, -inf  ;;  %v10061_v45 = vsel %vm5513_vm7, %v5484_v40, -inf  ;;  %v10063_v3 = vmax.f32 %v5405_v63, %v5406_v53  ;;  %v5413_v23 = vrot.slane %v5412_v48, 1  ;;  %5684 = vst.msk [vmem:[#allocation7 + $0x10] sm:$0xff] %vm5513_vm7, %v7549_v39 }
 0x576   : > { %v5253_v10 = vrot.slane %v5239_v26, %v8831_v13  ;;  %v5254_v38 = vcombine.high %v5246_v34, %v5246_v34  ;;  %v5485_v30 = vsel %vm5288_vm14, %v5246_v34, -inf  ;;  %v5109_v4 = vmax.f32 %v5093_v32, 0.0 }
 0x577   : > { %v5486_v46 = vrot.slane %v5485_v30, 4  ;;  %v10068_v47 = vmax.f32 %v5419_v21, %v5420_v6  ;;  %v5427_v14 = vrot.slane %v10050_v59, 1  ;;  %v10073_v8 = vmax.f32 %v5412_v48, %v5413_v23 }
 0x578   : > { %v5255_v15 = vcombine.high %v5253_v10, %v5253_v10  ;;  %v5492_v52 = vsel %vm5288_vm14, %v5254_v38, -inf  ;;  %v5499_v61 = vsel %vm5288_vm14, %v5253_v10, -inf  ;;  %v5205_v28 = vcombine.high %v5109_v4, %v5109_v4 }
 0x579   : > { %v5487_v29 = vmax.f32 %v5485_v30, %v5486_v46  ;;  %v5493_v33 = vrot.slane %v5492_v52, 4  ;;  %v5500_v31 = vrot.slane %v5499_v61, 4  ;;  %v5212_v18 = vrot.slane %v5109_v4, %v8831_v13 }
 0x57a   : > { %v5506_v44 = vsel %vm5288_vm14, %v5255_v15, -inf  ;;  %v5219_v37 = vrot.slane %v5205_v28, %v8831_v13 }
 0x57b   : > { %v5488_v50 = vrot.slane %v5487_v29, 2  ;;  %v5494_v49 = vmax.f32 %v5492_v52, %v5493_v33  ;;  %v5507_v62 = vrot.slane %v5506_v44, 4  ;;  %v5501_v24 = vmax.f32 %v5499_v61, %v5500_v31 }
 0x57c   : > { %v5220_v58 = vcombine.high %v5212_v18, %v5212_v18  ;;  %v5429_v27 = vsel %vm5288_vm14, %v5212_v18, -inf  ;;  %v5221_v43 = vcombine.high %v5219_v37, %v5219_v37  ;;  %v5443_v57 = vsel %vm5288_vm14, %v5219_v37, -inf }
 0x57d   : > { %v5489_v35 = vmax.f32 %v5487_v29, %v5488_v50  ;;  %v5495_v20 = vrot.slane %v5494_v49, 2  ;;  %v5508_v17 = vmax.f32 %v5506_v44, %v5507_v62  ;;  %v5430_v11 = vrot.slane %v5429_v27, 4 }
 0x57e   : > { %v5502_v16 = vrot.slane %v5501_v24, 2  ;;  %v5436_v1 = vsel %vm5288_vm14, %v5220_v58, -inf  ;;  %v5444_v7 = vrot.slane %v5443_v57, 4  ;;  %v5450_v2 = vsel %vm5288_vm14, %v5221_v43, -inf }
 0x57f   : > { %v5490_v22 = vrot.slane %v5489_v35, 1  ;;  %v5496_v63 = vmax.f32 %v5494_v49, %v5495_v20  ;;  %v5509_v60 = vrot.slane %v5508_v17, 2  ;;  %v5431_v56 = vmax.f32 %v5429_v27, %v5430_v11 }
 0x580   : > { %v5503_v21 = vmax.f32 %v5501_v24, %v5502_v16  ;;  %v5437_v51 = vrot.slane %v5436_v1, 4  ;;  %v5445_v5 = vmax.f32 %v5443_v57, %v5444_v7  ;;  %v5451_v26 = vrot.slane %v5450_v2, 4 }
 0x581   : > { %v5491_v42 = vmax.f32 %v5489_v35, %v5490_v22  ;;  %v5497_v54 = vrot.slane %v5496_v63, 1  ;;  %v5510_v40 = vmax.f32 %v5508_v17, %v5509_v60  ;;  %v5432_v53 = vrot.slane %v5431_v56, 2 }
 0x582   : > { %v5504_v48 = vrot.slane %v5503_v21, 1  ;;  %v5438_v25 = vmax.f32 %v5436_v1, %v5437_v51  ;;  %v5446_v30 = vrot.slane %v5445_v5, 2  ;;  %v5452_v52 = vmax.f32 %v5450_v2, %v5451_v26  ;;  %v7547_v51 = vld [vmem:[#allocation11 + $0xa0] sm:$0xff]   ;;  %v7557_v26 = vld [vmem:[#allocation11 + $0xd0] sm:$0xff]  }
 0x583   : > { %v5498_v34 = vmax.f32 %v5496_v63, %v5497_v54  ;;  %v5511_v36 = vrot.slane %v5510_v40, 1  ;;  %v5551_v6 = vsel %vm5513_vm7, %v5491_v42, -inf  ;;  %v5433_v32 = vmax.f32 %v5431_v56, %v5432_v53  ;;  %v7544_v56 = vld [vmem:[#allocation11 + $0x50] sm:$0xff]   ;;  %v7550_v42 = vld [vmem:[#allocation11 + $0x48] sm:$0xff]   ;;  %v7553_v53 = vld [vmem:[#allocation11 + $0x98] sm:$0xff]  }
 0x584   : > { %v5505_v39 = vmax.f32 %v5503_v21, %v5504_v48  ;;  %v5552_v10 = vmax.f32 %v10044_v9, %v5551_v6  ;;  %v5439_v38 = vrot.slane %v5438_v25, 2  ;;  %v5447_v33 = vmax.f32 %v5445_v5, %v5446_v30  ;;  %v7545_v21 = vld [vmem:[#allocation11 + $0x10] sm:$0xff]   ;;  %7315 = vmatprep.subr.bf16.mxu0 %v7544_v56  ;;  %v7551_v54 = vld [vmem:[#allocation11 + $0x8] sm:$0xff]   ;;  %v7556_v5 = vld [vmem:[#allocation11] sm:$0xff]  }
 0x585   : > { %v5512_v23 = vmax.f32 %v5510_v40, %v5511_v36  ;;  %v5554_v46 = vsel %vm5513_vm7, %v5498_v34, -inf  ;;  %v5434_v15 = vrot.slane %v5433_v32, 1  ;;  %v5453_v18 = vrot.slane %v5452_v52, 2  ;;  %7316 = vmatpush3.bf16.msra.mxu0 %v7545_v21  ;;  %v7552_v40 = vld [vmem:[#allocation11 + $0xd8] sm:$0xff]   ;;  %v7558_v34 = vld [vmem:[#allocation11 + $0x90] sm:$0xff]  }
 0x586   : > { %v5555_v61 = vmax.f32 %v10048_v12, %v5554_v46  ;;  %v5557_v4 = vsel %vm5513_vm7, %v5505_v39, -inf  ;;  %v5440_v29 = vmax.f32 %v5438_v25, %v5439_v38  ;;  %v5448_v62 = vrot.slane %v5447_v33, 1  ;;  %7317 = vmatprep.subr.bf16.mxu0 %v7550_v42  ;;  %v7555_v25 = vld [vmem:[#allocation11 + $0x40] sm:$0xff]   ;;  %v7560_v46 = vld [vmem:[#allocation11 + $0xc8] sm:$0xff]  }
 0x587   : > { %v5558_v31 = vmax.f32 %v10055_v41, %v5557_v4  ;;  %v5560_v44 = vsel %vm5513_vm7, %v5512_v23, -inf  ;;  %v5435_v28 = vmax.f32 %v5433_v32, %v5434_v15  ;;  %v5454_v37 = vmax.f32 %v5452_v52, %v5453_v18  ;;  %v7521_v30 = vld [vmem:[#allocation6 + $0xa] ss:$8 sps:$4 sm:$0xff]   ;;  %v7562_v15 = vld [vmem:[#allocation11 + $0x88] sm:$0xff]  }
 0x588   : > { %v5561_v9 = vmax.f32 %v10061_v45, %v5560_v44  ;;  %v5594_v50 = vsel %vm4355_vm15, %v5555_v61, %v5552_v10  ;;  %v5441_v49 = vrot.slane %v5440_v29, 1  ;;  %v5449_v27 = vmax.f32 %v5447_v33, %v5448_v62  ;;  %v7563_v52 = vld [vmem:[#allocation11 + $0xc0] sm:$0xff]   ;;  %v7570_v21 = vld [vmem:[%s10381_s7 + $0x70] ss:$8 sps:$4 sm:$0xff]  }
 0x589   : > { %v5595_v24 = vsel %vm4357_vm0, %v5558_v31, %v5594_v50  ;;  %v5539_v35 = vsel %vm5513_vm7, %v5435_v28, -inf  ;;  %v5428_v41 = vmax.f32 %v10050_v59, %v5427_v14  ;;  %v5538_v45 = vsel %vm5513_vm7, %v10063_v3, -inf  ;;  %7318 = vmatpush3.bf16.msra.mxu0 %v7551_v54  ;;  %v7575_v31 = vld [vmem:[%s10381_s7 + $0x174] ss:$8 sps:$4 sm:$0xff]   ;;  %v7585_v42 = vld [vmem:[%s10381_s7 + $0x150] ss:$8 sps:$4 sm:$0xff]  }
 0x58a   : > { %v5596_v12 = vsel %vm4359_vm1, %v5561_v9, %v5595_v24  ;;  %v5442_v58 = vmax.f32 %v5440_v29, %v5441_v49  ;;  %v5455_v20 = vrot.slane %v5454_v37, 1  ;;  %v5541_v17 = vsel %vm5513_vm7, %v10073_v8, -inf  ;;  %7319 = vmatprep.subr.bf16.mxu0 %v7555_v25  ;;  %v7565_v29 = vld [vmem:[#allocation11 + $0x80] sm:$0xff]   ;;  %v7587_v54 = vld [vmem:[%s10381_s7 + $0x154] ss:$8 sps:$4 sm:$0xff]  }
 0x58b   : > { %5606 = vst.msk [vmem:[#allocation6 + $0x21] sm:$0xf] %vm5602_vm8, %v5596_v12  ;;  %v5544_v11 = vsel %vm5513_vm7, %v10068_v47, -inf  ;;  %v5545_v43 = vsel %vm5513_vm7, %v5449_v27, -inf  ;;  %v5540_v57 = vmax.f32 %v5538_v45, %v5539_v35  ;;  %v5547_v14 = vsel %vm5513_vm7, %v5428_v41, -inf  ;;  %v7546_v47 = vld [vmem:[#allocation11 + $0xe0] sm:$0xff]  }
 0x58c   : > { %v5542_v16 = vsel %vm5513_vm7, %v5442_v58, -inf  ;;  %v5456_v1 = vmax.f32 %v5454_v37, %v5455_v20  ;;  %v5546_v59 = vmax.f32 %v5544_v11, %v5545_v43  ;;  %7333 = vmatprep.subr.bf16.mxu1 %v7546_v47  ;;  %v7561_v41 = vld [vmem:[#allocation11 + $0x118] sm:$0xff]   ;;  %v7564_v11 = vld [vmem:[#allocation11 + $0x110] sm:$0xff]   ;;  %v7566_v43 = vld [vmem:[#allocation11 + $0x108] sm:$0xff]  }
 0x58d   : > { %v5543_v22 = vmax.f32 %v5541_v17, %v5542_v16  ;;  %7334 = vmatpush3.bf16.msra.mxu1 %v7547_v51  ;;  %7320 = vmatpush3.bf16.msra.mxu0 %v7556_v5  ;;  %v7578_v51 = vld [vmem:[%s10381_s7 + $0x64] ss:$8 sps:$4 sm:$0xff]   ;;  %v7596_v5 = vld [vmem:[%s10381_s7 + $0x34] ss:$8 sps:$4 sm:$0xff]  }
 0x58e   : > { %v5548_v3 = vsel %vm5513_vm7, %v5456_v1, -inf  ;;  %7335 = vmatprep.subr.bf16.mxu1 %v7552_v40  ;;  %7424 = vmatprep.subr.bf16.mxu0 %v7788_v0  ;;  %v7588_v40 = vld [vmem:[%s10381_s7 + $0x40] ss:$8 sps:$4 sm:$0xff]   ;;  %v7593_v25 = vld [vmem:[%s10381_s7 + $0x144] ss:$8 sps:$4 sm:$0xff]  }
 0x58f   : > { %v5591_v63 = vsel %vm4355_vm15, %v5543_v22, %v5540_v57  ;;  %v5549_v60 = vmax.f32 %v5547_v14, %v5548_v3  ;;  %vm5637_vm15 = vcmask 1048064   ;;  %v7573_v22 = vld [vmem:[%s10381_s7 + $0x170] ss:$8 sps:$4 sm:$0xff]   ;;  %v7581_v14 = vld [vmem:[%s10381_s7 + $0x164] ss:$8 sps:$4 sm:$0xff]  }
 0x590   : > { %v5592_v8 = vsel %vm4357_vm0, %v5546_v59, %v5591_v63  ;;  %vm7802_vm0 = vmmov 0   ;;  %v7567_v3 = vld [vmem:[#allocation11 + $0x100] sm:$0xff]  }
 0x591   : > { %v5593_v7 = vsel %vm4359_vm1, %v5549_v60, %v5592_v8  ;;  %7336 = vmatpush3.bf16.msra.mxu1 %v7553_v53  ;;  %v7579_v63 = vld [vmem:[%s10381_s7 + $0x160] ss:$8 sps:$4 sm:$0xff]   ;;  %v7572_v60 = vld [vmem:[%s10381_s7 + $0x74] ss:$8 sps:$4 sm:$0xff]   ;;  %v7590_v53 = vld [vmem:[%s10381_s7 + $0x44] ss:$8 sps:$4 sm:$0xff]  }
 0x592   : > { %5605 = vst.msk [vmem:[#allocation6 + $0x19] sm:$0xf] %vm5602_vm8, %v5593_v7  ;;  %v7554_v2 = vld [vmem:[#allocation6 + $0x20] ss:$8 sps:$4 sm:$0xff]   ;;  %7337 = vmatprep.subr.bf16.mxu1 %v7557_v26  ;;  %vm6233_vm1 = vcmask 1041408  }
 0x593   : > { %5718 = vst.msk [vmem:[#allocation7 + $0x40] sm:$0xff] %vm5513_vm7, %v7554_v2  ;;  %v7569_v48 = vld [vmem:[#allocation6 + $0x22] ss:$8 sps:$4 sm:$0xff]  }
 0x594   : > { %5750 = vst.msk [vmem:[#allocation7 + $0x48] sm:$0xff] %vm5513_vm7, %v7569_v48  ;;  %v7522_v4 = vld [vmem:[#allocation6 + $0x21] ss:$8 sps:$4 sm:$0xff]   ;;  %v7591_v48 = vld [vmem:[%s10381_s7 + $0x140] ss:$8 sps:$4 sm:$0xff]  }
 0x595   : > { %7338 = vmatpush3.bf16.msra.mxu1 %v7558_v34  ;;  %v7582_v7 = vld [vmem:[%s10381_s7 + $0x50] ss:$8 sps:$4 sm:$0xff]   ;;  %v7584_v2 = vld [vmem:[%s10381_s7 + $0x54] ss:$8 sps:$4 sm:$0xff]  }
 0x596   : > { %7339 = vmatprep.subr.bf16.mxu1 %v7560_v46  ;;  %v7594_v26 = vld [vmem:[%s10381_s7 + $0x30] ss:$8 sps:$4 sm:$0xff]   ;;  %v7599_v34 = vld [vmem:[%s10381_s7 + $0x134] ss:$8 sps:$4 sm:$0xff]  }
 0x597   : > { %v7609_v46 = vld [vmem:[%s10381_s7 + $0x110] ss:$8 sps:$4 sm:$0xff]  }
 0x599   : > { %v7518_v36 = vld [vmem:[#allocation6 + $0x18] ss:$8 sps:$4 sm:$0xff]   ;;  %7340 = vmatpush3.bf16.msra.mxu1 %v7562_v15  ;;  %v7614_v15 = vld [vmem:[%s10381_s7 + $0x4] ss:$8 sps:$4 sm:$0xff]  }
 0x59a   : > { %v7519_v6 = vld [vmem:[#allocation6 + $0x11] ss:$8 sps:$4 sm:$0xff]   ;;  %5666 = vrot.lane.b32.xlu1 %v7518_v36, %s7800_s23  ;;  %7341 = vmatprep.subr.bf16.mxu1 %v7563_v52  ;;  %v7597_v36 = vld [vmem:[%s10381_s7 + $0x130] ss:$8 sps:$4 sm:$0xff]  }
 0x59b   : > { %v7520_v32 = vld [vmem:[#allocation6 + $0x11] ss:$8 sps:$4 sm:$0xff]   ;;  %5729 = vrot.lane.b32.xlu0 %v7519_v6, %s7800_s23 }
 0x59c   : > { %v7542_v39 = vld [vmem:[#allocation6 + $0x12] ss:$8 sps:$4 sm:$0xff]  }
 0x59d   : > { %v7543_v10 = vld [vmem:[#allocation6 + $0x10] ss:$8 sps:$4 sm:$0xff]   ;;  %5653 = vst.msk [vmem:[#allocation7 + $0x30] sm:$0xff] %vm5513_vm7, %v7542_v39  ;;  %7342 = vmatpush3.bf16.msra.mxu1 %v7565_v29  ;;  %v7602_v6 = vld [vmem:[%s10381_s7 + $0x24] ss:$8 sps:$4 sm:$0xff]  }
 0x59e   : > { %v7548_v38 = vld [vmem:[#allocation6 + $0x10] ss:$8 sps:$4 sm:$0xff]   ;;  %5717 = vst.msk [vmem:[#allocation7 + $0x18] sm:$0xff] %vm5513_vm7, %v7543_v10  ;;  %5633 = vrot.lane.b32.xlu1 %v7520_v32, %s7800_s23  ;;  %6765 = vmatprep.subr.bf16.mxu1 %v7575_v31  ;;  %v7605_v39 = vld [vmem:[%s10381_s7 + $0x124] ss:$8 sps:$4 sm:$0xff]  }
 0x59f   : > { %v7559_v23 = vld [vmem:[#allocation6 + $0x19] ss:$8 sps:$4 sm:$0xff]   ;;  %5620 = vst.msk [vmem:[#allocation7 + $0x28] sm:$0xff] %vm5513_vm7, %v7548_v38  ;;  %5696 = vrot.lane.b32.xlu0 %v7521_v30, %s7800_s23 }
 0x5a0   : > { %5685 = vst.msk [vmem:[#allocation7 + $0x38] sm:$0xff] %vm5513_vm7, %v7559_v23  ;;  %v7568_v61 = vld [vmem:[#allocation6 + $0x12] ss:$8 sps:$4 sm:$0xff]   ;;  %v7608_v38 = vld [vmem:[%s10381_s7 + $0x14] ss:$8 sps:$4 sm:$0xff]  }
 0x5a1   : > { %5749 = vst.msk [vmem:[#allocation7 + $0x20] sm:$0xff] %vm5513_vm7, %v7568_v61  ;;  %v7523_v33 = vld [vmem:[#allocation6 + $0x1a] ss:$8 sps:$4 sm:$0xff]  }
 0x5a2   : > { %5731 = vrot.lane.b32.xlu1 %v7522_v4, %s7800_s23  ;;  %v5760_v56 = vld [vmem:[#allocation7 + $0x48] sm:$0xff]  ;;  %v7611_v30 = vld [vmem:[%s10381_s7 + $0x114] ss:$8 sps:$4 sm:$0xff]   ;;  %v7606_v23 = vld [vmem:[%s10381_s7 + $0x10] ss:$8 sps:$4 sm:$0xff]  }
 0x5a3   : > { %v7600_v32 = vld [vmem:[%s10381_s7 + $0x20] ss:$8 sps:$4 sm:$0xff]   ;;  %v7617_v52 = vld [vmem:[%s10381_s7 + $0x104] ss:$8 sps:$4 sm:$0xff]   ;;  %v7620_v29 = vld [vmem:[%s10381_s7 + $0xf4] ss:$8 sps:$4 sm:$0xff]  }
 0x5a4   : > { %v7603_v10 = vld [vmem:[%s10381_s7 + $0x120] ss:$8 sps:$4 sm:$0xff]   ;;  %v7618_v31 = vld [vmem:[%s10381_s7 + $0xf0] ss:$8 sps:$4 sm:$0xff]  }
 0x5a5   : > { %v7612_v61 = vld [vmem:[%s10381_s7] ss:$8 sps:$4 sm:$0xff]  }
 0x5a6   : > { %5698 = vrot.lane.b32.xlu1 %v7523_v33, %s7800_s23  ;;  %v7615_v4 = vld [vmem:[%s10381_s7 + $0x100] ss:$8 sps:$4 sm:$0xff]   ;;  %v7623_v33 = vld [vmem:[%s10381_s7 + $0x1f4] ss:$8 sps:$4 sm:$0xff]  }
 0x5a8   : > { %v5755_v8 = vld [vmem:[#allocation7 + $0x20] sm:$0xff] }
 0x5a9   : > { %v5765_v47 = vpack.c.bf16 %v5760_v56, %v5755_v8  ;;  %v7663_v8 = vld [vmem:[%s10381_s7 + $0x180] ss:$8 sps:$4 sm:$0xff]  }
 0x5aa   : > { %v7666_v56 = vld [vmem:[#allocation13 + $0x78] sm:$0xff]  }
 0x5e2   : > { %v5665_v44 = vpop.permute.xlu0 %5664 }
 0x5e3   : > { %5670 = vst.msk [vmem:[#allocation7 + $0x8] sm:$0xff] %vm5637_vm15, %v5665_v44  ;;  %v7621_v44 = vld [vmem:[%s10381_s7 + $0x1f0] ss:$8 sps:$4 sm:$0xff]  }
 0x5e6   : > { %v5632_v28 = vpop.permute.xlu0 %5631 }
 0x5e7   : > { %5638 = vst.msk [vmem:[#allocation7] sm:$0xff] %vm5637_vm15, %v5632_v28  ;;  %v7626_v28 = vld [vmem:[%s10381_s7 + $0xe4] ss:$8 sps:$4 sm:$0xff]  }
 0x5ea   : > { %v5752_v24 = vld [vmem:[#allocation7 + $0x8] sm:$0xff] }
 0x5ee   : > { %v5751_v27 = vld [vmem:[#allocation7] sm:$0xff] }
 0x60c   : > { %v5667_v18 = vpop.permute.xlu1 %5666 }
 0x60d   : > { %5671 = vst.msk [vmem:[#allocation7 + $0x30] sm:$0xff] %vm5637_vm15, %v5667_v18  ;;  %v5730_v9 = vpop.permute.xlu0 %5729  ;;  %v7629_v18 = vld [vmem:[%s10381_s7 + $0x1e4] ss:$8 sps:$4 sm:$0xff]  }
 0x60e   : > { %5735 = vst.msk [vmem:[#allocation7 + $0x18] sm:$0xff] %vm5637_vm15, %v5730_v9  ;;  %v7624_v9 = vld [vmem:[%s10381_s7 + $0xe0] ss:$8 sps:$4 sm:$0xff]  }
 0x610   : > { %v5634_v50 = vpop.permute.xlu1 %5633 }
 0x611   : > { %5639 = vst.msk [vmem:[#allocation7 + $0x28] sm:$0xff] %vm5637_vm15, %v5634_v50  ;;  %v5697_v49 = vpop.permute.xlu0 %5696  ;;  %v7627_v50 = vld [vmem:[%s10381_s7 + $0x1e0] ss:$8 sps:$4 sm:$0xff]  }
 0x612   : > { %5702 = vst.msk [vmem:[#allocation7 + $0x10] sm:$0xff] %vm5637_vm15, %v5697_v49  ;;  %v7632_v49 = vld [vmem:[%s10381_s7 + $0xd4] ss:$8 sps:$4 sm:$0xff]  }
 0x614   : > { %v5732_v62 = vpop.permute.xlu1 %5731  ;;  %v5757_v37 = vld [vmem:[#allocation7 + $0x30] sm:$0xff] }
 0x615   : > { %5736 = vst.msk [vmem:[#allocation7 + $0x40] sm:$0xff] %vm5637_vm15, %v5732_v62  ;;  %v5762_v12 = vpack.c.bf16 %v5757_v37, %v5752_v24  ;;  %v5754_v20 = vld [vmem:[#allocation7 + $0x18] sm:$0xff] }
 0x616   : > { %v7635_v62 = vld [vmem:[%s10381_s7 + $0x1d4] ss:$8 sps:$4 sm:$0xff]   ;;  %v7630_v24 = vld [vmem:[%s10381_s7 + $0xd0] ss:$8 sps:$4 sm:$0xff]  }
 0x617   : > { %6096 = vmatprep.mubr.bf16.mxu0 %v5762_v12  ;;  %v7633_v37 = vld [vmem:[%s10381_s7 + $0x1d0] ss:$8 sps:$4 sm:$0xff]   ;;  %v7638_v12 = vld [vmem:[%s10381_s7 + $0xc4] ss:$8 sps:$4 sm:$0xff]  }
 0x618   : > { %v5699_v58 = vpop.permute.xlu1 %5698  ;;  %v5756_v35 = vld [vmem:[#allocation7 + $0x28] sm:$0xff] }
 0x619   : > { %5703 = vst.msk [vmem:[#allocation7 + $0x38] sm:$0xff] %vm5637_vm15, %v5699_v58  ;;  %v5761_v45 = vpack.c.bf16 %v5756_v35, %v5751_v27  ;;  %v5753_v1 = vld [vmem:[#allocation7 + $0x10] sm:$0xff]  ;;  %v7641_v58 = vld [vmem:[%s10381_s7 + $0x1c4] ss:$8 sps:$4 sm:$0xff]   ;;  %v7636_v27 = vld [vmem:[%s10381_s7 + $0xc0] ss:$8 sps:$4 sm:$0xff]  }
 0x61a   : > { %v7639_v35 = vld [vmem:[%s10381_s7 + $0x1c0] ss:$8 sps:$4 sm:$0xff]  }
 0x61b   : > { %6097 = vmatmul.mubr.bf16.vlgmr.msra.gmra.mxu0 %v5761_v45  ;;  %v7644_v45 = vld [vmem:[%s10381_s7 + $0xb4] ss:$8 sps:$4 sm:$0xff]  }
 0x61c   : > { %7425 = vmatpush3.bf16.msra.mxu0 %v7561_v41  ;;  %v5759_v17 = vld [vmem:[#allocation7 + $0x40] sm:$0xff]  ;;  %7432 = vmatprep.mubr.msk.bf16.mxu0 %vm7802_vm0, %v7788_v0  ;;  %v7642_v41 = vld [vmem:[%s10381_s7 + $0xb0] ss:$8 sps:$4 sm:$0xff]  }
 0x61d   : > { %7426 = vmatprep.subr.bf16.mxu0 %v7788_v0  ;;  %v5764_v16 = vpack.c.bf16 %v5759_v17, %v5754_v20  ;;  %v7645_v20 = vld [vmem:[%s10381_s7 + $0x1b0] ss:$8 sps:$4 sm:$0xff]   ;;  %v7647_v17 = vld [vmem:[%s10381_s7 + $0x1b4] ss:$8 sps:$4 sm:$0xff]  }
 0x61f   : > { %6137 = vmatprep.mubr.bf16.mxu1 %v5764_v16  ;;  %v7653_v16 = vld [vmem:[%s10381_s7 + $0x1a4] ss:$8 sps:$4 sm:$0xff]  }
 0x620   : > { %7427 = vmatpush3.bf16.msra.mxu0 %v7564_v11  ;;  %v5758_v57 = vld [vmem:[#allocation7 + $0x38] sm:$0xff]  ;;  %v7650_v11 = vld [vmem:[%s10381_s7 + $0xa4] ss:$8 sps:$4 sm:$0xff]  }
 0x621   : > { %7428 = vmatprep.subr.bf16.mxu0 %v7788_v0  ;;  %v5763_v59 = vpack.c.bf16 %v5758_v57, %v5753_v1  ;;  %v7651_v1 = vld [vmem:[%s10381_s7 + $0x1a0] ss:$8 sps:$4 sm:$0xff]   ;;  %v7656_v57 = vld [vmem:[%s10381_s7 + $0x94] ss:$8 sps:$4 sm:$0xff]  }
 0x623   : > { %6138 = vmatmul.mubr.bf16.vlgmr.msra.gmra.mxu1 %v5763_v59  ;;  %v7654_v59 = vld [vmem:[%s10381_s7 + $0x90] ss:$8 sps:$4 sm:$0xff]  }
 0x624   : > { %7429 = vmatpush3.bf16.msra.mxu0 %v7566_v43  ;;  %6766 = vmatpush1.bf16.msra.mxu1 %v7573_v22  ;;  %v7648_v43 = vld [vmem:[%s10381_s7 + $0xa0] ss:$8 sps:$4 sm:$0xff]   ;;  %v7659_v22 = vld [vmem:[%s10381_s7 + $0x194] ss:$8 sps:$4 sm:$0xff]  }
 0x625   : > { %7430 = vmatprep.subr.bf16.mxu0 %v7788_v0  ;;  %6767 = vmatprep.subr.bf16.mxu1 %v7581_v14  ;;  %v7576_v0 = vld [vmem:[%s10381_s7 + $0x60] ss:$8 sps:$4 sm:$0xff]   ;;  %v7657_v14 = vld [vmem:[%s10381_s7 + $0x190] ss:$8 sps:$4 sm:$0xff]  }
 0x628   : > { %7431 = vmatpush3.bf16.msra.mxu0 %v7567_v3  ;;  %6768 = vmatpush1.bf16.msra.mxu1 %v7579_v63  ;;  %v7662_v3 = vld [vmem:[%s10381_s7 + $0x84] ss:$8 sps:$4 sm:$0xff]  }
 0x629   : > { %6724 = vmatprep.subr.bf16.mxu0 %v7572_v60  ;;  %6769 = vmatprep.subr.bf16.mxu1 %v7587_v54  ;;  %v7665_v63 = vld [vmem:[%s10381_s7 + $0x184] ss:$8 sps:$4 sm:$0xff]   ;;  %v7660_v60 = vld [vmem:[%s10381_s7 + $0x80] ss:$8 sps:$4 sm:$0xff]  }
 0x62b   : > { %7433 = vmatmul.mubr.msk.bf16.vlgmr.msra.gmra.mxu0 %vm5513_vm7, %v5765_v47 }
 0x62c   : > { %6725 = vmatpush1.bf16.msra.mxu0 %v7570_v21  ;;  %6770 = vmatpush1.bf16.msra.mxu1 %v7585_v42 }
 0x62d   : > { %6726 = vmatprep.subr.bf16.mxu0 %v7578_v51  ;;  %6771 = vmatprep.subr.bf16.mxu1 %v7593_v25 }
 0x630   : > { %6727 = vmatpush1.bf16.msra.mxu0 %v7576_v0  ;;  %6772 = vmatpush1.bf16.msra.mxu1 %v7591_v48 }
 0x631   : > { %6728 = vmatprep.subr.bf16.mxu0 %v7584_v2  ;;  %6773 = vmatprep.subr.bf16.mxu1 %v7599_v34 }
 0x634   : > { %6729 = vmatpush1.bf16.msra.mxu0 %v7582_v7  ;;  %6774 = vmatpush1.bf16.msra.mxu1 %v7597_v36  ;;  %v7119_v7 = vld [vmem:[%s10380_s6] ss:$0 sm:$0xff] }
 0x635   : > { %6730 = vmatprep.subr.bf16.mxu0 %v7590_v53  ;;  %6775 = vmatprep.subr.bf16.mxu1 %v7605_v39 }
 0x638   : > { %6731 = vmatpush1.bf16.msra.mxu0 %v7588_v40  ;;  %6776 = vmatpush1.bf16.msra.mxu1 %v7603_v10 }
 0x639   : > { %6732 = vmatprep.subr.bf16.mxu0 %v7596_v5  ;;  %6777 = vmatprep.subr.bf16.mxu1 %v7611_v30 }
 0x63c   : > { %6733 = vmatpush1.bf16.msra.mxu0 %v7594_v26  ;;  %6778 = vmatpush1.bf16.msra.mxu1 %v7609_v46 }
 0x63d   : > { %6734 = vmatprep.subr.bf16.mxu0 %v7602_v6  ;;  %6779 = vmatprep.subr.bf16.mxu1 %v7617_v52 }
 0x640   : > { %6735 = vmatpush1.bf16.msra.mxu0 %v7600_v32  ;;  %6780 = vmatpush1.bf16.msra.mxu1 %v7615_v4 }
 0x641   : > { %6736 = vmatprep.subr.bf16.mxu0 %v7608_v38  ;;  %6781 = vmatprep.subr.bf16.mxu1 %v7623_v33 }
 0x644   : > { %6737 = vmatpush1.bf16.msra.mxu0 %v7606_v23  ;;  %6782 = vmatpush2.bf16.msra.mxu1 %v7621_v44 }
 0x645   : > { %6738 = vmatprep.subr.bf16.mxu0 %v7614_v15  ;;  %6783 = vmatprep.subr.bf16.mxu1 %v7629_v18 }
 0x648   : > { %6739 = vmatpush1.bf16.msra.mxu0 %v7612_v61  ;;  %6784 = vmatpush2.bf16.msra.mxu1 %v7627_v50 }
 0x649   : > { %6740 = vmatprep.subr.bf16.mxu0 %v7620_v29  ;;  %6785 = vmatprep.subr.bf16.mxu1 %v7635_v62 }
 0x64c   : > { %6741 = vmatpush2.bf16.msra.mxu0 %v7618_v31  ;;  %6786 = vmatpush2.bf16.msra.mxu1 %v7633_v37 }
 0x64d   : > { %6742 = vmatprep.subr.bf16.mxu0 %v7626_v28  ;;  %6787 = vmatprep.subr.bf16.mxu1 %v7641_v58 }
 0x650   : > { %6743 = vmatpush2.bf16.msra.mxu0 %v7624_v9  ;;  %6788 = vmatpush2.bf16.msra.mxu1 %v7639_v35 }
 0x651   : > { %6744 = vmatprep.subr.bf16.mxu0 %v7632_v49  ;;  %6789 = vmatprep.subr.bf16.mxu1 %v7647_v17 }
 0x654   : > { %6745 = vmatpush2.bf16.msra.mxu0 %v7630_v24  ;;  %6790 = vmatpush2.bf16.msra.mxu1 %v7645_v20 }
 0x655   : > { %6746 = vmatprep.subr.bf16.mxu0 %v7638_v12  ;;  %6791 = vmatprep.subr.bf16.mxu1 %v7653_v16 }
 0x658   : > { %6747 = vmatpush2.bf16.msra.mxu0 %v7636_v27  ;;  %6792 = vmatpush2.bf16.msra.mxu1 %v7651_v1 }
 0x659   : > { %6748 = vmatprep.subr.bf16.mxu0 %v7644_v45  ;;  %6793 = vmatprep.subr.bf16.mxu1 %v7659_v22 }
 0x65c   : > { %6749 = vmatpush2.bf16.msra.mxu0 %v7642_v41  ;;  %6794 = vmatpush2.bf16.msra.mxu1 %v7657_v14 }
 0x65d   : > { %6750 = vmatprep.subr.bf16.mxu0 %v7650_v11  ;;  %6795 = vmatprep.subr.bf16.mxu1 %v7665_v63 }
 0x660   : > { %6751 = vmatpush2.bf16.msra.mxu0 %v7648_v43  ;;  %6796 = vmatpush2.bf16.msra.mxu1 %v7663_v8 }
 0x661   : > { %6752 = vmatprep.subr.bf16.mxu0 %v7656_v57 }
 0x664   : > { %6753 = vmatpush2.bf16.msra.mxu0 %v7654_v59 }
 0x665   : > { %6754 = vmatprep.subr.bf16.mxu0 %v7662_v3 }
 0x668   : > { %6755 = vmatpush2.bf16.msra.mxu0 %v7660_v60 }
 0x669   : > { %7354 = vmatprep.subr.bf16.mxu0 %v7666_v56 }
 0x6db   : > { %v7321_v21 = vpop.f32.mrf.mxu0 }
 0x6dd   : > { %v7322_v47 = vpop.f32.mrf.mxu0 }
 0x6de   : > { %v7323_v0 = vadd.f32 %v7322_v47, %v7321_v21 }
 0x6df   : > { %v7324_v51 = vpop.f32.mrf.mxu0 }
 0x6e0   : > { %v6099_v40 = vadd.f32 %v7323_v0, %v7119_v7 }
 0x6e1   : > { %v7325_v2 = vpop.f32.mrf.mxu0 }
 0x6e2   : > { %v7326_v53 = vadd.f32 %v7325_v2, %v7324_v51 }
 0x6e3   : > { %v7343_v42 = vpop.f32.mrf.mxu1 }
 0x6e4   : > { %v6102_v34 = vadd.f32 %v7326_v53, %v7119_v7 }
 0x6e5   : > { %v7344_v54 = vpop.f32.mrf.mxu1 }
 0x6e6   : > { %v7345_v48 = vadd.f32 %v7344_v54, %v7343_v42 }
 0x6e7   : > { %v7346_v25 = vpop.f32.mrf.mxu1 }
 0x6e8   : > { %v6140_v5 = vadd.f32 %v7345_v48, %v6099_v40 }
 0x6e9   : > { %v7347_v26 = vpop.f32.mrf.mxu1 }
 0x6ea   : > { %v7348_v36 = vadd.f32 %v7347_v26, %v7346_v25 }
 0x6eb   : > { %v6180_v6 = vpop.f32.mrf.mxu0 }
 0x6ec   : > { %v6181_v32 = vadd.f32 %v6180_v6, %v6140_v5  ;;  %v6143_v39 = vadd.f32 %v7348_v36, %v6102_v34 }
 0x6ed   : > { %v7434_v10 = vpop.f32.mrf.mxu0 }
 0x6ee   : > { %v6187_v38 = vmax.f32 %v6181_v32, 0.0 }
 0x6ef   : > { %v6183_v30 = vpop.f32.mrf.mxu0 }
 0x6f0   : > { %v6191_v23 = vcombine.high %v6187_v38, %v6187_v38  ;;  %v6198_v46 = vrot.slane %v6187_v38, %v8831_v13  ;;  %v6184_v15 = vadd.f32 %v6183_v30, %v6143_v39 }
 0x6f1   : > { %v7435_v52 = vpop.f32.mrf.mxu0 }
 0x6f2   : > { %v6205_v61 = vrot.slane %v6191_v23, %v8831_v13  ;;  %v6206_v4 = vcombine.high %v6198_v46, %v6198_v46  ;;  %v6234_v29 = vsel %vm6233_vm1, %v6198_v46, -inf  ;;  %v6188_v33 = vmax.f32 %v6184_v15, 0.0 }
 0x6f3   : > { %v6235_v31 = vrot.slane %v6234_v29, 4 }
 0x6f4   : > { %v6207_v44 = vcombine.high %v6205_v61, %v6205_v61  ;;  %v6241_v28 = vsel %vm6233_vm1, %v6206_v4, -inf  ;;  %v6248_v18 = vsel %vm6233_vm1, %v6205_v61, -inf  ;;  %v6208_v9 = vcombine.high %v6188_v33, %v6188_v33 }
 0x6f5   : > { %v6236_v50 = vmax.f32 %v6234_v29, %v6235_v31  ;;  %v6242_v49 = vrot.slane %v6241_v28, 4  ;;  %v6249_v62 = vrot.slane %v6248_v18, 4  ;;  %v6215_v24 = vrot.slane %v6188_v33, %v8831_v13 }
 0x6f6   : > { %v6255_v37 = vsel %vm6233_vm1, %v6207_v44, -inf  ;;  %v6222_v12 = vrot.slane %v6208_v9, %v8831_v13  ;;  %v6318_v9 = vsub.s32 3, %v8812_v19 }
 0x6f7   : > { %v6237_v58 = vrot.slane %v6236_v50, 2  ;;  %v6243_v27 = vmax.f32 %v6241_v28, %v6242_v49  ;;  %v6250_v35 = vmax.f32 %v6248_v18, %v6249_v62  ;;  %v6256_v41 = vrot.slane %v6255_v37, 4 }
 0x6f8   : > { %v6223_v45 = vcombine.high %v6215_v24, %v6215_v24  ;;  %v6224_v20 = vcombine.high %v6222_v12, %v6222_v12  ;;  %v6262_v17 = vsel %vm6233_vm1, %v6215_v24, -inf  ;;  %v6276_v11 = vsel %vm6233_vm1, %v6222_v12, -inf }
 0x6f9   : > { %v6238_v16 = vmax.f32 %v6236_v50, %v6237_v58  ;;  %v6244_v43 = vrot.slane %v6243_v27, 2  ;;  %v6251_v1 = vrot.slane %v6250_v35, 2  ;;  %v6257_v57 = vmax.f32 %v6255_v37, %v6256_v41 }
 0x6fa   : > { %v6263_v22 = vrot.slane %v6262_v17, 4  ;;  %v6269_v59 = vsel %vm6233_vm1, %v6223_v45, -inf  ;;  %v6277_v14 = vrot.slane %v6276_v11, 4  ;;  %v6283_v13 = vsel %vm6233_vm1, %v6224_v20, -inf  ;;  %v7667_v20 = vld [vmem:[#allocation13 + $0x38] sm:$0xff]  }
 0x6fb   : > { %v6239_v3 = vrot.slane %v6238_v16, 1  ;;  %v6245_v63 = vmax.f32 %v6243_v27, %v6244_v43  ;;  %v6252_v60 = vmax.f32 %v6250_v35, %v6251_v1  ;;  %v6258_v8 = vrot.slane %v6257_v57, 2  ;;  %v7672_v43 = vld [vmem:[#allocation13 + $0x60] sm:$0xff]  }
 0x6fc   : > { %v6264_v56 = vmax.f32 %v6262_v17, %v6263_v22  ;;  %v6270_v21 = vrot.slane %v6269_v59, 4  ;;  %v6278_v47 = vmax.f32 %v6276_v11, %v6277_v14  ;;  %v6284_v51 = vrot.slane %v6283_v13, 4  ;;  %v7668_v17 = vld [vmem:[#allocation13 + $0x70] sm:$0xff]   ;;  %v7673_v1 = vld [vmem:[#allocation13 + $0x20] sm:$0xff]   ;;  %v7675_v22 = vld [vmem:[#allocation13 + $0x18] sm:$0xff]  }
 0x6fd   : > { %v6246_v0 = vrot.slane %v6245_v63, 1  ;;  %v6253_v7 = vrot.slane %v6252_v60, 1  ;;  %v6259_v2 = vmax.f32 %v6257_v57, %v6258_v8  ;;  %v6240_v48 = vmax.f32 %v6238_v16, %v6239_v3  ;;  %v7669_v11 = vld [vmem:[#allocation13 + $0x30] sm:$0xff]   ;;  %v7670_v16 = vld [vmem:[#allocation13 + $0x68] sm:$0xff]   ;;  %v7674_v57 = vld [vmem:[#allocation13 + $0x58] sm:$0xff]  }
 0x6fe   : > { %v6265_v42 = vrot.slane %v6264_v56, 2  ;;  %v6271_v54 = vmax.f32 %v6269_v59, %v6270_v21  ;;  %v6279_v40 = vrot.slane %v6278_v47, 2  ;;  %v6285_v53 = vmax.f32 %v6283_v13, %v6284_v51  ;;  %v7676_v59 = vld [vmem:[#allocation13 + $0x50] sm:$0xff]   ;;  %v7678_v13 = vld [vmem:[#allocation13 + $0x48] sm:$0xff]   ;;  %v6392_v8 = vld [vmem:[%s10382_s8] sm:$0x3] }
 0x6ff   : > { %v6254_v25 = vmax.f32 %v6252_v60, %v6253_v7  ;;  %v6260_v5 = vrot.slane %v6259_v2, 1  ;;  %v6247_v39 = vmax.f32 %v6245_v63, %v6246_v0  ;;  %v6310_v18 = vsub.s32 1, %v8812_v19  ;;  %v7677_v14 = vld [vmem:[#allocation13 + $0x10] sm:$0xff]   ;;  %v7679_v3 = vld [vmem:[#allocation13 + $0x8] sm:$0xff]   ;;  %v7680_v63 = vld [vmem:[#allocation13 + $0x40] sm:$0xff]  }
 0x700   : > { %v6266_v34 = vmax.f32 %v6264_v56, %v6265_v42  ;;  %v6272_v36 = vrot.slane %v6271_v54, 2  ;;  %v6280_v6 = vmax.f32 %v6278_v47, %v6279_v40  ;;  %v6286_v32 = vrot.slane %v6285_v53, 2  ;;  %v7681_v60 = vld [vmem:[#allocation13] sm:$0xff]  }
 0x701   : > { %v6261_v10 = vmax.f32 %v6259_v2, %v6260_v5  ;;  %v6290_v38 = vmax.f32 %v6240_v48, %v6254_v25  ;;  %v6306_v50 = vsub.s32 0, %v8812_v19  ;;  %v6314_v49 = vsub.s32 2, %v8812_v19  ;;  %v7671_v19 = vld [vmem:[#allocation13 + $0x28] sm:$0xff]  }
 0x702   : > { %v6267_v30 = vrot.slane %v6266_v34, 1  ;;  %v6273_v23 = vmax.f32 %v6271_v54, %v6272_v36  ;;  %v6281_v46 = vrot.slane %v6280_v6, 1  ;;  %v6287_v15 = vmax.f32 %v6285_v53, %v6286_v32 }
 0x703   : > { %v6291_v52 = vmax.f32 %v6247_v39, %v6261_v10  ;;  %6298 = vst.msk [vmem:[#allocation8] sm:$0x1] %vm10345_vm9, %v6290_v38  ;;  %v6717_v56 = vrot.slane %v6392_v8, %v6306_v50  ;;  %v6721_v21 = vrot.slane %v6392_v8, %v6310_v18  ;;  %v6842_v39 = vld [vmem:[%s10384_s10] sm:$0x1] }
 0x704   : > { %v6268_v61 = vmax.f32 %v6266_v34, %v6267_v30  ;;  %v6274_v55 = vrot.slane %v6273_v23, 1  ;;  %v6282_v4 = vmax.f32 %v6280_v6, %v6281_v46  ;;  %v6288_v29 = vrot.slane %v6287_v15, 1 }
 0x705   : > { %6299 = vst.msk [vmem:[#allocation8 + $0x1] sm:$0x1] %vm10345_vm9, %v6291_v52 }
 0x706   : > { %v6275_v33 = vmax.f32 %v6273_v23, %v6274_v55  ;;  %v6289_v31 = vmax.f32 %v6287_v15, %v6288_v29  ;;  %v6292_v44 = vmax.f32 %v6268_v61, %v6282_v4 }
 0x708   : > { %v6293_v28 = vmax.f32 %v6275_v33, %v6289_v31  ;;  %6300 = vst.msk [vmem:[#allocation8 + $0x2] sm:$0x1] %vm10345_vm9, %v6292_v44 }
 0x70a   : > { %6301 = vst.msk [vmem:[#allocation8 + $0x3] sm:$0x1] %vm10345_vm9, %v6293_v28 }
 0x711   : > { %v6302_v62 = vld [vmem:[#allocation8] sm:$0xf] }
 0x712   : > { %v6311_v24 = vrot.slane %v6302_v62, %v6310_v18  ;;  %v6319_v37 = vrot.slane %v6302_v62, %v6318_v9  ;;  %v6307_v12 = vrot.slane %v6302_v62, %v6306_v50  ;;  %v6315_v58 = vrot.slane %v6302_v62, %v6314_v49 }
 0x714   : > { %v6325_v27 = vpack.c.bf16 %v6311_v24, %v6311_v24  ;;  %v6327_v35 = vpack.c.bf16 %v6319_v37, %v6319_v37  ;;  %v6324_v41 = vpack.c.bf16 %v6307_v12, %v6307_v12  ;;  %v6326_v45 = vpack.c.bf16 %v6315_v58, %v6315_v58 }
 0x716   : > { %6756 = vmatprep.mubr.bf16.mxu0 %v6325_v27  ;;  %6797 = vmatprep.mubr.bf16.mxu1 %v6327_v35 }
 0x717   : > { %6757 = vmatmul.mubr.bf16.vlgmr.msra.gmra.mxu0 %v6324_v41  ;;  %6798 = vmatmul.mubr.bf16.vlgmr.msra.gmra.mxu1 %v6326_v45 }
 0x718   : > { %7355 = vmatpush3.bf16.msra.mxu0 %v7667_v20 }
 0x719   : > { %7356 = vmatprep.subr.bf16.mxu0 %v7668_v17 }
 0x71c   : > { %7357 = vmatpush3.bf16.msra.mxu0 %v7669_v11 }
 0x71d   : > { %7358 = vmatprep.subr.bf16.mxu0 %v7670_v16 }
 0x720   : > { %7359 = vmatpush3.bf16.msra.mxu0 %v7671_v19 }
 0x721   : > { %7360 = vmatprep.subr.bf16.mxu0 %v7672_v43 }
 0x724   : > { %7361 = vmatpush3.bf16.msra.mxu0 %v7673_v1 }
 0x725   : > { %7362 = vmatprep.subr.bf16.mxu0 %v7674_v57 }
 0x728   : > { %7363 = vmatpush3.bf16.msra.mxu0 %v7675_v22 }
 0x729   : > { %7364 = vmatprep.subr.bf16.mxu0 %v7676_v59 }
 0x72c   : > { %7365 = vmatpush3.bf16.msra.mxu0 %v7677_v14 }
 0x72d   : > { %7366 = vmatprep.subr.bf16.mxu0 %v7678_v13 }
 0x730   : > { %7367 = vmatpush3.bf16.msra.mxu0 %v7679_v3 }
 0x731   : > { %7368 = vmatprep.subr.bf16.mxu0 %v7680_v63 }
 0x734   : > { %7369 = vmatpush3.bf16.msra.mxu0 %v7681_v60 }
 0x7d7   : > { %v6758_v47 = vpop.f32.mrf.mxu0  ;;  %v6799_v51 = vpop.f32.mrf.mxu1 }
 0x7d8   : > { %v6759_v0 = vadd.f32 %v6758_v47, %v6717_v56 }
 0x7d9   : > { %v6760_v7 = vpop.f32.mrf.mxu0  ;;  %v6801_v2 = vpop.f32.mrf.mxu1 }
 0x7da   : > { %v6800_v42 = vadd.f32 %v6799_v51, %v6759_v0  ;;  %v6761_v54 = vadd.f32 %v6760_v7, %v6721_v21 }
 0x7db   : > { %v6762_v40 = vpop.f32.mrf.mxu0  ;;  %v6803_v53 = vpop.f32.mrf.mxu1 }
 0x7dc   : > { %v6802_v48 = vadd.f32 %v6801_v2, %v6761_v54  ;;  %v6806_v25 = vmax.f32 %v6800_v42, 0.0 }
 0x7dd   : > { %v6763_v5 = vpop.f32.mrf.mxu0  ;;  %v6804_v26 = vpop.f32.mrf.mxu1 }
 0x7de   : > { %v6807_v34 = vmax.f32 %v6802_v48, 0.0  ;;  %v6808_v6 = vpack.c.bf16 %v6806_v25, %v6806_v25 }
 0x7e0   : > { %v6809_v36 = vpack.c.bf16 %v6807_v34, %v6807_v34 }
 0x7e2   : > { %6971 = vmatprep.mubr.bf16.mxu0 %v6809_v36 }
 0x7e3   : > { %6972 = vmatmul.mubr.bf16.vlgmr.msra.gmra.mxu0 %v6808_v6 }
 0x8a3   : > { %v7370_v32 = vpop.f32.mrf.mxu0 }
 0x8a5   : > { %v7371_v10 = vpop.f32.mrf.mxu0 }
 0x8a6   : > { %v7372_v38 = vadd.f32 %v7371_v10, %v7370_v32 }
 0x8a7   : > { %v7373_v30 = vpop.f32.mrf.mxu0 }
 0x8a8   : > { %v6974_v23 = vadd.f32 %v7372_v38, %v6842_v39 }
 0x8a9   : > { %v7374_v46 = vpop.f32.mrf.mxu0 }
 0x8aa   : > { %v7237_v15 = vmul.f32 -1.442695, %v6974_v23 }
 0x8ac   : > { %7682 = vpow2.f32 %v7237_v15 }
 0x8b9   : > { %v7683_v52 = vpop.eup %7682 }
 0x8ba   : > { %v6982_v61 = vadd.f32 1.0, %v7683_v52 }
 0x8bc   : > { %7684 = vrcp.f32 %v6982_v61 }
 0x8c9   : > { %v7685_v55 = vpop.eup %7684 }
 0x8ca   : > { %6985 = vst [vmem:[%s426_s12] sm:$0x1] %v7685_v55 }
 0x8cb PF: > { %s23_s17 = sadd.s32 1, %s7781_s17  }
 0x8cc   : > { %p20_p3 = scmp.ge.s32.totalorder %s23_s17, 4  }
 0x8ce   :  { %22 = sbr.rel (!%p20_p3) target bundleno = 2 (0x2), region = 113 }
 0x8d3   :  { %7003 = vsyncpa [#allocation10], 1 }
 0x8d4   :  { %7005 = vsyncpa [#allocation10 + $0x1], 1 }
 0x8d5   :  { %7006 = vsyncpa [#allocation12], 1 }

</bundles_post_ra>
